<compile_context>
chip_gen: v5e
topology: v5e:2x2
jax: 0.10.0
libtpu: 0.0.40
codegen_flags: <defaults>
</compile_context>

<pallas_src>
import functools

import jax
import jax.numpy as jnp
from jax.experimental import pallas as pl
from jax.experimental.pallas import tpu as pltpu

MM_DTYPE = jnp.bfloat16  # MXU input dtype; accumulation / epilogue stay in f32


def _choose_tm(M):
    """Row-block size: a single full-M block, except when there is enough work to
    split across 2 TensorCores (v7x) -- then use two parallel blocks."""
    if M >= 2048 and M % 2 == 0 and (M // 2) % 8 == 0:
        return M // 2
    return M


# ----------------------------- Pallas kernels -----------------------------

def _mm_bias_act_kernel(x_ref, w_ref, b_ref, o_ref, *, relu):
    acc = jnp.dot(x_ref[...], w_ref[...], preferred_element_type=jnp.float32)
    acc = acc + b_ref[...]
    if relu:
        acc = jnp.maximum(acc, 0.0)
    o_ref[...] = acc


def pallas_matmul_bias(x2d, w2d, b, relu):
    """y = act(x2d @ w2d + b). x2d: (M, K), w2d: (K, N), b: (N,). No row padding."""
    M, K = x2d.shape
    _, Nout = w2d.shape
    TM = _choose_tm(M)
    grid = M // TM
    return pl.pallas_call(
        functools.partial(_mm_bias_act_kernel, relu=relu),
        out_shape=jax.ShapeDtypeStruct((M, Nout), jnp.float32),
        grid=(grid,),
        in_specs=[
            pl.BlockSpec((TM, K), lambda i: (i, 0)),
            pl.BlockSpec((K, Nout), lambda i: (0, 0)),
            pl.BlockSpec((1, Nout), lambda i: (0, 0)),
        ],
        out_specs=pl.BlockSpec((TM, Nout), lambda i: (i, 0)),
        compiler_params=pltpu.CompilerParams(dimension_semantics=("parallel",)),
    )(x2d.astype(MM_DTYPE), w2d.astype(MM_DTYPE),
      b.reshape(1, Nout).astype(jnp.float32))


def _fused_tail_kernel(xb_ref, wc_ref, xs_ref, wp_ref, b_ref, o_ref):
    # relu( conv_c(xb) + proj(xs) + folded biases )  -- two dots, one store.
    acc = jnp.dot(xb_ref[...], wc_ref[...], preferred_element_type=jnp.float32)
    acc = acc + jnp.dot(xs_ref[...], wp_ref[...], preferred_element_type=jnp.float32)
    o_ref[...] = jnp.maximum(acc + b_ref[...], 0.0)


def pallas_fused_tail(xb2d, wc2d, xs2d, wp2d, b):
    M, Cm = xb2d.shape
    _, Cout = wc2d.shape
    Cin = xs2d.shape[1]
    TM = _choose_tm(M)
    grid = M // TM
    return pl.pallas_call(
        _fused_tail_kernel,
        out_shape=jax.ShapeDtypeStruct((M, Cout), jnp.float32),
        grid=(grid,),
        in_specs=[
            pl.BlockSpec((TM, Cm), lambda i: (i, 0)),
            pl.BlockSpec((Cm, Cout), lambda i: (0, 0)),
            pl.BlockSpec((TM, Cin), lambda i: (i, 0)),
            pl.BlockSpec((Cin, Cout), lambda i: (0, 0)),
            pl.BlockSpec((1, Cout), lambda i: (0, 0)),
        ],
        out_specs=pl.BlockSpec((TM, Cout), lambda i: (i, 0)),
        compiler_params=pltpu.CompilerParams(dimension_semantics=("parallel",)),
    )(xb2d.astype(MM_DTYPE), wc2d.astype(MM_DTYPE),
      xs2d.astype(MM_DTYPE), wp2d.astype(MM_DTYPE),
      b.reshape(1, Cout).astype(jnp.float32))


def _max_taps_kernel(*refs):
    o_ref = refs[-1]
    r = refs[0][...]
    for t_ref in refs[1:-1]:
        r = jnp.maximum(r, t_ref[...])
    o_ref[...] = r


def pallas_max_taps(tap_list):
    """Running max over taps, each tap a (M, C) operand. Single full block."""
    M, C = tap_list[0].shape
    n = len(tap_list)
    return pl.pallas_call(
        _max_taps_kernel,
        out_shape=jax.ShapeDtypeStruct((M, C), jnp.float32),
        grid=(1,),
        in_specs=[pl.BlockSpec((M, C), lambda i: (0, 0)) for _ in range(n)],
        out_specs=pl.BlockSpec((M, C), lambda i: (0, 0)),
    )(*tap_list)


def _head_kernel(x_ref, w_ref, b_ref, o_ref):
    pooled = jnp.mean(x_ref[...], axis=1)                       # (N, C) global avg pool
    logits = jnp.dot(pooled, w_ref[...],
                     preferred_element_type=jnp.float32) + b_ref[...]
    z = logits - jnp.max(logits, axis=-1, keepdims=True)        # softmax (eval-mode act)
    e = jnp.exp(z)
    o_ref[...] = e / jnp.sum(e, axis=-1, keepdims=True)


def pallas_head(x3d, wfc, bfc):
    """Fused avg-pool + linear + softmax. x3d: (N, T*H*W, C)."""
    N, L, C = x3d.shape
    Ncls = wfc.shape[1]
    return pl.pallas_call(
        _head_kernel,
        out_shape=jax.ShapeDtypeStruct((N, Ncls), jnp.float32),
        grid=(1,),
        in_specs=[
            pl.BlockSpec((N, L, C), lambda i: (0, 0, 0)),
            pl.BlockSpec((C, Ncls), lambda i: (0, 0)),
            pl.BlockSpec((1, Ncls), lambda i: (0, 0)),
        ],
        out_specs=pl.BlockSpec((N, Ncls), lambda i: (0, 0)),
    )(x3d.astype(jnp.float32), wfc.astype(jnp.float32),
      bfc.reshape(1, Ncls).astype(jnp.float32))


# ----------------------------- conv / pool glue -----------------------------

def _im2col(x, ksize, stride, pad, pad_value=0.0):
    """x: (N,T,H,W,C). Returns list of shifted views (one per kernel tap)."""
    N, T, H, W, C = x.shape
    kt, kh, kw = ksize
    st, sh, sw = stride
    pt, ph, pw = pad
    xp = jnp.pad(x, ((0, 0), (pt, pt), (ph, ph), (pw, pw), (0, 0)),
                 constant_values=pad_value)
    To = (T + 2 * pt - kt) // st + 1
    Ho = (H + 2 * ph - kh) // sh + 1
    Wo = (W + 2 * pw - kw) // sw + 1
    taps = []
    for dt in range(kt):
        for dh in range(kh):
            for dw in range(kw):
                taps.append(xp[:, dt:dt + To * st:st,
                               dh:dh + Ho * sh:sh,
                               dw:dw + Wo * sw:sw, :])
    return taps, (To, Ho, Wo)


def conv3d_bn(x, w, b, stride, pad, relu):
    """Conv3d + (folded) BatchNorm + optional ReLU.  w: (kt,kh,kw,Cin,Cout)."""
    kt, kh, kw, Cin, Cout = w.shape
    if (kt, kh, kw) == (1, 1, 1) and stride == (1, 1, 1) and pad == (0, 0, 0):
        N, T, H, W, _ = x.shape
        y = pallas_matmul_bias(x.reshape(N * T * H * W, Cin),
                               w.reshape(Cin, Cout), b, relu)
        return y.reshape(N, T, H, W, Cout)
    # Multi-tap case: patch extraction in bf16 (halves the glue traffic), fused
    # matmul+bias+ReLU in Pallas with full-size row blocks.
    taps, (To, Ho, Wo) = _im2col(x.astype(MM_DTYPE), (kt, kh, kw), stride, pad)
    patches = taps[0] if len(taps) == 1 else jnp.concatenate(taps, axis=-1)
    N = x.shape[0]
    M = N * To * Ho * Wo
    K = kt * kh * kw * Cin
    y = pallas_matmul_bias(patches.reshape(M, K), w.reshape(K, Cout), b, relu)
    return y.reshape(N, To, Ho, Wo, Cout)


def maxpool3d(x, ksize, stride, pad):
    taps, (To, Ho, Wo) = _im2col(x, ksize, stride, pad, pad_value=-jnp.inf)
    N, C = x.shape[0], x.shape[-1]
    M = N * To * Ho * Wo
    y = pallas_max_taps([t.reshape(M, C) for t in taps])
    return y.reshape(N, To, Ho, Wo, C)


# ----------------------------- parameters -----------------------------

def _fold_bn(w, gamma, beta, mean, var, eps=1e-5):
    scale = gamma / jnp.sqrt(var + eps)       # (Cout,)
    return w * scale, beta - mean * scale     # conv bias is False in SlowFast


def make_conv_bn(key, ksize, cin, cout):
    kt, kh, kw = ksize
    kw_, kg, kb, km, kv = jax.random.split(key, 5)
    fan_in = kt * kh * kw * cin
    w = jax.random.normal(kw_, (kt, kh, kw, cin, cout), jnp.float32) / jnp.sqrt(fan_in)
    gamma = 1.0 + 0.1 * jax.random.normal(kg, (cout,), jnp.float32)
    beta = 0.1 * jax.random.normal(kb, (cout,), jnp.float32)
    mean = 0.1 * jax.random.normal(km, (cout,), jnp.float32)
    var = jnp.abs(jax.random.normal(kv, (cout,), jnp.float32)) + 0.5
    return _fold_bn(w, gamma, beta, mean, var)


def make_bottleneck(key, cin, cmid, cout, temporal_k):
    k1, k2, k3, k4 = jax.random.split(key, 4)
    return {
        "a": make_conv_bn(k1, (temporal_k, 1, 1), cin, cmid),
        "b": make_conv_bn(k2, (1, 3, 3), cmid, cmid),
        "c": make_conv_bn(k3, (1, 1, 1), cmid, cout),
        "proj": make_conv_bn(k4, (1, 1, 1), cin, cout),
    }


def make_params(key, num_classes=10):
    keys = jax.random.split(key, 7)
    params = {
        "s1": make_conv_bn(keys[0], (1, 7, 7), 3, 8),
        "s2": make_bottleneck(keys[1], 8, 4, 16, 1),
        "s3": make_bottleneck(keys[2], 16, 8, 32, 1),
        "s4": make_bottleneck(keys[3], 32, 16, 64, 3),
        "s5": make_bottleneck(keys[4], 64, 32, 128, 3),
    }
    wfc = jax.random.normal(keys[5], (128, num_classes), jnp.float32) / jnp.sqrt(128.0)
    bfc = jnp.zeros((num_classes,), jnp.float32)
    params["head"] = (wfc, bfc)
    return params


# ----------------------------- forward pass -----------------------------

def bottleneck(x, p, spatial_stride, temporal_k):
    wa, ba = p["a"]
    wb, bb = p["b"]
    wc, bc = p["c"]
    wp, bp = p["proj"]
    out = conv3d_bn(x, wa, ba, (1, 1, 1), (temporal_k // 2, 0, 0), relu=True)
    out = conv3d_bn(out, wb, bb, (1, spatial_stride, spatial_stride), (0, 1, 1), relu=True)
    # Fused tail: conv_c(out) + strided 1x1x1 proj(x) + residual add + ReLU, one kernel.
    N, To, Ho, Wo, Cmid = out.shape
    Cin = x.shape[-1]
    Cout = wc.shape[-1]
    xs = x[:, :, ::spatial_stride, ::spatial_stride, :]   # proj's spatial stride = slice
    M = N * To * Ho * Wo
    y = pallas_fused_tail(out.reshape(M, Cmid), wc.reshape(Cmid, Cout),
                          xs.reshape(M, Cin), wp.reshape(Cin, Cout), bc + bp)
    return y.reshape(N, To, Ho, Wo, Cout)


def slow_only_forward(x_ncthw, params):
    # NCTHW (PyTorch) -> NTHWC (kernel layout)
    x = jnp.transpose(x_ncthw, (0, 2, 3, 4, 1)).astype(jnp.float32)

    # s1: stem conv (1,7,7) stride (1,2,2) + BN + ReLU + maxpool (1,3,3) stride (1,2,2)
    w, b = params["s1"]
    x = conv3d_bn(x, w, b, (1, 2, 2), (0, 3, 3), relu=True)
    x = maxpool3d(x, (1, 3, 3), (1, 2, 2), (0, 1, 1))

    # s2..s5: one bottleneck residual block per stage (temporal conv in s4/s5)
    x = bottleneck(x, params["s2"], spatial_stride=1, temporal_k=1)
    x = bottleneck(x, params["s3"], spatial_stride=2, temporal_k=1)
    x = bottleneck(x, params["s4"], spatial_stride=2, temporal_k=3)
    x = bottleneck(x, params["s5"], spatial_stride=2, temporal_k=3)

    # head: fused global avg pool + linear + softmax (eval-mode activation)
    N, T, H, W, C = x.shape
    wfc, bfc = params["head"]
    # TODO(synk): head dropout omitted (no-op in eval mode).
    return pallas_head(x.reshape(N, T * H * W, C), wfc, bfc)


if __name__ == "__main__":
    key = jax.random.PRNGKey(0)
    kx, kp = jax.random.split(key)
    # PyTorch-layout input: (N, C, T, H, W)
    x = jax.random.normal(kx, (2, 3, 4, 32, 32), jnp.float32)
    params = make_params(kp)
    out = jax.jit(slow_only_forward)(x, params)
    out = jax.block_until_ready(out)
    assert out.shape == (2, 10)
    assert bool(jnp.all(jnp.isfinite(out)))
    print("KERNEL_OK")
</pallas_src>

<mosaic_0001>
module attributes {stable_mosaic.version = 11 : i64} {
  func.func @_mm_bias_act_kernel(%arg0: i32, %arg1: memref<1024x147xbf16, #tpu.memory_space<vmem>>, %arg2: memref<147x8xbf16, #tpu.memory_space<vmem>>, %arg3: memref<1x8xf32, #tpu.memory_space<vmem>>, %arg4: memref<1024x8xf32, #tpu.memory_space<vmem>>) attributes {dimension_semantics = [#tpu.dimension_semantics<parallel>], iteration_bounds = array<i64: 2>, scalar_prefetch = 0 : i64, scratch_operands = 0 : i64, tpu.core_type = #tpu.core_type<tc>, window_params = [{transform_indices = @transform_0, window_bounds = array<i64: 1024, 147>}, {pipeline_mode = #tpu.pipeline_mode<synchronous>, transform_indices = @transform_1, window_bounds = array<i64: 147, 8>}, {pipeline_mode = #tpu.pipeline_mode<synchronous>, transform_indices = @transform_2, window_bounds = array<i64: 1, 8>}, {transform_indices = @transform_3, window_bounds = array<i64: 1024, 8>}]} {
    %c0 = arith.constant 0 : index
    %c0_0 = arith.constant 0 : index
    %0 = vector.load %arg1[%c0, %c0_0] : memref<1024x147xbf16, #tpu.memory_space<vmem>>, vector<1024x147xbf16>
    %c0_1 = arith.constant 0 : index
    %c0_2 = arith.constant 0 : index
    %1 = vector.load %arg2[%c0_1, %c0_2] : memref<147x8xbf16, #tpu.memory_space<vmem>>, vector<147x8xbf16>
    %cst = arith.constant dense<0.000000e+00> : vector<1024x8xf32>
    %2 = tpu.matmul %0, %1, %cst {dimension_numbers = #tpu.dot_dimension_numbers<[1], [0], [0], [1], [0, 0, 1, 1], [], []>} : vector<1024x147xbf16>, vector<147x8xbf16>, vector<1024x8xf32> -> vector<1024x8xf32>
    %c0_3 = arith.constant 0 : index
    %c0_4 = arith.constant 0 : index
    %3 = vector.load %arg3[%c0_3, %c0_4] : memref<1x8xf32, #tpu.memory_space<vmem>>, vector<1x8xf32>
    %4 = vector.broadcast %3 : vector<1x8xf32> to vector<1024x8xf32>
    %5 = arith.addf %2, %4 : vector<1024x8xf32>
    %cst_5 = arith.constant 0.000000e+00 : f32
    %6 = vector.broadcast %cst_5 : f32 to vector<1024x8xf32>
    %7 = arith.maximumf %5, %6 : vector<1024x8xf32>
    %c0_6 = arith.constant 0 : index
    %c0_7 = arith.constant 0 : index
    %8 = vector.load %arg4[%c0_6, %c0_7] : memref<1024x8xf32, #tpu.memory_space<vmem>>, vector<1024x8xf32>
    tpu.vector_store %arg4[%c0_6, %c0_7], %7 {strides = array<i32>} : memref<1024x8xf32, #tpu.memory_space<vmem>>, vector<1024x8xf32>,
    return
  }
  func.func @transform_0(%arg0: i32) -> (i32, i32) {
    %c0_i32 = arith.constant 0 : i32
    %c0_i32_0 = arith.constant 0 : i32
    return %arg0, %c0_i32 : i32, i32
  }
  func.func @transform_1(%arg0: i32) -> (i32, i32) {
    %c0_i32 = arith.constant 0 : i32
    %c0_i32_0 = arith.constant 0 : i32
    %c0_i32_1 = arith.constant 0 : i32
    return %c0_i32, %c0_i32_0 : i32, i32
  }
  func.func @transform_2(%arg0: i32) -> (i32, i32) {
    %c0_i32 = arith.constant 0 : i32
    %c0_i32_0 = arith.constant 0 : i32
    %c0_i32_1 = arith.constant 0 : i32
    return %c0_i32, %c0_i32_0 : i32, i32
  }
  func.func @transform_3(%arg0: i32) -> (i32, i32) {
    %c0_i32 = arith.constant 0 : i32
    %c0_i32_0 = arith.constant 0 : i32
    return %arg0, %c0_i32 : i32, i32
  }
}

module attributes {stable_mosaic.version = 11 : i64} {
  func.func @_max_taps_kernel(%arg0: i32, %arg1: memref<512x8xf32, #tpu.memory_space<vmem>>, %arg2: memref<512x8xf32, #tpu.memory_space<vmem>>, %arg3: memref<512x8xf32, #tpu.memory_space<vmem>>, %arg4: memref<512x8xf32, #tpu.memory_space<vmem>>, %arg5: memref<512x8xf32, #tpu.memory_space<vmem>>, %arg6: memref<512x8xf32, #tpu.memory_space<vmem>>, %arg7: memref<512x8xf32, #tpu.memory_space<vmem>>, %arg8: memref<512x8xf32, #tpu.memory_space<vmem>>, %arg9: memref<512x8xf32, #tpu.memory_space<vmem>>, %arg10: memref<512x8xf32, #tpu.memory_space<vmem>>) attributes {dimension_semantics = [#tpu.dimension_semantics<arbitrary>], iteration_bounds = array<i64: 1>, scalar_prefetch = 0 : i64, scratch_operands = 0 : i64, tpu.core_type = #tpu.core_type<tc>, window_params = [{pipeline_mode = #tpu.pipeline_mode<synchronous>, transform_indices = @transform_0, window_bounds = array<i64: 512, 8>}, {pipeline_mode = #tpu.pipeline_mode<synchronous>, transform_indices = @transform_1, window_bounds = array<i64: 512, 8>}, {pipeline_mode = #tpu.pipeline_mode<synchronous>, transform_indices = @transform_2, window_bounds = array<i64: 512, 8>}, {pipeline_mode = #tpu.pipeline_mode<synchronous>, transform_indices = @transform_3, window_bounds = array<i64: 512, 8>}, {pipeline_mode = #tpu.pipeline_mode<synchronous>, transform_indices = @transform_4, window_bounds = array<i64: 512, 8>}, {pipeline_mode = #tpu.pipeline_mode<synchronous>, transform_indices = @transform_5, window_bounds = array<i64: 512, 8>}, {pipeline_mode = #tpu.pipeline_mode<synchronous>, transform_indices = @transform_6, window_bounds = array<i64: 512, 8>}, {pipeline_mode = #tpu.pipeline_mode<synchronous>, transform_indices = @transform_7, window_bounds = array<i64: 512, 8>}, {pipeline_mode = #tpu.pipeline_mode<synchronous>, transform_indices = @transform_8, window_bounds = array<i64: 512, 8>}, {pipeline_mode = #tpu.pipeline_mode<synchronous>, transform_indices = @transform_9, window_bounds = array<i64: 512, 8>}]} {
    %c0 = arith.constant 0 : index
    %c0_0 = arith.constant 0 : index
    %0 = vector.load %arg1[%c0, %c0_0] : memref<512x8xf32, #tpu.memory_space<vmem>>, vector<512x8xf32>
    %c0_1 = arith.constant 0 : index
    %c0_2 = arith.constant 0 : index
    %1 = vector.load %arg2[%c0_1, %c0_2] : memref<512x8xf32, #tpu.memory_space<vmem>>, vector<512x8xf32>
    %2 = arith.maximumf %0, %1 : vector<512x8xf32>
    %c0_3 = arith.constant 0 : index
    %c0_4 = arith.constant 0 : index
    %3 = vector.load %arg3[%c0_3, %c0_4] : memref<512x8xf32, #tpu.memory_space<vmem>>, vector<512x8xf32>
    %4 = arith.maximumf %2, %3 : vector<512x8xf32>
    %c0_5 = arith.constant 0 : index
    %c0_6 = arith.constant 0 : index
    %5 = vector.load %arg4[%c0_5, %c0_6] : memref<512x8xf32, #tpu.memory_space<vmem>>, vector<512x8xf32>
    %6 = arith.maximumf %4, %5 : vector<512x8xf32>
    %c0_7 = arith.constant 0 : index
    %c0_8 = arith.constant 0 : index
    %7 = vector.load %arg5[%c0_7, %c0_8] : memref<512x8xf32, #tpu.memory_space<vmem>>, vector<512x8xf32>
    %8 = arith.maximumf %6, %7 : vector<512x8xf32>
    %c0_9 = arith.constant 0 : index
    %c0_10 = arith.constant 0 : index
    %9 = vector.load %arg6[%c0_9, %c0_10] : memref<512x8xf32, #tpu.memory_space<vmem>>, vector<512x8xf32>
    %10 = arith.maximumf %8, %9 : vector<512x8xf32>
    %c0_11 = arith.constant 0 : index
    %c0_12 = arith.constant 0 : index
    %11 = vector.load %arg7[%c0_11, %c0_12] : memref<512x8xf32, #tpu.memory_space<vmem>>, vector<512x8xf32>
    %12 = arith.maximumf %10, %11 : vector<512x8xf32>
    %c0_13 = arith.constant 0 : index
    %c0_14 = arith.constant 0 : index
    %13 = vector.load %arg8[%c0_13, %c0_14] : memref<512x8xf32, #tpu.memory_space<vmem>>, vector<512x8xf32>
    %14 = arith.maximumf %12, %13 : vector<512x8xf32>
    %c0_15 = arith.constant 0 : index
    %c0_16 = arith.constant 0 : index
    %15 = vector.load %arg9[%c0_15, %c0_16] : memref<512x8xf32, #tpu.memory_space<vmem>>, vector<512x8xf32>
    %16 = arith.maximumf %14, %15 : vector<512x8xf32>
    %c0_17 = arith.constant 0 : index
    %c0_18 = arith.constant 0 : index
    %17 = vector.load %arg10[%c0_17, %c0_18] : memref<512x8xf32, #tpu.memory_space<vmem>>, vector<512x8xf32>
    tpu.vector_store %arg10[%c0_17, %c0_18], %16 {strides = array<i32>} : memref<512x8xf32, #tpu.memory_space<vmem>>, vector<512x8xf32>,
    return
  }
  func.func @transform_0(%arg0: i32) -> (i32, i32) {
    %c0_i32 = arith.constant 0 : i32
    %c0_i32_0 = arith.constant 0 : i32
    %c0_i32_1 = arith.constant 0 : i32
    return %c0_i32, %c0_i32_0 : i32, i32
  }
  func.func @transform_1(%arg0: i32) -> (i32, i32) {
    %c0_i32 = arith.constant 0 : i32
    %c0_i32_0 = arith.constant 0 : i32
    %c0_i32_1 = arith.constant 0 : i32
    return %c0_i32, %c0_i32_0 : i32, i32
  }
  func.func @transform_2(%arg0: i32) -> (i32, i32) {
    %c0_i32 = arith.constant 0 : i32
    %c0_i32_0 = arith.constant 0 : i32
    %c0_i32_1 = arith.constant 0 : i32
    return %c0_i32, %c0_i32_0 : i32, i32
  }
  func.func @transform_3(%arg0: i32) -> (i32, i32) {
    %c0_i32 = arith.constant 0 : i32
    %c0_i32_0 = arith.constant 0 : i32
    %c0_i32_1 = arith.constant 0 : i32
    return %c0_i32, %c0_i32_0 : i32, i32
  }
  func.func @transform_4(%arg0: i32) -> (i32, i32) {
    %c0_i32 = arith.constant 0 : i32
    %c0_i32_0 = arith.constant 0 : i32
    %c0_i32_1 = arith.constant 0 : i32
    return %c0_i32, %c0_i32_0 : i32, i32
  }
  func.func @transform_5(%arg0: i32) -> (i32, i32) {
    %c0_i32 = arith.constant 0 : i32
    %c0_i32_0 = arith.constant 0 : i32
    %c0_i32_1 = arith.constant 0 : i32
    return %c0_i32, %c0_i32_0 : i32, i32
  }
  func.func @transform_6(%arg0: i32) -> (i32, i32) {
    %c0_i32 = arith.constant 0 : i32
    %c0_i32_0 = arith.constant 0 : i32
    %c0_i32_1 = arith.constant 0 : i32
    return %c0_i32, %c0_i32_0 : i32, i32
  }
  func.func @transform_7(%arg0: i32) -> (i32, i32) {
    %c0_i32 = arith.constant 0 : i32
    %c0_i32_0 = arith.constant 0 : i32
    %c0_i32_1 = arith.constant 0 : i32
    return %c0_i32, %c0_i32_0 : i32, i32
  }
  func.func @transform_8(%arg0: i32) -> (i32, i32) {
    %c0_i32 = arith.constant 0 : i32
    %c0_i32_0 = arith.constant 0 : i32
    %c0_i32_1 = arith.constant 0 : i32
    return %c0_i32, %c0_i32_0 : i32, i32
  }
  func.func @transform_9(%arg0: i32) -> (i32, i32) {
    %c0_i32 = arith.constant 0 : i32
    %c0_i32_0 = arith.constant 0 : i32
    %c0_i32_1 = arith.constant 0 : i32
    return %c0_i32, %c0_i32_0 : i32, i32
  }
}

module attributes {stable_mosaic.version = 11 : i64} {
  func.func @_mm_bias_act_kernel(%arg0: i32, %arg1: memref<512x8xbf16, #tpu.memory_space<vmem>>, %arg2: memref<8x4xbf16, #tpu.memory_space<vmem>>, %arg3: memref<1x4xf32, #tpu.memory_space<vmem>>, %arg4: memref<512x4xf32, #tpu.memory_space<vmem>>) attributes {dimension_semantics = [#tpu.dimension_semantics<parallel>], iteration_bounds = array<i64: 1>, scalar_prefetch = 0 : i64, scratch_operands = 0 : i64, tpu.core_type = #tpu.core_type<tc>, window_params = [{transform_indices = @transform_0, window_bounds = array<i64: 512, 8>}, {pipeline_mode = #tpu.pipeline_mode<synchronous>, transform_indices = @transform_1, window_bounds = array<i64: 8, 4>}, {pipeline_mode = #tpu.pipeline_mode<synchronous>, transform_indices = @transform_2, window_bounds = array<i64: 1, 4>}, {transform_indices = @transform_3, window_bounds = array<i64: 512, 4>}]} {
    %c0 = arith.constant 0 : index
    %c0_0 = arith.constant 0 : index
    %0 = vector.load %arg1[%c0, %c0_0] : memref<512x8xbf16, #tpu.memory_space<vmem>>, vector<512x8xbf16>
    %c0_1 = arith.constant 0 : index
    %c0_2 = arith.constant 0 : index
    %1 = vector.load %arg2[%c0_1, %c0_2] : memref<8x4xbf16, #tpu.memory_space<vmem>>, vector<8x4xbf16>
    %cst = arith.constant dense<0.000000e+00> : vector<512x4xf32>
    %2 = tpu.matmul %0, %1, %cst {dimension_numbers = #tpu.dot_dimension_numbers<[1], [0], [0], [1], [0, 0, 1, 1], [], []>} : vector<512x8xbf16>, vector<8x4xbf16>, vector<512x4xf32> -> vector<512x4xf32>
    %c0_3 = arith.constant 0 : index
    %c0_4 = arith.constant 0 : index
    %3 = vector.load %arg3[%c0_3, %c0_4] : memref<1x4xf32, #tpu.memory_space<vmem>>, vector<1x4xf32>
    %4 = vector.broadcast %3 : vector<1x4xf32> to vector<512x4xf32>
    %5 = arith.addf %2, %4 : vector<512x4xf32>
    %cst_5 = arith.constant 0.000000e+00 : f32
    %6 = vector.broadcast %cst_5 : f32 to vector<512x4xf32>
    %7 = arith.maximumf %5, %6 : vector<512x4xf32>
    %c0_6 = arith.constant 0 : index
    %c0_7 = arith.constant 0 : index
    %8 = vector.load %arg4[%c0_6, %c0_7] : memref<512x4xf32, #tpu.memory_space<vmem>>, vector<512x4xf32>
    tpu.vector_store %arg4[%c0_6, %c0_7], %7 {strides = array<i32>} : memref<512x4xf32, #tpu.memory_space<vmem>>, vector<512x4xf32>,
    return
  }
  func.func @transform_0(%arg0: i32) -> (i32, i32) {
    %c0_i32 = arith.constant 0 : i32
    %c0_i32_0 = arith.constant 0 : i32
    return %arg0, %c0_i32 : i32, i32
  }
  func.func @transform_1(%arg0: i32) -> (i32, i32) {
    %c0_i32 = arith.constant 0 : i32
    %c0_i32_0 = arith.constant 0 : i32
    %c0_i32_1 = arith.constant 0 : i32
    return %c0_i32, %c0_i32_0 : i32, i32
  }
  func.func @transform_2(%arg0: i32) -> (i32, i32) {
    %c0_i32 = arith.constant 0 : i32
    %c0_i32_0 = arith.constant 0 : i32
    %c0_i32_1 = arith.constant 0 : i32
    return %c0_i32, %c0_i32_0 : i32, i32
  }
  func.func @transform_3(%arg0: i32) -> (i32, i32) {
    %c0_i32 = arith.constant 0 : i32
    %c0_i32_0 = arith.constant 0 : i32
    return %arg0, %c0_i32 : i32, i32
  }
}

module attributes {stable_mosaic.version = 11 : i64} {
  func.func @_mm_bias_act_kernel(%arg0: i32, %arg1: memref<512x36xbf16, #tpu.memory_space<vmem>>, %arg2: memref<36x4xbf16, #tpu.memory_space<vmem>>, %arg3: memref<1x4xf32, #tpu.memory_space<vmem>>, %arg4: memref<512x4xf32, #tpu.memory_space<vmem>>) attributes {dimension_semantics = [#tpu.dimension_semantics<parallel>], iteration_bounds = array<i64: 1>, scalar_prefetch = 0 : i64, scratch_operands = 0 : i64, tpu.core_type = #tpu.core_type<tc>, window_params = [{transform_indices = @transform_0, window_bounds = array<i64: 512, 36>}, {pipeline_mode = #tpu.pipeline_mode<synchronous>, transform_indices = @transform_1, window_bounds = array<i64: 36, 4>}, {pipeline_mode = #tpu.pipeline_mode<synchronous>, transform_indices = @transform_2, window_bounds = array<i64: 1, 4>}, {transform_indices = @transform_3, window_bounds = array<i64: 512, 4>}]} {
    %c0 = arith.constant 0 : index
    %c0_0 = arith.constant 0 : index
    %0 = vector.load %arg1[%c0, %c0_0] : memref<512x36xbf16, #tpu.memory_space<vmem>>, vector<512x36xbf16>
    %c0_1 = arith.constant 0 : index
    %c0_2 = arith.constant 0 : index
    %1 = vector.load %arg2[%c0_1, %c0_2] : memref<36x4xbf16, #tpu.memory_space<vmem>>, vector<36x4xbf16>
    %cst = arith.constant dense<0.000000e+00> : vector<512x4xf32>
    %2 = tpu.matmul %0, %1, %cst {dimension_numbers = #tpu.dot_dimension_numbers<[1], [0], [0], [1], [0, 0, 1, 1], [], []>} : vector<512x36xbf16>, vector<36x4xbf16>, vector<512x4xf32> -> vector<512x4xf32>
    %c0_3 = arith.constant 0 : index
    %c0_4 = arith.constant 0 : index
    %3 = vector.load %arg3[%c0_3, %c0_4] : memref<1x4xf32, #tpu.memory_space<vmem>>, vector<1x4xf32>
    %4 = vector.broadcast %3 : vector<1x4xf32> to vector<512x4xf32>
    %5 = arith.addf %2, %4 : vector<512x4xf32>
    %cst_5 = arith.constant 0.000000e+00 : f32
    %6 = vector.broadcast %cst_5 : f32 to vector<512x4xf32>
    %7 = arith.maximumf %5, %6 : vector<512x4xf32>
    %c0_6 = arith.constant 0 : index
    %c0_7 = arith.constant 0 : index
    %8 = vector.load %arg4[%c0_6, %c0_7] : memref<512x4xf32, #tpu.memory_space<vmem>>, vector<512x4xf32>
    tpu.vector_store %arg4[%c0_6, %c0_7], %7 {strides = array<i32>} : memref<512x4xf32, #tpu.memory_space<vmem>>, vector<512x4xf32>,
    return
  }
  func.func @transform_0(%arg0: i32) -> (i32, i32) {
    %c0_i32 = arith.constant 0 : i32
    %c0_i32_0 = arith.constant 0 : i32
    return %arg0, %c0_i32 : i32, i32
  }
  func.func @transform_1(%arg0: i32) -> (i32, i32) {
    %c0_i32 = arith.constant 0 : i32
    %c0_i32_0 = arith.constant 0 : i32
    %c0_i32_1 = arith.constant 0 : i32
    return %c0_i32, %c0_i32_0 : i32, i32
  }
  func.func @transform_2(%arg0: i32) -> (i32, i32) {
    %c0_i32 = arith.constant 0 : i32
    %c0_i32_0 = arith.constant 0 : i32
    %c0_i32_1 = arith.constant 0 : i32
    return %c0_i32, %c0_i32_0 : i32, i32
  }
  func.func @transform_3(%arg0: i32) -> (i32, i32) {
    %c0_i32 = arith.constant 0 : i32
    %c0_i32_0 = arith.constant 0 : i32
    return %arg0, %c0_i32 : i32, i32
  }
}

module attributes {stable_mosaic.version = 11 : i64} {
  func.func @_fused_tail_kernel(%arg0: i32, %arg1: memref<512x4xbf16, #tpu.memory_space<vmem>>, %arg2: memref<4x16xbf16, #tpu.memory_space<vmem>>, %arg3: memref<512x8xbf16, #tpu.memory_space<vmem>>, %arg4: memref<8x16xbf16, #tpu.memory_space<vmem>>, %arg5: memref<1x16xf32, #tpu.memory_space<vmem>>, %arg6: memref<512x16xf32, #tpu.memory_space<vmem>>) attributes {dimension_semantics = [#tpu.dimension_semantics<parallel>], iteration_bounds = array<i64: 1>, scalar_prefetch = 0 : i64, scratch_operands = 0 : i64, tpu.core_type = #tpu.core_type<tc>, window_params = [{transform_indices = @transform_0, window_bounds = array<i64: 512, 4>}, {pipeline_mode = #tpu.pipeline_mode<synchronous>, transform_indices = @transform_1, window_bounds = array<i64: 4, 16>}, {transform_indices = @transform_2, window_bounds = array<i64: 512, 8>}, {pipeline_mode = #tpu.pipeline_mode<synchronous>, transform_indices = @transform_3, window_bounds = array<i64: 8, 16>}, {pipeline_mode = #tpu.pipeline_mode<synchronous>, transform_indices = @transform_4, window_bounds = array<i64: 1, 16>}, {transform_indices = @transform_5, window_bounds = array<i64: 512, 16>}]} {
    %c0 = arith.constant 0 : index
    %c0_0 = arith.constant 0 : index
    %0 = vector.load %arg1[%c0, %c0_0] : memref<512x4xbf16, #tpu.memory_space<vmem>>, vector<512x4xbf16>
    %c0_1 = arith.constant 0 : index
    %c0_2 = arith.constant 0 : index
    %1 = vector.load %arg2[%c0_1, %c0_2] : memref<4x16xbf16, #tpu.memory_space<vmem>>, vector<4x16xbf16>
    %cst = arith.constant dense<0.000000e+00> : vector<512x16xf32>
    %2 = tpu.matmul %0, %1, %cst {dimension_numbers = #tpu.dot_dimension_numbers<[1], [0], [0], [1], [0, 0, 1, 1], [], []>} : vector<512x4xbf16>, vector<4x16xbf16>, vector<512x16xf32> -> vector<512x16xf32>
    %c0_3 = arith.constant 0 : index
    %c0_4 = arith.constant 0 : index
    %3 = vector.load %arg3[%c0_3, %c0_4] : memref<512x8xbf16, #tpu.memory_space<vmem>>, vector<512x8xbf16>
    %c0_5 = arith.constant 0 : index
    %c0_6 = arith.constant 0 : index
    %4 = vector.load %arg4[%c0_5, %c0_6] : memref<8x16xbf16, #tpu.memory_space<vmem>>, vector<8x16xbf16>
    %cst_7 = arith.constant dense<0.000000e+00> : vector<512x16xf32>
    %5 = tpu.matmul %3, %4, %cst_7 {dimension_numbers = #tpu.dot_dimension_numbers<[1], [0], [0], [1], [0, 0, 1, 1], [], []>} : vector<512x8xbf16>, vector<8x16xbf16>, vector<512x16xf32> -> vector<512x16xf32>
    %6 = arith.addf %2, %5 : vector<512x16xf32>
    %c0_8 = arith.constant 0 : index
    %c0_9 = arith.constant 0 : index
    %7 = vector.load %arg5[%c0_8, %c0_9] : memref<1x16xf32, #tpu.memory_space<vmem>>, vector<1x16xf32>
    %8 = vector.broadcast %7 : vector<1x16xf32> to vector<512x16xf32>
    %9 = arith.addf %6, %8 : vector<512x16xf32>
    %cst_10 = arith.constant 0.000000e+00 : f32
    %10 = vector.broadcast %cst_10 : f32 to vector<512x16xf32>
    %11 = arith.maximumf %9, %10 : vector<512x16xf32>
    %c0_11 = arith.constant 0 : index
    %c0_12 = arith.constant 0 : index
    %12 = vector.load %arg6[%c0_11, %c0_12] : memref<512x16xf32, #tpu.memory_space<vmem>>, vector<512x16xf32>
    tpu.vector_store %arg6[%c0_11, %c0_12], %11 {strides = array<i32>} : memref<512x16xf32, #tpu.memory_space<vmem>>, vector<512x16xf32>,
    return
  }
  func.func @transform_0(%arg0: i32) -> (i32, i32) {
    %c0_i32 = arith.constant 0 : i32
    %c0_i32_0 = arith.constant 0 : i32
    return %arg0, %c0_i32 : i32, i32
  }
  func.func @transform_1(%arg0: i32) -> (i32, i32) {
    %c0_i32 = arith.constant 0 : i32
    %c0_i32_0 = arith.constant 0 : i32
    %c0_i32_1 = arith.constant 0 : i32
    return %c0_i32, %c0_i32_0 : i32, i32
  }
  func.func @transform_2(%arg0: i32) -> (i32, i32) {
    %c0_i32 = arith.constant 0 : i32
    %c0_i32_0 = arith.constant 0 : i32
    return %arg0, %c0_i32 : i32, i32
  }
  func.func @transform_3(%arg0: i32) -> (i32, i32) {
    %c0_i32 = arith.constant 0 : i32
    %c0_i32_0 = arith.constant 0 : i32
    %c0_i32_1 = arith.constant 0 : i32
    return %c0_i32, %c0_i32_0 : i32, i32
  }
  func.func @transform_4(%arg0: i32) -> (i32, i32) {
    %c0_i32 = arith.constant 0 : i32
    %c0_i32_0 = arith.constant 0 : i32
    %c0_i32_1 = arith.constant 0 : i32
    return %c0_i32, %c0_i32_0 : i32, i32
  }
  func.func @transform_5(%arg0: i32) -> (i32, i32) {
    %c0_i32 = arith.constant 0 : i32
    %c0_i32_0 = arith.constant 0 : i32
    return %arg0, %c0_i32 : i32, i32
  }
}

module attributes {stable_mosaic.version = 11 : i64} {
  func.func @_mm_bias_act_kernel(%arg0: i32, %arg1: memref<512x16xbf16, #tpu.memory_space<vmem>>, %arg2: memref<16x8xbf16, #tpu.memory_space<vmem>>, %arg3: memref<1x8xf32, #tpu.memory_space<vmem>>, %arg4: memref<512x8xf32, #tpu.memory_space<vmem>>) attributes {dimension_semantics = [#tpu.dimension_semantics<parallel>], iteration_bounds = array<i64: 1>, scalar_prefetch = 0 : i64, scratch_operands = 0 : i64, tpu.core_type = #tpu.core_type<tc>, window_params = [{transform_indices = @transform_0, window_bounds = array<i64: 512, 16>}, {pipeline_mode = #tpu.pipeline_mode<synchronous>, transform_indices = @transform_1, window_bounds = array<i64: 16, 8>}, {pipeline_mode = #tpu.pipeline_mode<synchronous>, transform_indices = @transform_2, window_bounds = array<i64: 1, 8>}, {transform_indices = @transform_3, window_bounds = array<i64: 512, 8>}]} {
    %c0 = arith.constant 0 : index
    %c0_0 = arith.constant 0 : index
    %0 = vector.load %arg1[%c0, %c0_0] : memref<512x16xbf16, #tpu.memory_space<vmem>>, vector<512x16xbf16>
    %c0_1 = arith.constant 0 : index
    %c0_2 = arith.constant 0 : index
    %1 = vector.load %arg2[%c0_1, %c0_2] : memref<16x8xbf16, #tpu.memory_space<vmem>>, vector<16x8xbf16>
    %cst = arith.constant dense<0.000000e+00> : vector<512x8xf32>
    %2 = tpu.matmul %0, %1, %cst {dimension_numbers = #tpu.dot_dimension_numbers<[1], [0], [0], [1], [0, 0, 1, 1], [], []>} : vector<512x16xbf16>, vector<16x8xbf16>, vector<512x8xf32> -> vector<512x8xf32>
    %c0_3 = arith.constant 0 : index
    %c0_4 = arith.constant 0 : index
    %3 = vector.load %arg3[%c0_3, %c0_4] : memref<1x8xf32, #tpu.memory_space<vmem>>, vector<1x8xf32>
    %4 = vector.broadcast %3 : vector<1x8xf32> to vector<512x8xf32>
    %5 = arith.addf %2, %4 : vector<512x8xf32>
    %cst_5 = arith.constant 0.000000e+00 : f32
    %6 = vector.broadcast %cst_5 : f32 to vector<512x8xf32>
    %7 = arith.maximumf %5, %6 : vector<512x8xf32>
    %c0_6 = arith.constant 0 : index
    %c0_7 = arith.constant 0 : index
    %8 = vector.load %arg4[%c0_6, %c0_7] : memref<512x8xf32, #tpu.memory_space<vmem>>, vector<512x8xf32>
    tpu.vector_store %arg4[%c0_6, %c0_7], %7 {strides = array<i32>} : memref<512x8xf32, #tpu.memory_space<vmem>>, vector<512x8xf32>,
    return
  }
  func.func @transform_0(%arg0: i32) -> (i32, i32) {
    %c0_i32 = arith.constant 0 : i32
    %c0_i32_0 = arith.constant 0 : i32
    return %arg0, %c0_i32 : i32, i32
  }
  func.func @transform_1(%arg0: i32) -> (i32, i32) {
    %c0_i32 = arith.constant 0 : i32
    %c0_i32_0 = arith.constant 0 : i32
    %c0_i32_1 = arith.constant 0 : i32
    return %c0_i32, %c0_i32_0 : i32, i32
  }
  func.func @transform_2(%arg0: i32) -> (i32, i32) {
    %c0_i32 = arith.constant 0 : i32
    %c0_i32_0 = arith.constant 0 : i32
    %c0_i32_1 = arith.constant 0 : i32
    return %c0_i32, %c0_i32_0 : i32, i32
  }
  func.func @transform_3(%arg0: i32) -> (i32, i32) {
    %c0_i32 = arith.constant 0 : i32
    %c0_i32_0 = arith.constant 0 : i32
    return %arg0, %c0_i32 : i32, i32
  }
}

module attributes {stable_mosaic.version = 11 : i64} {
  func.func @_mm_bias_act_kernel(%arg0: i32, %arg1: memref<128x72xbf16, #tpu.memory_space<vmem>>, %arg2: memref<72x8xbf16, #tpu.memory_space<vmem>>, %arg3: memref<1x8xf32, #tpu.memory_space<vmem>>, %arg4: memref<128x8xf32, #tpu.memory_space<vmem>>) attributes {dimension_semantics = [#tpu.dimension_semantics<parallel>], iteration_bounds = array<i64: 1>, scalar_prefetch = 0 : i64, scratch_operands = 0 : i64, tpu.core_type = #tpu.core_type<tc>, window_params = [{transform_indices = @transform_0, window_bounds = array<i64: 128, 72>}, {pipeline_mode = #tpu.pipeline_mode<synchronous>, transform_indices = @transform_1, window_bounds = array<i64: 72, 8>}, {pipeline_mode = #tpu.pipeline_mode<synchronous>, transform_indices = @transform_2, window_bounds = array<i64: 1, 8>}, {transform_indices = @transform_3, window_bounds = array<i64: 128, 8>}]} {
    %c0 = arith.constant 0 : index
    %c0_0 = arith.constant 0 : index
    %0 = vector.load %arg1[%c0, %c0_0] : memref<128x72xbf16, #tpu.memory_space<vmem>>, vector<128x72xbf16>
    %c0_1 = arith.constant 0 : index
    %c0_2 = arith.constant 0 : index
    %1 = vector.load %arg2[%c0_1, %c0_2] : memref<72x8xbf16, #tpu.memory_space<vmem>>, vector<72x8xbf16>
    %cst = arith.constant dense<0.000000e+00> : vector<128x8xf32>
    %2 = tpu.matmul %0, %1, %cst {dimension_numbers = #tpu.dot_dimension_numbers<[1], [0], [0], [1], [0, 0, 1, 1], [], []>} : vector<128x72xbf16>, vector<72x8xbf16>, vector<128x8xf32> -> vector<128x8xf32>
    %c0_3 = arith.constant 0 : index
    %c0_4 = arith.constant 0 : index
    %3 = vector.load %arg3[%c0_3, %c0_4] : memref<1x8xf32, #tpu.memory_space<vmem>>, vector<1x8xf32>
    %4 = vector.broadcast %3 : vector<1x8xf32> to vector<128x8xf32>
    %5 = arith.addf %2, %4 : vector<128x8xf32>
    %cst_5 = arith.constant 0.000000e+00 : f32
    %6 = vector.broadcast %cst_5 : f32 to vector<128x8xf32>
    %7 = arith.maximumf %5, %6 : vector<128x8xf32>
    %c0_6 = arith.constant 0 : index
    %c0_7 = arith.constant 0 : index
    %8 = vector.load %arg4[%c0_6, %c0_7] : memref<128x8xf32, #tpu.memory_space<vmem>>, vector<128x8xf32>
    tpu.vector_store %arg4[%c0_6, %c0_7], %7 {strides = array<i32>} : memref<128x8xf32, #tpu.memory_space<vmem>>, vector<128x8xf32>,
    return
  }
  func.func @transform_0(%arg0: i32) -> (i32, i32) {
    %c0_i32 = arith.constant 0 : i32
    %c0_i32_0 = arith.constant 0 : i32
    return %arg0, %c0_i32 : i32, i32
  }
  func.func @transform_1(%arg0: i32) -> (i32, i32) {
    %c0_i32 = arith.constant 0 : i32
    %c0_i32_0 = arith.constant 0 : i32
    %c0_i32_1 = arith.constant 0 : i32
    return %c0_i32, %c0_i32_0 : i32, i32
  }
  func.func @transform_2(%arg0: i32) -> (i32, i32) {
    %c0_i32 = arith.constant 0 : i32
    %c0_i32_0 = arith.constant 0 : i32
    %c0_i32_1 = arith.constant 0 : i32
    return %c0_i32, %c0_i32_0 : i32, i32
  }
  func.func @transform_3(%arg0: i32) -> (i32, i32) {
    %c0_i32 = arith.constant 0 : i32
    %c0_i32_0 = arith.constant 0 : i32
    return %arg0, %c0_i32 : i32, i32
  }
}

module attributes {stable_mosaic.version = 11 : i64} {
  func.func @_fused_tail_kernel(%arg0: i32, %arg1: memref<128x8xbf16, #tpu.memory_space<vmem>>, %arg2: memref<8x32xbf16, #tpu.memory_space<vmem>>, %arg3: memref<128x16xbf16, #tpu.memory_space<vmem>>, %arg4: memref<16x32xbf16, #tpu.memory_space<vmem>>, %arg5: memref<1x32xf32, #tpu.memory_space<vmem>>, %arg6: memref<128x32xf32, #tpu.memory_space<vmem>>) attributes {dimension_semantics = [#tpu.dimension_semantics<parallel>], iteration_bounds = array<i64: 1>, scalar_prefetch = 0 : i64, scratch_operands = 0 : i64, tpu.core_type = #tpu.core_type<tc>, window_params = [{transform_indices = @transform_0, window_bounds = array<i64: 128, 8>}, {pipeline_mode = #tpu.pipeline_mode<synchronous>, transform_indices = @transform_1, window_bounds = array<i64: 8, 32>}, {transform_indices = @transform_2, window_bounds = array<i64: 128, 16>}, {pipeline_mode = #tpu.pipeline_mode<synchronous>, transform_indices = @transform_3, window_bounds = array<i64: 16, 32>}, {pipeline_mode = #tpu.pipeline_mode<synchronous>, transform_indices = @transform_4, window_bounds = array<i64: 1, 32>}, {transform_indices = @transform_5, window_bounds = array<i64: 128, 32>}]} {
    %c0 = arith.constant 0 : index
    %c0_0 = arith.constant 0 : index
    %0 = vector.load %arg1[%c0, %c0_0] : memref<128x8xbf16, #tpu.memory_space<vmem>>, vector<128x8xbf16>
    %c0_1 = arith.constant 0 : index
    %c0_2 = arith.constant 0 : index
    %1 = vector.load %arg2[%c0_1, %c0_2] : memref<8x32xbf16, #tpu.memory_space<vmem>>, vector<8x32xbf16>
    %cst = arith.constant dense<0.000000e+00> : vector<128x32xf32>
    %2 = tpu.matmul %0, %1, %cst {dimension_numbers = #tpu.dot_dimension_numbers<[1], [0], [0], [1], [0, 0, 1, 1], [], []>} : vector<128x8xbf16>, vector<8x32xbf16>, vector<128x32xf32> -> vector<128x32xf32>
    %c0_3 = arith.constant 0 : index
    %c0_4 = arith.constant 0 : index
    %3 = vector.load %arg3[%c0_3, %c0_4] : memref<128x16xbf16, #tpu.memory_space<vmem>>, vector<128x16xbf16>
    %c0_5 = arith.constant 0 : index
    %c0_6 = arith.constant 0 : index
    %4 = vector.load %arg4[%c0_5, %c0_6] : memref<16x32xbf16, #tpu.memory_space<vmem>>, vector<16x32xbf16>
    %cst_7 = arith.constant dense<0.000000e+00> : vector<128x32xf32>
    %5 = tpu.matmul %3, %4, %cst_7 {dimension_numbers = #tpu.dot_dimension_numbers<[1], [0], [0], [1], [0, 0, 1, 1], [], []>} : vector<128x16xbf16>, vector<16x32xbf16>, vector<128x32xf32> -> vector<128x32xf32>
    %6 = arith.addf %2, %5 : vector<128x32xf32>
    %c0_8 = arith.constant 0 : index
    %c0_9 = arith.constant 0 : index
    %7 = vector.load %arg5[%c0_8, %c0_9] : memref<1x32xf32, #tpu.memory_space<vmem>>, vector<1x32xf32>
    %8 = vector.broadcast %7 : vector<1x32xf32> to vector<128x32xf32>
    %9 = arith.addf %6, %8 : vector<128x32xf32>
    %cst_10 = arith.constant 0.000000e+00 : f32
    %10 = vector.broadcast %cst_10 : f32 to vector<128x32xf32>
    %11 = arith.maximumf %9, %10 : vector<128x32xf32>
    %c0_11 = arith.constant 0 : index
    %c0_12 = arith.constant 0 : index
    %12 = vector.load %arg6[%c0_11, %c0_12] : memref<128x32xf32, #tpu.memory_space<vmem>>, vector<128x32xf32>
    tpu.vector_store %arg6[%c0_11, %c0_12], %11 {strides = array<i32>} : memref<128x32xf32, #tpu.memory_space<vmem>>, vector<128x32xf32>,
    return
  }
  func.func @transform_0(%arg0: i32) -> (i32, i32) {
    %c0_i32 = arith.constant 0 : i32
    %c0_i32_0 = arith.constant 0 : i32
    return %arg0, %c0_i32 : i32, i32
  }
  func.func @transform_1(%arg0: i32) -> (i32, i32) {
    %c0_i32 = arith.constant 0 : i32
    %c0_i32_0 = arith.constant 0 : i32
    %c0_i32_1 = arith.constant 0 : i32
    return %c0_i32, %c0_i32_0 : i32, i32
  }
  func.func @transform_2(%arg0: i32) -> (i32, i32) {
    %c0_i32 = arith.constant 0 : i32
    %c0_i32_0 = arith.constant 0 : i32
    return %arg0, %c0_i32 : i32, i32
  }
  func.func @transform_3(%arg0: i32) -> (i32, i32) {
    %c0_i32 = arith.constant 0 : i32
    %c0_i32_0 = arith.constant 0 : i32
    %c0_i32_1 = arith.constant 0 : i32
    return %c0_i32, %c0_i32_0 : i32, i32
  }
  func.func @transform_4(%arg0: i32) -> (i32, i32) {
    %c0_i32 = arith.constant 0 : i32
    %c0_i32_0 = arith.constant 0 : i32
    %c0_i32_1 = arith.constant 0 : i32
    return %c0_i32, %c0_i32_0 : i32, i32
  }
  func.func @transform_5(%arg0: i32) -> (i32, i32) {
    %c0_i32 = arith.constant 0 : i32
    %c0_i32_0 = arith.constant 0 : i32
    return %arg0, %c0_i32 : i32, i32
  }
}

module attributes {stable_mosaic.version = 11 : i64} {
  func.func @_mm_bias_act_kernel(%arg0: i32, %arg1: memref<128x96xbf16, #tpu.memory_space<vmem>>, %arg2: memref<96x16xbf16, #tpu.memory_space<vmem>>, %arg3: memref<1x16xf32, #tpu.memory_space<vmem>>, %arg4: memref<128x16xf32, #tpu.memory_space<vmem>>) attributes {dimension_semantics = [#tpu.dimension_semantics<parallel>], iteration_bounds = array<i64: 1>, scalar_prefetch = 0 : i64, scratch_operands = 0 : i64, tpu.core_type = #tpu.core_type<tc>, window_params = [{transform_indices = @transform_0, window_bounds = array<i64: 128, 96>}, {pipeline_mode = #tpu.pipeline_mode<synchronous>, transform_indices = @transform_1, window_bounds = array<i64: 96, 16>}, {pipeline_mode = #tpu.pipeline_mode<synchronous>, transform_indices = @transform_2, window_bounds = array<i64: 1, 16>}, {transform_indices = @transform_3, window_bounds = array<i64: 128, 16>}]} {
    %c0 = arith.constant 0 : index
    %c0_0 = arith.constant 0 : index
    %0 = vector.load %arg1[%c0, %c0_0] : memref<128x96xbf16, #tpu.memory_space<vmem>>, vector<128x96xbf16>
    %c0_1 = arith.constant 0 : index
    %c0_2 = arith.constant 0 : index
    %1 = vector.load %arg2[%c0_1, %c0_2] : memref<96x16xbf16, #tpu.memory_space<vmem>>, vector<96x16xbf16>
    %cst = arith.constant dense<0.000000e+00> : vector<128x16xf32>
    %2 = tpu.matmul %0, %1, %cst {dimension_numbers = #tpu.dot_dimension_numbers<[1], [0], [0], [1], [0, 0, 1, 1], [], []>} : vector<128x96xbf16>, vector<96x16xbf16>, vector<128x16xf32> -> vector<128x16xf32>
    %c0_3 = arith.constant 0 : index
    %c0_4 = arith.constant 0 : index
    %3 = vector.load %arg3[%c0_3, %c0_4] : memref<1x16xf32, #tpu.memory_space<vmem>>, vector<1x16xf32>
    %4 = vector.broadcast %3 : vector<1x16xf32> to vector<128x16xf32>
    %5 = arith.addf %2, %4 : vector<128x16xf32>
    %cst_5 = arith.constant 0.000000e+00 : f32
    %6 = vector.broadcast %cst_5 : f32 to vector<128x16xf32>
    %7 = arith.maximumf %5, %6 : vector<128x16xf32>
    %c0_6 = arith.constant 0 : index
    %c0_7 = arith.constant 0 : index
    %8 = vector.load %arg4[%c0_6, %c0_7] : memref<128x16xf32, #tpu.memory_space<vmem>>, vector<128x16xf32>
    tpu.vector_store %arg4[%c0_6, %c0_7], %7 {strides = array<i32>} : memref<128x16xf32, #tpu.memory_space<vmem>>, vector<128x16xf32>,
    return
  }
  func.func @transform_0(%arg0: i32) -> (i32, i32) {
    %c0_i32 = arith.constant 0 : i32
    %c0_i32_0 = arith.constant 0 : i32
    return %arg0, %c0_i32 : i32, i32
  }
  func.func @transform_1(%arg0: i32) -> (i32, i32) {
    %c0_i32 = arith.constant 0 : i32
    %c0_i32_0 = arith.constant 0 : i32
    %c0_i32_1 = arith.constant 0 : i32
    return %c0_i32, %c0_i32_0 : i32, i32
  }
  func.func @transform_2(%arg0: i32) -> (i32, i32) {
    %c0_i32 = arith.constant 0 : i32
    %c0_i32_0 = arith.constant 0 : i32
    %c0_i32_1 = arith.constant 0 : i32
    return %c0_i32, %c0_i32_0 : i32, i32
  }
  func.func @transform_3(%arg0: i32) -> (i32, i32) {
    %c0_i32 = arith.constant 0 : i32
    %c0_i32_0 = arith.constant 0 : i32
    return %arg0, %c0_i32 : i32, i32
  }
}

module attributes {stable_mosaic.version = 11 : i64} {
  func.func @_mm_bias_act_kernel(%arg0: i32, %arg1: memref<32x144xbf16, #tpu.memory_space<vmem>>, %arg2: memref<144x16xbf16, #tpu.memory_space<vmem>>, %arg3: memref<1x16xf32, #tpu.memory_space<vmem>>, %arg4: memref<32x16xf32, #tpu.memory_space<vmem>>) attributes {dimension_semantics = [#tpu.dimension_semantics<parallel>], iteration_bounds = array<i64: 1>, scalar_prefetch = 0 : i64, scratch_operands = 0 : i64, tpu.core_type = #tpu.core_type<tc>, window_params = [{transform_indices = @transform_0, window_bounds = array<i64: 32, 144>}, {pipeline_mode = #tpu.pipeline_mode<synchronous>, transform_indices = @transform_1, window_bounds = array<i64: 144, 16>}, {pipeline_mode = #tpu.pipeline_mode<synchronous>, transform_indices = @transform_2, window_bounds = array<i64: 1, 16>}, {transform_indices = @transform_3, window_bounds = array<i64: 32, 16>}]} {
    %c0 = arith.constant 0 : index
    %c0_0 = arith.constant 0 : index
    %0 = vector.load %arg1[%c0, %c0_0] : memref<32x144xbf16, #tpu.memory_space<vmem>>, vector<32x144xbf16>
    %c0_1 = arith.constant 0 : index
    %c0_2 = arith.constant 0 : index
    %1 = vector.load %arg2[%c0_1, %c0_2] : memref<144x16xbf16, #tpu.memory_space<vmem>>, vector<144x16xbf16>
    %cst = arith.constant dense<0.000000e+00> : vector<32x16xf32>
    %2 = tpu.matmul %0, %1, %cst {dimension_numbers = #tpu.dot_dimension_numbers<[1], [0], [0], [1], [0, 0, 1, 1], [], []>} : vector<32x144xbf16>, vector<144x16xbf16>, vector<32x16xf32> -> vector<32x16xf32>
    %c0_3 = arith.constant 0 : index
    %c0_4 = arith.constant 0 : index
    %3 = vector.load %arg3[%c0_3, %c0_4] : memref<1x16xf32, #tpu.memory_space<vmem>>, vector<1x16xf32>
    %4 = vector.broadcast %3 : vector<1x16xf32> to vector<32x16xf32>
    %5 = arith.addf %2, %4 : vector<32x16xf32>
    %cst_5 = arith.constant 0.000000e+00 : f32
    %6 = vector.broadcast %cst_5 : f32 to vector<32x16xf32>
    %7 = arith.maximumf %5, %6 : vector<32x16xf32>
    %c0_6 = arith.constant 0 : index
    %c0_7 = arith.constant 0 : index
    %8 = vector.load %arg4[%c0_6, %c0_7] : memref<32x16xf32, #tpu.memory_space<vmem>>, vector<32x16xf32>
    tpu.vector_store %arg4[%c0_6, %c0_7], %7 {strides = array<i32>} : memref<32x16xf32, #tpu.memory_space<vmem>>, vector<32x16xf32>,
    return
  }
  func.func @transform_0(%arg0: i32) -> (i32, i32) {
    %c0_i32 = arith.constant 0 : i32
    %c0_i32_0 = arith.constant 0 : i32
    return %arg0, %c0_i32 : i32, i32
  }
  func.func @transform_1(%arg0: i32) -> (i32, i32) {
    %c0_i32 = arith.constant 0 : i32
    %c0_i32_0 = arith.constant 0 : i32
    %c0_i32_1 = arith.constant 0 : i32
    return %c0_i32, %c0_i32_0 : i32, i32
  }
  func.func @transform_2(%arg0: i32) -> (i32, i32) {
    %c0_i32 = arith.constant 0 : i32
    %c0_i32_0 = arith.constant 0 : i32
    %c0_i32_1 = arith.constant 0 : i32
    return %c0_i32, %c0_i32_0 : i32, i32
  }
  func.func @transform_3(%arg0: i32) -> (i32, i32) {
    %c0_i32 = arith.constant 0 : i32
    %c0_i32_0 = arith.constant 0 : i32
    return %arg0, %c0_i32 : i32, i32
  }
}

module attributes {stable_mosaic.version = 11 : i64} {
  func.func @_fused_tail_kernel(%arg0: i32, %arg1: memref<32x16xbf16, #tpu.memory_space<vmem>>, %arg2: memref<16x64xbf16, #tpu.memory_space<vmem>>, %arg3: memref<32x32xbf16, #tpu.memory_space<vmem>>, %arg4: memref<32x64xbf16, #tpu.memory_space<vmem>>, %arg5: memref<1x64xf32, #tpu.memory_space<vmem>>, %arg6: memref<32x64xf32, #tpu.memory_space<vmem>>) attributes {dimension_semantics = [#tpu.dimension_semantics<parallel>], iteration_bounds = array<i64: 1>, scalar_prefetch = 0 : i64, scratch_operands = 0 : i64, tpu.core_type = #tpu.core_type<tc>, window_params = [{transform_indices = @transform_0, window_bounds = array<i64: 32, 16>}, {pipeline_mode = #tpu.pipeline_mode<synchronous>, transform_indices = @transform_1, window_bounds = array<i64: 16, 64>}, {transform_indices = @transform_2, window_bounds = array<i64: 32, 32>}, {pipeline_mode = #tpu.pipeline_mode<synchronous>, transform_indices = @transform_3, window_bounds = array<i64: 32, 64>}, {pipeline_mode = #tpu.pipeline_mode<synchronous>, transform_indices = @transform_4, window_bounds = array<i64: 1, 64>}, {transform_indices = @transform_5, window_bounds = array<i64: 32, 64>}]} {
    %c0 = arith.constant 0 : index
    %c0_0 = arith.constant 0 : index
    %0 = vector.load %arg1[%c0, %c0_0] : memref<32x16xbf16, #tpu.memory_space<vmem>>, vector<32x16xbf16>
    %c0_1 = arith.constant 0 : index
    %c0_2 = arith.constant 0 : index
    %1 = vector.load %arg2[%c0_1, %c0_2] : memref<16x64xbf16, #tpu.memory_space<vmem>>, vector<16x64xbf16>
    %cst = arith.constant dense<0.000000e+00> : vector<32x64xf32>
    %2 = tpu.matmul %0, %1, %cst {dimension_numbers = #tpu.dot_dimension_numbers<[1], [0], [0], [1], [0, 0, 1, 1], [], []>} : vector<32x16xbf16>, vector<16x64xbf16>, vector<32x64xf32> -> vector<32x64xf32>
    %c0_3 = arith.constant 0 : index
    %c0_4 = arith.constant 0 : index
    %3 = vector.load %arg3[%c0_3, %c0_4] : memref<32x32xbf16, #tpu.memory_space<vmem>>, vector<32x32xbf16>
    %c0_5 = arith.constant 0 : index
    %c0_6 = arith.constant 0 : index
    %4 = vector.load %arg4[%c0_5, %c0_6] : memref<32x64xbf16, #tpu.memory_space<vmem>>, vector<32x64xbf16>
    %cst_7 = arith.constant dense<0.000000e+00> : vector<32x64xf32>
    %5 = tpu.matmul %3, %4, %cst_7 {dimension_numbers = #tpu.dot_dimension_numbers<[1], [0], [0], [1], [0, 0, 1, 1], [], []>} : vector<32x32xbf16>, vector<32x64xbf16>, vector<32x64xf32> -> vector<32x64xf32>
    %6 = arith.addf %2, %5 : vector<32x64xf32>
    %c0_8 = arith.constant 0 : index
    %c0_9 = arith.constant 0 : index
    %7 = vector.load %arg5[%c0_8, %c0_9] : memref<1x64xf32, #tpu.memory_space<vmem>>, vector<1x64xf32>
    %8 = vector.broadcast %7 : vector<1x64xf32> to vector<32x64xf32>
    %9 = arith.addf %6, %8 : vector<32x64xf32>
    %cst_10 = arith.constant 0.000000e+00 : f32
    %10 = vector.broadcast %cst_10 : f32 to vector<32x64xf32>
    %11 = arith.maximumf %9, %10 : vector<32x64xf32>
    %c0_11 = arith.constant 0 : index
    %c0_12 = arith.constant 0 : index
    %12 = vector.load %arg6[%c0_11, %c0_12] : memref<32x64xf32, #tpu.memory_space<vmem>>, vector<32x64xf32>
    tpu.vector_store %arg6[%c0_11, %c0_12], %11 {strides = array<i32>} : memref<32x64xf32, #tpu.memory_space<vmem>>, vector<32x64xf32>,
    return
  }
  func.func @transform_0(%arg0: i32) -> (i32, i32) {
    %c0_i32 = arith.constant 0 : i32
    %c0_i32_0 = arith.constant 0 : i32
    return %arg0, %c0_i32 : i32, i32
  }
  func.func @transform_1(%arg0: i32) -> (i32, i32) {
    %c0_i32 = arith.constant 0 : i32
    %c0_i32_0 = arith.constant 0 : i32
    %c0_i32_1 = arith.constant 0 : i32
    return %c0_i32, %c0_i32_0 : i32, i32
  }
  func.func @transform_2(%arg0: i32) -> (i32, i32) {
    %c0_i32 = arith.constant 0 : i32
    %c0_i32_0 = arith.constant 0 : i32
    return %arg0, %c0_i32 : i32, i32
  }
  func.func @transform_3(%arg0: i32) -> (i32, i32) {
    %c0_i32 = arith.constant 0 : i32
    %c0_i32_0 = arith.constant 0 : i32
    %c0_i32_1 = arith.constant 0 : i32
    return %c0_i32, %c0_i32_0 : i32, i32
  }
  func.func @transform_4(%arg0: i32) -> (i32, i32) {
    %c0_i32 = arith.constant 0 : i32
    %c0_i32_0 = arith.constant 0 : i32
    %c0_i32_1 = arith.constant 0 : i32
    return %c0_i32, %c0_i32_0 : i32, i32
  }
  func.func @transform_5(%arg0: i32) -> (i32, i32) {
    %c0_i32 = arith.constant 0 : i32
    %c0_i32_0 = arith.constant 0 : i32
    return %arg0, %c0_i32 : i32, i32
  }
}

module attributes {stable_mosaic.version = 11 : i64} {
  func.func @_mm_bias_act_kernel(%arg0: i32, %arg1: memref<32x192xbf16, #tpu.memory_space<vmem>>, %arg2: memref<192x32xbf16, #tpu.memory_space<vmem>>, %arg3: memref<1x32xf32, #tpu.memory_space<vmem>>, %arg4: memref<32x32xf32, #tpu.memory_space<vmem>>) attributes {dimension_semantics = [#tpu.dimension_semantics<parallel>], iteration_bounds = array<i64: 1>, scalar_prefetch = 0 : i64, scratch_operands = 0 : i64, tpu.core_type = #tpu.core_type<tc>, window_params = [{transform_indices = @transform_0, window_bounds = array<i64: 32, 192>}, {pipeline_mode = #tpu.pipeline_mode<synchronous>, transform_indices = @transform_1, window_bounds = array<i64: 192, 32>}, {pipeline_mode = #tpu.pipeline_mode<synchronous>, transform_indices = @transform_2, window_bounds = array<i64: 1, 32>}, {transform_indices = @transform_3, window_bounds = array<i64: 32, 32>}]} {
    %c0 = arith.constant 0 : index
    %c0_0 = arith.constant 0 : index
    %0 = vector.load %arg1[%c0, %c0_0] : memref<32x192xbf16, #tpu.memory_space<vmem>>, vector<32x192xbf16>
    %c0_1 = arith.constant 0 : index
    %c0_2 = arith.constant 0 : index
    %1 = vector.load %arg2[%c0_1, %c0_2] : memref<192x32xbf16, #tpu.memory_space<vmem>>, vector<192x32xbf16>
    %cst = arith.constant dense<0.000000e+00> : vector<32x32xf32>
    %2 = tpu.matmul %0, %1, %cst {dimension_numbers = #tpu.dot_dimension_numbers<[1], [0], [0], [1], [0, 0, 1, 1], [], []>} : vector<32x192xbf16>, vector<192x32xbf16>, vector<32x32xf32> -> vector<32x32xf32>
    %c0_3 = arith.constant 0 : index
    %c0_4 = arith.constant 0 : index
    %3 = vector.load %arg3[%c0_3, %c0_4] : memref<1x32xf32, #tpu.memory_space<vmem>>, vector<1x32xf32>
    %4 = vector.broadcast %3 : vector<1x32xf32> to vector<32x32xf32>
    %5 = arith.addf %2, %4 : vector<32x32xf32>
    %cst_5 = arith.constant 0.000000e+00 : f32
    %6 = vector.broadcast %cst_5 : f32 to vector<32x32xf32>
    %7 = arith.maximumf %5, %6 : vector<32x32xf32>
    %c0_6 = arith.constant 0 : index
    %c0_7 = arith.constant 0 : index
    %8 = vector.load %arg4[%c0_6, %c0_7] : memref<32x32xf32, #tpu.memory_space<vmem>>, vector<32x32xf32>
    tpu.vector_store %arg4[%c0_6, %c0_7], %7 {strides = array<i32>} : memref<32x32xf32, #tpu.memory_space<vmem>>, vector<32x32xf32>,
    return
  }
  func.func @transform_0(%arg0: i32) -> (i32, i32) {
    %c0_i32 = arith.constant 0 : i32
    %c0_i32_0 = arith.constant 0 : i32
    return %arg0, %c0_i32 : i32, i32
  }
  func.func @transform_1(%arg0: i32) -> (i32, i32) {
    %c0_i32 = arith.constant 0 : i32
    %c0_i32_0 = arith.constant 0 : i32
    %c0_i32_1 = arith.constant 0 : i32
    return %c0_i32, %c0_i32_0 : i32, i32
  }
  func.func @transform_2(%arg0: i32) -> (i32, i32) {
    %c0_i32 = arith.constant 0 : i32
    %c0_i32_0 = arith.constant 0 : i32
    %c0_i32_1 = arith.constant 0 : i32
    return %c0_i32, %c0_i32_0 : i32, i32
  }
  func.func @transform_3(%arg0: i32) -> (i32, i32) {
    %c0_i32 = arith.constant 0 : i32
    %c0_i32_0 = arith.constant 0 : i32
    return %arg0, %c0_i32 : i32, i32
  }
}

module attributes {stable_mosaic.version = 11 : i64} {
  func.func @_mm_bias_act_kernel(%arg0: i32, %arg1: memref<8x288xbf16, #tpu.memory_space<vmem>>, %arg2: memref<288x32xbf16, #tpu.memory_space<vmem>>, %arg3: memref<1x32xf32, #tpu.memory_space<vmem>>, %arg4: memref<8x32xf32, #tpu.memory_space<vmem>>) attributes {dimension_semantics = [#tpu.dimension_semantics<parallel>], iteration_bounds = array<i64: 1>, scalar_prefetch = 0 : i64, scratch_operands = 0 : i64, tpu.core_type = #tpu.core_type<tc>, window_params = [{transform_indices = @transform_0, window_bounds = array<i64: 8, 288>}, {pipeline_mode = #tpu.pipeline_mode<synchronous>, transform_indices = @transform_1, window_bounds = array<i64: 288, 32>}, {pipeline_mode = #tpu.pipeline_mode<synchronous>, transform_indices = @transform_2, window_bounds = array<i64: 1, 32>}, {transform_indices = @transform_3, window_bounds = array<i64: 8, 32>}]} {
    %c0 = arith.constant 0 : index
    %c0_0 = arith.constant 0 : index
    %0 = vector.load %arg1[%c0, %c0_0] : memref<8x288xbf16, #tpu.memory_space<vmem>>, vector<8x288xbf16>
    %c0_1 = arith.constant 0 : index
    %c0_2 = arith.constant 0 : index
    %1 = vector.load %arg2[%c0_1, %c0_2] : memref<288x32xbf16, #tpu.memory_space<vmem>>, vector<288x32xbf16>
    %cst = arith.constant dense<0.000000e+00> : vector<8x32xf32>
    %2 = tpu.matmul %0, %1, %cst {dimension_numbers = #tpu.dot_dimension_numbers<[1], [0], [0], [1], [0, 0, 1, 1], [], []>} : vector<8x288xbf16>, vector<288x32xbf16>, vector<8x32xf32> -> vector<8x32xf32>
    %c0_3 = arith.constant 0 : index
    %c0_4 = arith.constant 0 : index
    %3 = vector.load %arg3[%c0_3, %c0_4] : memref<1x32xf32, #tpu.memory_space<vmem>>, vector<1x32xf32>
    %4 = vector.broadcast %3 : vector<1x32xf32> to vector<8x32xf32>
    %5 = arith.addf %2, %4 : vector<8x32xf32>
    %cst_5 = arith.constant 0.000000e+00 : f32
    %6 = vector.broadcast %cst_5 : f32 to vector<8x32xf32>
    %7 = arith.maximumf %5, %6 : vector<8x32xf32>
    %c0_6 = arith.constant 0 : index
    %c0_7 = arith.constant 0 : index
    %8 = vector.load %arg4[%c0_6, %c0_7] : memref<8x32xf32, #tpu.memory_space<vmem>>, vector<8x32xf32>
    tpu.vector_store %arg4[%c0_6, %c0_7], %7 {strides = array<i32>} : memref<8x32xf32, #tpu.memory_space<vmem>>, vector<8x32xf32>,
    return
  }
  func.func @transform_0(%arg0: i32) -> (i32, i32) {
    %c0_i32 = arith.constant 0 : i32
    %c0_i32_0 = arith.constant 0 : i32
    return %arg0, %c0_i32 : i32, i32
  }
  func.func @transform_1(%arg0: i32) -> (i32, i32) {
    %c0_i32 = arith.constant 0 : i32
    %c0_i32_0 = arith.constant 0 : i32
    %c0_i32_1 = arith.constant 0 : i32
    return %c0_i32, %c0_i32_0 : i32, i32
  }
  func.func @transform_2(%arg0: i32) -> (i32, i32) {
    %c0_i32 = arith.constant 0 : i32
    %c0_i32_0 = arith.constant 0 : i32
    %c0_i32_1 = arith.constant 0 : i32
    return %c0_i32, %c0_i32_0 : i32, i32
  }
  func.func @transform_3(%arg0: i32) -> (i32, i32) {
    %c0_i32 = arith.constant 0 : i32
    %c0_i32_0 = arith.constant 0 : i32
    return %arg0, %c0_i32 : i32, i32
  }
}

module attributes {stable_mosaic.version = 11 : i64} {
  func.func @_head_kernel(%arg0: i32, %arg1: memref<2x4x128xf32, #tpu.memory_space<vmem>>, %arg2: memref<128x10xf32, #tpu.memory_space<vmem>>, %arg3: memref<1x10xf32, #tpu.memory_space<vmem>>, %arg4: memref<2x10xf32, #tpu.memory_space<vmem>>) attributes {dimension_semantics = [#tpu.dimension_semantics<arbitrary>], iteration_bounds = array<i64: 1>, scalar_prefetch = 0 : i64, scratch_operands = 0 : i64, tpu.core_type = #tpu.core_type<tc>, window_params = [{pipeline_mode = #tpu.pipeline_mode<synchronous>, transform_indices = @transform_0, window_bounds = array<i64: 2, 4, 128>}, {pipeline_mode = #tpu.pipeline_mode<synchronous>, transform_indices = @transform_1, window_bounds = array<i64: 128, 10>}, {pipeline_mode = #tpu.pipeline_mode<synchronous>, transform_indices = @transform_2, window_bounds = array<i64: 1, 10>}, {pipeline_mode = #tpu.pipeline_mode<synchronous>, transform_indices = @transform_3, window_bounds = array<i64: 2, 10>}]} {
    %c0 = arith.constant 0 : index
    %c0_0 = arith.constant 0 : index
    %c0_1 = arith.constant 0 : index
    %0 = vector.load %arg1[%c0, %c0_0, %c0_1] : memref<2x4x128xf32, #tpu.memory_space<vmem>>, vector<2x4x128xf32>
    %cst = arith.constant dense<0.000000e+00> : vector<2x128xf32>
    %1 = vector.multi_reduction <add>, %0, %cst [1] : vector<2x4x128xf32> to vector<2x128xf32>
    %cst_2 = arith.constant 4.000000e+00 : f32
    %2 = vector.broadcast %cst_2 : f32 to vector<2x128xf32>
    %3 = arith.divf %1, %2 : vector<2x128xf32>
    %c0_3 = arith.constant 0 : index
    %c0_4 = arith.constant 0 : index
    %4 = vector.load %arg2[%c0_3, %c0_4] : memref<128x10xf32, #tpu.memory_space<vmem>>, vector<128x10xf32>
    %cst_5 = arith.constant dense<0.000000e+00> : vector<2x10xf32>
    %5 = tpu.matmul %3, %4, %cst_5 {dimension_numbers = #tpu.dot_dimension_numbers<[1], [0], [0], [1], [0, 0, 1, 1], [], []>} : vector<2x128xf32>, vector<128x10xf32>, vector<2x10xf32> -> vector<2x10xf32>
    %c0_6 = arith.constant 0 : index
    %c0_7 = arith.constant 0 : index
    %6 = vector.load %arg3[%c0_6, %c0_7] : memref<1x10xf32, #tpu.memory_space<vmem>>, vector<1x10xf32>
    %7 = vector.broadcast %6 : vector<1x10xf32> to vector<2x10xf32>
    %8 = arith.addf %5, %7 : vector<2x10xf32>
    %cst_8 = arith.constant dense<0xFF800000> : vector<2xf32>
    %9 = vector.multi_reduction <maximumf>, %8, %cst_8 [1] : vector<2x10xf32> to vector<2xf32>
    %10 = vector.shape_cast %9 : vector<2xf32> to vector<2x1xf32>
    %11 = vector.broadcast %10 : vector<2x1xf32> to vector<2x10xf32>
    %12 = arith.subf %8, %11 : vector<2x10xf32>
    %13 = math.exp %12 : vector<2x10xf32>
    %cst_9 = arith.constant dense<0.000000e+00> : vector<2xf32>
    %14 = vector.multi_reduction <add>, %13, %cst_9 [1] : vector<2x10xf32> to vector<2xf32>
    %15 = vector.shape_cast %14 : vector<2xf32> to vector<2x1xf32>
    %16 = vector.broadcast %15 : vector<2x1xf32> to vector<2x10xf32>
    %17 = arith.divf %13, %16 : vector<2x10xf32>
    %c0_10 = arith.constant 0 : index
    %c0_11 = arith.constant 0 : index
    %18 = vector.load %arg4[%c0_10, %c0_11] : memref<2x10xf32, #tpu.memory_space<vmem>>, vector<2x10xf32>
    tpu.vector_store %arg4[%c0_10, %c0_11], %17 {strides = array<i32>} : memref<2x10xf32, #tpu.memory_space<vmem>>, vector<2x10xf32>,
    return
  }
  func.func @transform_0(%arg0: i32) -> (i32, i32, i32) {
    %c0_i32 = arith.constant 0 : i32
    %c0_i32_0 = arith.constant 0 : i32
    %c0_i32_1 = arith.constant 0 : i32
    %c0_i32_2 = arith.constant 0 : i32
    return %c0_i32, %c0_i32_0, %c0_i32_1 : i32, i32, i32
  }
  func.func @transform_1(%arg0: i32) -> (i32, i32) {
    %c0_i32 = arith.constant 0 : i32
    %c0_i32_0 = arith.constant 0 : i32
    %c0_i32_1 = arith.constant 0 : i32
    return %c0_i32, %c0_i32_0 : i32, i32
  }
  func.func @transform_2(%arg0: i32) -> (i32, i32) {
    %c0_i32 = arith.constant 0 : i32
    %c0_i32_0 = arith.constant 0 : i32
    %c0_i32_1 = arith.constant 0 : i32
    return %c0_i32, %c0_i32_0 : i32, i32
  }
  func.func @transform_3(%arg0: i32) -> (i32, i32) {
    %c0_i32 = arith.constant 0 : i32
    %c0_i32_0 = arith.constant 0 : i32
    %c0_i32_1 = arith.constant 0 : i32
    return %c0_i32, %c0_i32_0 : i32, i32
  }
}

module attributes {stable_mosaic.version = 11 : i64} {
  func.func @_fused_tail_kernel(%arg0: i32, %arg1: memref<8x32xbf16, #tpu.memory_space<vmem>>, %arg2: memref<32x128xbf16, #tpu.memory_space<vmem>>, %arg3: memref<8x64xbf16, #tpu.memory_space<vmem>>, %arg4: memref<64x128xbf16, #tpu.memory_space<vmem>>, %arg5: memref<1x128xf32, #tpu.memory_space<vmem>>, %arg6: memref<8x128xf32, #tpu.memory_space<vmem>>) attributes {dimension_semantics = [#tpu.dimension_semantics<parallel>], iteration_bounds = array<i64: 1>, scalar_prefetch = 0 : i64, scratch_operands = 0 : i64, tpu.core_type = #tpu.core_type<tc>, window_params = [{transform_indices = @transform_0, window_bounds = array<i64: 8, 32>}, {pipeline_mode = #tpu.pipeline_mode<synchronous>, transform_indices = @transform_1, window_bounds = array<i64: 32, 128>}, {transform_indices = @transform_2, window_bounds = array<i64: 8, 64>}, {pipeline_mode = #tpu.pipeline_mode<synchronous>, transform_indices = @transform_3, window_bounds = array<i64: 64, 128>}, {pipeline_mode = #tpu.pipeline_mode<synchronous>, transform_indices = @transform_4, window_bounds = array<i64: 1, 128>}, {transform_indices = @transform_5, window_bounds = array<i64: 8, 128>}]} {
    %c0 = arith.constant 0 : index
    %c0_0 = arith.constant 0 : index
    %0 = vector.load %arg1[%c0, %c0_0] : memref<8x32xbf16, #tpu.memory_space<vmem>>, vector<8x32xbf16>
    %c0_1 = arith.constant 0 : index
    %c0_2 = arith.constant 0 : index
    %1 = vector.load %arg2[%c0_1, %c0_2] : memref<32x128xbf16, #tpu.memory_space<vmem>>, vector<32x128xbf16>
    %cst = arith.constant dense<0.000000e+00> : vector<8x128xf32>
    %2 = tpu.matmul %0, %1, %cst {dimension_numbers = #tpu.dot_dimension_numbers<[1], [0], [0], [1], [0, 0, 1, 1], [], []>} : vector<8x32xbf16>, vector<32x128xbf16>, vector<8x128xf32> -> vector<8x128xf32>
    %c0_3 = arith.constant 0 : index
    %c0_4 = arith.constant 0 : index
    %3 = vector.load %arg3[%c0_3, %c0_4] : memref<8x64xbf16, #tpu.memory_space<vmem>>, vector<8x64xbf16>
    %c0_5 = arith.constant 0 : index
    %c0_6 = arith.constant 0 : index
    %4 = vector.load %arg4[%c0_5, %c0_6] : memref<64x128xbf16, #tpu.memory_space<vmem>>, vector<64x128xbf16>
    %cst_7 = arith.constant dense<0.000000e+00> : vector<8x128xf32>
    %5 = tpu.matmul %3, %4, %cst_7 {dimension_numbers = #tpu.dot_dimension_numbers<[1], [0], [0], [1], [0, 0, 1, 1], [], []>} : vector<8x64xbf16>, vector<64x128xbf16>, vector<8x128xf32> -> vector<8x128xf32>
    %6 = arith.addf %2, %5 : vector<8x128xf32>
    %c0_8 = arith.constant 0 : index
    %c0_9 = arith.constant 0 : index
    %7 = vector.load %arg5[%c0_8, %c0_9] : memref<1x128xf32, #tpu.memory_space<vmem>>, vector<1x128xf32>
    %8 = vector.broadcast %7 : vector<1x128xf32> to vector<8x128xf32>
    %9 = arith.addf %6, %8 : vector<8x128xf32>
    %cst_10 = arith.constant 0.000000e+00 : f32
    %10 = vector.broadcast %cst_10 : f32 to vector<8x128xf32>
    %11 = arith.maximumf %9, %10 : vector<8x128xf32>
    %c0_11 = arith.constant 0 : index
    %c0_12 = arith.constant 0 : index
    %12 = vector.load %arg6[%c0_11, %c0_12] : memref<8x128xf32, #tpu.memory_space<vmem>>, vector<8x128xf32>
    tpu.vector_store %arg6[%c0_11, %c0_12], %11 {strides = array<i32>} : memref<8x128xf32, #tpu.memory_space<vmem>>, vector<8x128xf32>,
    return
  }
  func.func @transform_0(%arg0: i32) -> (i32, i32) {
    %c0_i32 = arith.constant 0 : i32
    %c0_i32_0 = arith.constant 0 : i32
    return %arg0, %c0_i32 : i32, i32
  }
  func.func @transform_1(%arg0: i32) -> (i32, i32) {
    %c0_i32 = arith.constant 0 : i32
    %c0_i32_0 = arith.constant 0 : i32
    %c0_i32_1 = arith.constant 0 : i32
    return %c0_i32, %c0_i32_0 : i32, i32
  }
  func.func @transform_2(%arg0: i32) -> (i32, i32) {
    %c0_i32 = arith.constant 0 : i32
    %c0_i32_0 = arith.constant 0 : i32
    return %arg0, %c0_i32 : i32, i32
  }
  func.func @transform_3(%arg0: i32) -> (i32, i32) {
    %c0_i32 = arith.constant 0 : i32
    %c0_i32_0 = arith.constant 0 : i32
    %c0_i32_1 = arith.constant 0 : i32
    return %c0_i32, %c0_i32_0 : i32, i32
  }
  func.func @transform_4(%arg0: i32) -> (i32, i32) {
    %c0_i32 = arith.constant 0 : i32
    %c0_i32_0 = arith.constant 0 : i32
    %c0_i32_1 = arith.constant 0 : i32
    return %c0_i32, %c0_i32_0 : i32, i32
  }
  func.func @transform_5(%arg0: i32) -> (i32, i32) {
    %c0_i32 = arith.constant 0 : i32
    %c0_i32_0 = arith.constant 0 : i32
    return %arg0, %c0_i32 : i32, i32
  }
}

</mosaic_0001>

<bundles_post_ra>
// kernel: slow_only_forward.15
= control target key start
LH: loop header
LB: loop body
LE: loop exit
PB: predicated region body
PF: predicated region fallthrough
CT: control target
= control target key end

     0   :  { %s2946_s12 = smov 0   ;;  %s3864_s0 = inlined_call_operand.vmem [shape: bf16[2048,147], index: 0, kind: input, shape index: {}]   ;;  %s3865_s1 = inlined_call_operand.vmem [shape: bf16[147,8], index: 1, kind: input, shape index: {}]   ;;  %s3866_s2 = inlined_call_operand.vmem [shape: f32[1,8], index: 2, kind: input, shape index: {}]   ;;  %s3867_s3 = inlined_call_operand.vmem [shape: f32[2048,8], index: 3, kind: output, shape index: {}]  }
   0x1 LB: > { %s2133_s13 = sadd.s32 4294967295, %s2923_s12   ;;  %p2137_p0 = scmp.ge.s32.totalorder %s2923_s12, 1  ;;  %s2923_s12 = sphi %s2946_s12, %s13_s12  }
   0x2   : > { %p139_p1 = scmp.lt.s32.totalorder %s2923_s12, 3 }
   0x4   : > { %p140_p2 = pnand %p2137_p0, %p139_p1 }
   0x5   : > { %s2138_s18 = sshll.u32 (!%p140_p2), %s2133_s13, 7 }
   0x6   : > { %143 = sbr.rel (%p140_p2) target bundleno = 686 (0x2ae), region = 32  ;;  %p165_p3 = scmp.lt.s32.totalorder (!%p140_p2), %s2138_s18, 255 }
   0xb   : > { %v2893_v0 = vld [vmem:[%s3865_s1 + $0x38] sm:$0xff]  ;;  %v324_v1 = vld [vmem:[%s3865_s1 + $0x48] sm:$0x3]  ;;  %vm1155_vm0 = vcmask 1040384   ;;  %vm1156_vm1 = vcmask 1041408   ;;  %v2892_v3 = vld [vmem:[%s3865_s1 + $0x30] sm:$0xff] }
   0xc   : > { %v942_v2 = vunpack.c.l.b16 %v324_v1  ;;  %1162 = vmatpush.bf16.msra.mxu0 %v2893_v0  ;;  %2895 = vmatpush.bf16.msra.mxu2 %v2893_v0  ;;  %v2925_v4 = vmov 65535   ;;  %s3869_s18 = smov (!%p165_p3, %s2138_s18), 255  ;;  %v2891_v9 = vld [vmem:[%s3865_s1 + $0x28] sm:$0xff]  ;;  %v2894_v10 = vld [vmem:[%s3865_s1 + $0x40] sm:$0xff]  ;;  %vm962_vm2 = vcmask 154624   ;;  %v2889_v18 = vld [vmem:[%s3865_s1 + $0x18] sm:$0xff] }
   0xd   : > { %v1157_v5 = vsel %vm1155_vm0, 4294967295, %v2925_v4  ;;  %s2757_s23 = sshll.u32 %s3869_s18, 3  ;;  %v2890_v14 = vld [vmem:[%s3865_s1 + $0x20] sm:$0xff]  ;;  %v2888_v19 = vld [vmem:[%s3865_s1 + $0x10] sm:$0xff]  ;;  %v2887_v20 = vld [vmem:[%s3865_s1 + $0x8] sm:$0xff]  ;;  %vm1948_vm3 = vcmask 64512  }
   0xe   : > { %v952_v6 = vpack.c.b16 %v942_v2, %v942_v2  ;;  %v1158_v7 = vsel %vm1156_vm1, %v1157_v5, 0  ;;  %s2977_s28 = scalar_lea.vmem %s3864_s0, %s2757_s23  ;;  %v2886_v26 = vld [vmem:[%s3865_s1] sm:$0xff]  ;;  %s3105_s17 = scalar_lea.vmem %s3867_s3, %s2757_s23 }
   0xf   : > { %v2758_v11 = vld [vmem:[%s2977_s28 + $0x4] sm:$0xf]  ;;  %v2147_v12 = vld [vmem:[%s2977_s28 + $0x8] sm:$0xf0]  ;;  %v2824_v15 = vld [vmem:[%s2977_s28 + $0x214] sm:$0xf] }
  0x10   : > { %v1160_v8 = vand.u32 %v1158_v7, %v952_v6  ;;  %1163 = vmatpush.bf16.msra.mxu0 %v2892_v3  ;;  %2896 = vmatpush.bf16.msra.mxu2 %v2892_v3  ;;  %v2150_v13 = vor.u32 %v2758_v11, %v2147_v12  ;;  %v2411_v16 = vld [vmem:[%s2977_s28 + $0x218] sm:$0xf0]  ;;  %v2760_v21 = vld [vmem:[%s2977_s28 + $0x14] sm:$0xf]  ;;  %v2826_v23 = vld [vmem:[%s2977_s28 + $0x224] sm:$0xf] }
  0x11   : > { %v2414_v17 = vor.u32 %v2824_v15, %v2411_v16  ;;  %v2155_v22 = vld [vmem:[%s2977_s28 + $0x18] sm:$0xf0]  ;;  %v2419_v24 = vld [vmem:[%s2977_s28 + $0x228] sm:$0xf0]  ;;  %v2145_v27 = vld [vmem:[%s2977_s28] sm:$0xf] }
  0x12   : > { %1497 = vmatpush.bf16.msra.mxu1 %v1160_v8  ;;  %2903 = vmatpush.bf16.msra.mxu3 %v1160_v8  ;;  %v2158_v25 = vor.u32 %v2760_v21, %v2155_v22  ;;  %v2759_v28 = vld [vmem:[%s2977_s28 + $0x4] sm:$0xf0]  ;;  %v2401_v29 = vld [vmem:[%s2977_s28 + $0x200] sm:$0xf]  ;;  %v2422_v31 = vor.u32 %v2826_v23, %v2419_v24  ;;  %v2762_v34 = vld [vmem:[%s2977_s28 + $0x24] sm:$0xf] }
  0x13   : > { %v2823_v30 = vld [vmem:[%s2977_s28 + $0x204] sm:$0xf0]  ;;  %v2146_v32 = vor.u32 %v2759_v28, %v2145_v27  ;;  %v2163_v35 = vld [vmem:[%s2977_s28 + $0x28] sm:$0xf0]  ;;  %v2828_v36 = vld [vmem:[%s2977_s28 + $0x234] sm:$0xf] }
  0x14   : > { %1164 = vmatpush.bf16.msra.mxu0 %v2891_v9  ;;  %2897 = vmatpush.bf16.msra.mxu2 %v2891_v9  ;;  %v2402_v33 = vor.u32 %v2823_v30, %v2401_v29  ;;  %v2427_v37 = vld [vmem:[%s2977_s28 + $0x238] sm:$0xf0]  ;;  %v2166_v38 = vor.u32 %v2762_v34, %v2163_v35  ;;  %v2153_v39 = vld [vmem:[%s2977_s28 + $0x10] sm:$0xf]  ;;  %v2761_v40 = vld [vmem:[%s2977_s28 + $0x14] sm:$0xf0] }
  0x15   : > { %v2409_v41 = vld [vmem:[%s2977_s28 + $0x210] sm:$0xf]  ;;  %v2825_v42 = vld [vmem:[%s2977_s28 + $0x214] sm:$0xf0]  ;;  %v2430_v43 = vor.u32 %v2828_v36, %v2427_v37  ;;  %v2154_v44 = vor.u32 %v2761_v40, %v2153_v39  ;;  %v2764_v46 = vld [vmem:[%s2977_s28 + $0x34] sm:$0xf] }
  0x16   : > { %1498 = vmatpush.bf16.msra.mxu1 %v2894_v10  ;;  %2904 = vmatpush.bf16.msra.mxu3 %v2894_v10  ;;  %v2410_v45 = vor.u32 %v2825_v42, %v2409_v41  ;;  %v2171_v47 = vld [vmem:[%s2977_s28 + $0x38] sm:$0xf0]  ;;  %v2830_v48 = vld [vmem:[%s2977_s28 + $0x244] sm:$0xf]  ;;  %v2435_v49 = vld [vmem:[%s2977_s28 + $0x248] sm:$0xf0] }
  0x17   : > { %v2174_v50 = vor.u32 %v2764_v46, %v2171_v47  ;;  %v2161_v51 = vld [vmem:[%s2977_s28 + $0x20] sm:$0xf]  ;;  %v2763_v52 = vld [vmem:[%s2977_s28 + $0x24] sm:$0xf0]  ;;  %v2438_v55 = vor.u32 %v2830_v48, %v2435_v49  ;;  %v2766_v58 = vld [vmem:[%s2977_s28 + $0x44] sm:$0xf] }
  0x18   : > { %1165 = vmatpush.bf16.msra.mxu0 %v2890_v14  ;;  %2898 = vmatpush.bf16.msra.mxu2 %v2890_v14  ;;  %v2417_v53 = vld [vmem:[%s2977_s28 + $0x220] sm:$0xf]  ;;  %v2827_v54 = vld [vmem:[%s2977_s28 + $0x224] sm:$0xf0]  ;;  %v2162_v56 = vor.u32 %v2763_v52, %v2161_v51  ;;  %v2179_v59 = vld [vmem:[%s2977_s28 + $0x48] sm:$0xf0] }
  0x19   : > { %2691 = vmatmul.msk.bf16.vlgmr.msra.gmra.mxu1 %vm962_vm2, %v2150_v13  ;;  %2724 = vmatmul.msk.bf16.vlgmr.msra.gmra.mxu3 %vm962_vm2, %v2414_v17  ;;  %v2418_v57 = vor.u32 %v2827_v54, %v2417_v53  ;;  %v2832_v60 = vld [vmem:[%s2977_s28 + $0x254] sm:$0xf]  ;;  %v2443_v61 = vld [vmem:[%s2977_s28 + $0x258] sm:$0xf0]  ;;  %v2182_v62 = vor.u32 %v2766_v58, %v2179_v59  ;;  %v2169_v63 = vld [vmem:[%s2977_s28 + $0x30] sm:$0xf] }
  0x1a   : > { %v2765_v0 = vld [vmem:[%s2977_s28 + $0x34] sm:$0xf0]  ;;  %v2425_v1 = vld [vmem:[%s2977_s28 + $0x230] sm:$0xf]  ;;  %v2446_v3 = vor.u32 %v2832_v60, %v2443_v61  ;;  %v2768_v6 = vld [vmem:[%s2977_s28 + $0x54] sm:$0xf] }
  0x1b   : > { %v2829_v2 = vld [vmem:[%s2977_s28 + $0x234] sm:$0xf0]  ;;  %v2170_v4 = vor.u32 %v2765_v0, %v2169_v63  ;;  %v2187_v7 = vld [vmem:[%s2977_s28 + $0x58] sm:$0xf0]  ;;  %v2834_v8 = vld [vmem:[%s2977_s28 + $0x264] sm:$0xf] }
  0x1c   : > { %1166 = vmatpush.bf16.msra.mxu0 %v2889_v18  ;;  %2899 = vmatpush.bf16.msra.mxu2 %v2889_v18  ;;  %v2426_v5 = vor.u32 %v2829_v2, %v2425_v1  ;;  %v2451_v9 = vld [vmem:[%s2977_s28 + $0x268] sm:$0xf0]  ;;  %v2190_v10 = vor.u32 %v2768_v6, %v2187_v7  ;;  %v2177_v11 = vld [vmem:[%s2977_s28 + $0x40] sm:$0xf]  ;;  %v2767_v12 = vld [vmem:[%s2977_s28 + $0x44] sm:$0xf0] }
  0x1d   : > { %v2433_v13 = vld [vmem:[%s2977_s28 + $0x240] sm:$0xf]  ;;  %v2831_v14 = vld [vmem:[%s2977_s28 + $0x244] sm:$0xf0]  ;;  %v2454_v15 = vor.u32 %v2834_v8, %v2451_v9  ;;  %v2178_v16 = vor.u32 %v2767_v12, %v2177_v11  ;;  %v2770_v18 = vld [vmem:[%s2977_s28 + $0x64] sm:$0xf] }
  0x1e   : > { %v2434_v17 = vor.u32 %v2831_v14, %v2433_v13  ;;  %v2459_v21 = vld [vmem:[%s2977_s28 + $0x278] sm:$0xf0]  ;;  %v2185_v23 = vld [vmem:[%s2977_s28 + $0x50] sm:$0xf]  ;;  %v2769_v24 = vld [vmem:[%s2977_s28 + $0x54] sm:$0xf0] }
  0x1f   : > { %v2186_v28 = vor.u32 %v2769_v24, %v2185_v23  ;;  %v2772_v30 = vld [vmem:[%s2977_s28 + $0x74] sm:$0xf]  ;;  %v2193_v35 = vld [vmem:[%s2977_s28 + $0x60] sm:$0xf]  ;;  %v2771_v36 = vld [vmem:[%s2977_s28 + $0x64] sm:$0xf0] }
  0x20   : > { %1167 = vmatpush.bf16.msra.mxu0 %v2888_v19  ;;  %2900 = vmatpush.bf16.msra.mxu2 %v2888_v19  ;;  %v2195_v19 = vld [vmem:[%s2977_s28 + $0x68] sm:$0xf0]  ;;  %v2449_v37 = vld [vmem:[%s2977_s28 + $0x260] sm:$0xf]  ;;  %v2194_v40 = vor.u32 %v2771_v36, %v2193_v35  ;;  %v2774_v42 = vld [vmem:[%s2977_s28 + $0x84] sm:$0xf] }
  0x21   : > { %v2198_v22 = vor.u32 %v2770_v18, %v2195_v19  ;;  %v2201_v47 = vld [vmem:[%s2977_s28 + $0x70] sm:$0xf]  ;;  %v2773_v48 = vld [vmem:[%s2977_s28 + $0x74] sm:$0xf0]  ;;  %v2219_v58 = vld [vmem:[%s2977_s28 + $0x98] sm:$0xf0] }
  0x22   : > { %v2837_v51 = vld [vmem:[%s2977_s28 + $0x274] sm:$0xf0]  ;;  %v2202_v53 = vor.u32 %v2773_v48, %v2201_v47  ;;  %v2842_v59 = vld [vmem:[%s2977_s28 + $0x2a4] sm:$0xf]  ;;  %v2483_v60 = vld [vmem:[%s2977_s28 + $0x2a8] sm:$0xf0] }
  0x23   : > { %v2775_v63 = vld [vmem:[%s2977_s28 + $0x84] sm:$0xf0]  ;;  %v3093_v2 = vld [vmem:[%s3866_s2] ss:$0 sm:$0xff]  ;;  %v2227_v18 = vld [vmem:[%s2977_s28 + $0xa8] sm:$0xf0] }
  0x24   : > { %1168 = vmatpush.bf16.msra.mxu0 %v2887_v20  ;;  %2901 = vmatpush.bf16.msra.mxu2 %v2887_v20  ;;  %v2836_v20 = vld [vmem:[%s2977_s28 + $0x274] sm:$0xf]  ;;  %v2217_v23 = vld [vmem:[%s2977_s28 + $0x90] sm:$0xf]  ;;  %v2777_v24 = vld [vmem:[%s2977_s28 + $0x94] sm:$0xf0] }
  0x25   : > { %v2462_v27 = vor.u32 %v2836_v20, %v2459_v21  ;;  %v2844_v20 = vld [vmem:[%s2977_s28 + $0x2b4] sm:$0xf]  ;;  %v2491_v21 = vld [vmem:[%s2977_s28 + $0x2b8] sm:$0xf0]  ;;  %v2846_v48 = vld [vmem:[%s2977_s28 + $0x2c4] sm:$0xf] }
  0x28   : > { %1169 = vmatpush.bf16.msra.mxu0 %v2886_v26  ;;  %2902 = vmatpush.bf16.msra.mxu2 %v2886_v26  ;;  %v2833_v26 = vld [vmem:[%s2977_s28 + $0x254] sm:$0xf0] }
  0x29   : > { %2692 = vmatmul.msk.bf16.gmra.mxu1 %vm962_vm2, %v2158_v25  ;;  %2725 = vmatmul.msk.bf16.gmra.mxu3 %vm962_vm2, %v2422_v31  ;;  %v2441_v25 = vld [vmem:[%s2977_s28 + $0x250] sm:$0xf]  ;;  %v2203_v31 = vld [vmem:[%s2977_s28 + $0x78] sm:$0xf0] }
  0x2a   : > { %v2442_v29 = vor.u32 %v2833_v26, %v2441_v25  ;;  %v2206_v34 = vor.u32 %v2772_v30, %v2203_v31  ;;  %v2494_v30 = vor.u32 %v2844_v20, %v2491_v21  ;;  %v2507_v20 = vld [vmem:[%s2977_s28 + $0x2d8] sm:$0xf0] }
  0x2b   : > { %1170 = vmatmul.bf16.vlgmr.msra.gmra.mxu0 %v2146_v32  ;;  %1330 = vmatmul.bf16.vlgmr.msra.gmra.mxu2 %v2402_v33  ;;  %v2838_v32 = vld [vmem:[%s2977_s28 + $0x284] sm:$0xf]  ;;  %v2467_v33 = vld [vmem:[%s2977_s28 + $0x288] sm:$0xf0] }
  0x2c   : > { %v2470_v39 = vor.u32 %v2838_v32, %v2467_v33  ;;  %v2218_v32 = vor.u32 %v2777_v24, %v2217_v23  ;;  %v2233_v23 = vld [vmem:[%s2977_s28 + $0xb0] sm:$0xf]  ;;  %v2781_v24 = vld [vmem:[%s2977_s28 + $0xb4] sm:$0xf0] }
  0x39   : > { %2693 = vmatmul.msk.bf16.gmra.mxu1 %vm962_vm2, %v2166_v38  ;;  %2726 = vmatmul.msk.bf16.gmra.mxu3 %vm962_vm2, %v2430_v43  ;;  %v2835_v38 = vld [vmem:[%s2977_s28 + $0x264] sm:$0xf0]  ;;  %v2211_v43 = vld [vmem:[%s2977_s28 + $0x88] sm:$0xf0] }
  0x3a   : > { %v2450_v41 = vor.u32 %v2835_v38, %v2449_v37  ;;  %v2214_v46 = vor.u32 %v2774_v42, %v2211_v43 }
  0x3b   : > { %1175 = vmatmul.bf16.gmra.mxu0 %v2154_v44  ;;  %1335 = vmatmul.bf16.gmra.mxu2 %v2410_v45  ;;  %v2840_v44 = vld [vmem:[%s2977_s28 + $0x294] sm:$0xf]  ;;  %v2475_v45 = vld [vmem:[%s2977_s28 + $0x298] sm:$0xf0] }
  0x3c   : > { %v2478_v52 = vor.u32 %v2840_v44, %v2475_v45  ;;  %v2780_v44 = vld [vmem:[%s2977_s28 + $0xb4] sm:$0xf]  ;;  %v2235_v45 = vld [vmem:[%s2977_s28 + $0xb8] sm:$0xf0] }
  0x49   : > { %2694 = vmatmul.msk.bf16.gmra.mxu1 %vm962_vm2, %v2174_v50  ;;  %2727 = vmatmul.msk.bf16.gmra.mxu3 %vm962_vm2, %v2438_v55  ;;  %v2457_v50 = vld [vmem:[%s2977_s28 + $0x270] sm:$0xf] }
  0x4a   : > { %v2458_v54 = vor.u32 %v2837_v51, %v2457_v50  ;;  %v2238_v51 = vor.u32 %v2780_v44, %v2235_v45 }
  0x4b   : > { %1180 = vmatmul.bf16.gmra.mxu0 %v2162_v56  ;;  %1340 = vmatmul.bf16.gmra.mxu2 %v2418_v57  ;;  %v2776_v57 = vld [vmem:[%s2977_s28 + $0x94] sm:$0xf] }
  0x4c   : > { %v2222_v61 = vor.u32 %v2776_v57, %v2219_v58  ;;  %v2481_v58 = vld [vmem:[%s2977_s28 + $0x2a0] sm:$0xf] }
  0x59   : > { %2695 = vmatmul.msk.bf16.gmra.mxu1 %vm962_vm2, %v2182_v62  ;;  %2728 = vmatmul.msk.bf16.gmra.mxu3 %vm962_vm2, %v2446_v3  ;;  %v2209_v62 = vld [vmem:[%s2977_s28 + $0x80] sm:$0xf] }
  0x5a   : > { %v2465_v3 = vld [vmem:[%s2977_s28 + $0x280] sm:$0xf]  ;;  %v2210_v6 = vor.u32 %v2775_v63, %v2209_v62 }
  0x5b   : > { %1185 = vmatmul.bf16.gmra.mxu0 %v2170_v4  ;;  %1345 = vmatmul.bf16.gmra.mxu2 %v2426_v5  ;;  %v2839_v4 = vld [vmem:[%s2977_s28 + $0x284] sm:$0xf0]  ;;  %v2486_v5 = vor.u32 %v2842_v59, %v2483_v60 }
  0x5c   : > { %v2466_v8 = vor.u32 %v2839_v4, %v2465_v3  ;;  %v2843_v59 = vld [vmem:[%s2977_s28 + $0x2a4] sm:$0xf0] }
  0x69   : > { %2696 = vmatmul.msk.bf16.gmra.mxu1 %vm962_vm2, %v2190_v10  ;;  %2729 = vmatmul.msk.bf16.gmra.mxu3 %vm962_vm2, %v2454_v15 }
  0x6b   : > { %1190 = vmatmul.bf16.gmra.mxu0 %v2178_v16  ;;  %1350 = vmatmul.bf16.gmra.mxu2 %v2434_v17  ;;  %v2778_v17 = vld [vmem:[%s2977_s28 + $0xa4] sm:$0xf] }
  0x79   : > { %2697 = vmatmul.msk.bf16.gmra.mxu1 %vm962_vm2, %v2198_v22  ;;  %2730 = vmatmul.msk.bf16.gmra.mxu3 %vm962_vm2, %v2462_v27  ;;  %v2230_v22 = vor.u32 %v2778_v17, %v2227_v18 }
  0x7b   : > { %1195 = vmatmul.bf16.gmra.mxu0 %v2186_v28  ;;  %1355 = vmatmul.bf16.gmra.mxu2 %v2442_v29  ;;  %v2473_v28 = vld [vmem:[%s2977_s28 + $0x290] sm:$0xf]  ;;  %v2841_v29 = vld [vmem:[%s2977_s28 + $0x294] sm:$0xf0] }
  0x89   : > { %2698 = vmatmul.msk.bf16.gmra.mxu1 %vm962_vm2, %v2206_v34  ;;  %2731 = vmatmul.msk.bf16.gmra.mxu3 %vm962_vm2, %v2470_v39  ;;  %v2474_v34 = vor.u32 %v2841_v29, %v2473_v28  ;;  %v2489_v29 = vld [vmem:[%s2977_s28 + $0x2b0] sm:$0xf] }
  0x8b   : > { %1200 = vmatmul.bf16.gmra.mxu0 %v2194_v40  ;;  %1360 = vmatmul.bf16.gmra.mxu2 %v2450_v41 }
  0x96   : > { %v1500_v49 = vpop.f32.mrf.mxu1 }
  0x99   : > { %2699 = vmatmul.msk.bf16.gmra.mxu1 %vm962_vm2, %v2214_v46  ;;  %2732 = vmatmul.msk.bf16.gmra.mxu3 %vm962_vm2, %v2478_v52  ;;  %v2225_v52 = vld [vmem:[%s2977_s28 + $0xa0] sm:$0xf] }
  0x9b   : > { %1205 = vmatmul.bf16.gmra.mxu0 %v2202_v53  ;;  %1365 = vmatmul.bf16.gmra.mxu2 %v2458_v54  ;;  %v2779_v53 = vld [vmem:[%s2977_s28 + $0xa4] sm:$0xf0] }
  0x9c   : > { %v3080_v55 = vpop.f32.mrf.mxu3 }
  0x9e   : > { %v1502_v56 = vpop.f32.mrf.mxu1 }
  0xa4   : > { %v3088_v0 = vpop.f32.mrf.mxu3 }
  0xa6   : > { %v1505_v1 = vpop.f32.mrf.mxu1 }
  0xa8   : > { %v1171_v7 = vpop.f32.mrf.mxu0 }
  0xa9   : > { %2700 = vmatmul.msk.bf16.gmra.mxu1 %vm962_vm2, %v2222_v61  ;;  %v1172_v9 = vadd.f32 %v3093_v2, %v1171_v7  ;;  %2733 = vmatmul.msk.bf16.gmra.mxu3 %vm962_vm2, %v2486_v5 }
  0xab   : > { %v1501_v10 = vadd.f32 %v1500_v49, %v1172_v9  ;;  %1210 = vmatmul.bf16.gmra.mxu0 %v2210_v6  ;;  %1370 = vmatmul.bf16.gmra.mxu2 %v2466_v8  ;;  %v2499_v49 = vld [vmem:[%s2977_s28 + $0x2c8] sm:$0xf0] }
  0xac   : > { %v3107_v11 = vpop.f32.mrf.mxu3  ;;  %v2502_v60 = vor.u32 %v2846_v48, %v2499_v49  ;;  %v2784_v48 = vld [vmem:[%s2977_s28 + $0xd4] sm:$0xf]  ;;  %v2251_v49 = vld [vmem:[%s2977_s28 + $0xd8] sm:$0xf0] }
  0xad   : > { %v1820_v12 = vmax.f32 %v1501_v10, 0.0 }
  0xae   : > { %v1507_v13 = vpop.f32.mrf.mxu1  ;;  %v3111_v14 = vpop.f32.mrf.mxu2 }
  0xaf   : > { %1949 = vst.msk [vmem:[%s3105_s17] sm:$0xff] %vm1948_vm3, %v1820_v12 }
  0xb0   : > { %v1173_v15 = vpop.f32.mrf.mxu0 }
  0xb1   : > { %v1174_v16 = vadd.f32 %v3093_v2, %v1173_v15  ;;  %v2782_v15 = vld [vmem:[%s2977_s28 + $0xc4] sm:$0xf] }
  0xb3   : > { %v1503_v19 = vadd.f32 %v1502_v56, %v1174_v16  ;;  %v2243_v16 = vld [vmem:[%s2977_s28 + $0xc8] sm:$0xf0] }
  0xb4   : > { %v3120_v25 = vpop.f32.mrf.mxu3 }
  0xb5   : > { %v1821_v26 = vmax.f32 %v1503_v19, 0.0  ;;  %v2848_v19 = vld [vmem:[%s2977_s28 + $0x2d4] sm:$0xf] }
  0xb6   : > { %v1510_v27 = vpop.f32.mrf.mxu1  ;;  %v3126_v31 = vpop.f32.mrf.mxu2 }
  0xb7   : > { %1950 = vst.msk [vmem:[%s3105_s17 + $0x8] sm:$0xff] %vm1948_vm3, %v1821_v26 }
  0xb8   : > { %v1176_v33 = vpop.f32.mrf.mxu0 }
  0xb9   : > { %2701 = vmatmul.msk.bf16.gmra.mxu1 %vm962_vm2, %v2230_v22  ;;  %v1177_v35 = vadd.f32 %v3093_v2, %v1176_v33  ;;  %2734 = vmatmul.msk.bf16.gmra.mxu3 %vm962_vm2, %v2494_v30  ;;  %v2246_v22 = vor.u32 %v2782_v15, %v2243_v16  ;;  %v2845_v30 = vld [vmem:[%s2977_s28 + $0x2b4] sm:$0xf0] }
  0xbb   : > { %v1506_v36 = vadd.f32 %v1505_v1, %v1177_v35  ;;  %1215 = vmatmul.bf16.gmra.mxu0 %v2218_v32  ;;  %1375 = vmatmul.bf16.gmra.mxu2 %v2474_v34  ;;  %v2482_v1 = vor.u32 %v2843_v59, %v2481_v58  ;;  %v2510_v32 = vor.u32 %v2848_v19, %v2507_v20  ;;  %v2241_v58 = vld [vmem:[%s2977_s28 + $0xc0] sm:$0xf]  ;;  %v2783_v59 = vld [vmem:[%s2977_s28 + $0xc4] sm:$0xf0]  ;;  %v2786_v19 = vld [vmem:[%s2977_s28 + $0xe4] sm:$0xf] }
  0xbc   : > { %v3131_v37 = vpop.f32.mrf.mxu3  ;;  %v2259_v20 = vld [vmem:[%s2977_s28 + $0xe8] sm:$0xf0] }
  0xbd   : > { %v1822_v38 = vmax.f32 %v1506_v36, 0.0  ;;  %v2490_v36 = vor.u32 %v2845_v30, %v2489_v29  ;;  %v2249_v29 = vld [vmem:[%s2977_s28 + $0xd0] sm:$0xf]  ;;  %v2785_v30 = vld [vmem:[%s2977_s28 + $0xd4] sm:$0xf0] }
  0xbe   : > { %v1512_v39 = vpop.f32.mrf.mxu1  ;;  %v1336_v40 = vpop.f32.mrf.mxu2 }
  0xbf   : > { %1951 = vst.msk [vmem:[%s3105_s17 + $0x10] sm:$0xff] %vm1948_vm3, %v1822_v38  ;;  %v1337_v41 = vadd.f32 %v3093_v2, %v1336_v40 }
  0xc0   : > { %v1178_v42 = vpop.f32.mrf.mxu0 }
  0xc1   : > { %v1179_v43 = vadd.f32 %v3093_v2, %v1178_v42  ;;  %v1666_v46 = vadd.f32 %v3080_v55, %v1337_v41  ;;  %v2226_v55 = vor.u32 %v2779_v53, %v2225_v52  ;;  %v2850_v52 = vld [vmem:[%s2977_s28 + $0x2e4] sm:$0xf]  ;;  %v2515_v53 = vld [vmem:[%s2977_s28 + $0x2e8] sm:$0xf0] }
  0xc3   : > { %v1508_v47 = vadd.f32 %v1507_v13, %v1179_v43  ;;  %v1886_v50 = vmax.f32 %v1666_v46, 0.0 }
  0xc4   : > { %v3144_v54 = vpop.f32.mrf.mxu3 }
  0xc5   : > { %v1823_v56 = vmax.f32 %v1508_v47, 0.0  ;;  %2015 = vst.msk [vmem:[%s3105_s17 + $0x210] sm:$0xff] %vm1948_vm3, %v1886_v50 }
  0xc6   : > { %v1515_v57 = vpop.f32.mrf.mxu1  ;;  %v1338_v61 = vpop.f32.mrf.mxu2 }
  0xc7   : > { %1952 = vst.msk [vmem:[%s3105_s17 + $0x18] sm:$0xff] %vm1948_vm3, %v1823_v56  ;;  %v1339_v62 = vadd.f32 %v3093_v2, %v1338_v61 }
  0xc8   : > { %v1181_v63 = vpop.f32.mrf.mxu0 }
  0xc9   : > { %2702 = vmatmul.msk.bf16.gmra.mxu1 %vm962_vm2, %v2238_v51  ;;  %v1182_v3 = vadd.f32 %v3093_v2, %v1181_v63  ;;  %2735 = vmatmul.msk.bf16.gmra.mxu3 %vm962_vm2, %v2502_v60  ;;  %v1668_v4 = vadd.f32 %v3088_v0, %v1339_v62  ;;  %v2497_v62 = vld [vmem:[%s2977_s28 + $0x2c0] sm:$0xf]  ;;  %v2847_v63 = vld [vmem:[%s2977_s28 + $0x2c4] sm:$0xf0] }
  0xcb   : > { %v1511_v5 = vadd.f32 %v1510_v27, %v1182_v3  ;;  %1220 = vmatmul.bf16.gmra.mxu0 %v2226_v55  ;;  %v1887_v6 = vmax.f32 %v1668_v4, 0.0  ;;  %1380 = vmatmul.bf16.gmra.mxu2 %v2482_v1  ;;  %v2518_v1 = vor.u32 %v2850_v52, %v2515_v53  ;;  %v2788_v52 = vld [vmem:[%s2977_s28 + $0xf4] sm:$0xf]  ;;  %v2267_v53 = vld [vmem:[%s2977_s28 + $0xf8] sm:$0xf0] }
  0xcc   : > { %v3157_v7 = vpop.f32.mrf.mxu3 }
  0xcd   : > { %v1824_v8 = vmax.f32 %v1511_v5, 0.0  ;;  %2016 = vst.msk [vmem:[%s3105_s17 + $0x218] sm:$0xff] %vm1948_vm3, %v1887_v6  ;;  %v2498_v6 = vor.u32 %v2847_v63, %v2497_v62  ;;  %v2257_v62 = vld [vmem:[%s2977_s28 + $0xe0] sm:$0xf]  ;;  %v2787_v63 = vld [vmem:[%s2977_s28 + $0xe4] sm:$0xf0] }
  0xce   : > { %v1517_v9 = vpop.f32.mrf.mxu1  ;;  %v1341_v10 = vpop.f32.mrf.mxu2 }
  0xcf   : > { %1953 = vst.msk [vmem:[%s3105_s17 + $0x20] sm:$0xff] %vm1948_vm3, %v1824_v8  ;;  %v1342_v12 = vadd.f32 %v3093_v2, %v1341_v10 }
  0xd0   : > { %v1183_v0 = vpop.f32.mrf.mxu0 }
  0xd1   : > { %v1184_v13 = vadd.f32 %v3093_v2, %v1183_v0  ;;  %v1671_v17 = vadd.f32 %v3107_v11, %v1342_v12  ;;  %v2234_v11 = vor.u32 %v2781_v24, %v2233_v23  ;;  %v2852_v23 = vld [vmem:[%s2977_s28 + $0x2f4] sm:$0xf]  ;;  %v2523_v24 = vld [vmem:[%s2977_s28 + $0x2f8] sm:$0xf0] }
  0xd3   : > { %v1513_v18 = vadd.f32 %v1512_v39, %v1184_v13  ;;  %v1888_v21 = vmax.f32 %v1671_v17, 0.0 }
  0xd4   : > { %v3172_v26 = vpop.f32.mrf.mxu3 }
  0xd5   : > { %v1825_v27 = vmax.f32 %v1513_v18, 0.0  ;;  %2017 = vst.msk [vmem:[%s3105_s17 + $0x220] sm:$0xff] %vm1948_vm3, %v1888_v21 }
  0xd6   : > { %v1520_v28 = vpop.f32.mrf.mxu1  ;;  %v1343_v33 = vpop.f32.mrf.mxu2 }
  0xd7   : > { %1954 = vst.msk [vmem:[%s3105_s17 + $0x28] sm:$0xff] %vm1948_vm3, %v1825_v27  ;;  %v1344_v34 = vadd.f32 %v3093_v2, %v1343_v33 }
  0xd8   : > { %v1186_v35 = vpop.f32.mrf.mxu0 }
  0xd9   : > { %2703 = vmatmul.msk.bf16.gmra.mxu1 %vm962_vm2, %v2246_v22  ;;  %v1187_v38 = vadd.f32 %v3093_v2, %v1186_v35  ;;  %2736 = vmatmul.msk.bf16.gmra.mxu3 %vm962_vm2, %v2510_v32  ;;  %v1673_v39 = vadd.f32 %v3120_v25, %v1344_v34  ;;  %v2505_v34 = vld [vmem:[%s2977_s28 + $0x2d0] sm:$0xf]  ;;  %v2849_v35 = vld [vmem:[%s2977_s28 + $0x2d4] sm:$0xf0] }
  0xdb   : > { %v1516_v40 = vadd.f32 %v1515_v57, %v1187_v38  ;;  %1225 = vmatmul.bf16.gmra.mxu0 %v2234_v11  ;;  %v1889_v41 = vmax.f32 %v1673_v39, 0.0  ;;  %1385 = vmatmul.bf16.gmra.mxu2 %v2490_v36  ;;  %v2254_v57 = vor.u32 %v2784_v48, %v2251_v49  ;;  %v2526_v36 = vor.u32 %v2852_v23, %v2523_v24  ;;  %v2790_v23 = vld [vmem:[%s2977_s28 + $0x104] sm:$0xf]  ;;  %v2275_v24 = vld [vmem:[%s2977_s28 + $0x108] sm:$0xf0] }
  0xdc   : > { %v3185_v42 = vpop.f32.mrf.mxu3 }
  0xdd   : > { %v1826_v43 = vmax.f32 %v1516_v40, 0.0  ;;  %2018 = vst.msk [vmem:[%s3105_s17 + $0x228] sm:$0xff] %vm1948_vm3, %v1889_v41  ;;  %v2506_v41 = vor.u32 %v2849_v35, %v2505_v34  ;;  %v2265_v34 = vld [vmem:[%s2977_s28 + $0xf0] sm:$0xf]  ;;  %v2789_v35 = vld [vmem:[%s2977_s28 + $0xf4] sm:$0xf0] }
  0xde   : > { %v1522_v44 = vpop.f32.mrf.mxu1  ;;  %v1346_v45 = vpop.f32.mrf.mxu2 }
  0xdf   : > { %1955 = vst.msk [vmem:[%s3105_s17 + $0x30] sm:$0xff] %vm1948_vm3, %v1826_v43  ;;  %v1347_v46 = vadd.f32 %v3093_v2, %v1346_v45 }
  0xe0   : > { %v1188_v25 = vpop.f32.mrf.mxu0 }
  0xe1   : > { %v1189_v47 = vadd.f32 %v3093_v2, %v1188_v25  ;;  %v1676_v50 = vadd.f32 %v3131_v37, %v1347_v46  ;;  %v2242_v37 = vor.u32 %v2783_v59, %v2241_v58  ;;  %v2854_v58 = vld [vmem:[%s2977_s28 + $0x304] sm:$0xf]  ;;  %v2531_v59 = vld [vmem:[%s2977_s28 + $0x308] sm:$0xf0] }
  0xe3   : > { %v1518_v51 = vadd.f32 %v1517_v9, %v1189_v47  ;;  %v1890_v56 = vmax.f32 %v1676_v50, 0.0 }
  0xe4   : > { %v3200_v60 = vpop.f32.mrf.mxu3 }
  0xe5   : > { %v1827_v61 = vmax.f32 %v1518_v51, 0.0  ;;  %2019 = vst.msk [vmem:[%s3105_s17 + $0x230] sm:$0xff] %vm1948_vm3, %v1890_v56 }
  0xe6   : > { %v1525_v55 = vpop.f32.mrf.mxu1  ;;  %v1348_v3 = vpop.f32.mrf.mxu2 }
  0xe7   : > { %1956 = vst.msk [vmem:[%s3105_s17 + $0x38] sm:$0xff] %vm1948_vm3, %v1827_v61  ;;  %v1349_v4 = vadd.f32 %v3093_v2, %v1348_v3 }
  0xe8   : > { %v1191_v5 = vpop.f32.mrf.mxu0 }
  0xe9   : > { %2704 = vmatmul.msk.bf16.gmra.mxu1 %vm962_vm2, %v2254_v57  ;;  %v1192_v8 = vadd.f32 %v3093_v2, %v1191_v5  ;;  %2737 = vmatmul.msk.bf16.gmra.mxu3 %vm962_vm2, %v2518_v1  ;;  %v1678_v9 = vadd.f32 %v3144_v54, %v1349_v4  ;;  %v2513_v4 = vld [vmem:[%s2977_s28 + $0x2e0] sm:$0xf]  ;;  %v2851_v5 = vld [vmem:[%s2977_s28 + $0x2e4] sm:$0xf0] }
  0xeb   : > { %v1521_v10 = vadd.f32 %v1520_v28, %v1192_v8  ;;  %1230 = vmatmul.bf16.gmra.mxu0 %v2242_v37  ;;  %v1891_v12 = vmax.f32 %v1678_v9, 0.0  ;;  %1390 = vmatmul.bf16.gmra.mxu2 %v2498_v6  ;;  %v2262_v28 = vor.u32 %v2786_v19, %v2259_v20  ;;  %v2534_v6 = vor.u32 %v2854_v58, %v2531_v59  ;;  %v2792_v58 = vld [vmem:[%s2977_s28 + $0x114] sm:$0xf]  ;;  %v2283_v59 = vld [vmem:[%s2977_s28 + $0x118] sm:$0xf0] }
  0xec   : > { %v3213_v0 = vpop.f32.mrf.mxu3 }
  0xed   : > { %v1828_v13 = vmax.f32 %v1521_v10, 0.0  ;;  %2020 = vst.msk [vmem:[%s3105_s17 + $0x238] sm:$0xff] %vm1948_vm3, %v1891_v12  ;;  %v2514_v12 = vor.u32 %v2851_v5, %v2513_v4  ;;  %v2273_v4 = vld [vmem:[%s2977_s28 + $0x100] sm:$0xf]  ;;  %v2791_v5 = vld [vmem:[%s2977_s28 + $0x104] sm:$0xf0] }
  0xee   : > { %v1527_v15 = vpop.f32.mrf.mxu1  ;;  %v1351_v16 = vpop.f32.mrf.mxu2 }
  0xef   : > { %1957 = vst.msk [vmem:[%s3105_s17 + $0x40] sm:$0xff] %vm1948_vm3, %v1828_v13  ;;  %v1352_v17 = vadd.f32 %v3093_v2, %v1351_v16 }
  0xf0   : > { %v1193_v54 = vpop.f32.mrf.mxu0 }
  0xf1   : > { %v1194_v18 = vadd.f32 %v3093_v2, %v1193_v54  ;;  %v1681_v21 = vadd.f32 %v3157_v7, %v1352_v17  ;;  %v2250_v7 = vor.u32 %v2785_v30, %v2249_v29  ;;  %v2856_v29 = vld [vmem:[%s2977_s28 + $0x314] sm:$0xf]  ;;  %v2539_v30 = vld [vmem:[%s2977_s28 + $0x318] sm:$0xf0] }
  0xf3   : > { %v1523_v22 = vadd.f32 %v1522_v44, %v1194_v18  ;;  %v1892_v27 = vmax.f32 %v1681_v21, 0.0 }
  0xf4   : > { %v3228_v32 = vpop.f32.mrf.mxu3 }
  0xf5   : > { %v1829_v33 = vmax.f32 %v1523_v22, 0.0  ;;  %2021 = vst.msk [vmem:[%s3105_s17 + $0x240] sm:$0xff] %vm1948_vm3, %v1892_v27 }
  0xf6   : > { %v1530_v11 = vpop.f32.mrf.mxu1  ;;  %v1353_v38 = vpop.f32.mrf.mxu2 }
  0xf7   : > { %1958 = vst.msk [vmem:[%s3105_s17 + $0x48] sm:$0xff] %vm1948_vm3, %v1829_v33  ;;  %v1354_v39 = vadd.f32 %v3093_v2, %v1353_v38 }
  0xf8   : > { %v1196_v40 = vpop.f32.mrf.mxu0 }
  0xf9   : > { %2705 = vmatmul.msk.bf16.gmra.mxu1 %vm962_vm2, %v2262_v28  ;;  %v1197_v43 = vadd.f32 %v3093_v2, %v1196_v40  ;;  %2738 = vmatmul.msk.bf16.gmra.mxu3 %vm962_vm2, %v2526_v36  ;;  %v1683_v44 = vadd.f32 %v3172_v26, %v1354_v39  ;;  %v2521_v39 = vld [vmem:[%s2977_s28 + $0x2f0] sm:$0xf]  ;;  %v2853_v40 = vld [vmem:[%s2977_s28 + $0x2f4] sm:$0xf0] }
  0xfb   : > { %v1526_v45 = vadd.f32 %v1525_v55, %v1197_v43  ;;  %1235 = vmatmul.bf16.gmra.mxu0 %v2250_v7  ;;  %v1893_v46 = vmax.f32 %v1683_v44, 0.0  ;;  %1395 = vmatmul.bf16.gmra.mxu2 %v2506_v41  ;;  %v2270_v55 = vor.u32 %v2788_v52, %v2267_v53  ;;  %v2542_v41 = vor.u32 %v2856_v29, %v2539_v30  ;;  %v2794_v29 = vld [vmem:[%s2977_s28 + $0x124] sm:$0xf]  ;;  %v2291_v30 = vld [vmem:[%s2977_s28 + $0x128] sm:$0xf0] }
  0xfc   : > { %v3241_v25 = vpop.f32.mrf.mxu3 }
  0xfd   : > { %v1830_v47 = vmax.f32 %v1526_v45, 0.0  ;;  %2022 = vst.msk [vmem:[%s3105_s17 + $0x248] sm:$0xff] %vm1948_vm3, %v1893_v46  ;;  %v2522_v46 = vor.u32 %v2853_v40, %v2521_v39  ;;  %v2281_v39 = vld [vmem:[%s2977_s28 + $0x110] sm:$0xf]  ;;  %v2793_v40 = vld [vmem:[%s2977_s28 + $0x114] sm:$0xf0] }
  0xfe   : > { %v1532_v48 = vpop.f32.mrf.mxu1  ;;  %v1356_v49 = vpop.f32.mrf.mxu2 }
  0xff   : > { %1959 = vst.msk [vmem:[%s3105_s17 + $0x50] sm:$0xff] %vm1948_vm3, %v1830_v47  ;;  %v1357_v50 = vadd.f32 %v3093_v2, %v1356_v49 }
 0x100   : > { %v1198_v26 = vpop.f32.mrf.mxu0 }
 0x101   : > { %v1199_v51 = vadd.f32 %v3093_v2, %v1198_v26  ;;  %v1686_v56 = vadd.f32 %v3185_v42, %v1357_v50  ;;  %v2258_v42 = vor.u32 %v2787_v63, %v2257_v62  ;;  %v2858_v62 = vld [vmem:[%s2977_s28 + $0x324] sm:$0xf]  ;;  %v2547_v63 = vld [vmem:[%s2977_s28 + $0x328] sm:$0xf0] }
 0x103   : > { %v1528_v57 = vadd.f32 %v1527_v15, %v1199_v51  ;;  %v1894_v61 = vmax.f32 %v1686_v56, 0.0 }
 0x104   : > { %v3256_v1 = vpop.f32.mrf.mxu3 }
 0x105   : > { %v1831_v3 = vmax.f32 %v1528_v57, 0.0  ;;  %2023 = vst.msk [vmem:[%s3105_s17 + $0x250] sm:$0xff] %vm1948_vm3, %v1894_v61 }
 0x106   : > { %v1535_v37 = vpop.f32.mrf.mxu1  ;;  %v1358_v8 = vpop.f32.mrf.mxu2 }
 0x107   : > { %1960 = vst.msk [vmem:[%s3105_s17 + $0x58] sm:$0xff] %vm1948_vm3, %v1831_v3  ;;  %v1359_v9 = vadd.f32 %v3093_v2, %v1358_v8 }
 0x108   : > { %v1201_v10 = vpop.f32.mrf.mxu0 }
 0x109   : > { %2706 = vmatmul.msk.bf16.gmra.mxu1 %vm962_vm2, %v2270_v55  ;;  %v1202_v13 = vadd.f32 %v3093_v2, %v1201_v10  ;;  %2739 = vmatmul.msk.bf16.gmra.mxu3 %vm962_vm2, %v2534_v6  ;;  %v1688_v15 = vadd.f32 %v3200_v60, %v1359_v9  ;;  %v2529_v9 = vld [vmem:[%s2977_s28 + $0x300] sm:$0xf]  ;;  %v2855_v10 = vld [vmem:[%s2977_s28 + $0x304] sm:$0xf0] }
 0x10b   : > { %v1531_v16 = vadd.f32 %v1530_v11, %v1202_v13  ;;  %1240 = vmatmul.bf16.gmra.mxu0 %v2258_v42  ;;  %v1895_v17 = vmax.f32 %v1688_v15, 0.0  ;;  %1400 = vmatmul.bf16.gmra.mxu2 %v2514_v12  ;;  %v2278_v11 = vor.u32 %v2790_v23, %v2275_v24  ;;  %v2550_v12 = vor.u32 %v2858_v62, %v2547_v63  ;;  %v2796_v62 = vld [vmem:[%s2977_s28 + $0x134] sm:$0xf]  ;;  %v2299_v63 = vld [vmem:[%s2977_s28 + $0x138] sm:$0xf0] }
 0x10c   : > { %v3269_v54 = vpop.f32.mrf.mxu3 }
 0x10d   : > { %v1832_v18 = vmax.f32 %v1531_v16, 0.0  ;;  %2024 = vst.msk [vmem:[%s3105_s17 + $0x258] sm:$0xff] %vm1948_vm3, %v1895_v17  ;;  %v2530_v17 = vor.u32 %v2855_v10, %v2529_v9  ;;  %v2289_v9 = vld [vmem:[%s2977_s28 + $0x120] sm:$0xf]  ;;  %v2795_v10 = vld [vmem:[%s2977_s28 + $0x124] sm:$0xf0] }
 0x10e   : > { %v1537_v19 = vpop.f32.mrf.mxu1  ;;  %v1361_v20 = vpop.f32.mrf.mxu2 }
 0x10f   : > { %1961 = vst.msk [vmem:[%s3105_s17 + $0x60] sm:$0xff] %vm1948_vm3, %v1832_v18  ;;  %v1362_v21 = vadd.f32 %v3093_v2, %v1361_v20 }
 0x110   : > { %v1203_v60 = vpop.f32.mrf.mxu0 }
 0x111   : > { %v1204_v22 = vadd.f32 %v3093_v2, %v1203_v60  ;;  %v1691_v27 = vadd.f32 %v3213_v0, %v1362_v21  ;;  %v2266_v0 = vor.u32 %v2789_v35, %v2265_v34  ;;  %v2860_v34 = vld [vmem:[%s2977_s28 + $0x334] sm:$0xf]  ;;  %v2555_v35 = vld [vmem:[%s2977_s28 + $0x338] sm:$0xf0] }
 0x113   : > { %v1533_v28 = vadd.f32 %v1532_v48, %v1204_v22  ;;  %v1896_v33 = vmax.f32 %v1691_v27, 0.0 }
 0x114   : > { %v3284_v36 = vpop.f32.mrf.mxu3 }
 0x115   : > { %v1833_v38 = vmax.f32 %v1533_v28, 0.0  ;;  %2025 = vst.msk [vmem:[%s3105_s17 + $0x260] sm:$0xff] %vm1948_vm3, %v1896_v33 }
 0x116   : > { %v1540_v7 = vpop.f32.mrf.mxu1  ;;  %v1363_v43 = vpop.f32.mrf.mxu2 }
 0x117   : > { %1962 = vst.msk [vmem:[%s3105_s17 + $0x68] sm:$0xff] %vm1948_vm3, %v1833_v38  ;;  %v1364_v44 = vadd.f32 %v3093_v2, %v1363_v43 }
 0x118   : > { %v1206_v45 = vpop.f32.mrf.mxu0 }
 0x119   : > { %2707 = vmatmul.msk.bf16.gmra.mxu1 %vm962_vm2, %v2278_v11  ;;  %v1207_v47 = vadd.f32 %v3093_v2, %v1206_v45  ;;  %2740 = vmatmul.msk.bf16.gmra.mxu3 %vm962_vm2, %v2542_v41  ;;  %v1693_v48 = vadd.f32 %v3228_v32, %v1364_v44  ;;  %v2537_v44 = vld [vmem:[%s2977_s28 + $0x310] sm:$0xf]  ;;  %v2857_v45 = vld [vmem:[%s2977_s28 + $0x314] sm:$0xf0] }
 0x11b   : > { %v1536_v49 = vadd.f32 %v1535_v37, %v1207_v47  ;;  %1245 = vmatmul.bf16.gmra.mxu0 %v2266_v0  ;;  %v1897_v50 = vmax.f32 %v1693_v48, 0.0  ;;  %1405 = vmatmul.bf16.gmra.mxu2 %v2522_v46  ;;  %v2286_v37 = vor.u32 %v2792_v58, %v2283_v59  ;;  %v2558_v46 = vor.u32 %v2860_v34, %v2555_v35  ;;  %v2798_v34 = vld [vmem:[%s2977_s28 + $0x144] sm:$0xf]  ;;  %v2307_v35 = vld [vmem:[%s2977_s28 + $0x148] sm:$0xf0] }
 0x11c   : > { %v3297_v26 = vpop.f32.mrf.mxu3 }
 0x11d   : > { %v1834_v51 = vmax.f32 %v1536_v49, 0.0  ;;  %2026 = vst.msk [vmem:[%s3105_s17 + $0x268] sm:$0xff] %vm1948_vm3, %v1897_v50  ;;  %v2538_v50 = vor.u32 %v2857_v45, %v2537_v44  ;;  %v2297_v44 = vld [vmem:[%s2977_s28 + $0x130] sm:$0xf]  ;;  %v2797_v45 = vld [vmem:[%s2977_s28 + $0x134] sm:$0xf0] }
 0x11e   : > { %v1542_v52 = vpop.f32.mrf.mxu1  ;;  %v1366_v53 = vpop.f32.mrf.mxu2 }
 0x11f   : > { %1963 = vst.msk [vmem:[%s3105_s17 + $0x70] sm:$0xff] %vm1948_vm3, %v1834_v51  ;;  %v1367_v56 = vadd.f32 %v3093_v2, %v1366_v53 }
 0x120   : > { %v1208_v32 = vpop.f32.mrf.mxu0 }
 0x121   : > { %v1209_v57 = vadd.f32 %v3093_v2, %v1208_v32  ;;  %v1696_v61 = vadd.f32 %v3241_v25, %v1367_v56  ;;  %v2274_v25 = vor.u32 %v2791_v5, %v2273_v4  ;;  %v2862_v4 = vld [vmem:[%s2977_s28 + $0x344] sm:$0xf]  ;;  %v2563_v5 = vld [vmem:[%s2977_s28 + $0x348] sm:$0xf0] }
 0x123   : > { %v1538_v55 = vadd.f32 %v1537_v19, %v1209_v57  ;;  %v1898_v3 = vmax.f32 %v1696_v61, 0.0 }
 0x124   : > { %v3312_v6 = vpop.f32.mrf.mxu3 }
 0x125   : > { %v1835_v8 = vmax.f32 %v1538_v55, 0.0  ;;  %2027 = vst.msk [vmem:[%s3105_s17 + $0x270] sm:$0xff] %vm1948_vm3, %v1898_v3 }
 0x126   : > { %v1545_v42 = vpop.f32.mrf.mxu1  ;;  %v1368_v13 = vpop.f32.mrf.mxu2 }
 0x127   : > { %1964 = vst.msk [vmem:[%s3105_s17 + $0x78] sm:$0xff] %vm1948_vm3, %v1835_v8  ;;  %v1369_v15 = vadd.f32 %v3093_v2, %v1368_v13 }
 0x128   : > { %v1211_v16 = vpop.f32.mrf.mxu0 }
 0x129   : > { %2708 = vmatmul.msk.bf16.gmra.mxu1 %vm962_vm2, %v2286_v37  ;;  %v1212_v18 = vadd.f32 %v3093_v2, %v1211_v16  ;;  %2741 = vmatmul.msk.bf16.gmra.mxu3 %vm962_vm2, %v2550_v12  ;;  %v1698_v19 = vadd.f32 %v3256_v1, %v1369_v15  ;;  %v2545_v15 = vld [vmem:[%s2977_s28 + $0x320] sm:$0xf]  ;;  %v2859_v16 = vld [vmem:[%s2977_s28 + $0x324] sm:$0xf0] }
 0x12b   : > { %v1541_v20 = vadd.f32 %v1540_v7, %v1212_v18  ;;  %1250 = vmatmul.bf16.gmra.mxu0 %v2274_v25  ;;  %v1899_v21 = vmax.f32 %v1698_v19, 0.0  ;;  %1410 = vmatmul.bf16.gmra.mxu2 %v2530_v17  ;;  %v2294_v7 = vor.u32 %v2794_v29, %v2291_v30  ;;  %v2566_v17 = vor.u32 %v2862_v4, %v2563_v5  ;;  %v2800_v4 = vld [vmem:[%s2977_s28 + $0x154] sm:$0xf]  ;;  %v2315_v5 = vld [vmem:[%s2977_s28 + $0x158] sm:$0xf0] }
 0x12c   : > { %v3325_v60 = vpop.f32.mrf.mxu3 }
 0x12d   : > { %v1836_v22 = vmax.f32 %v1541_v20, 0.0  ;;  %2028 = vst.msk [vmem:[%s3105_s17 + $0x278] sm:$0xff] %vm1948_vm3, %v1899_v21  ;;  %v2546_v21 = vor.u32 %v2859_v16, %v2545_v15  ;;  %v2305_v15 = vld [vmem:[%s2977_s28 + $0x140] sm:$0xf]  ;;  %v2799_v16 = vld [vmem:[%s2977_s28 + $0x144] sm:$0xf0] }
 0x12e   : > { %v1547_v23 = vpop.f32.mrf.mxu1  ;;  %v1371_v24 = vpop.f32.mrf.mxu2 }
 0x12f   : > { %1965 = vst.msk [vmem:[%s3105_s17 + $0x80] sm:$0xff] %vm1948_vm3, %v1836_v22  ;;  %v1372_v27 = vadd.f32 %v3093_v2, %v1371_v24 }
 0x130   : > { %v1213_v1 = vpop.f32.mrf.mxu0 }
 0x131   : > { %v1214_v28 = vadd.f32 %v3093_v2, %v1213_v1  ;;  %v1701_v33 = vadd.f32 %v3269_v54, %v1372_v27  ;;  %v2282_v54 = vor.u32 %v2793_v40, %v2281_v39  ;;  %v2864_v39 = vld [vmem:[%s2977_s28 + $0x354] sm:$0xf]  ;;  %v2571_v40 = vld [vmem:[%s2977_s28 + $0x358] sm:$0xf0] }
 0x133   : > { %v1543_v11 = vadd.f32 %v1542_v52, %v1214_v28  ;;  %v1900_v38 = vmax.f32 %v1701_v33, 0.0 }
 0x134   : > { %v3340_v41 = vpop.f32.mrf.mxu3 }
 0x135   : > { %v1837_v43 = vmax.f32 %v1543_v11, 0.0  ;;  %2029 = vst.msk [vmem:[%s3105_s17 + $0x280] sm:$0xff] %vm1948_vm3, %v1900_v38 }
 0x136   : > { %v1550_v0 = vpop.f32.mrf.mxu1  ;;  %v1373_v47 = vpop.f32.mrf.mxu2 }
 0x137   : > { %1966 = vst.msk [vmem:[%s3105_s17 + $0x88] sm:$0xff] %vm1948_vm3, %v1837_v43  ;;  %v1374_v48 = vadd.f32 %v3093_v2, %v1373_v47 }
 0x138   : > { %v1216_v49 = vpop.f32.mrf.mxu0 }
 0x139   : > { %2709 = vmatmul.msk.bf16.gmra.mxu1 %vm962_vm2, %v2294_v7  ;;  %v1217_v51 = vadd.f32 %v3093_v2, %v1216_v49  ;;  %2742 = vmatmul.msk.bf16.gmra.mxu3 %vm962_vm2, %v2558_v46  ;;  %v1703_v52 = vadd.f32 %v3284_v36, %v1374_v48  ;;  %v2553_v48 = vld [vmem:[%s2977_s28 + $0x330] sm:$0xf]  ;;  %v2861_v49 = vld [vmem:[%s2977_s28 + $0x334] sm:$0xf0] }
 0x13b   : > { %v1546_v53 = vadd.f32 %v1545_v42, %v1217_v51  ;;  %1255 = vmatmul.bf16.gmra.mxu0 %v2282_v54  ;;  %v1901_v56 = vmax.f32 %v1703_v52, 0.0  ;;  %1415 = vmatmul.bf16.gmra.mxu2 %v2538_v50  ;;  %v2302_v42 = vor.u32 %v2796_v62, %v2299_v63  ;;  %v2574_v50 = vor.u32 %v2864_v39, %v2571_v40  ;;  %v2802_v39 = vld [vmem:[%s2977_s28 + $0x164] sm:$0xf]  ;;  %v2323_v40 = vld [vmem:[%s2977_s28 + $0x168] sm:$0xf0] }
 0x13c   : > { %v3353_v32 = vpop.f32.mrf.mxu3 }
 0x13d   : > { %v1838_v57 = vmax.f32 %v1546_v53, 0.0  ;;  %2030 = vst.msk [vmem:[%s3105_s17 + $0x288] sm:$0xff] %vm1948_vm3, %v1901_v56  ;;  %v2554_v56 = vor.u32 %v2861_v49, %v2553_v48  ;;  %v2313_v48 = vld [vmem:[%s2977_s28 + $0x150] sm:$0xf]  ;;  %v2801_v49 = vld [vmem:[%s2977_s28 + $0x154] sm:$0xf0] }
 0x13e   : > { %v1552_v58 = vpop.f32.mrf.mxu1  ;;  %v1376_v59 = vpop.f32.mrf.mxu2 }
 0x13f   : > { %1967 = vst.msk [vmem:[%s3105_s17 + $0x90] sm:$0xff] %vm1948_vm3, %v1838_v57  ;;  %v1377_v61 = vadd.f32 %v3093_v2, %v1376_v59 }
 0x140   : > { %v1218_v36 = vpop.f32.mrf.mxu0 }
 0x141   : > { %v1219_v55 = vadd.f32 %v3093_v2, %v1218_v36  ;;  %v1706_v3 = vadd.f32 %v3297_v26, %v1377_v61  ;;  %v2290_v26 = vor.u32 %v2795_v10, %v2289_v9  ;;  %v2866_v9 = vld [vmem:[%s2977_s28 + $0x364] sm:$0xf]  ;;  %v2579_v10 = vld [vmem:[%s2977_s28 + $0x368] sm:$0xf0] }
 0x143   : > { %v1548_v37 = vadd.f32 %v1547_v23, %v1219_v55  ;;  %v1902_v8 = vmax.f32 %v1706_v3, 0.0 }
 0x144   : > { %v3368_v12 = vpop.f32.mrf.mxu3 }
 0x145   : > { %v1839_v13 = vmax.f32 %v1548_v37, 0.0  ;;  %2031 = vst.msk [vmem:[%s3105_s17 + $0x290] sm:$0xff] %vm1948_vm3, %v1902_v8 }
 0x146   : > { %v1555_v25 = vpop.f32.mrf.mxu1  ;;  %v1378_v18 = vpop.f32.mrf.mxu2 }
 0x147   : > { %1968 = vst.msk [vmem:[%s3105_s17 + $0x98] sm:$0xff] %vm1948_vm3, %v1839_v13  ;;  %v1379_v19 = vadd.f32 %v3093_v2, %v1378_v18 }
 0x148   : > { %v1221_v20 = vpop.f32.mrf.mxu0 }
 0x149   : > { %2710 = vmatmul.msk.bf16.gmra.mxu1 %vm962_vm2, %v2302_v42  ;;  %v1222_v22 = vadd.f32 %v3093_v2, %v1221_v20  ;;  %2743 = vmatmul.msk.bf16.gmra.mxu3 %vm962_vm2, %v2566_v17  ;;  %v1708_v23 = vadd.f32 %v3312_v6, %v1379_v19  ;;  %v2561_v19 = vld [vmem:[%s2977_s28 + $0x340] sm:$0xf]  ;;  %v2863_v20 = vld [vmem:[%s2977_s28 + $0x344] sm:$0xf0] }
 0x14b   : > { %v1551_v24 = vadd.f32 %v1550_v0, %v1222_v22  ;;  %1260 = vmatmul.bf16.gmra.mxu0 %v2290_v26  ;;  %v1903_v27 = vmax.f32 %v1708_v23, 0.0  ;;  %1420 = vmatmul.bf16.gmra.mxu2 %v2546_v21  ;;  %v2310_v0 = vor.u32 %v2798_v34, %v2307_v35  ;;  %v2582_v21 = vor.u32 %v2866_v9, %v2579_v10  ;;  %v2804_v9 = vld [vmem:[%s2977_s28 + $0x174] sm:$0xf]  ;;  %v2331_v10 = vld [vmem:[%s2977_s28 + $0x178] sm:$0xf0] }
 0x14c   : > { %v3381_v1 = vpop.f32.mrf.mxu3 }
 0x14d   : > { %v1840_v28 = vmax.f32 %v1551_v24, 0.0  ;;  %2032 = vst.msk [vmem:[%s3105_s17 + $0x298] sm:$0xff] %vm1948_vm3, %v1903_v27  ;;  %v2562_v27 = vor.u32 %v2863_v20, %v2561_v19  ;;  %v2321_v19 = vld [vmem:[%s2977_s28 + $0x160] sm:$0xf]  ;;  %v2803_v20 = vld [vmem:[%s2977_s28 + $0x164] sm:$0xf0] }
 0x14e   : > { %v1557_v29 = vpop.f32.mrf.mxu1  ;;  %v1381_v30 = vpop.f32.mrf.mxu2 }
 0x14f   : > { %1969 = vst.msk [vmem:[%s3105_s17 + $0xa0] sm:$0xff] %vm1948_vm3, %v1840_v28  ;;  %v1382_v33 = vadd.f32 %v3093_v2, %v1381_v30 }
 0x150   : > { %v1223_v6 = vpop.f32.mrf.mxu0 }
 0x151   : > { %v1224_v11 = vadd.f32 %v3093_v2, %v1223_v6  ;;  %v1711_v38 = vadd.f32 %v3325_v60, %v1382_v33  ;;  %v2298_v60 = vor.u32 %v2797_v45, %v2297_v44  ;;  %v2868_v44 = vld [vmem:[%s2977_s28 + $0x374] sm:$0xf]  ;;  %v2587_v45 = vld [vmem:[%s2977_s28 + $0x378] sm:$0xf0] }
 0x153   : > { %v1553_v7 = vadd.f32 %v1552_v58, %v1224_v11  ;;  %v1904_v43 = vmax.f32 %v1711_v38, 0.0 }
 0x154   : > { %v3396_v46 = vpop.f32.mrf.mxu3 }
 0x155   : > { %v1841_v47 = vmax.f32 %v1553_v7, 0.0  ;;  %2033 = vst.msk [vmem:[%s3105_s17 + $0x2a0] sm:$0xff] %vm1948_vm3, %v1904_v43 }
 0x156   : > { %v1560_v54 = vpop.f32.mrf.mxu1  ;;  %v1383_v51 = vpop.f32.mrf.mxu2 }
 0x157   : > { %1970 = vst.msk [vmem:[%s3105_s17 + $0xa8] sm:$0xff] %vm1948_vm3, %v1841_v47  ;;  %v1384_v52 = vadd.f32 %v3093_v2, %v1383_v51 }
 0x158   : > { %v1226_v53 = vpop.f32.mrf.mxu0 }
 0x159   : > { %2711 = vmatmul.msk.bf16.gmra.mxu1 %vm962_vm2, %v2310_v0  ;;  %v1227_v57 = vadd.f32 %v3093_v2, %v1226_v53  ;;  %2744 = vmatmul.msk.bf16.gmra.mxu3 %vm962_vm2, %v2574_v50  ;;  %v1713_v58 = vadd.f32 %v3340_v41, %v1384_v52  ;;  %v2569_v52 = vld [vmem:[%s2977_s28 + $0x350] sm:$0xf]  ;;  %v2865_v53 = vld [vmem:[%s2977_s28 + $0x354] sm:$0xf0] }
 0x15b   : > { %v1556_v59 = vadd.f32 %v1555_v25, %v1227_v57  ;;  %1265 = vmatmul.bf16.gmra.mxu0 %v2298_v60  ;;  %v1905_v61 = vmax.f32 %v1713_v58, 0.0  ;;  %1425 = vmatmul.bf16.gmra.mxu2 %v2554_v56  ;;  %v2318_v25 = vor.u32 %v2800_v4, %v2315_v5  ;;  %v3463_v57 = vld [vmem:[%s3866_s2] ss:$0 sm:$0xff] }
 0x15c   : > { %v3409_v36 = vpop.f32.mrf.mxu3 }
 0x15d   : > { %v1842_v55 = vmax.f32 %v1556_v59, 0.0  ;;  %2034 = vst.msk [vmem:[%s3105_s17 + $0x2a8] sm:$0xff] %vm1948_vm3, %v1905_v61  ;;  %v2570_v61 = vor.u32 %v2865_v53, %v2569_v52  ;;  %v2329_v52 = vld [vmem:[%s2977_s28 + $0x170] sm:$0xf]  ;;  %v2805_v53 = vld [vmem:[%s2977_s28 + $0x174] sm:$0xf0] }
 0x15e   : > { %v1562_v62 = vpop.f32.mrf.mxu1  ;;  %v1386_v63 = vpop.f32.mrf.mxu2 }
 0x15f   : > { %1971 = vst.msk [vmem:[%s3105_s17 + $0xb0] sm:$0xff] %vm1948_vm3, %v1842_v55  ;;  %v1387_v3 = vadd.f32 %v3093_v2, %v1386_v63 }
 0x160   : > { %v1228_v41 = vpop.f32.mrf.mxu0 }
 0x161   : > { %v1229_v37 = vadd.f32 %v3093_v2, %v1228_v41  ;;  %v1716_v8 = vadd.f32 %v3353_v32, %v1387_v3  ;;  %v2306_v32 = vor.u32 %v2799_v16, %v2305_v15  ;;  %v2870_v15 = vld [vmem:[%s2977_s28 + $0x384] sm:$0xf]  ;;  %v2595_v16 = vld [vmem:[%s2977_s28 + $0x388] sm:$0xf0] }
 0x163   : > { %v1558_v42 = vadd.f32 %v1557_v29, %v1229_v37  ;;  %v1906_v13 = vmax.f32 %v1716_v8, 0.0 }
 0x164   : > { %v3424_v17 = vpop.f32.mrf.mxu3 }
 0x165   : > { %v1843_v18 = vmax.f32 %v1558_v42, 0.0  ;;  %2035 = vst.msk [vmem:[%s3105_s17 + $0x2b0] sm:$0xff] %vm1948_vm3, %v1906_v13 }
 0x166   : > { %v1565_v26 = vpop.f32.mrf.mxu1  ;;  %v1388_v22 = vpop.f32.mrf.mxu2 }
 0x167   : > { %1972 = vst.msk [vmem:[%s3105_s17 + $0xb8] sm:$0xff] %vm1948_vm3, %v1843_v18  ;;  %v1389_v23 = vadd.f32 %v3093_v2, %v1388_v22 }
 0x168   : > { %v1231_v24 = vpop.f32.mrf.mxu0 }
 0x169   : > { %2712 = vmatmul.msk.bf16.gmra.mxu1 %vm962_vm2, %v2318_v25  ;;  %v1232_v28 = vadd.f32 %v3093_v2, %v1231_v24  ;;  %2745 = vmatmul.msk.bf16.gmra.mxu3 %vm962_vm2, %v2582_v21  ;;  %v1718_v29 = vadd.f32 %v3368_v12, %v1389_v23  ;;  %v2577_v23 = vld [vmem:[%s2977_s28 + $0x360] sm:$0xf]  ;;  %v2867_v24 = vld [vmem:[%s2977_s28 + $0x364] sm:$0xf0] }
 0x16b   : > { %v1561_v30 = vadd.f32 %v1560_v54, %v1232_v28  ;;  %1270 = vmatmul.bf16.gmra.mxu0 %v2306_v32  ;;  %v1907_v33 = vmax.f32 %v1718_v29, 0.0  ;;  %1430 = vmatmul.bf16.gmra.mxu2 %v2562_v27  ;;  %v2326_v54 = vor.u32 %v2802_v39, %v2323_v40  ;;  %v2598_v27 = vor.u32 %v2870_v15, %v2595_v16  ;;  %v2808_v15 = vld [vmem:[%s2977_s28 + $0x194] sm:$0xf]  ;;  %v2347_v16 = vld [vmem:[%s2977_s28 + $0x198] sm:$0xf0] }
 0x16c   : > { %v3437_v6 = vpop.f32.mrf.mxu3 }
 0x16d   : > { %v1844_v11 = vmax.f32 %v1561_v30, 0.0  ;;  %2036 = vst.msk [vmem:[%s3105_s17 + $0x2b8] sm:$0xff] %vm1948_vm3, %v1907_v33  ;;  %v2578_v33 = vor.u32 %v2867_v24, %v2577_v23  ;;  %v2337_v23 = vld [vmem:[%s2977_s28 + $0x180] sm:$0xf]  ;;  %v2807_v24 = vld [vmem:[%s2977_s28 + $0x184] sm:$0xf0] }
 0x16e   : > { %v1567_v34 = vpop.f32.mrf.mxu1  ;;  %v1391_v35 = vpop.f32.mrf.mxu2 }
 0x16f   : > { %1973 = vst.msk [vmem:[%s3105_s17 + $0xc0] sm:$0xff] %vm1948_vm3, %v1844_v11  ;;  %v1392_v38 = vadd.f32 %v3093_v2, %v1391_v35 }
 0x170   : > { %v1233_v12 = vpop.f32.mrf.mxu0 }
 0x171   : > { %v1234_v7 = vadd.f32 %v3093_v2, %v1233_v12  ;;  %v1721_v43 = vadd.f32 %v3381_v1, %v1392_v38  ;;  %v2590_v2 = vor.u32 %v2868_v44, %v2587_v45  ;;  %v2314_v1 = vor.u32 %v2801_v49, %v2313_v48  ;;  %v2806_v44 = vld [vmem:[%s2977_s28 + $0x184] sm:$0xf]  ;;  %v2339_v45 = vld [vmem:[%s2977_s28 + $0x188] sm:$0xf0]  ;;  %v2872_v48 = vld [vmem:[%s2977_s28 + $0x394] sm:$0xf] }
 0x172   : > { %v2603_v49 = vld [vmem:[%s2977_s28 + $0x398] sm:$0xf0] }
 0x173   : > { %v1563_v0 = vadd.f32 %v1562_v62, %v1234_v7  ;;  %v1908_v47 = vmax.f32 %v1721_v43, 0.0 }
 0x174   : > { %v3452_v50 = vpop.f32.mrf.mxu3 }
 0x175   : > { %v1845_v51 = vmax.f32 %v1563_v0, 0.0  ;;  %2037 = vst.msk [vmem:[%s3105_s17 + $0x2c0] sm:$0xff] %vm1948_vm3, %v1908_v47 }
 0x176   : > { %v1570_v60 = vpop.f32.mrf.mxu1  ;;  %v1393_v56 = vpop.f32.mrf.mxu2 }
 0x177   : > { %1974 = vst.msk [vmem:[%s3105_s17 + $0xc8] sm:$0xff] %vm1948_vm3, %v1845_v51  ;;  %v1394_v58 = vadd.f32 %v3463_v57, %v1393_v56 }
 0x178   : > { %v1236_v59 = vpop.f32.mrf.mxu0 }
 0x179   : > { %2713 = vmatmul.msk.bf16.gmra.mxu1 %vm962_vm2, %v2326_v54  ;;  %v1237_v55 = vadd.f32 %v3463_v57, %v1236_v59  ;;  %2746 = vmatmul.msk.bf16.gmra.mxu3 %vm962_vm2, %v2590_v2  ;;  %v1723_v62 = vadd.f32 %v3396_v46, %v1394_v58  ;;  %v2585_v58 = vld [vmem:[%s2977_s28 + $0x370] sm:$0xf]  ;;  %v2869_v59 = vld [vmem:[%s2977_s28 + $0x374] sm:$0xf0] }
 0x17b   : > { %v1566_v63 = vadd.f32 %v1565_v26, %v1237_v55  ;;  %1275 = vmatmul.bf16.gmra.mxu0 %v2314_v1  ;;  %v1909_v3 = vmax.f32 %v1723_v62, 0.0  ;;  %1435 = vmatmul.bf16.gmra.mxu2 %v2570_v61  ;;  %v2334_v26 = vor.u32 %v2804_v9, %v2331_v10  ;;  %v2606_v61 = vor.u32 %v2872_v48, %v2603_v49  ;;  %v2810_v48 = vld [vmem:[%s2977_s28 + $0x1a4] sm:$0xf]  ;;  %v2355_v49 = vld [vmem:[%s2977_s28 + $0x1a8] sm:$0xf0] }
 0x17c   : > { %v3470_v41 = vpop.f32.mrf.mxu3 }
 0x17d   : > { %v1846_v37 = vmax.f32 %v1566_v63, 0.0  ;;  %2038 = vst.msk [vmem:[%s3105_s17 + $0x2c8] sm:$0xff] %vm1948_vm3, %v1909_v3  ;;  %v2586_v3 = vor.u32 %v2869_v59, %v2585_v58  ;;  %v2345_v58 = vld [vmem:[%s2977_s28 + $0x190] sm:$0xf]  ;;  %v2809_v59 = vld [vmem:[%s2977_s28 + $0x194] sm:$0xf0] }
 0x17e   : > { %v1572_v4 = vpop.f32.mrf.mxu1  ;;  %v1396_v5 = vpop.f32.mrf.mxu2 }
 0x17f   : > { %1975 = vst.msk [vmem:[%s3105_s17 + $0xd0] sm:$0xff] %vm1948_vm3, %v1846_v37  ;;  %v1397_v8 = vadd.f32 %v3463_v57, %v1396_v5 }
 0x180   : > { %v1238_v46 = vpop.f32.mrf.mxu0 }
 0x181   : > { %v1239_v42 = vadd.f32 %v3463_v57, %v1238_v46  ;;  %v1726_v13 = vadd.f32 %v3409_v36, %v1397_v8  ;;  %v2322_v36 = vor.u32 %v2803_v20, %v2321_v19  ;;  %v2874_v19 = vld [vmem:[%s2977_s28 + $0x3a4] sm:$0xf]  ;;  %v2611_v20 = vld [vmem:[%s2977_s28 + $0x3a8] sm:$0xf0] }
 0x183   : > { %v1568_v25 = vadd.f32 %v1567_v34, %v1239_v42  ;;  %v1910_v18 = vmax.f32 %v1726_v13, 0.0 }
 0x184   : > { %v3485_v21 = vpop.f32.mrf.mxu3 }
 0x185   : > { %v1847_v22 = vmax.f32 %v1568_v25, 0.0  ;;  %2039 = vst.msk [vmem:[%s3105_s17 + $0x2d0] sm:$0xff] %vm1948_vm3, %v1910_v18 }
 0x186   : > { %v1575_v32 = vpop.f32.mrf.mxu1  ;;  %v1398_v28 = vpop.f32.mrf.mxu2 }
 0x187   : > { %1976 = vst.msk [vmem:[%s3105_s17 + $0xd8] sm:$0xff] %vm1948_vm3, %v1847_v22  ;;  %v1399_v29 = vadd.f32 %v3463_v57, %v1398_v28 }
 0x188   : > { %v1241_v30 = vpop.f32.mrf.mxu0 }
 0x189   : > { %2714 = vmatmul.msk.bf16.gmra.mxu1 %vm962_vm2, %v2334_v26  ;;  %v1242_v11 = vadd.f32 %v3463_v57, %v1241_v30  ;;  %2747 = vmatmul.msk.bf16.gmra.mxu3 %vm962_vm2, %v2598_v27  ;;  %v1728_v34 = vadd.f32 %v3424_v17, %v1399_v29  ;;  %v2593_v29 = vld [vmem:[%s2977_s28 + $0x380] sm:$0xf]  ;;  %v2871_v30 = vld [vmem:[%s2977_s28 + $0x384] sm:$0xf0] }
 0x18b   : > { %v1571_v35 = vadd.f32 %v1570_v60, %v1242_v11  ;;  %1280 = vmatmul.bf16.gmra.mxu0 %v2322_v36  ;;  %v1911_v38 = vmax.f32 %v1728_v34, 0.0  ;;  %1440 = vmatmul.bf16.gmra.mxu2 %v2578_v33  ;;  %v2342_v60 = vor.u32 %v2806_v44, %v2339_v45  ;;  %v2614_v33 = vor.u32 %v2874_v19, %v2611_v20  ;;  %v2812_v19 = vld [vmem:[%s2977_s28 + $0x1b4] sm:$0xf]  ;;  %v2363_v20 = vld [vmem:[%s2977_s28 + $0x1b8] sm:$0xf0] }
 0x18c   : > { %v3498_v12 = vpop.f32.mrf.mxu3 }
 0x18d   : > { %v1848_v7 = vmax.f32 %v1571_v35, 0.0  ;;  %2040 = vst.msk [vmem:[%s3105_s17 + $0x2d8] sm:$0xff] %vm1948_vm3, %v1911_v38  ;;  %v2594_v38 = vor.u32 %v2871_v30, %v2593_v29  ;;  %v2353_v29 = vld [vmem:[%s2977_s28 + $0x1a0] sm:$0xf]  ;;  %v2811_v30 = vld [vmem:[%s2977_s28 + $0x1a4] sm:$0xf0] }
 0x18e   : > { %v1577_v39 = vpop.f32.mrf.mxu1  ;;  %v1401_v40 = vpop.f32.mrf.mxu2 }
 0x18f   : > { %1977 = vst.msk [vmem:[%s3105_s17 + $0xe0] sm:$0xff] %vm1948_vm3, %v1848_v7  ;;  %v1402_v43 = vadd.f32 %v3463_v57, %v1401_v40 }
 0x190   : > { %v1243_v17 = vpop.f32.mrf.mxu0 }
 0x191   : > { %v1244_v0 = vadd.f32 %v3463_v57, %v1243_v17  ;;  %v1731_v47 = vadd.f32 %v3437_v6, %v1402_v43  ;;  %v2330_v6 = vor.u32 %v2805_v53, %v2329_v52  ;;  %v2876_v52 = vld [vmem:[%s2977_s28 + $0x3b4] sm:$0xf]  ;;  %v2619_v53 = vld [vmem:[%s2977_s28 + $0x3b8] sm:$0xf0] }
 0x193   : > { %v1573_v54 = vadd.f32 %v1572_v4, %v1244_v0  ;;  %v1912_v51 = vmax.f32 %v1731_v47, 0.0 }
 0x194   : > { %v3513_v2 = vpop.f32.mrf.mxu3 }
 0x195   : > { %v1849_v56 = vmax.f32 %v1573_v54, 0.0  ;;  %2041 = vst.msk [vmem:[%s3105_s17 + $0x2e0] sm:$0xff] %vm1948_vm3, %v1912_v51 }
 0x196   : > { %v1580_v1 = vpop.f32.mrf.mxu1  ;;  %v1403_v55 = vpop.f32.mrf.mxu2 }
 0x197   : > { %1978 = vst.msk [vmem:[%s3105_s17 + $0xe8] sm:$0xff] %vm1948_vm3, %v1849_v56  ;;  %v1404_v62 = vadd.f32 %v3463_v57, %v1403_v55 }
 0x198   : > { %v1246_v63 = vpop.f32.mrf.mxu0 }
 0x199   : > { %2715 = vmatmul.msk.bf16.gmra.mxu1 %vm962_vm2, %v2342_v60  ;;  %v1247_v37 = vadd.f32 %v3463_v57, %v1246_v63  ;;  %2748 = vmatmul.msk.bf16.gmra.mxu3 %vm962_vm2, %v2606_v61  ;;  %v1733_v4 = vadd.f32 %v3452_v50, %v1404_v62  ;;  %v2601_v62 = vld [vmem:[%s2977_s28 + $0x390] sm:$0xf]  ;;  %v2873_v63 = vld [vmem:[%s2977_s28 + $0x394] sm:$0xf0] }
 0x19b   : > { %v1576_v5 = vadd.f32 %v1575_v32, %v1247_v37  ;;  %1285 = vmatmul.bf16.gmra.mxu0 %v2330_v6  ;;  %v1913_v8 = vmax.f32 %v1733_v4, 0.0  ;;  %1445 = vmatmul.bf16.gmra.mxu2 %v2586_v3  ;;  %v2350_v32 = vor.u32 %v2808_v15, %v2347_v16  ;;  %v2622_v3 = vor.u32 %v2876_v52, %v2619_v53  ;;  %v2814_v52 = vld [vmem:[%s2977_s28 + $0x1c4] sm:$0xf]  ;;  %v2371_v53 = vld [vmem:[%s2977_s28 + $0x1c8] sm:$0xf0] }
 0x19c   : > { %v3526_v46 = vpop.f32.mrf.mxu3 }
 0x19d   : > { %v1850_v42 = vmax.f32 %v1576_v5, 0.0  ;;  %2042 = vst.msk [vmem:[%s3105_s17 + $0x2e8] sm:$0xff] %vm1948_vm3, %v1913_v8  ;;  %v2602_v8 = vor.u32 %v2873_v63, %v2601_v62  ;;  %v2361_v62 = vld [vmem:[%s2977_s28 + $0x1b0] sm:$0xf]  ;;  %v2813_v63 = vld [vmem:[%s2977_s28 + $0x1b4] sm:$0xf0] }
 0x19e   : > { %v1582_v9 = vpop.f32.mrf.mxu1  ;;  %v1406_v10 = vpop.f32.mrf.mxu2 }
 0x19f   : > { %1979 = vst.msk [vmem:[%s3105_s17 + $0xf0] sm:$0xff] %vm1948_vm3, %v1850_v42  ;;  %v1407_v13 = vadd.f32 %v3463_v57, %v1406_v10 }
 0x1a0   : > { %v1248_v50 = vpop.f32.mrf.mxu0 }
 0x1a1   : > { %v1249_v25 = vadd.f32 %v3463_v57, %v1248_v50  ;;  %v1736_v18 = vadd.f32 %v3470_v41, %v1407_v13  ;;  %v2338_v41 = vor.u32 %v2807_v24, %v2337_v23  ;;  %v2878_v23 = vld [vmem:[%s2977_s28 + $0x3c4] sm:$0xf]  ;;  %v2627_v24 = vld [vmem:[%s2977_s28 + $0x3c8] sm:$0xf0] }
 0x1a3   : > { %v1578_v26 = vadd.f32 %v1577_v39, %v1249_v25  ;;  %v1914_v22 = vmax.f32 %v1736_v18, 0.0 }
 0x1a4   : > { %v3541_v27 = vpop.f32.mrf.mxu3 }
 0x1a5   : > { %v1851_v28 = vmax.f32 %v1578_v26, 0.0  ;;  %2043 = vst.msk [vmem:[%s3105_s17 + $0x2f0] sm:$0xff] %vm1948_vm3, %v1914_v22 }
 0x1a6   : > { %v1585_v36 = vpop.f32.mrf.mxu1  ;;  %v1408_v11 = vpop.f32.mrf.mxu2 }
 0x1a7   : > { %1980 = vst.msk [vmem:[%s3105_s17 + $0xf8] sm:$0xff] %vm1948_vm3, %v1851_v28  ;;  %v1409_v34 = vadd.f32 %v3463_v57, %v1408_v11 }
 0x1a8   : > { %v1251_v35 = vpop.f32.mrf.mxu0 }
 0x1a9   : > { %2716 = vmatmul.msk.bf16.gmra.mxu1 %vm962_vm2, %v2350_v32  ;;  %v1252_v7 = vadd.f32 %v3463_v57, %v1251_v35  ;;  %2749 = vmatmul.msk.bf16.gmra.mxu3 %vm962_vm2, %v2614_v33  ;;  %v1738_v39 = vadd.f32 %v3485_v21, %v1409_v34  ;;  %v2609_v34 = vld [vmem:[%s2977_s28 + $0x3a0] sm:$0xf]  ;;  %v2875_v35 = vld [vmem:[%s2977_s28 + $0x3a4] sm:$0xf0] }
 0x1ab   : > { %v1581_v40 = vadd.f32 %v1580_v1, %v1252_v7  ;;  %1290 = vmatmul.bf16.gmra.mxu0 %v2338_v41  ;;  %v1915_v43 = vmax.f32 %v1738_v39, 0.0  ;;  %1450 = vmatmul.bf16.gmra.mxu2 %v2594_v38  ;;  %v2358_v1 = vor.u32 %v2810_v48, %v2355_v49  ;;  %v2630_v38 = vor.u32 %v2878_v23, %v2627_v24  ;;  %v2816_v23 = vld [vmem:[%s2977_s28 + $0x1d4] sm:$0xf]  ;;  %v2379_v24 = vld [vmem:[%s2977_s28 + $0x1d8] sm:$0xf0] }
 0x1ac   : > { %v3554_v17 = vpop.f32.mrf.mxu3 }
 0x1ad   : > { %v1852_v0 = vmax.f32 %v1581_v40, 0.0  ;;  %2044 = vst.msk [vmem:[%s3105_s17 + $0x2f8] sm:$0xff] %vm1948_vm3, %v1915_v43  ;;  %v2610_v43 = vor.u32 %v2875_v35, %v2609_v34  ;;  %v2369_v34 = vld [vmem:[%s2977_s28 + $0x1c0] sm:$0xf]  ;;  %v2815_v35 = vld [vmem:[%s2977_s28 + $0x1c4] sm:$0xf0] }
 0x1ae   : > { %v1587_v44 = vpop.f32.mrf.mxu1  ;;  %v1411_v45 = vpop.f32.mrf.mxu2 }
 0x1af   : > { %1981 = vst.msk [vmem:[%s3105_s17 + $0x100] sm:$0xff] %vm1948_vm3, %v1852_v0  ;;  %v1412_v47 = vadd.f32 %v3463_v57, %v1411_v45 }
 0x1b0   : > { %v1253_v21 = vpop.f32.mrf.mxu0 }
 0x1b1   : > { %v1254_v54 = vadd.f32 %v3463_v57, %v1253_v21  ;;  %v1741_v51 = vadd.f32 %v3498_v12, %v1412_v47  ;;  %v2346_v12 = vor.u32 %v2809_v59, %v2345_v58  ;;  %v2880_v58 = vld [vmem:[%s2977_s28 + $0x3d4] sm:$0xf]  ;;  %v2635_v59 = vld [vmem:[%s2977_s28 + $0x3d8] sm:$0xf0] }
 0x1b3   : > { %v1583_v60 = vadd.f32 %v1582_v9, %v1254_v54  ;;  %v1916_v56 = vmax.f32 %v1741_v51, 0.0 }
 0x1b4   : > { %v3569_v61 = vpop.f32.mrf.mxu3 }
 0x1b5   : > { %v1853_v55 = vmax.f32 %v1583_v60, 0.0  ;;  %2045 = vst.msk [vmem:[%s3105_s17 + $0x300] sm:$0xff] %vm1948_vm3, %v1916_v56 }
 0x1b6   : > { %v1590_v6 = vpop.f32.mrf.mxu1  ;;  %v1413_v37 = vpop.f32.mrf.mxu2 }
 0x1b7   : > { %1982 = vst.msk [vmem:[%s3105_s17 + $0x108] sm:$0xff] %vm1948_vm3, %v1853_v55  ;;  %v1414_v4 = vadd.f32 %v3463_v57, %v1413_v37 }
 0x1b8   : > { %v1256_v5 = vpop.f32.mrf.mxu0 }
 0x1b9   : > { %2717 = vmatmul.msk.bf16.gmra.mxu1 %vm962_vm2, %v2358_v1  ;;  %v1257_v42 = vadd.f32 %v3463_v57, %v1256_v5  ;;  %2750 = vmatmul.msk.bf16.gmra.mxu3 %vm962_vm2, %v2622_v3  ;;  %v1743_v9 = vadd.f32 %v3513_v2, %v1414_v4  ;;  %v2617_v4 = vld [vmem:[%s2977_s28 + $0x3b0] sm:$0xf]  ;;  %v2877_v5 = vld [vmem:[%s2977_s28 + $0x3b4] sm:$0xf0] }
 0x1bb   : > { %v1586_v10 = vadd.f32 %v1585_v36, %v1257_v42  ;;  %1295 = vmatmul.bf16.gmra.mxu0 %v2346_v12  ;;  %v1917_v13 = vmax.f32 %v1743_v9, 0.0  ;;  %1455 = vmatmul.bf16.gmra.mxu2 %v2602_v8  ;;  %v2366_v36 = vor.u32 %v2812_v19, %v2363_v20  ;;  %v2638_v8 = vor.u32 %v2880_v58, %v2635_v59  ;;  %v2818_v58 = vld [vmem:[%s2977_s28 + $0x1e4] sm:$0xf]  ;;  %v2387_v59 = vld [vmem:[%s2977_s28 + $0x1e8] sm:$0xf0] }
 0x1bc   : > { %v3582_v50 = vpop.f32.mrf.mxu3 }
 0x1bd   : > { %v1854_v25 = vmax.f32 %v1586_v10, 0.0  ;;  %2046 = vst.msk [vmem:[%s3105_s17 + $0x308] sm:$0xff] %vm1948_vm3, %v1917_v13  ;;  %v2618_v13 = vor.u32 %v2877_v5, %v2617_v4  ;;  %v2377_v4 = vld [vmem:[%s2977_s28 + $0x1d0] sm:$0xf]  ;;  %v2817_v5 = vld [vmem:[%s2977_s28 + $0x1d4] sm:$0xf0] }
 0x1be   : > { %v1592_v15 = vpop.f32.mrf.mxu1  ;;  %v1416_v16 = vpop.f32.mrf.mxu2 }
 0x1bf   : > { %1983 = vst.msk [vmem:[%s3105_s17 + $0x110] sm:$0xff] %vm1948_vm3, %v1854_v25  ;;  %v1417_v18 = vadd.f32 %v3463_v57, %v1416_v16 }
 0x1c0   : > { %v1258_v2 = vpop.f32.mrf.mxu0 }
 0x1c1   : > { %v1259_v26 = vadd.f32 %v3463_v57, %v1258_v2  ;;  %v1746_v22 = vadd.f32 %v3526_v46, %v1417_v18  ;;  %v2354_v46 = vor.u32 %v2811_v30, %v2353_v29  ;;  %v2882_v29 = vld [vmem:[%s2977_s28 + $0x3e4] sm:$0xf]  ;;  %v2643_v30 = vld [vmem:[%s2977_s28 + $0x3e8] sm:$0xf0] }
 0x1c3   : > { %v1588_v32 = vadd.f32 %v1587_v44, %v1259_v26  ;;  %v1918_v28 = vmax.f32 %v1746_v22, 0.0 }
 0x1c4   : > { %v3597_v33 = vpop.f32.mrf.mxu3 }
 0x1c5   : > { %v1855_v11 = vmax.f32 %v1588_v32, 0.0  ;;  %2047 = vst.msk [vmem:[%s3105_s17 + $0x310] sm:$0xff] %vm1948_vm3, %v1918_v28 }
 0x1c6   : > { %v1595_v41 = vpop.f32.mrf.mxu1  ;;  %v1418_v7 = vpop.f32.mrf.mxu2 }
 0x1c7   : > { %1984 = vst.msk [vmem:[%s3105_s17 + $0x118] sm:$0xff] %vm1948_vm3, %v1855_v11  ;;  %v1419_v39 = vadd.f32 %v3463_v57, %v1418_v7 }
 0x1c8   : > { %v1261_v40 = vpop.f32.mrf.mxu0 }
 0x1c9   : > { %2718 = vmatmul.msk.bf16.gmra.mxu1 %vm962_vm2, %v2366_v36  ;;  %v1262_v0 = vadd.f32 %v3463_v57, %v1261_v40  ;;  %2751 = vmatmul.msk.bf16.gmra.mxu3 %vm962_vm2, %v2630_v38  ;;  %v1748_v44 = vadd.f32 %v3541_v27, %v1419_v39  ;;  %v2625_v39 = vld [vmem:[%s2977_s28 + $0x3c0] sm:$0xf]  ;;  %v2879_v40 = vld [vmem:[%s2977_s28 + $0x3c4] sm:$0xf0] }
 0x1cb   : > { %v1591_v45 = vadd.f32 %v1590_v6, %v1262_v0  ;;  %1300 = vmatmul.bf16.gmra.mxu0 %v2354_v46  ;;  %v1919_v47 = vmax.f32 %v1748_v44, 0.0  ;;  %1460 = vmatmul.bf16.gmra.mxu2 %v2610_v43  ;;  %v2374_v6 = vor.u32 %v2814_v52, %v2371_v53  ;;  %v2646_v43 = vor.u32 %v2882_v29, %v2643_v30  ;;  %v2820_v29 = vld [vmem:[%s2977_s28 + $0x1f4] sm:$0xf]  ;;  %v2395_v30 = vld [vmem:[%s2977_s28 + $0x1f8] sm:$0xf0] }
 0x1cc   : > { %v3610_v21 = vpop.f32.mrf.mxu3 }
 0x1cd   : > { %v1856_v54 = vmax.f32 %v1591_v45, 0.0  ;;  %2048 = vst.msk [vmem:[%s3105_s17 + $0x318] sm:$0xff] %vm1948_vm3, %v1919_v47  ;;  %v2626_v47 = vor.u32 %v2879_v40, %v2625_v39 }
 0x1ce   : > { %v1597_v48 = vpop.f32.mrf.mxu1  ;;  %v1421_v49 = vpop.f32.mrf.mxu2 }
 0x1cf   : > { %1985 = vst.msk [vmem:[%s3105_s17 + $0x120] sm:$0xff] %vm1948_vm3, %v1856_v54  ;;  %v1422_v51 = vadd.f32 %v3463_v57, %v1421_v49 }
 0x1d0   : > { %v1263_v27 = vpop.f32.mrf.mxu0 }
 0x1d1   : > { %v1264_v60 = vadd.f32 %v3463_v57, %v1263_v27  ;;  %v1751_v56 = vadd.f32 %v3554_v17, %v1422_v51  ;;  %v2362_v17 = vor.u32 %v2813_v63, %v2361_v62  ;;  %v2884_v62 = vld [vmem:[%s2977_s28 + $0x3f4] sm:$0xf]  ;;  %v2651_v63 = vld [vmem:[%s2977_s28 + $0x3f8] sm:$0xf0] }
 0x1d3   : > { %v1593_v1 = vadd.f32 %v1592_v15, %v1264_v60  ;;  %v1920_v55 = vmax.f32 %v1751_v56, 0.0 }
 0x1d4   : > { %v3625_v3 = vpop.f32.mrf.mxu3 }
 0x1d5   : > { %v1857_v37 = vmax.f32 %v1593_v1, 0.0  ;;  %2049 = vst.msk [vmem:[%s3105_s17 + $0x320] sm:$0xff] %vm1948_vm3, %v1920_v55 }
 0x1d6   : > { %v1600_v12 = vpop.f32.mrf.mxu1  ;;  %v1423_v42 = vpop.f32.mrf.mxu2 }
 0x1d7   : > { %1986 = vst.msk [vmem:[%s3105_s17 + $0x128] sm:$0xff] %vm1948_vm3, %v1857_v37  ;;  %v1424_v9 = vadd.f32 %v3463_v57, %v1423_v42 }
 0x1d8   : > { %v1266_v10 = vpop.f32.mrf.mxu0 }
 0x1d9   : > { %2719 = vmatmul.msk.bf16.gmra.mxu1 %vm962_vm2, %v2374_v6  ;;  %v1267_v25 = vadd.f32 %v3463_v57, %v1266_v10  ;;  %2752 = vmatmul.msk.bf16.gmra.mxu3 %vm962_vm2, %v2638_v8  ;;  %v1753_v15 = vadd.f32 %v3569_v61, %v1424_v9  ;;  %v2881_v9 = vld [vmem:[%s2977_s28 + $0x3d4] sm:$0xf0] }
 0x1db   : > { %v1596_v16 = vadd.f32 %v1595_v41, %v1267_v25  ;;  %1305 = vmatmul.bf16.gmra.mxu0 %v2362_v17  ;;  %v1921_v18 = vmax.f32 %v1753_v15, 0.0  ;;  %1465 = vmatmul.bf16.gmra.mxu2 %v2618_v13  ;;  %v2382_v41 = vor.u32 %v2816_v23, %v2379_v24  ;;  %v2633_v17 = vld [vmem:[%s2977_s28 + $0x3d0] sm:$0xf]  ;;  %v2654_v13 = vor.u32 %v2884_v62, %v2651_v63 }
 0x1dc   : > { %v3638_v2 = vpop.f32.mrf.mxu3  ;;  %v2378_v25 = vor.u32 %v2817_v5, %v2377_v4  ;;  %v2821_v4 = vld [vmem:[%s2977_s28 + $0x1f4] sm:$0xf0] }
 0x1dd   : > { %v1858_v26 = vmax.f32 %v1596_v16, 0.0  ;;  %2050 = vst.msk [vmem:[%s3105_s17 + $0x328] sm:$0xff] %vm1948_vm3, %v1921_v18  ;;  %v2634_v18 = vor.u32 %v2881_v9, %v2633_v17  ;;  %v2885_v17 = vld [vmem:[%s2977_s28 + $0x3f4] sm:$0xf0] }
 0x1de   : > { %v1602_v19 = vpop.f32.mrf.mxu1  ;;  %v1426_v20 = vpop.f32.mrf.mxu2 }
 0x1df   : > { %1987 = vst.msk [vmem:[%s3105_s17 + $0x130] sm:$0xff] %vm1948_vm3, %v1858_v26  ;;  %v1427_v22 = vadd.f32 %v3463_v57, %v1426_v20 }
 0x1e0   : > { %v1268_v61 = vpop.f32.mrf.mxu0 }
 0x1e1   : > { %v1269_v32 = vadd.f32 %v3463_v57, %v1268_v61  ;;  %v1756_v28 = vadd.f32 %v3582_v50, %v1427_v22  ;;  %v2370_v50 = vor.u32 %v2815_v35, %v2369_v34  ;;  %v2398_v35 = vor.u32 %v2820_v29, %v2395_v30 }
 0x1e3   : > { %v1598_v36 = vadd.f32 %v1597_v48, %v1269_v32  ;;  %v1922_v11 = vmax.f32 %v1756_v28, 0.0 }
 0x1e4   : > { %v3653_v38 = vpop.f32.mrf.mxu3 }
 0x1e5   : > { %v1859_v7 = vmax.f32 %v1598_v36, 0.0  ;;  %2051 = vst.msk [vmem:[%s3105_s17 + $0x330] sm:$0xff] %vm1948_vm3, %v1922_v11 }
 0x1e6   : > { %v1605_v46 = vpop.f32.mrf.mxu1  ;;  %v1428_v0 = vpop.f32.mrf.mxu2 }
 0x1e7   : > { %1988 = vst.msk [vmem:[%s3105_s17 + $0x138] sm:$0xff] %vm1948_vm3, %v1859_v7  ;;  %v1429_v44 = vadd.f32 %v3463_v57, %v1428_v0  ;;  %v2385_v7 = vld [vmem:[%s2977_s28 + $0x1e0] sm:$0xf]  ;;  %v2883_v0 = vld [vmem:[%s2977_s28 + $0x3e4] sm:$0xf0] }
 0x1e8   : > { %v1271_v45 = vpop.f32.mrf.mxu0 }
 0x1e9   : > { %2720 = vmatmul.msk.bf16.gmra.mxu1 %vm962_vm2, %v2382_v41  ;;  %v1272_v54 = vadd.f32 %v3463_v57, %v1271_v45  ;;  %2753 = vmatmul.msk.bf16.gmra.mxu3 %vm962_vm2, %v2646_v43  ;;  %v1758_v48 = vadd.f32 %v3597_v33, %v1429_v44  ;;  %v2641_v43 = vld [vmem:[%s2977_s28 + $0x3e0] sm:$0xf] }
 0x1eb   : > { %v1601_v49 = vadd.f32 %v1600_v12, %v1272_v54  ;;  %1310 = vmatmul.bf16.gmra.mxu0 %v2370_v50  ;;  %v1923_v51 = vmax.f32 %v1758_v48, 0.0  ;;  %1470 = vmatmul.bf16.gmra.mxu2 %v2626_v47  ;;  %v2390_v12 = vor.u32 %v2818_v58, %v2387_v59  ;;  %v2642_v47 = vor.u32 %v2883_v0, %v2641_v43  ;;  %v2822_v58 = vld [vmem:[%s2977_s28 + $0x204] sm:$0xf]  ;;  %v2403_v59 = vld [vmem:[%s2977_s28 + $0x208] sm:$0xf0] }
 0x1ec   : > { %v3666_v27 = vpop.f32.mrf.mxu3 }
 0x1ed   : > { %v1860_v60 = vmax.f32 %v1601_v49, 0.0  ;;  %2052 = vst.msk [vmem:[%s3105_s17 + $0x338] sm:$0xff] %vm1948_vm3, %v1923_v51 }
 0x1ee   : > { %v1607_v52 = vpop.f32.mrf.mxu1  ;;  %v1431_v53 = vpop.f32.mrf.mxu2 }
 0x1ef   : > { %1989 = vst.msk [vmem:[%s3105_s17 + $0x140] sm:$0xff] %vm1948_vm3, %v1860_v60  ;;  %v1432_v33 = vadd.f32 %v3463_v57, %v1431_v53 }
 0x1f0   : > { %v1273_v56 = vpop.f32.mrf.mxu0 }
 0x1f1   : > { %v1274_v1 = vadd.f32 %v3463_v57, %v1273_v56  ;;  %v1761_v55 = vadd.f32 %v3610_v21, %v1432_v33 }
 0x1f3   : > { %v1603_v6 = vadd.f32 %v1602_v19, %v1274_v1  ;;  %v1924_v37 = vmax.f32 %v1761_v55, 0.0 }
 0x1f4   : > { %v3683_v10 = vpop.f32.mrf.mxu3 }
 0x1f5   : > { %v1861_v8 = vmax.f32 %v1603_v6, 0.0  ;;  %2053 = vst.msk [vmem:[%s3105_s17 + $0x340] sm:$0xff] %vm1948_vm3, %v1924_v37  ;;  %v2406_v37 = vor.u32 %v2822_v58, %v2403_v59 }
 0x1f6   : > { %v1610_v42 = vpop.f32.mrf.mxu1  ;;  %v1433_v21 = vpop.f32.mrf.mxu2 }
 0x1f7   : > { %1990 = vst.msk [vmem:[%s3105_s17 + $0x148] sm:$0xff] %vm1948_vm3, %v1861_v8  ;;  %v1434_v15 = vadd.f32 %v3463_v57, %v1433_v21 }
 0x1f8   : > { %v1276_v16 = vpop.f32.mrf.mxu0 }
 0x1f9   : > { %2721 = vmatmul.msk.bf16.gmra.mxu1 %vm962_vm2, %v2390_v12  ;;  %v1277_v26 = vadd.f32 %v3463_v57, %v1276_v16  ;;  %2754 = vmatmul.msk.bf16.gmra.mxu3 %vm962_vm2, %v2654_v13  ;;  %v1763_v19 = vadd.f32 %v3625_v3, %v1434_v15  ;;  %v2393_v12 = vld [vmem:[%s2977_s28 + $0x1f0] sm:$0xf] }
 0x1fa   : > { %v2394_v13 = vor.u32 %v2821_v4, %v2393_v12 }
 0x1fb   : > { %v1606_v20 = vadd.f32 %v1605_v46, %v1277_v26  ;;  %1315 = vmatmul.bf16.gmra.mxu0 %v2378_v25  ;;  %v1925_v22 = vmax.f32 %v1763_v19, 0.0  ;;  %1475 = vmatmul.bf16.gmra.mxu2 %v2634_v18  ;;  %v2819_v46 = vld [vmem:[%s2977_s28 + $0x1e4] sm:$0xf0] }
 0x1fc   : > { %v3698_v24 = vpop.f32.mrf.mxu3  ;;  %v2386_v44 = vor.u32 %v2819_v46, %v2385_v7 }
 0x1fd   : > { %v1862_v61 = vmax.f32 %v1606_v20, 0.0  ;;  %2054 = vst.msk [vmem:[%s3105_s17 + $0x348] sm:$0xff] %vm1948_vm3, %v1925_v22 }
 0x1fe   : > { %v1612_v32 = vpop.f32.mrf.mxu1  ;;  %v1436_v23 = vpop.f32.mrf.mxu2 }
 0x1ff   : > { %1991 = vst.msk [vmem:[%s3105_s17 + $0x150] sm:$0xff] %vm1948_vm3, %v1862_v61  ;;  %v1437_v3 = vadd.f32 %v3463_v57, %v1436_v23 }
 0x200   : > { %v1278_v28 = vpop.f32.mrf.mxu0 }
 0x201   : > { %v1279_v36 = vadd.f32 %v3463_v57, %v1278_v28  ;;  %v1766_v11 = vadd.f32 %v3638_v2, %v1437_v3 }
 0x203   : > { %v1608_v41 = vadd.f32 %v1607_v52, %v1279_v36  ;;  %v1926_v34 = vmax.f32 %v1766_v11, 0.0 }
 0x204   : > { %v1777_v48 = vpop.f32.mrf.mxu3 }
 0x205   : > { %v1863_v39 = vmax.f32 %v1608_v41, 0.0  ;;  %2055 = vst.msk [vmem:[%s3105_s17 + $0x350] sm:$0xff] %vm1948_vm3, %v1926_v34 }
 0x206   : > { %v1615_v40 = vpop.f32.mrf.mxu1  ;;  %v1438_v50 = vpop.f32.mrf.mxu2 }
 0x207   : > { %1992 = vst.msk [vmem:[%s3105_s17 + $0x158] sm:$0xff] %vm1948_vm3, %v1863_v39  ;;  %v1439_v45 = vadd.f32 %v3463_v57, %v1438_v50 }
 0x208   : > { %v1281_v2 = vpop.f32.mrf.mxu0 }
 0x209   : > { %2722 = vmatmul.msk.bf16.gmra.mxu1 %vm962_vm2, %v2398_v35  ;;  %v1282_v54 = vadd.f32 %v3463_v57, %v1281_v2  ;;  %v1768_v49 = vadd.f32 %v3653_v38, %v1439_v45 }
 0x20b   : > { %v1611_v51 = vadd.f32 %v1610_v42, %v1282_v54  ;;  %1320 = vmatmul.bf16.gmra.mxu0 %v2386_v44  ;;  %v1927_v60 = vmax.f32 %v1768_v49, 0.0  ;;  %1480 = vmatmul.bf16.gmra.mxu2 %v2642_v47  ;;  %v2649_v42 = vld [vmem:[%s2977_s28 + $0x3f0] sm:$0xf] }
 0x20c   : > { %v1780_v62 = vpop.f32.mrf.mxu3  ;;  %v2650_v25 = vor.u32 %v2885_v17, %v2649_v42 }
 0x20d   : > { %v1864_v52 = vmax.f32 %v1611_v51, 0.0  ;;  %2056 = vst.msk [vmem:[%s3105_s17 + $0x358] sm:$0xff] %vm1948_vm3, %v1927_v60 }
 0x20e   : > { %v1617_v53 = vpop.f32.mrf.mxu1  ;;  %v1441_v33 = vpop.f32.mrf.mxu2 }
 0x20f   : > { %1993 = vst.msk [vmem:[%s3105_s17 + $0x160] sm:$0xff] %vm1948_vm3, %v1864_v52  ;;  %v1442_v56 = vadd.f32 %v3463_v57, %v1441_v33 }
 0x210   : > { %v1283_v1 = vpop.f32.mrf.mxu0 }
 0x211   : > { %v1284_v38 = vadd.f32 %v3463_v57, %v1283_v1  ;;  %v1771_v55 = vadd.f32 %v3666_v27, %v1442_v56 }
 0x213   : > { %v1613_v6 = vadd.f32 %v1612_v32, %v1284_v38  ;;  %v1928_v63 = vmax.f32 %v1771_v55, 0.0 }
 0x214   : > { %v1782_v22 = vpop.f32.mrf.mxu3 }
 0x215   : > { %v1865_v5 = vmax.f32 %v1613_v6, 0.0  ;;  %2057 = vst.msk [vmem:[%s3105_s17 + $0x360] sm:$0xff] %vm1948_vm3, %v1928_v63 }
 0x216   : > { %v1620_v8 = vpop.f32.mrf.mxu1  ;;  %v1443_v9 = vpop.f32.mrf.mxu2 }
 0x217   : > { %1994 = vst.msk [vmem:[%s3105_s17 + $0x168] sm:$0xff] %vm1948_vm3, %v1865_v5  ;;  %v1444_v27 = vadd.f32 %v3463_v57, %v1443_v9 }
 0x218   : > { %v1286_v21 = vpop.f32.mrf.mxu0 }
 0x219   : > { %2723 = vmatmul.msk.bf16.gmra.mxu1 %vm962_vm2, %v2406_v37  ;;  %v1287_v15 = vadd.f32 %v3463_v57, %v1286_v21  ;;  %v1773_v16 = vadd.f32 %v3683_v10, %v1444_v27 }
 0x21b   : > { %v1616_v18 = vadd.f32 %v1615_v40, %v1287_v15  ;;  %1325 = vmatmul.bf16.gmra.mxu0 %v2394_v13  ;;  %v1929_v26 = vmax.f32 %v1773_v16, 0.0  ;;  %1485 = vmatmul.bf16.gmra.mxu2 %v2650_v25 }
 0x21c   : > { %v1785_v41 = vpop.f32.mrf.mxu3 }
 0x21d   : > { %v1866_v19 = vmax.f32 %v1616_v18, 0.0  ;;  %2058 = vst.msk [vmem:[%s3105_s17 + $0x368] sm:$0xff] %vm1948_vm3, %v1929_v26 }
 0x21e   : > { %v1622_v20 = vpop.f32.mrf.mxu1  ;;  %v1446_v61 = vpop.f32.mrf.mxu2 }
 0x21f   : > { %1995 = vst.msk [vmem:[%s3105_s17 + $0x170] sm:$0xff] %vm1948_vm3, %v1866_v19  ;;  %v1447_v32 = vadd.f32 %v3463_v57, %v1446_v61 }
 0x220   : > { %v1288_v23 = vpop.f32.mrf.mxu0 }
 0x221   : > { %v1289_v3 = vadd.f32 %v3463_v57, %v1288_v23  ;;  %v1776_v10 = vadd.f32 %v3698_v24, %v1447_v32 }
 0x223   : > { %v1618_v28 = vadd.f32 %v1617_v53, %v1289_v3  ;;  %v1930_v36 = vmax.f32 %v1776_v10, 0.0 }
 0x224   : > { %v1787_v2 = vpop.f32.mrf.mxu3 }
 0x225   : > { %v1867_v29 = vmax.f32 %v1618_v28, 0.0  ;;  %2059 = vst.msk [vmem:[%s3105_s17 + $0x370] sm:$0xff] %vm1948_vm3, %v1930_v36 }
 0x226   : > { %v1625_v30 = vpop.f32.mrf.mxu1  ;;  %v1448_v11 = vpop.f32.mrf.mxu2 }
 0x227   : > { %1996 = vst.msk [vmem:[%s3105_s17 + $0x178] sm:$0xff] %vm1948_vm3, %v1867_v29  ;;  %v1449_v34 = vadd.f32 %v3463_v57, %v1448_v11 }
 0x228   : > { %v1291_v35 = vpop.f32.mrf.mxu0 }
 0x229   : > { %v1292_v7 = vadd.f32 %v3463_v57, %v1291_v35  ;;  %v1778_v46 = vadd.f32 %v1777_v48, %v1449_v34 }
 0x22b   : > { %v1621_v39 = vadd.f32 %v1620_v8, %v1292_v7  ;;  %v1931_v24 = vmax.f32 %v1778_v46, 0.0 }
 0x22c   : > { %v1790_v38 = vpop.f32.mrf.mxu3 }
 0x22d   : > { %v1868_v40 = vmax.f32 %v1621_v39, 0.0  ;;  %2060 = vst.msk [vmem:[%s3105_s17 + $0x378] sm:$0xff] %vm1948_vm3, %v1931_v24 }
 0x22e   : > { %v1627_v43 = vpop.f32.mrf.mxu1  ;;  %v1451_v0 = vpop.f32.mrf.mxu2 }
 0x22f   : > { %1997 = vst.msk [vmem:[%s3105_s17 + $0x180] sm:$0xff] %vm1948_vm3, %v1868_v40  ;;  %v1452_v50 = vadd.f32 %v3463_v57, %v1451_v0 }
 0x230   : > { %v1293_v44 = vpop.f32.mrf.mxu0 }
 0x231   : > { %v1294_v45 = vadd.f32 %v3463_v57, %v1293_v44  ;;  %v1781_v47 = vadd.f32 %v1780_v62, %v1452_v50 }
 0x233   : > { %v1623_v54 = vadd.f32 %v1622_v20, %v1294_v45  ;;  %v1932_v48 = vmax.f32 %v1781_v47, 0.0 }
 0x234   : > { %v1792_v17 = vpop.f32.mrf.mxu3 }
 0x235   : > { %v1869_v49 = vmax.f32 %v1623_v54, 0.0  ;;  %2061 = vst.msk [vmem:[%s3105_s17 + $0x380] sm:$0xff] %vm1948_vm3, %v1932_v48 }
 0x236   : > { %v1630_v51 = vpop.f32.mrf.mxu1  ;;  %v1453_v60 = vpop.f32.mrf.mxu2 }
 0x237   : > { %1998 = vst.msk [vmem:[%s3105_s17 + $0x188] sm:$0xff] %vm1948_vm3, %v1869_v49  ;;  %v1454_v52 = vadd.f32 %v3463_v57, %v1453_v60 }
 0x238   : > { %v1296_v53 = vpop.f32.mrf.mxu0 }
 0x239   : > { %v1297_v33 = vadd.f32 %v3463_v57, %v1296_v53  ;;  %v1783_v56 = vadd.f32 %v1782_v22, %v1454_v52 }
 0x23b   : > { %v1626_v1 = vadd.f32 %v1625_v30, %v1297_v33  ;;  %v1933_v58 = vmax.f32 %v1783_v56, 0.0 }
 0x23c   : > { %v1795_v20 = vpop.f32.mrf.mxu3 }
 0x23d   : > { %v1870_v59 = vmax.f32 %v1626_v1, 0.0  ;;  %2062 = vst.msk [vmem:[%s3105_s17 + $0x388] sm:$0xff] %vm1948_vm3, %v1933_v58 }
 0x23e   : > { %v1632_v55 = vpop.f32.mrf.mxu1  ;;  %v1456_v6 = vpop.f32.mrf.mxu2 }
 0x23f   : > { %1999 = vst.msk [vmem:[%s3105_s17 + $0x190] sm:$0xff] %vm1948_vm3, %v1870_v59  ;;  %v1457_v62 = vadd.f32 %v3463_v57, %v1456_v6 }
 0x240   : > { %v1298_v63 = vpop.f32.mrf.mxu0 }
 0x241   : > { %v1299_v37 = vadd.f32 %v3463_v57, %v1298_v63  ;;  %v1786_v12 = vadd.f32 %v1785_v41, %v1457_v62 }
 0x243   : > { %v1628_v4 = vadd.f32 %v1627_v43, %v1299_v37  ;;  %v1934_v5 = vmax.f32 %v1786_v12, 0.0 }
 0x244   : > { %v1797_v34 = vpop.f32.mrf.mxu3 }
 0x245   : > { %v1871_v8 = vmax.f32 %v1628_v4, 0.0  ;;  %2063 = vst.msk [vmem:[%s3105_s17 + $0x390] sm:$0xff] %vm1948_vm3, %v1934_v5 }
 0x246   : > { %v1635_v42 = vpop.f32.mrf.mxu1  ;;  %v1458_v9 = vpop.f32.mrf.mxu2 }
 0x247   : > { %2000 = vst.msk [vmem:[%s3105_s17 + $0x198] sm:$0xff] %vm1948_vm3, %v1871_v8  ;;  %v1459_v13 = vadd.f32 %v3463_v57, %v1458_v9 }
 0x248   : > { %v1301_v27 = vpop.f32.mrf.mxu0 }
 0x249   : > { %v1302_v21 = vadd.f32 %v3463_v57, %v1301_v27  ;;  %v1788_v25 = vadd.f32 %v1787_v2, %v1459_v13 }
 0x24b   : > { %v1631_v15 = vadd.f32 %v1630_v51, %v1302_v21  ;;  %v1935_v16 = vmax.f32 %v1788_v25, 0.0  ;;  %v3800_v51 = vld [vmem:[%s3866_s2] ss:$0 sm:$0xff] }
 0x24c   : > { %v1800_v2 = vpop.f32.mrf.mxu3 }
 0x24d   : > { %v1872_v18 = vmax.f32 %v1631_v15, 0.0  ;;  %2064 = vst.msk [vmem:[%s3105_s17 + $0x398] sm:$0xff] %vm1948_vm3, %v1935_v16 }
 0x24e   : > { %v1637_v26 = vpop.f32.mrf.mxu1  ;;  %v1461_v19 = vpop.f32.mrf.mxu2 }
 0x24f   : > { %2001 = vst.msk [vmem:[%s3105_s17 + $0x1a0] sm:$0xff] %vm1948_vm3, %v1872_v18  ;;  %v1462_v22 = vadd.f32 %v3463_v57, %v1461_v19 }
 0x250   : > { %v1303_v61 = vpop.f32.mrf.mxu0 }
 0x251   : > { %v1304_v32 = vadd.f32 %v3463_v57, %v1303_v61  ;;  %v1791_v23 = vadd.f32 %v1790_v38, %v1462_v22 }
 0x253   : > { %v1633_v3 = vadd.f32 %v1632_v55, %v1304_v32  ;;  %v1936_v10 = vmax.f32 %v1791_v23, 0.0 }
 0x254   : > { %v1802_v58 = vpop.f32.mrf.mxu3 }
 0x255   : > { %v1873_v28 = vmax.f32 %v1633_v3, 0.0  ;;  %2065 = vst.msk [vmem:[%s3105_s17 + $0x3a0] sm:$0xff] %vm1948_vm3, %v1936_v10 }
 0x256   : > { %v1640_v36 = vpop.f32.mrf.mxu1  ;;  %v1463_v29 = vpop.f32.mrf.mxu2 }
 0x257   : > { %2002 = vst.msk [vmem:[%s3105_s17 + $0x1a8] sm:$0xff] %vm1948_vm3, %v1873_v28  ;;  %v1464_v30 = vadd.f32 %v3463_v57, %v1463_v29 }
 0x258   : > { %v1306_v11 = vpop.f32.mrf.mxu0 }
 0x259   : > { %v1307_v41 = vadd.f32 %v3463_v57, %v1306_v11  ;;  %v1793_v35 = vadd.f32 %v1792_v17, %v1464_v30 }
 0x25b   : > { %v1636_v7 = vadd.f32 %v1635_v42, %v1307_v41  ;;  %v1937_v46 = vmax.f32 %v1793_v35, 0.0 }
 0x25c   : > { %v1805_v42 = vpop.f32.mrf.mxu3 }
 0x25d   : > { %v1874_v39 = vmax.f32 %v1636_v7, 0.0  ;;  %2066 = vst.msk [vmem:[%s3105_s17 + $0x3a8] sm:$0xff] %vm1948_vm3, %v1937_v46 }
 0x25e   : > { %v1642_v24 = vpop.f32.mrf.mxu1  ;;  %v1466_v40 = vpop.f32.mrf.mxu2 }
 0x25f   : > { %2003 = vst.msk [vmem:[%s3105_s17 + $0x1b0] sm:$0xff] %vm1948_vm3, %v1874_v39  ;;  %v1467_v43 = vadd.f32 %v3463_v57, %v1466_v40 }
 0x260   : > { %v1308_v0 = vpop.f32.mrf.mxu0 }
 0x261   : > { %v1309_v50 = vadd.f32 %v3463_v57, %v1308_v0  ;;  %v1796_v44 = vadd.f32 %v1795_v20, %v1467_v43 }
 0x263   : > { %v1638_v45 = vadd.f32 %v1637_v26, %v1309_v50  ;;  %v1938_v47 = vmax.f32 %v1796_v44, 0.0  ;;  %v1332_v44 = vadd.f32 %v3800_v51, %v3111_v14 }
 0x264   : > { %v1807_v22 = vpop.f32.mrf.mxu3 }
 0x265   : > { %v1875_v54 = vmax.f32 %v1638_v45, 0.0  ;;  %2067 = vst.msk [vmem:[%s3105_s17 + $0x3b0] sm:$0xff] %vm1948_vm3, %v1938_v47 }
 0x266   : > { %v1645_v48 = vpop.f32.mrf.mxu1  ;;  %v1468_v49 = vpop.f32.mrf.mxu2 }
 0x267   : > { %2004 = vst.msk [vmem:[%s3105_s17 + $0x1b8] sm:$0xff] %vm1948_vm3, %v1875_v54  ;;  %v1469_v57 = vadd.f32 %v3800_v51, %v1468_v49 }
 0x268   : > { %v1311_v60 = vpop.f32.mrf.mxu0 }
 0x269   : > { %v1312_v52 = vadd.f32 %v3800_v51, %v1311_v60  ;;  %v1798_v53 = vadd.f32 %v1797_v34, %v1469_v57 }
 0x26b   : > { %v1641_v33 = vadd.f32 %v1640_v36, %v1312_v52  ;;  %v1939_v56 = vmax.f32 %v1798_v53, 0.0 }
 0x26c   : > { %v1810_v34 = vpop.f32.mrf.mxu3 }
 0x26d   : > { %v1876_v1 = vmax.f32 %v1641_v33, 0.0  ;;  %2068 = vst.msk [vmem:[%s3105_s17 + $0x3b8] sm:$0xff] %vm1948_vm3, %v1939_v56  ;;  %v1334_v56 = vadd.f32 %v3800_v51, %v3126_v31 }
 0x26e   : > { %v1647_v38 = vpop.f32.mrf.mxu1  ;;  %v1471_v59 = vpop.f32.mrf.mxu2 }
 0x26f   : > { %2005 = vst.msk [vmem:[%s3105_s17 + $0x1c0] sm:$0xff] %vm1948_vm3, %v1876_v1  ;;  %v1472_v55 = vadd.f32 %v3800_v51, %v1471_v59 }
 0x270   : > { %v1313_v6 = vpop.f32.mrf.mxu0 }
 0x271   : > { %v1314_v62 = vadd.f32 %v3800_v51, %v1313_v6  ;;  %v1801_v63 = vadd.f32 %v1800_v2, %v1472_v55 }
 0x273   : > { %v1643_v37 = vadd.f32 %v1642_v24, %v1314_v62  ;;  %v1940_v12 = vmax.f32 %v1801_v63, 0.0 }
 0x274   : > { %v1812_v47 = vpop.f32.mrf.mxu3 }
 0x275   : > { %v1877_v4 = vmax.f32 %v1643_v37, 0.0  ;;  %2069 = vst.msk [vmem:[%s3105_s17 + $0x3c0] sm:$0xff] %vm1948_vm3, %v1940_v12 }
 0x276   : > { %v1650_v5 = vpop.f32.mrf.mxu1  ;;  %v1473_v8 = vpop.f32.mrf.mxu2 }
 0x277   : > { %2006 = vst.msk [vmem:[%s3105_s17 + $0x1c8] sm:$0xff] %vm1948_vm3, %v1877_v4  ;;  %v1474_v17 = vadd.f32 %v3800_v51, %v1473_v8 }
 0x278   : > { %v1316_v9 = vpop.f32.mrf.mxu0 }
 0x279   : > { %v1317_v13 = vadd.f32 %v3800_v51, %v1316_v9  ;;  %v1803_v27 = vadd.f32 %v1802_v58, %v1474_v17 }
 0x27b   : > { %v1646_v21 = vadd.f32 %v1645_v48, %v1317_v13  ;;  %v1941_v25 = vmax.f32 %v1803_v27, 0.0 }
 0x27c   : > { %v1815_v55 = vpop.f32.mrf.mxu3 }
 0x27d   : > { %v1878_v15 = vmax.f32 %v1646_v21, 0.0  ;;  %2070 = vst.msk [vmem:[%s3105_s17 + $0x3c8] sm:$0xff] %vm1948_vm3, %v1941_v25 }
 0x27e   : > { %v1652_v16 = vpop.f32.mrf.mxu1  ;;  %v1476_v18 = vpop.f32.mrf.mxu2 }
 0x27f   : > { %2007 = vst.msk [vmem:[%s3105_s17 + $0x1d0] sm:$0xff] %vm1948_vm3, %v1878_v15  ;;  %v1477_v26 = vadd.f32 %v3800_v51, %v1476_v18 }
 0x280   : > { %v1318_v19 = vpop.f32.mrf.mxu0 }
 0x281   : > { %v1319_v20 = vadd.f32 %v3800_v51, %v1318_v19  ;;  %v1806_v61 = vadd.f32 %v1805_v42, %v1477_v26 }
 0x283   : > { %v1648_v32 = vadd.f32 %v1647_v38, %v1319_v20  ;;  %v1942_v23 = vmax.f32 %v1806_v61, 0.0 }
 0x284   : > { %v1817_v9 = vpop.f32.mrf.mxu3 }
 0x285   : > { %v1879_v3 = vmax.f32 %v1648_v32, 0.0  ;;  %2071 = vst.msk [vmem:[%s3105_s17 + $0x3d0] sm:$0xff] %vm1948_vm3, %v1942_v23 }
 0x286   : > { %v1655_v10 = vpop.f32.mrf.mxu1  ;;  %v1478_v28 = vpop.f32.mrf.mxu2 }
 0x287   : > { %2008 = vst.msk [vmem:[%s3105_s17 + $0x1d8] sm:$0xff] %vm1948_vm3, %v1879_v3  ;;  %v1479_v36 = vadd.f32 %v3800_v51, %v1478_v28 }
 0x288   : > { %v1321_v29 = vpop.f32.mrf.mxu0 }
 0x289   : > { %v1322_v30 = vadd.f32 %v3800_v51, %v1321_v29  ;;  %v1808_v11 = vadd.f32 %v1807_v22, %v1479_v36 }
 0x28b   : > { %v1651_v41 = vadd.f32 %v1650_v5, %v1322_v30  ;;  %v1943_v35 = vmax.f32 %v1808_v11, 0.0 }
 0x28d   : > { %v1880_v7 = vmax.f32 %v1651_v41, 0.0  ;;  %2072 = vst.msk [vmem:[%s3105_s17 + $0x3d8] sm:$0xff] %vm1948_vm3, %v1943_v35 }
 0x28e   : > { %v1657_v46 = vpop.f32.mrf.mxu1  ;;  %v1481_v39 = vpop.f32.mrf.mxu2 }
 0x28f   : > { %2009 = vst.msk [vmem:[%s3105_s17 + $0x1e0] sm:$0xff] %vm1948_vm3, %v1880_v7  ;;  %v1482_v24 = vadd.f32 %v3800_v51, %v1481_v39 }
 0x290   : > { %v1323_v40 = vpop.f32.mrf.mxu0 }
 0x291   : > { %v1324_v43 = vadd.f32 %v3800_v51, %v1323_v40  ;;  %v1811_v0 = vadd.f32 %v1810_v34, %v1482_v24 }
 0x293   : > { %v1653_v50 = vadd.f32 %v1652_v16, %v1324_v43  ;;  %v1944_v45 = vmax.f32 %v1811_v0, 0.0 }
 0x295   : > { %v1881_v2 = vmax.f32 %v1653_v50, 0.0  ;;  %2073 = vst.msk [vmem:[%s3105_s17 + $0x3e0] sm:$0xff] %vm1948_vm3, %v1944_v45 }
 0x296   : > { %v1660_v54 = vpop.f32.mrf.mxu1  ;;  %v1483_v49 = vpop.f32.mrf.mxu2 }
 0x297   : > { %v1661_v48 = vadd.f32 %v1660_v54, %v1332_v44  ;;  %2010 = vst.msk [vmem:[%s3105_s17 + $0x1e8] sm:$0xff] %vm1948_vm3, %v1881_v2  ;;  %v1484_v60 = vadd.f32 %v3800_v51, %v1483_v49 }
 0x298   : > { %v1326_v52 = vpop.f32.mrf.mxu0 }
 0x299   : > { %v1884_v57 = vmax.f32 %v1661_v48, 0.0  ;;  %v1327_v53 = vadd.f32 %v3800_v51, %v1326_v52  ;;  %v1813_v14 = vadd.f32 %v1812_v47, %v1484_v60 }
 0x29b   : > { %2013 = vst.msk [vmem:[%s3105_s17 + $0x200] sm:$0xff] %vm1948_vm3, %v1884_v57  ;;  %v1656_v33 = vadd.f32 %v1655_v10, %v1327_v53  ;;  %v1945_v1 = vmax.f32 %v1813_v14, 0.0 }
 0x29d   : > { %v1882_v38 = vmax.f32 %v1656_v33, 0.0  ;;  %2074 = vst.msk [vmem:[%s3105_s17 + $0x3e8] sm:$0xff] %vm1948_vm3, %v1945_v1 }
 0x29e   : > { %v1662_v58 = vpop.f32.mrf.mxu1  ;;  %v1486_v6 = vpop.f32.mrf.mxu2 }
 0x29f   : > { %v1663_v59 = vadd.f32 %v1662_v58, %v1334_v56  ;;  %2011 = vst.msk [vmem:[%s3105_s17 + $0x1f0] sm:$0xff] %vm1948_vm3, %v1882_v38  ;;  %v1487_v63 = vadd.f32 %v3800_v51, %v1486_v6 }
 0x2a0   : > { %v1328_v37 = vpop.f32.mrf.mxu0 }
 0x2a1   : > { %v1885_v62 = vmax.f32 %v1663_v59, 0.0  ;;  %v1329_v12 = vadd.f32 %v3800_v51, %v1328_v37  ;;  %v1816_v31 = vadd.f32 %v1815_v55, %v1487_v63 }
 0x2a3   : > { %2014 = vst.msk [vmem:[%s3105_s17 + $0x208] sm:$0xff] %vm1948_vm3, %v1885_v62  ;;  %v1658_v4 = vadd.f32 %v1657_v46, %v1329_v12  ;;  %v1946_v5 = vmax.f32 %v1816_v31, 0.0 }
 0x2a5   : > { %v1883_v8 = vmax.f32 %v1658_v4, 0.0  ;;  %2075 = vst.msk [vmem:[%s3105_s17 + $0x3f0] sm:$0xff] %vm1948_vm3, %v1946_v5 }
 0x2a6   : > { %v1488_v42 = vpop.f32.mrf.mxu2 }
 0x2a7   : > { %2012 = vst.msk [vmem:[%s3105_s17 + $0x1f8] sm:$0xff] %vm1948_vm3, %v1883_v8  ;;  %v1489_v17 = vadd.f32 %v3800_v51, %v1488_v42 }
 0x2a9   : > { %v1818_v13 = vadd.f32 %v1817_v9, %v1489_v17 }
 0x2ab   : > { %v1947_v27 = vmax.f32 %v1818_v13, 0.0 }
 0x2ad   : > { %2076 = vst.msk [vmem:[%s3105_s17 + $0x3f8] sm:$0xff] %vm1948_vm3, %v1947_v27 }
 0x2ae PF: > { %s13_s12 = sadd.s32 1, %s2923_s12  }
 0x2af   : > { %p10_p4 = scmp.ge.s32.totalorder %s13_s12, 4  }
 0x2b1   :  { %12 = sbr.rel (!%p10_p4) target bundleno = 1 (0x1), region = 62 }

// kernel: slow_only_forward.17
= control target key start
LH: loop header
LB: loop body
LE: loop exit
PB: predicated region body
PF: predicated region fallthrough
CT: control target
= control target key end

     0   :  { %vm341_vm0 = vcmask 1043456   ;;  %vm244_vm1 = vcmask 64512   ;;  %vm578_vm2 = vcmask 31744   ;;  %s1319_s1 = inlined_call_operand.vmem [shape: bf16[8,4], index: 1, kind: input, shape index: {}]   ;;  %s1320_s0 = inlined_call_operand.vmem [shape: bf16[512,8], index: 0, kind: input, shape index: {}]   ;;  %s1321_s2 = inlined_call_operand.vmem [shape: f32[1,4], index: 2, kind: input, shape index: {}]   ;;  %s1322_s3 = inlined_call_operand.vmem [shape: f32[512,4], index: 3, kind: output, shape index: {}]  }
   0x1   :  { %v79_v0 = vld [vmem:[%s1319_s1] sm:$0xf]  ;;  %v808_v6 = vld [vmem:[%s1320_s0 + $0x8] sm:$0xff]  ;;  %v809_v10 = vld [vmem:[%s1320_s0 + $0x10] sm:$0xff] }
   0x2   :  { %v343_v1 = vsel %vm341_vm0, %v79_v0, 0  ;;  %v807_v2 = vld [vmem:[%s1320_s0] sm:$0xff]  ;;  %v816_v7 = vld [vmem:[%s1320_s0 + $0x48] sm:$0xff]  ;;  %v817_v11 = vld [vmem:[%s1320_s0 + $0x50] sm:$0xff] }
   0x3   :  { %v815_v3 = vld [vmem:[%s1320_s0 + $0x40] sm:$0xff]  ;;  %352 = vmatpush.bf16.msra.mxu0 %v343_v1  ;;  %839 = vmatpush.bf16.msra.mxu1 %v343_v1  ;;  %v824_v8 = vld [vmem:[%s1320_s0 + $0x88] sm:$0xff]  ;;  %v825_v12 = vld [vmem:[%s1320_s0 + $0x90] sm:$0xff] }
   0x4   :  { %v823_v4 = vld [vmem:[%s1320_s0 + $0x80] sm:$0xff]  ;;  %840 = vmatpush.bf16.msra.mxu2 %v343_v1  ;;  %841 = vmatpush.bf16.msra.mxu3 %v343_v1  ;;  %v832_v9 = vld [vmem:[%s1320_s0 + $0xc8] sm:$0xff]  ;;  %v833_v13 = vld [vmem:[%s1320_s0 + $0xd0] sm:$0xff] }
   0x5   :  { %v831_v5 = vld [vmem:[%s1320_s0 + $0xc0] sm:$0xff]  ;;  %v810_v14 = vld [vmem:[%s1320_s0 + $0x18] sm:$0xff]  ;;  %v812_v22 = vld [vmem:[%s1320_s0 + $0x28] sm:$0xff] }
   0x6   :  { %775 = vmatmul.msk.bf16.vlgmr.msra.gmra.mxu0 %vm244_vm1, %v807_v2  ;;  %783 = vmatmul.msk.bf16.vlgmr.msra.gmra.mxu1 %vm244_vm1, %v815_v3  ;;  %v818_v15 = vld [vmem:[%s1320_s0 + $0x58] sm:$0xff]  ;;  %v811_v18 = vld [vmem:[%s1320_s0 + $0x20] sm:$0xff]  ;;  %v820_v23 = vld [vmem:[%s1320_s0 + $0x68] sm:$0xff] }
   0x7   :  { %791 = vmatmul.msk.bf16.vlgmr.msra.gmra.mxu2 %vm244_vm1, %v823_v4  ;;  %799 = vmatmul.msk.bf16.vlgmr.msra.gmra.mxu3 %vm244_vm1, %v831_v5  ;;  %v826_v16 = vld [vmem:[%s1320_s0 + $0x98] sm:$0xff]  ;;  %v819_v19 = vld [vmem:[%s1320_s0 + $0x60] sm:$0xff]  ;;  %v828_v24 = vld [vmem:[%s1320_s0 + $0xa8] sm:$0xff] }
   0x8   :  { %v834_v17 = vld [vmem:[%s1320_s0 + $0xd8] sm:$0xff]  ;;  %v827_v20 = vld [vmem:[%s1320_s0 + $0xa0] sm:$0xff]  ;;  %v836_v25 = vld [vmem:[%s1320_s0 + $0xe8] sm:$0xff] }
   0x9   :  { %v835_v21 = vld [vmem:[%s1320_s0 + $0xe0] sm:$0xff]  ;;  %v813_v26 = vld [vmem:[%s1320_s0 + $0x30] sm:$0xff]  ;;  %v814_v30 = vld [vmem:[%s1320_s0 + $0x38] sm:$0xff] }
   0xa   :  { %v821_v27 = vld [vmem:[%s1320_s0 + $0x70] sm:$0xff]  ;;  %v822_v31 = vld [vmem:[%s1320_s0 + $0x78] sm:$0xff]  ;;  %v997_v34 = vld [vmem:[%s1321_s2] ss:$0 sm:$0xff] }
   0xb   :  { %v829_v28 = vld [vmem:[%s1320_s0 + $0xb0] sm:$0xff]  ;;  %v830_v32 = vld [vmem:[%s1320_s0 + $0xb8] sm:$0xff] }
   0xc   :  { %v837_v29 = vld [vmem:[%s1320_s0 + $0xf0] sm:$0xff]  ;;  %v838_v33 = vld [vmem:[%s1320_s0 + $0xf8] sm:$0xff] }
  0x16   :  { %776 = vmatmul.msk.bf16.gmra.mxu0 %vm244_vm1, %v808_v6  ;;  %784 = vmatmul.msk.bf16.gmra.mxu1 %vm244_vm1, %v816_v7 }
  0x17   :  { %792 = vmatmul.msk.bf16.gmra.mxu2 %vm244_vm1, %v824_v8  ;;  %800 = vmatmul.msk.bf16.gmra.mxu3 %vm244_vm1, %v832_v9 }
  0x26   :  { %777 = vmatmul.msk.bf16.gmra.mxu0 %vm244_vm1, %v809_v10  ;;  %785 = vmatmul.msk.bf16.gmra.mxu1 %vm244_vm1, %v817_v11 }
  0x27   :  { %793 = vmatmul.msk.bf16.gmra.mxu2 %vm244_vm1, %v825_v12  ;;  %801 = vmatmul.msk.bf16.gmra.mxu3 %vm244_vm1, %v833_v13 }
  0x36   :  { %778 = vmatmul.msk.bf16.gmra.mxu0 %vm244_vm1, %v810_v14  ;;  %786 = vmatmul.msk.bf16.gmra.mxu1 %vm244_vm1, %v818_v15 }
  0x37   :  { %794 = vmatmul.msk.bf16.gmra.mxu2 %vm244_vm1, %v826_v16  ;;  %802 = vmatmul.msk.bf16.gmra.mxu3 %vm244_vm1, %v834_v17 }
  0x46   :  { %779 = vmatmul.msk.bf16.gmra.mxu0 %vm244_vm1, %v811_v18  ;;  %787 = vmatmul.msk.bf16.gmra.mxu1 %vm244_vm1, %v819_v19 }
  0x47   :  { %795 = vmatmul.msk.bf16.gmra.mxu2 %vm244_vm1, %v827_v20  ;;  %803 = vmatmul.msk.bf16.gmra.mxu3 %vm244_vm1, %v835_v21 }
  0x56   :  { %780 = vmatmul.msk.bf16.gmra.mxu0 %vm244_vm1, %v812_v22  ;;  %788 = vmatmul.msk.bf16.gmra.mxu1 %vm244_vm1, %v820_v23 }
  0x57   :  { %796 = vmatmul.msk.bf16.gmra.mxu2 %vm244_vm1, %v828_v24  ;;  %804 = vmatmul.msk.bf16.gmra.mxu3 %vm244_vm1, %v836_v25 }
  0x66   :  { %781 = vmatmul.msk.bf16.gmra.mxu0 %vm244_vm1, %v813_v26  ;;  %789 = vmatmul.msk.bf16.gmra.mxu1 %vm244_vm1, %v821_v27 }
  0x67   :  { %797 = vmatmul.msk.bf16.gmra.mxu2 %vm244_vm1, %v829_v28  ;;  %805 = vmatmul.msk.bf16.gmra.mxu3 %vm244_vm1, %v837_v29 }
  0x76   :  { %782 = vmatmul.msk.bf16.gmra.mxu0 %vm244_vm1, %v814_v30  ;;  %790 = vmatmul.msk.bf16.gmra.mxu1 %vm244_vm1, %v822_v31 }
  0x77   :  { %798 = vmatmul.msk.bf16.gmra.mxu2 %vm244_vm1, %v830_v32  ;;  %806 = vmatmul.msk.bf16.gmra.mxu3 %vm244_vm1, %v838_v33 }
  0x83   :  { %v354_v35 = vpop.f32.mrf.mxu0  ;;  %v394_v36 = vpop.f32.mrf.mxu1 }
  0x84   :  { %v355_v37 = vadd.f32 %v997_v34, %v354_v35  ;;  %v395_v38 = vadd.f32 %v997_v34, %v394_v36 }
  0x86   :  { %v514_v39 = vmax.f32 %v355_v37, 0.0  ;;  %v530_v40 = vmax.f32 %v395_v38, 0.0 }
  0x88   :  { %579 = vst.msk [vmem:[%s1322_s3] sm:$0xff] %vm578_vm2, %v514_v39 }
  0x89   :  { %595 = vst.msk [vmem:[%s1322_s3 + $0x80] sm:$0xff] %vm578_vm2, %v530_v40 }
  0x8a   :  { %v434_v41 = vpop.f32.mrf.mxu2  ;;  %v474_v42 = vpop.f32.mrf.mxu3 }
  0x8b   :  { %v435_v43 = vadd.f32 %v997_v34, %v434_v41  ;;  %v475_v44 = vadd.f32 %v997_v34, %v474_v42  ;;  %v356_v45 = vpop.f32.mrf.mxu0  ;;  %v396_v46 = vpop.f32.mrf.mxu1 }
  0x8c   :  { %v357_v47 = vadd.f32 %v997_v34, %v356_v45  ;;  %v397_v48 = vadd.f32 %v997_v34, %v396_v46 }
  0x8d   :  { %v546_v49 = vmax.f32 %v435_v43, 0.0  ;;  %v562_v50 = vmax.f32 %v475_v44, 0.0 }
  0x8e   :  { %v515_v51 = vmax.f32 %v357_v47, 0.0  ;;  %v531_v52 = vmax.f32 %v397_v48, 0.0 }
  0x8f   :  { %611 = vst.msk [vmem:[%s1322_s3 + $0x100] sm:$0xff] %vm578_vm2, %v546_v49 }
  0x90   :  { %627 = vst.msk [vmem:[%s1322_s3 + $0x180] sm:$0xff] %vm578_vm2, %v562_v50 }
  0x91   :  { %580 = vst.msk [vmem:[%s1322_s3 + $0x8] sm:$0xff] %vm578_vm2, %v515_v51 }
  0x92   :  { %596 = vst.msk [vmem:[%s1322_s3 + $0x88] sm:$0xff] %vm578_vm2, %v531_v52  ;;  %v436_v53 = vpop.f32.mrf.mxu2  ;;  %v476_v54 = vpop.f32.mrf.mxu3 }
  0x93   :  { %v437_v55 = vadd.f32 %v997_v34, %v436_v53  ;;  %v477_v56 = vadd.f32 %v997_v34, %v476_v54  ;;  %v359_v57 = vpop.f32.mrf.mxu0  ;;  %v399_v58 = vpop.f32.mrf.mxu1 }
  0x94   :  { %v360_v59 = vadd.f32 %v997_v34, %v359_v57  ;;  %v400_v60 = vadd.f32 %v997_v34, %v399_v58 }
  0x95   :  { %v547_v61 = vmax.f32 %v437_v55, 0.0  ;;  %v563_v62 = vmax.f32 %v477_v56, 0.0 }
  0x96   :  { %v516_v63 = vmax.f32 %v360_v59, 0.0  ;;  %v532_v0 = vmax.f32 %v400_v60, 0.0 }
  0x97   :  { %612 = vst.msk [vmem:[%s1322_s3 + $0x108] sm:$0xff] %vm578_vm2, %v547_v61 }
  0x98   :  { %628 = vst.msk [vmem:[%s1322_s3 + $0x188] sm:$0xff] %vm578_vm2, %v563_v62 }
  0x99   :  { %581 = vst.msk [vmem:[%s1322_s3 + $0x10] sm:$0xff] %vm578_vm2, %v516_v63 }
  0x9a   :  { %597 = vst.msk [vmem:[%s1322_s3 + $0x90] sm:$0xff] %vm578_vm2, %v532_v0  ;;  %v439_v1 = vpop.f32.mrf.mxu2  ;;  %v479_v2 = vpop.f32.mrf.mxu3 }
  0x9b   :  { %v440_v3 = vadd.f32 %v997_v34, %v439_v1  ;;  %v480_v4 = vadd.f32 %v997_v34, %v479_v2  ;;  %v361_v5 = vpop.f32.mrf.mxu0  ;;  %v401_v6 = vpop.f32.mrf.mxu1 }
  0x9c   :  { %v362_v7 = vadd.f32 %v997_v34, %v361_v5  ;;  %v402_v8 = vadd.f32 %v997_v34, %v401_v6 }
  0x9d   :  { %v548_v9 = vmax.f32 %v440_v3, 0.0  ;;  %v564_v10 = vmax.f32 %v480_v4, 0.0 }
  0x9e   :  { %v517_v11 = vmax.f32 %v362_v7, 0.0  ;;  %v533_v12 = vmax.f32 %v402_v8, 0.0 }
  0x9f   :  { %613 = vst.msk [vmem:[%s1322_s3 + $0x110] sm:$0xff] %vm578_vm2, %v548_v9 }
  0xa0   :  { %629 = vst.msk [vmem:[%s1322_s3 + $0x190] sm:$0xff] %vm578_vm2, %v564_v10 }
  0xa1   :  { %582 = vst.msk [vmem:[%s1322_s3 + $0x18] sm:$0xff] %vm578_vm2, %v517_v11 }
  0xa2   :  { %598 = vst.msk [vmem:[%s1322_s3 + $0x98] sm:$0xff] %vm578_vm2, %v533_v12  ;;  %v441_v13 = vpop.f32.mrf.mxu2  ;;  %v481_v14 = vpop.f32.mrf.mxu3 }
  0xa3   :  { %v442_v15 = vadd.f32 %v997_v34, %v441_v13  ;;  %v482_v16 = vadd.f32 %v997_v34, %v481_v14  ;;  %v364_v17 = vpop.f32.mrf.mxu0  ;;  %v404_v18 = vpop.f32.mrf.mxu1 }
  0xa4   :  { %v365_v19 = vadd.f32 %v997_v34, %v364_v17  ;;  %v405_v20 = vadd.f32 %v997_v34, %v404_v18 }
  0xa5   :  { %v549_v21 = vmax.f32 %v442_v15, 0.0  ;;  %v565_v22 = vmax.f32 %v482_v16, 0.0 }
  0xa6   :  { %v518_v23 = vmax.f32 %v365_v19, 0.0  ;;  %v534_v24 = vmax.f32 %v405_v20, 0.0 }
  0xa7   :  { %614 = vst.msk [vmem:[%s1322_s3 + $0x118] sm:$0xff] %vm578_vm2, %v549_v21 }
  0xa8   :  { %630 = vst.msk [vmem:[%s1322_s3 + $0x198] sm:$0xff] %vm578_vm2, %v565_v22 }
  0xa9   :  { %583 = vst.msk [vmem:[%s1322_s3 + $0x20] sm:$0xff] %vm578_vm2, %v518_v23 }
  0xaa   :  { %599 = vst.msk [vmem:[%s1322_s3 + $0xa0] sm:$0xff] %vm578_vm2, %v534_v24  ;;  %v444_v25 = vpop.f32.mrf.mxu2  ;;  %v484_v26 = vpop.f32.mrf.mxu3 }
  0xab   :  { %v445_v27 = vadd.f32 %v997_v34, %v444_v25  ;;  %v485_v28 = vadd.f32 %v997_v34, %v484_v26  ;;  %v366_v29 = vpop.f32.mrf.mxu0  ;;  %v406_v30 = vpop.f32.mrf.mxu1 }
  0xac   :  { %v367_v31 = vadd.f32 %v997_v34, %v366_v29  ;;  %v407_v32 = vadd.f32 %v997_v34, %v406_v30 }
  0xad   :  { %v550_v33 = vmax.f32 %v445_v27, 0.0  ;;  %v566_v35 = vmax.f32 %v485_v28, 0.0 }
  0xae   :  { %v519_v36 = vmax.f32 %v367_v31, 0.0  ;;  %v535_v37 = vmax.f32 %v407_v32, 0.0 }
  0xaf   :  { %615 = vst.msk [vmem:[%s1322_s3 + $0x120] sm:$0xff] %vm578_vm2, %v550_v33 }
  0xb0   :  { %631 = vst.msk [vmem:[%s1322_s3 + $0x1a0] sm:$0xff] %vm578_vm2, %v566_v35 }
  0xb1   :  { %584 = vst.msk [vmem:[%s1322_s3 + $0x28] sm:$0xff] %vm578_vm2, %v519_v36 }
  0xb2   :  { %600 = vst.msk [vmem:[%s1322_s3 + $0xa8] sm:$0xff] %vm578_vm2, %v535_v37  ;;  %v446_v38 = vpop.f32.mrf.mxu2  ;;  %v486_v39 = vpop.f32.mrf.mxu3 }
  0xb3   :  { %v447_v40 = vadd.f32 %v997_v34, %v446_v38  ;;  %v487_v41 = vadd.f32 %v997_v34, %v486_v39  ;;  %v369_v42 = vpop.f32.mrf.mxu0  ;;  %v409_v43 = vpop.f32.mrf.mxu1 }
  0xb4   :  { %v370_v44 = vadd.f32 %v997_v34, %v369_v42  ;;  %v410_v45 = vadd.f32 %v997_v34, %v409_v43 }
  0xb5   :  { %v551_v46 = vmax.f32 %v447_v40, 0.0  ;;  %v567_v47 = vmax.f32 %v487_v41, 0.0 }
  0xb6   :  { %v520_v48 = vmax.f32 %v370_v44, 0.0  ;;  %v536_v49 = vmax.f32 %v410_v45, 0.0 }
  0xb7   :  { %616 = vst.msk [vmem:[%s1322_s3 + $0x128] sm:$0xff] %vm578_vm2, %v551_v46 }
  0xb8   :  { %632 = vst.msk [vmem:[%s1322_s3 + $0x1a8] sm:$0xff] %vm578_vm2, %v567_v47 }
  0xb9   :  { %585 = vst.msk [vmem:[%s1322_s3 + $0x30] sm:$0xff] %vm578_vm2, %v520_v48 }
  0xba   :  { %601 = vst.msk [vmem:[%s1322_s3 + $0xb0] sm:$0xff] %vm578_vm2, %v536_v49  ;;  %v449_v50 = vpop.f32.mrf.mxu2  ;;  %v489_v51 = vpop.f32.mrf.mxu3 }
  0xbb   :  { %v450_v52 = vadd.f32 %v997_v34, %v449_v50  ;;  %v490_v53 = vadd.f32 %v997_v34, %v489_v51  ;;  %v371_v54 = vpop.f32.mrf.mxu0  ;;  %v411_v55 = vpop.f32.mrf.mxu1 }
  0xbc   :  { %v372_v56 = vadd.f32 %v997_v34, %v371_v54  ;;  %v412_v57 = vadd.f32 %v997_v34, %v411_v55 }
  0xbd   :  { %v552_v58 = vmax.f32 %v450_v52, 0.0  ;;  %v568_v59 = vmax.f32 %v490_v53, 0.0 }
  0xbe   :  { %v521_v60 = vmax.f32 %v372_v56, 0.0  ;;  %v537_v61 = vmax.f32 %v412_v57, 0.0 }
  0xbf   :  { %617 = vst.msk [vmem:[%s1322_s3 + $0x130] sm:$0xff] %vm578_vm2, %v552_v58 }
  0xc0   :  { %633 = vst.msk [vmem:[%s1322_s3 + $0x1b0] sm:$0xff] %vm578_vm2, %v568_v59 }
  0xc1   :  { %586 = vst.msk [vmem:[%s1322_s3 + $0x38] sm:$0xff] %vm578_vm2, %v521_v60 }
  0xc2   :  { %602 = vst.msk [vmem:[%s1322_s3 + $0xb8] sm:$0xff] %vm578_vm2, %v537_v61  ;;  %v451_v62 = vpop.f32.mrf.mxu2  ;;  %v491_v63 = vpop.f32.mrf.mxu3 }
  0xc3   :  { %v452_v0 = vadd.f32 %v997_v34, %v451_v62  ;;  %v492_v1 = vadd.f32 %v997_v34, %v491_v63  ;;  %v374_v2 = vpop.f32.mrf.mxu0  ;;  %v414_v3 = vpop.f32.mrf.mxu1 }
  0xc4   :  { %v375_v4 = vadd.f32 %v997_v34, %v374_v2  ;;  %v415_v5 = vadd.f32 %v997_v34, %v414_v3 }
  0xc5   :  { %v553_v6 = vmax.f32 %v452_v0, 0.0  ;;  %v569_v7 = vmax.f32 %v492_v1, 0.0 }
  0xc6   :  { %v522_v8 = vmax.f32 %v375_v4, 0.0  ;;  %v538_v9 = vmax.f32 %v415_v5, 0.0 }
  0xc7   :  { %618 = vst.msk [vmem:[%s1322_s3 + $0x138] sm:$0xff] %vm578_vm2, %v553_v6 }
  0xc8   :  { %634 = vst.msk [vmem:[%s1322_s3 + $0x1b8] sm:$0xff] %vm578_vm2, %v569_v7 }
  0xc9   :  { %587 = vst.msk [vmem:[%s1322_s3 + $0x40] sm:$0xff] %vm578_vm2, %v522_v8 }
  0xca   :  { %603 = vst.msk [vmem:[%s1322_s3 + $0xc0] sm:$0xff] %vm578_vm2, %v538_v9  ;;  %v454_v10 = vpop.f32.mrf.mxu2  ;;  %v494_v11 = vpop.f32.mrf.mxu3 }
  0xcb   :  { %v455_v12 = vadd.f32 %v997_v34, %v454_v10  ;;  %v495_v13 = vadd.f32 %v997_v34, %v494_v11  ;;  %v376_v14 = vpop.f32.mrf.mxu0  ;;  %v416_v15 = vpop.f32.mrf.mxu1 }
  0xcc   :  { %v377_v16 = vadd.f32 %v997_v34, %v376_v14  ;;  %v417_v17 = vadd.f32 %v997_v34, %v416_v15 }
  0xcd   :  { %v554_v18 = vmax.f32 %v455_v12, 0.0  ;;  %v570_v19 = vmax.f32 %v495_v13, 0.0 }
  0xce   :  { %v523_v20 = vmax.f32 %v377_v16, 0.0  ;;  %v539_v21 = vmax.f32 %v417_v17, 0.0 }
  0xcf   :  { %619 = vst.msk [vmem:[%s1322_s3 + $0x140] sm:$0xff] %vm578_vm2, %v554_v18 }
  0xd0   :  { %635 = vst.msk [vmem:[%s1322_s3 + $0x1c0] sm:$0xff] %vm578_vm2, %v570_v19 }
  0xd1   :  { %588 = vst.msk [vmem:[%s1322_s3 + $0x48] sm:$0xff] %vm578_vm2, %v523_v20 }
  0xd2   :  { %604 = vst.msk [vmem:[%s1322_s3 + $0xc8] sm:$0xff] %vm578_vm2, %v539_v21  ;;  %v456_v22 = vpop.f32.mrf.mxu2  ;;  %v496_v23 = vpop.f32.mrf.mxu3 }
  0xd3   :  { %v457_v24 = vadd.f32 %v997_v34, %v456_v22  ;;  %v497_v25 = vadd.f32 %v997_v34, %v496_v23  ;;  %v379_v26 = vpop.f32.mrf.mxu0  ;;  %v419_v27 = vpop.f32.mrf.mxu1 }
  0xd4   :  { %v380_v28 = vadd.f32 %v997_v34, %v379_v26  ;;  %v420_v29 = vadd.f32 %v997_v34, %v419_v27 }
  0xd5   :  { %v555_v30 = vmax.f32 %v457_v24, 0.0  ;;  %v571_v31 = vmax.f32 %v497_v25, 0.0 }
  0xd6   :  { %v524_v32 = vmax.f32 %v380_v28, 0.0  ;;  %v540_v33 = vmax.f32 %v420_v29, 0.0 }
  0xd7   :  { %620 = vst.msk [vmem:[%s1322_s3 + $0x148] sm:$0xff] %vm578_vm2, %v555_v30 }
  0xd8   :  { %636 = vst.msk [vmem:[%s1322_s3 + $0x1c8] sm:$0xff] %vm578_vm2, %v571_v31 }
  0xd9   :  { %589 = vst.msk [vmem:[%s1322_s3 + $0x50] sm:$0xff] %vm578_vm2, %v524_v32 }
  0xda   :  { %605 = vst.msk [vmem:[%s1322_s3 + $0xd0] sm:$0xff] %vm578_vm2, %v540_v33  ;;  %v459_v35 = vpop.f32.mrf.mxu2  ;;  %v499_v36 = vpop.f32.mrf.mxu3 }
  0xdb   :  { %v460_v37 = vadd.f32 %v997_v34, %v459_v35  ;;  %v500_v38 = vadd.f32 %v997_v34, %v499_v36  ;;  %v381_v39 = vpop.f32.mrf.mxu0  ;;  %v421_v40 = vpop.f32.mrf.mxu1 }
  0xdc   :  { %v382_v41 = vadd.f32 %v997_v34, %v381_v39  ;;  %v422_v42 = vadd.f32 %v997_v34, %v421_v40 }
  0xdd   :  { %v556_v43 = vmax.f32 %v460_v37, 0.0  ;;  %v572_v44 = vmax.f32 %v500_v38, 0.0 }
  0xde   :  { %v525_v45 = vmax.f32 %v382_v41, 0.0  ;;  %v541_v46 = vmax.f32 %v422_v42, 0.0 }
  0xdf   :  { %621 = vst.msk [vmem:[%s1322_s3 + $0x150] sm:$0xff] %vm578_vm2, %v556_v43 }
  0xe0   :  { %637 = vst.msk [vmem:[%s1322_s3 + $0x1d0] sm:$0xff] %vm578_vm2, %v572_v44 }
  0xe1   :  { %590 = vst.msk [vmem:[%s1322_s3 + $0x58] sm:$0xff] %vm578_vm2, %v525_v45 }
  0xe2   :  { %606 = vst.msk [vmem:[%s1322_s3 + $0xd8] sm:$0xff] %vm578_vm2, %v541_v46  ;;  %v461_v47 = vpop.f32.mrf.mxu2  ;;  %v501_v48 = vpop.f32.mrf.mxu3 }
  0xe3   :  { %v462_v49 = vadd.f32 %v997_v34, %v461_v47  ;;  %v502_v50 = vadd.f32 %v997_v34, %v501_v48  ;;  %v384_v51 = vpop.f32.mrf.mxu0  ;;  %v424_v52 = vpop.f32.mrf.mxu1 }
  0xe4   :  { %v385_v53 = vadd.f32 %v997_v34, %v384_v51  ;;  %v425_v54 = vadd.f32 %v997_v34, %v424_v52 }
  0xe5   :  { %v557_v55 = vmax.f32 %v462_v49, 0.0  ;;  %v573_v56 = vmax.f32 %v502_v50, 0.0 }
  0xe6   :  { %v526_v57 = vmax.f32 %v385_v53, 0.0  ;;  %v542_v58 = vmax.f32 %v425_v54, 0.0 }
  0xe7   :  { %622 = vst.msk [vmem:[%s1322_s3 + $0x158] sm:$0xff] %vm578_vm2, %v557_v55 }
  0xe8   :  { %638 = vst.msk [vmem:[%s1322_s3 + $0x1d8] sm:$0xff] %vm578_vm2, %v573_v56 }
  0xe9   :  { %591 = vst.msk [vmem:[%s1322_s3 + $0x60] sm:$0xff] %vm578_vm2, %v526_v57 }
  0xea   :  { %607 = vst.msk [vmem:[%s1322_s3 + $0xe0] sm:$0xff] %vm578_vm2, %v542_v58  ;;  %v464_v59 = vpop.f32.mrf.mxu2  ;;  %v504_v60 = vpop.f32.mrf.mxu3 }
  0xeb   :  { %v465_v61 = vadd.f32 %v997_v34, %v464_v59  ;;  %v505_v62 = vadd.f32 %v997_v34, %v504_v60  ;;  %v386_v63 = vpop.f32.mrf.mxu0  ;;  %v426_v0 = vpop.f32.mrf.mxu1 }
  0xec   :  { %v387_v1 = vadd.f32 %v997_v34, %v386_v63  ;;  %v427_v2 = vadd.f32 %v997_v34, %v426_v0 }
  0xed   :  { %v558_v3 = vmax.f32 %v465_v61, 0.0  ;;  %v574_v4 = vmax.f32 %v505_v62, 0.0 }
  0xee   :  { %v527_v5 = vmax.f32 %v387_v1, 0.0  ;;  %v543_v6 = vmax.f32 %v427_v2, 0.0 }
  0xef   :  { %623 = vst.msk [vmem:[%s1322_s3 + $0x160] sm:$0xff] %vm578_vm2, %v558_v3 }
  0xf0   :  { %639 = vst.msk [vmem:[%s1322_s3 + $0x1e0] sm:$0xff] %vm578_vm2, %v574_v4 }
  0xf1   :  { %592 = vst.msk [vmem:[%s1322_s3 + $0x68] sm:$0xff] %vm578_vm2, %v527_v5 }
  0xf2   :  { %608 = vst.msk [vmem:[%s1322_s3 + $0xe8] sm:$0xff] %vm578_vm2, %v543_v6  ;;  %v466_v7 = vpop.f32.mrf.mxu2  ;;  %v506_v8 = vpop.f32.mrf.mxu3 }
  0xf3   :  { %v467_v9 = vadd.f32 %v997_v34, %v466_v7  ;;  %v507_v10 = vadd.f32 %v997_v34, %v506_v8  ;;  %v389_v11 = vpop.f32.mrf.mxu0  ;;  %v429_v12 = vpop.f32.mrf.mxu1 }
  0xf4   :  { %v390_v13 = vadd.f32 %v997_v34, %v389_v11  ;;  %v430_v14 = vadd.f32 %v997_v34, %v429_v12 }
  0xf5   :  { %v559_v15 = vmax.f32 %v467_v9, 0.0  ;;  %v575_v16 = vmax.f32 %v507_v10, 0.0 }
  0xf6   :  { %v528_v17 = vmax.f32 %v390_v13, 0.0  ;;  %v544_v18 = vmax.f32 %v430_v14, 0.0 }
  0xf7   :  { %624 = vst.msk [vmem:[%s1322_s3 + $0x168] sm:$0xff] %vm578_vm2, %v559_v15 }
  0xf8   :  { %640 = vst.msk [vmem:[%s1322_s3 + $0x1e8] sm:$0xff] %vm578_vm2, %v575_v16 }
  0xf9   :  { %593 = vst.msk [vmem:[%s1322_s3 + $0x70] sm:$0xff] %vm578_vm2, %v528_v17 }
  0xfa   :  { %609 = vst.msk [vmem:[%s1322_s3 + $0xf0] sm:$0xff] %vm578_vm2, %v544_v18  ;;  %v469_v19 = vpop.f32.mrf.mxu2  ;;  %v509_v20 = vpop.f32.mrf.mxu3 }
  0xfb   :  { %v470_v21 = vadd.f32 %v997_v34, %v469_v19  ;;  %v510_v22 = vadd.f32 %v997_v34, %v509_v20  ;;  %v391_v23 = vpop.f32.mrf.mxu0  ;;  %v431_v24 = vpop.f32.mrf.mxu1 }
  0xfc   :  { %v392_v25 = vadd.f32 %v997_v34, %v391_v23  ;;  %v432_v26 = vadd.f32 %v997_v34, %v431_v24 }
  0xfd   :  { %v560_v27 = vmax.f32 %v470_v21, 0.0  ;;  %v576_v28 = vmax.f32 %v510_v22, 0.0 }
  0xfe   :  { %v529_v29 = vmax.f32 %v392_v25, 0.0  ;;  %v545_v30 = vmax.f32 %v432_v26, 0.0 }
  0xff   :  { %625 = vst.msk [vmem:[%s1322_s3 + $0x170] sm:$0xff] %vm578_vm2, %v560_v27 }
 0x100   :  { %641 = vst.msk [vmem:[%s1322_s3 + $0x1f0] sm:$0xff] %vm578_vm2, %v576_v28 }
 0x101   :  { %594 = vst.msk [vmem:[%s1322_s3 + $0x78] sm:$0xff] %vm578_vm2, %v529_v29 }
 0x102   :  { %610 = vst.msk [vmem:[%s1322_s3 + $0xf8] sm:$0xff] %vm578_vm2, %v545_v30  ;;  %v471_v31 = vpop.f32.mrf.mxu2  ;;  %v511_v32 = vpop.f32.mrf.mxu3 }
 0x103   :  { %v472_v33 = vadd.f32 %v997_v34, %v471_v31  ;;  %v512_v35 = vadd.f32 %v997_v34, %v511_v32 }
 0x105   :  { %v561_v36 = vmax.f32 %v472_v33, 0.0  ;;  %v577_v37 = vmax.f32 %v512_v35, 0.0 }
 0x107   :  { %626 = vst.msk [vmem:[%s1322_s3 + $0x178] sm:$0xff] %vm578_vm2, %v561_v36 }
 0x108   :  { %642 = vst.msk [vmem:[%s1322_s3 + $0x1f8] sm:$0xff] %vm578_vm2, %v577_v37 }

// kernel: slow_only_forward.16
= control target key start
LH: loop header
LB: loop body
LE: loop exit
PB: predicated region body
PF: predicated region fallthrough
CT: control target
= control target key end

     0   :  { %vm1120_vm0 = vcmask 64512   ;;  %s3223_s0 = inlined_call_operand.vmem [shape: f32[512,8], index: 0, kind: input, shape index: {}]   ;;  %s3224_s1 = inlined_call_operand.vmem [shape: f32[512,8], index: 1, kind: input, shape index: {}]   ;;  %s3225_s2 = inlined_call_operand.vmem [shape: f32[512,8], index: 2, kind: input, shape index: {}]   ;;  %s3226_s3 = inlined_call_operand.vmem [shape: f32[512,8], index: 3, kind: input, shape index: {}]   ;;  %s3227_s4 = inlined_call_operand.vmem [shape: f32[512,8], index: 4, kind: input, shape index: {}]   ;;  %s3228_s5 = inlined_call_operand.vmem [shape: f32[512,8], index: 5, kind: input, shape index: {}]   ;;  %s3229_s6 = inlined_call_operand.vmem [shape: f32[512,8], index: 6, kind: input, shape index: {}]   ;;  %s3230_s7 = inlined_call_operand.vmem [shape: f32[512,8], index: 7, kind: input, shape index: {}]   ;;  %s3231_s8 = inlined_call_operand.vmem [shape: f32[512,8], index: 8, kind: input, shape index: {}]   ;;  %s3232_s9 = inlined_call_operand.vmem [shape: f32[512,8], index: 9, kind: output, shape index: {}]  }
   0x1   :  { %v32_v0 = vld [vmem:[%s3223_s0] sm:$0xff]  ;;  %v33_v6 = vld [vmem:[%s3223_s0 + $0x8] sm:$0xff]  ;;  %v34_v15 = vld [vmem:[%s3223_s0 + $0x10] sm:$0xff] }
   0x2   :  { %v96_v1 = vld [vmem:[%s3224_s1] sm:$0xff]  ;;  %v97_v7 = vld [vmem:[%s3224_s1 + $0x8] sm:$0xff]  ;;  %v98_v16 = vld [vmem:[%s3224_s1 + $0x10] sm:$0xff] }
   0x3   :  { %v224_v2 = vld [vmem:[%s3225_s2] sm:$0xff]  ;;  %v160_v3 = vmax.f32 %v32_v0, %v96_v1  ;;  %v225_v8 = vld [vmem:[%s3225_s2 + $0x8] sm:$0xff]  ;;  %v161_v10 = vmax.f32 %v33_v6, %v97_v7  ;;  %v226_v17 = vld [vmem:[%s3225_s2 + $0x10] sm:$0xff]  ;;  %v162_v20 = vmax.f32 %v34_v15, %v98_v16 }
   0x4   :  { %v352_v4 = vld [vmem:[%s3226_s3] sm:$0xff]  ;;  %v353_v13 = vld [vmem:[%s3226_s3 + $0x8] sm:$0xff]  ;;  %v354_v24 = vld [vmem:[%s3226_s3 + $0x10] sm:$0xff] }
   0x5   :  { %v288_v5 = vmax.f32 %v160_v3, %v224_v2  ;;  %v480_v9 = vld [vmem:[%s3227_s4] sm:$0xff]  ;;  %v289_v14 = vmax.f32 %v161_v10, %v225_v8  ;;  %v481_v19 = vld [vmem:[%s3227_s4 + $0x8] sm:$0xff]  ;;  %v290_v26 = vmax.f32 %v162_v20, %v226_v17  ;;  %v35_v27 = vld [vmem:[%s3223_s0 + $0x18] sm:$0xff] }
   0x6   :  { %v608_v12 = vld [vmem:[%s3228_s5] sm:$0xff]  ;;  %v609_v23 = vld [vmem:[%s3228_s5 + $0x8] sm:$0xff]  ;;  %v99_v28 = vld [vmem:[%s3224_s1 + $0x18] sm:$0xff] }
   0x7   :  { %v416_v11 = vmax.f32 %v288_v5, %v352_v4  ;;  %v736_v21 = vld [vmem:[%s3229_s6] sm:$0xff]  ;;  %v417_v22 = vmax.f32 %v289_v14, %v353_v13  ;;  %v227_v29 = vld [vmem:[%s3225_s2 + $0x18] sm:$0xff]  ;;  %v482_v33 = vld [vmem:[%s3227_s4 + $0x10] sm:$0xff]  ;;  %v163_v34 = vmax.f32 %v35_v27, %v99_v28  ;;  %v418_v37 = vmax.f32 %v290_v26, %v354_v24 }
   0x8   :  { %v864_v30 = vld [vmem:[%s3230_s7] sm:$0xff]  ;;  %v737_v36 = vld [vmem:[%s3229_s6 + $0x8] sm:$0xff]  ;;  %v610_v38 = vld [vmem:[%s3228_s5 + $0x10] sm:$0xff] }
   0x9   :  { %v544_v18 = vmax.f32 %v416_v11, %v480_v9  ;;  %v992_v31 = vld [vmem:[%s3231_s8] sm:$0xff]  ;;  %v545_v32 = vmax.f32 %v417_v22, %v481_v19  ;;  %v355_v39 = vld [vmem:[%s3226_s3 + $0x18] sm:$0xff]  ;;  %v291_v41 = vmax.f32 %v163_v34, %v227_v29  ;;  %v865_v46 = vld [vmem:[%s3230_s7 + $0x8] sm:$0xff]  ;;  %v546_v48 = vmax.f32 %v418_v37, %v482_v33 }
   0xa   :  { %v36_v42 = vld [vmem:[%s3223_s0 + $0x20] sm:$0xff]  ;;  %v993_v47 = vld [vmem:[%s3231_s8 + $0x8] sm:$0xff]  ;;  %v483_v49 = vld [vmem:[%s3227_s4 + $0x18] sm:$0xff] }
   0xb   :  { %v672_v25 = vmax.f32 %v544_v18, %v608_v12  ;;  %v673_v40 = vmax.f32 %v545_v32, %v609_v23  ;;  %v100_v43 = vld [vmem:[%s3224_s1 + $0x20] sm:$0xff]  ;;  %v738_v52 = vld [vmem:[%s3229_s6 + $0x10] sm:$0xff]  ;;  %v419_v53 = vmax.f32 %v291_v41, %v355_v39  ;;  %v611_v54 = vld [vmem:[%s3228_s5 + $0x18] sm:$0xff]  ;;  %v674_v57 = vmax.f32 %v546_v48, %v610_v38 }
   0xc   :  { %v228_v44 = vld [vmem:[%s3225_s2 + $0x20] sm:$0xff]  ;;  %v164_v50 = vmax.f32 %v36_v42, %v100_v43  ;;  %v37_v59 = vld [vmem:[%s3223_s0 + $0x28] sm:$0xff]  ;;  %v866_v63 = vld [vmem:[%s3230_s7 + $0x10] sm:$0xff] }
   0xd   :  { %v800_v35 = vmax.f32 %v672_v25, %v736_v21  ;;  %v801_v51 = vmax.f32 %v673_v40, %v737_v36  ;;  %v356_v55 = vld [vmem:[%s3226_s3 + $0x20] sm:$0xff]  ;;  %v101_v60 = vld [vmem:[%s3224_s1 + $0x28] sm:$0xff]  ;;  %v994_v0 = vld [vmem:[%s3231_s8 + $0x10] sm:$0xff]  ;;  %v547_v1 = vmax.f32 %v419_v53, %v483_v49  ;;  %v802_v4 = vmax.f32 %v674_v57, %v738_v52 }
   0xe   :  { %v292_v58 = vmax.f32 %v164_v50, %v228_v44  ;;  %v229_v61 = vld [vmem:[%s3225_s2 + $0x28] sm:$0xff]  ;;  %v484_v2 = vld [vmem:[%s3227_s4 + $0x20] sm:$0xff]  ;;  %v165_v3 = vmax.f32 %v37_v59, %v101_v60  ;;  %v739_v5 = vld [vmem:[%s3229_s6 + $0x18] sm:$0xff] }
   0xf   :  { %v928_v45 = vmax.f32 %v800_v35, %v864_v30  ;;  %v929_v62 = vmax.f32 %v801_v51, %v865_v46  ;;  %v612_v7 = vld [vmem:[%s3228_s5 + $0x20] sm:$0xff]  ;;  %v357_v8 = vld [vmem:[%s3226_s3 + $0x28] sm:$0xff]  ;;  %v675_v10 = vmax.f32 %v547_v1, %v611_v54  ;;  %v38_v12 = vld [vmem:[%s3223_s0 + $0x30] sm:$0xff]  ;;  %v930_v15 = vmax.f32 %v802_v4, %v866_v63 }
  0x10   :  { %v420_v6 = vmax.f32 %v292_v58, %v356_v55  ;;  %v293_v11 = vmax.f32 %v165_v3, %v229_v61  ;;  %v102_v13 = vld [vmem:[%s3224_s1 + $0x30] sm:$0xff]  ;;  %v867_v16 = vld [vmem:[%s3230_s7 + $0x18] sm:$0xff]  ;;  %v485_v19 = vld [vmem:[%s3227_s4 + $0x28] sm:$0xff] }
  0x11   :  { %v1056_v56 = vmax.f32 %v928_v45, %v992_v31  ;;  %v1057_v9 = vmax.f32 %v929_v62, %v993_v47  ;;  %v230_v14 = vld [vmem:[%s3225_s2 + $0x30] sm:$0xff]  ;;  %v995_v17 = vld [vmem:[%s3231_s8 + $0x18] sm:$0xff]  ;;  %v166_v20 = vmax.f32 %v38_v12, %v102_v13  ;;  %v803_v21 = vmax.f32 %v675_v10, %v739_v5  ;;  %v740_v22 = vld [vmem:[%s3229_s6 + $0x20] sm:$0xff] }
  0x12   :  { %v548_v18 = vmax.f32 %v420_v6, %v484_v2  ;;  %v421_v23 = vmax.f32 %v293_v11, %v357_v8  ;;  %v613_v24 = vld [vmem:[%s3228_s5 + $0x28] sm:$0xff]  ;;  %v358_v25 = vld [vmem:[%s3226_s3 + $0x30] sm:$0xff]  ;;  %v1058_v26 = vmax.f32 %v930_v15, %v994_v0  ;;  %v39_v29 = vld [vmem:[%s3223_s0 + $0x38] sm:$0xff] }
  0x13   :  { %1121 = vst.msk [vmem:[%s3232_s9] sm:$0xff] %vm1120_vm0, %v1056_v56  ;;  %v294_v28 = vmax.f32 %v166_v20, %v230_v14  ;;  %v103_v30 = vld [vmem:[%s3224_s1 + $0x38] sm:$0xff]  ;;  %v931_v32 = vmax.f32 %v803_v21, %v867_v16  ;;  %v868_v33 = vld [vmem:[%s3230_s7 + $0x20] sm:$0xff]  ;;  %v486_v36 = vld [vmem:[%s3227_s4 + $0x30] sm:$0xff] }
  0x14   :  { %1122 = vst.msk [vmem:[%s3232_s9 + $0x8] sm:$0xff] %vm1120_vm0, %v1057_v9  ;;  %v676_v27 = vmax.f32 %v548_v18, %v612_v7  ;;  %v231_v31 = vld [vmem:[%s3225_s2 + $0x38] sm:$0xff]  ;;  %v996_v34 = vld [vmem:[%s3231_s8 + $0x20] sm:$0xff]  ;;  %v549_v35 = vmax.f32 %v421_v23, %v485_v19  ;;  %v167_v37 = vmax.f32 %v39_v29, %v103_v30  ;;  %v741_v39 = vld [vmem:[%s3229_s6 + $0x28] sm:$0xff] }
  0x15   :  { %1123 = vst.msk [vmem:[%s3232_s9 + $0x10] sm:$0xff] %vm1120_vm0, %v1058_v26  ;;  %v422_v40 = vmax.f32 %v294_v28, %v358_v25  ;;  %v614_v41 = vld [vmem:[%s3228_s5 + $0x30] sm:$0xff]  ;;  %v359_v42 = vld [vmem:[%s3226_s3 + $0x38] sm:$0xff]  ;;  %v1059_v43 = vmax.f32 %v931_v32, %v995_v17  ;;  %v40_v46 = vld [vmem:[%s3223_s0 + $0x40] sm:$0xff] }
  0x16   :  { %v804_v38 = vmax.f32 %v676_v27, %v740_v22  ;;  %v677_v44 = vmax.f32 %v549_v35, %v613_v24  ;;  %v295_v45 = vmax.f32 %v167_v37, %v231_v31  ;;  %v104_v47 = vld [vmem:[%s3224_s1 + $0x40] sm:$0xff]  ;;  %v869_v50 = vld [vmem:[%s3230_s7 + $0x28] sm:$0xff]  ;;  %v487_v53 = vld [vmem:[%s3227_s4 + $0x38] sm:$0xff] }
  0x17   :  { %v232_v48 = vld [vmem:[%s3225_s2 + $0x40] sm:$0xff]  ;;  %v997_v51 = vld [vmem:[%s3231_s8 + $0x28] sm:$0xff]  ;;  %v550_v52 = vmax.f32 %v422_v40, %v486_v36  ;;  %v168_v54 = vmax.f32 %v40_v46, %v104_v47  ;;  %1124 = vst.msk [vmem:[%s3232_s9 + $0x18] sm:$0xff] %vm1120_vm0, %v1059_v43  ;;  %v742_v56 = vld [vmem:[%s3229_s6 + $0x30] sm:$0xff] }
  0x18   :  { %v932_v49 = vmax.f32 %v804_v38, %v868_v33  ;;  %v805_v55 = vmax.f32 %v677_v44, %v741_v39  ;;  %v423_v57 = vmax.f32 %v295_v45, %v359_v42  ;;  %v615_v58 = vld [vmem:[%s3228_s5 + $0x38] sm:$0xff]  ;;  %v360_v59 = vld [vmem:[%s3226_s3 + $0x40] sm:$0xff]  ;;  %v41_v63 = vld [vmem:[%s3223_s0 + $0x48] sm:$0xff] }
  0x19   :  { %v678_v61 = vmax.f32 %v550_v52, %v614_v41  ;;  %v296_v62 = vmax.f32 %v168_v54, %v232_v48  ;;  %v105_v0 = vld [vmem:[%s3224_s1 + $0x48] sm:$0xff]  ;;  %v870_v3 = vld [vmem:[%s3230_s7 + $0x30] sm:$0xff]  ;;  %v488_v6 = vld [vmem:[%s3227_s4 + $0x40] sm:$0xff] }
  0x1a   :  { %v1060_v60 = vmax.f32 %v932_v49, %v996_v34  ;;  %v233_v1 = vld [vmem:[%s3225_s2 + $0x48] sm:$0xff]  ;;  %v933_v2 = vmax.f32 %v805_v55, %v869_v50  ;;  %v998_v4 = vld [vmem:[%s3231_s8 + $0x30] sm:$0xff]  ;;  %v551_v5 = vmax.f32 %v423_v57, %v487_v53  ;;  %v169_v7 = vmax.f32 %v41_v63, %v105_v0  ;;  %v743_v9 = vld [vmem:[%s3229_s6 + $0x38] sm:$0xff] }
  0x1b   :  { %v806_v8 = vmax.f32 %v678_v61, %v742_v56  ;;  %v424_v10 = vmax.f32 %v296_v62, %v360_v59  ;;  %v616_v11 = vld [vmem:[%s3228_s5 + $0x40] sm:$0xff]  ;;  %v361_v12 = vld [vmem:[%s3226_s3 + $0x48] sm:$0xff]  ;;  %v42_v16 = vld [vmem:[%s3223_s0 + $0x50] sm:$0xff] }
  0x1c   :  { %1125 = vst.msk [vmem:[%s3232_s9 + $0x20] sm:$0xff] %vm1120_vm0, %v1060_v60  ;;  %v1061_v13 = vmax.f32 %v933_v2, %v997_v51  ;;  %v679_v14 = vmax.f32 %v551_v5, %v615_v58  ;;  %v297_v15 = vmax.f32 %v169_v7, %v233_v1  ;;  %v106_v17 = vld [vmem:[%s3224_s1 + $0x50] sm:$0xff]  ;;  %v871_v20 = vld [vmem:[%s3230_s7 + $0x38] sm:$0xff]  ;;  %v489_v23 = vld [vmem:[%s3227_s4 + $0x48] sm:$0xff] }
  0x1d   :  { %v234_v18 = vld [vmem:[%s3225_s2 + $0x50] sm:$0xff]  ;;  %v934_v19 = vmax.f32 %v806_v8, %v870_v3  ;;  %v999_v21 = vld [vmem:[%s3231_s8 + $0x38] sm:$0xff]  ;;  %v552_v22 = vmax.f32 %v424_v10, %v488_v6  ;;  %v170_v24 = vmax.f32 %v42_v16, %v106_v17  ;;  %v744_v26 = vld [vmem:[%s3229_s6 + $0x40] sm:$0xff] }
  0x1e   :  { %1126 = vst.msk [vmem:[%s3232_s9 + $0x28] sm:$0xff] %vm1120_vm0, %v1061_v13  ;;  %v807_v25 = vmax.f32 %v679_v14, %v743_v9  ;;  %v425_v27 = vmax.f32 %v297_v15, %v361_v12  ;;  %v617_v28 = vld [vmem:[%s3228_s5 + $0x48] sm:$0xff]  ;;  %v362_v29 = vld [vmem:[%s3226_s3 + $0x50] sm:$0xff]  ;;  %v43_v33 = vld [vmem:[%s3223_s0 + $0x58] sm:$0xff] }
  0x1f   :  { %v1062_v30 = vmax.f32 %v934_v19, %v998_v4  ;;  %v680_v31 = vmax.f32 %v552_v22, %v616_v11  ;;  %v298_v32 = vmax.f32 %v170_v24, %v234_v18  ;;  %v107_v34 = vld [vmem:[%s3224_s1 + $0x58] sm:$0xff]  ;;  %v872_v37 = vld [vmem:[%s3230_s7 + $0x40] sm:$0xff]  ;;  %v490_v40 = vld [vmem:[%s3227_s4 + $0x50] sm:$0xff] }
  0x20   :  { %v235_v35 = vld [vmem:[%s3225_s2 + $0x58] sm:$0xff]  ;;  %v935_v36 = vmax.f32 %v807_v25, %v871_v20  ;;  %v1000_v38 = vld [vmem:[%s3231_s8 + $0x40] sm:$0xff]  ;;  %v553_v39 = vmax.f32 %v425_v27, %v489_v23  ;;  %v171_v41 = vmax.f32 %v43_v33, %v107_v34  ;;  %v745_v43 = vld [vmem:[%s3229_s6 + $0x48] sm:$0xff] }
  0x21   :  { %1127 = vst.msk [vmem:[%s3232_s9 + $0x30] sm:$0xff] %vm1120_vm0, %v1062_v30  ;;  %v808_v42 = vmax.f32 %v680_v31, %v744_v26  ;;  %v426_v44 = vmax.f32 %v298_v32, %v362_v29  ;;  %v618_v45 = vld [vmem:[%s3228_s5 + $0x50] sm:$0xff]  ;;  %v363_v46 = vld [vmem:[%s3226_s3 + $0x58] sm:$0xff]  ;;  %v44_v50 = vld [vmem:[%s3223_s0 + $0x60] sm:$0xff] }
  0x22   :  { %v1063_v47 = vmax.f32 %v935_v36, %v999_v21  ;;  %v681_v48 = vmax.f32 %v553_v39, %v617_v28  ;;  %v299_v49 = vmax.f32 %v171_v41, %v235_v35  ;;  %v108_v51 = vld [vmem:[%s3224_s1 + $0x60] sm:$0xff]  ;;  %v873_v54 = vld [vmem:[%s3230_s7 + $0x48] sm:$0xff]  ;;  %v491_v57 = vld [vmem:[%s3227_s4 + $0x58] sm:$0xff] }
  0x23   :  { %v236_v52 = vld [vmem:[%s3225_s2 + $0x60] sm:$0xff]  ;;  %v936_v53 = vmax.f32 %v808_v42, %v872_v37  ;;  %v1001_v55 = vld [vmem:[%s3231_s8 + $0x48] sm:$0xff]  ;;  %v554_v56 = vmax.f32 %v426_v44, %v490_v40  ;;  %v172_v58 = vmax.f32 %v44_v50, %v108_v51  ;;  %v746_v60 = vld [vmem:[%s3229_s6 + $0x50] sm:$0xff] }
  0x24   :  { %1128 = vst.msk [vmem:[%s3232_s9 + $0x38] sm:$0xff] %vm1120_vm0, %v1063_v47  ;;  %v809_v59 = vmax.f32 %v681_v48, %v745_v43  ;;  %v427_v61 = vmax.f32 %v299_v49, %v363_v46  ;;  %v619_v62 = vld [vmem:[%s3228_s5 + $0x58] sm:$0xff]  ;;  %v364_v63 = vld [vmem:[%s3226_s3 + $0x60] sm:$0xff]  ;;  %v45_v3 = vld [vmem:[%s3223_s0 + $0x68] sm:$0xff] }
  0x25   :  { %v1064_v0 = vmax.f32 %v936_v53, %v1000_v38  ;;  %v682_v1 = vmax.f32 %v554_v56, %v618_v45  ;;  %v300_v2 = vmax.f32 %v172_v58, %v236_v52  ;;  %v109_v4 = vld [vmem:[%s3224_s1 + $0x68] sm:$0xff]  ;;  %v874_v7 = vld [vmem:[%s3230_s7 + $0x50] sm:$0xff]  ;;  %v492_v10 = vld [vmem:[%s3227_s4 + $0x60] sm:$0xff] }
  0x26   :  { %v237_v5 = vld [vmem:[%s3225_s2 + $0x68] sm:$0xff]  ;;  %v937_v6 = vmax.f32 %v809_v59, %v873_v54  ;;  %v1002_v8 = vld [vmem:[%s3231_s8 + $0x50] sm:$0xff]  ;;  %v555_v9 = vmax.f32 %v427_v61, %v491_v57  ;;  %v173_v11 = vmax.f32 %v45_v3, %v109_v4  ;;  %v747_v13 = vld [vmem:[%s3229_s6 + $0x58] sm:$0xff] }
  0x27   :  { %1129 = vst.msk [vmem:[%s3232_s9 + $0x40] sm:$0xff] %vm1120_vm0, %v1064_v0  ;;  %v810_v12 = vmax.f32 %v682_v1, %v746_v60  ;;  %v428_v14 = vmax.f32 %v300_v2, %v364_v63  ;;  %v620_v15 = vld [vmem:[%s3228_s5 + $0x60] sm:$0xff]  ;;  %v365_v16 = vld [vmem:[%s3226_s3 + $0x68] sm:$0xff]  ;;  %v46_v20 = vld [vmem:[%s3223_s0 + $0x70] sm:$0xff] }
  0x28   :  { %v1065_v17 = vmax.f32 %v937_v6, %v1001_v55  ;;  %v683_v18 = vmax.f32 %v555_v9, %v619_v62  ;;  %v301_v19 = vmax.f32 %v173_v11, %v237_v5  ;;  %v110_v21 = vld [vmem:[%s3224_s1 + $0x70] sm:$0xff]  ;;  %v875_v24 = vld [vmem:[%s3230_s7 + $0x58] sm:$0xff]  ;;  %v493_v27 = vld [vmem:[%s3227_s4 + $0x68] sm:$0xff] }
  0x29   :  { %v238_v22 = vld [vmem:[%s3225_s2 + $0x70] sm:$0xff]  ;;  %v938_v23 = vmax.f32 %v810_v12, %v874_v7  ;;  %v1003_v25 = vld [vmem:[%s3231_s8 + $0x58] sm:$0xff]  ;;  %v556_v26 = vmax.f32 %v428_v14, %v492_v10  ;;  %v174_v28 = vmax.f32 %v46_v20, %v110_v21  ;;  %v748_v30 = vld [vmem:[%s3229_s6 + $0x60] sm:$0xff] }
  0x2a   :  { %1130 = vst.msk [vmem:[%s3232_s9 + $0x48] sm:$0xff] %vm1120_vm0, %v1065_v17  ;;  %v811_v29 = vmax.f32 %v683_v18, %v747_v13  ;;  %v429_v31 = vmax.f32 %v301_v19, %v365_v16  ;;  %v621_v32 = vld [vmem:[%s3228_s5 + $0x68] sm:$0xff]  ;;  %v366_v33 = vld [vmem:[%s3226_s3 + $0x70] sm:$0xff]  ;;  %v47_v37 = vld [vmem:[%s3223_s0 + $0x78] sm:$0xff] }
  0x2b   :  { %v1066_v34 = vmax.f32 %v938_v23, %v1002_v8  ;;  %v684_v35 = vmax.f32 %v556_v26, %v620_v15  ;;  %v302_v36 = vmax.f32 %v174_v28, %v238_v22  ;;  %v111_v38 = vld [vmem:[%s3224_s1 + $0x78] sm:$0xff]  ;;  %v876_v41 = vld [vmem:[%s3230_s7 + $0x60] sm:$0xff]  ;;  %v494_v44 = vld [vmem:[%s3227_s4 + $0x70] sm:$0xff] }
  0x2c   :  { %v239_v39 = vld [vmem:[%s3225_s2 + $0x78] sm:$0xff]  ;;  %v939_v40 = vmax.f32 %v811_v29, %v875_v24  ;;  %v1004_v42 = vld [vmem:[%s3231_s8 + $0x60] sm:$0xff]  ;;  %v557_v43 = vmax.f32 %v429_v31, %v493_v27  ;;  %v175_v45 = vmax.f32 %v47_v37, %v111_v38  ;;  %v749_v47 = vld [vmem:[%s3229_s6 + $0x68] sm:$0xff] }
  0x2d   :  { %1131 = vst.msk [vmem:[%s3232_s9 + $0x50] sm:$0xff] %vm1120_vm0, %v1066_v34  ;;  %v812_v46 = vmax.f32 %v684_v35, %v748_v30  ;;  %v430_v48 = vmax.f32 %v302_v36, %v366_v33  ;;  %v622_v49 = vld [vmem:[%s3228_s5 + $0x70] sm:$0xff]  ;;  %v367_v50 = vld [vmem:[%s3226_s3 + $0x78] sm:$0xff]  ;;  %v48_v54 = vld [vmem:[%s3223_s0 + $0x80] sm:$0xff] }
  0x2e   :  { %v1067_v51 = vmax.f32 %v939_v40, %v1003_v25  ;;  %v685_v52 = vmax.f32 %v557_v43, %v621_v32  ;;  %v303_v53 = vmax.f32 %v175_v45, %v239_v39  ;;  %v112_v55 = vld [vmem:[%s3224_s1 + $0x80] sm:$0xff]  ;;  %v877_v58 = vld [vmem:[%s3230_s7 + $0x68] sm:$0xff]  ;;  %v495_v61 = vld [vmem:[%s3227_s4 + $0x78] sm:$0xff] }
  0x2f   :  { %v240_v56 = vld [vmem:[%s3225_s2 + $0x80] sm:$0xff]  ;;  %v940_v57 = vmax.f32 %v812_v46, %v876_v41  ;;  %v1005_v59 = vld [vmem:[%s3231_s8 + $0x68] sm:$0xff]  ;;  %v558_v60 = vmax.f32 %v430_v48, %v494_v44  ;;  %v176_v62 = vmax.f32 %v48_v54, %v112_v55  ;;  %v750_v0 = vld [vmem:[%s3229_s6 + $0x70] sm:$0xff] }
  0x30   :  { %1132 = vst.msk [vmem:[%s3232_s9 + $0x58] sm:$0xff] %vm1120_vm0, %v1067_v51  ;;  %v813_v63 = vmax.f32 %v685_v52, %v749_v47  ;;  %v431_v1 = vmax.f32 %v303_v53, %v367_v50  ;;  %v623_v2 = vld [vmem:[%s3228_s5 + $0x78] sm:$0xff]  ;;  %v368_v3 = vld [vmem:[%s3226_s3 + $0x80] sm:$0xff]  ;;  %v49_v7 = vld [vmem:[%s3223_s0 + $0x88] sm:$0xff] }
  0x31   :  { %v1068_v4 = vmax.f32 %v940_v57, %v1004_v42  ;;  %v686_v5 = vmax.f32 %v558_v60, %v622_v49  ;;  %v304_v6 = vmax.f32 %v176_v62, %v240_v56  ;;  %v113_v8 = vld [vmem:[%s3224_s1 + $0x88] sm:$0xff]  ;;  %v878_v11 = vld [vmem:[%s3230_s7 + $0x70] sm:$0xff]  ;;  %v496_v14 = vld [vmem:[%s3227_s4 + $0x80] sm:$0xff] }
  0x32   :  { %v241_v9 = vld [vmem:[%s3225_s2 + $0x88] sm:$0xff]  ;;  %v941_v10 = vmax.f32 %v813_v63, %v877_v58  ;;  %v1006_v12 = vld [vmem:[%s3231_s8 + $0x70] sm:$0xff]  ;;  %v559_v13 = vmax.f32 %v431_v1, %v495_v61  ;;  %v177_v15 = vmax.f32 %v49_v7, %v113_v8  ;;  %v751_v17 = vld [vmem:[%s3229_s6 + $0x78] sm:$0xff] }
  0x33   :  { %1133 = vst.msk [vmem:[%s3232_s9 + $0x60] sm:$0xff] %vm1120_vm0, %v1068_v4  ;;  %v814_v16 = vmax.f32 %v686_v5, %v750_v0  ;;  %v432_v18 = vmax.f32 %v304_v6, %v368_v3  ;;  %v624_v19 = vld [vmem:[%s3228_s5 + $0x80] sm:$0xff]  ;;  %v369_v20 = vld [vmem:[%s3226_s3 + $0x88] sm:$0xff]  ;;  %v50_v24 = vld [vmem:[%s3223_s0 + $0x90] sm:$0xff] }
  0x34   :  { %v1069_v21 = vmax.f32 %v941_v10, %v1005_v59  ;;  %v687_v22 = vmax.f32 %v559_v13, %v623_v2  ;;  %v305_v23 = vmax.f32 %v177_v15, %v241_v9  ;;  %v114_v25 = vld [vmem:[%s3224_s1 + $0x90] sm:$0xff]  ;;  %v879_v28 = vld [vmem:[%s3230_s7 + $0x78] sm:$0xff]  ;;  %v497_v31 = vld [vmem:[%s3227_s4 + $0x88] sm:$0xff] }
  0x35   :  { %v242_v26 = vld [vmem:[%s3225_s2 + $0x90] sm:$0xff]  ;;  %v942_v27 = vmax.f32 %v814_v16, %v878_v11  ;;  %v1007_v29 = vld [vmem:[%s3231_s8 + $0x78] sm:$0xff]  ;;  %v560_v30 = vmax.f32 %v432_v18, %v496_v14  ;;  %v178_v32 = vmax.f32 %v50_v24, %v114_v25  ;;  %v752_v34 = vld [vmem:[%s3229_s6 + $0x80] sm:$0xff] }
  0x36   :  { %1134 = vst.msk [vmem:[%s3232_s9 + $0x68] sm:$0xff] %vm1120_vm0, %v1069_v21  ;;  %v815_v33 = vmax.f32 %v687_v22, %v751_v17  ;;  %v433_v35 = vmax.f32 %v305_v23, %v369_v20  ;;  %v625_v36 = vld [vmem:[%s3228_s5 + $0x88] sm:$0xff]  ;;  %v370_v37 = vld [vmem:[%s3226_s3 + $0x90] sm:$0xff]  ;;  %v51_v41 = vld [vmem:[%s3223_s0 + $0x98] sm:$0xff] }
  0x37   :  { %v1070_v38 = vmax.f32 %v942_v27, %v1006_v12  ;;  %v688_v39 = vmax.f32 %v560_v30, %v624_v19  ;;  %v306_v40 = vmax.f32 %v178_v32, %v242_v26  ;;  %v115_v42 = vld [vmem:[%s3224_s1 + $0x98] sm:$0xff]  ;;  %v880_v45 = vld [vmem:[%s3230_s7 + $0x80] sm:$0xff]  ;;  %v498_v48 = vld [vmem:[%s3227_s4 + $0x90] sm:$0xff] }
  0x38   :  { %v243_v43 = vld [vmem:[%s3225_s2 + $0x98] sm:$0xff]  ;;  %v943_v44 = vmax.f32 %v815_v33, %v879_v28  ;;  %v1008_v46 = vld [vmem:[%s3231_s8 + $0x80] sm:$0xff]  ;;  %v561_v47 = vmax.f32 %v433_v35, %v497_v31  ;;  %v179_v49 = vmax.f32 %v51_v41, %v115_v42  ;;  %v753_v51 = vld [vmem:[%s3229_s6 + $0x88] sm:$0xff] }
  0x39   :  { %1135 = vst.msk [vmem:[%s3232_s9 + $0x70] sm:$0xff] %vm1120_vm0, %v1070_v38  ;;  %v816_v50 = vmax.f32 %v688_v39, %v752_v34  ;;  %v434_v52 = vmax.f32 %v306_v40, %v370_v37  ;;  %v626_v53 = vld [vmem:[%s3228_s5 + $0x90] sm:$0xff]  ;;  %v371_v54 = vld [vmem:[%s3226_s3 + $0x98] sm:$0xff]  ;;  %v52_v58 = vld [vmem:[%s3223_s0 + $0xa0] sm:$0xff] }
  0x3a   :  { %v1071_v55 = vmax.f32 %v943_v44, %v1007_v29  ;;  %v689_v56 = vmax.f32 %v561_v47, %v625_v36  ;;  %v307_v57 = vmax.f32 %v179_v49, %v243_v43  ;;  %v116_v59 = vld [vmem:[%s3224_s1 + $0xa0] sm:$0xff]  ;;  %v881_v62 = vld [vmem:[%s3230_s7 + $0x88] sm:$0xff]  ;;  %v499_v1 = vld [vmem:[%s3227_s4 + $0x98] sm:$0xff] }
  0x3b   :  { %v244_v60 = vld [vmem:[%s3225_s2 + $0xa0] sm:$0xff]  ;;  %v944_v61 = vmax.f32 %v816_v50, %v880_v45  ;;  %v1009_v63 = vld [vmem:[%s3231_s8 + $0x88] sm:$0xff]  ;;  %v562_v0 = vmax.f32 %v434_v52, %v498_v48  ;;  %v180_v2 = vmax.f32 %v52_v58, %v116_v59  ;;  %v754_v4 = vld [vmem:[%s3229_s6 + $0x90] sm:$0xff] }
  0x3c   :  { %1136 = vst.msk [vmem:[%s3232_s9 + $0x78] sm:$0xff] %vm1120_vm0, %v1071_v55  ;;  %v817_v3 = vmax.f32 %v689_v56, %v753_v51  ;;  %v435_v5 = vmax.f32 %v307_v57, %v371_v54  ;;  %v627_v6 = vld [vmem:[%s3228_s5 + $0x98] sm:$0xff]  ;;  %v372_v7 = vld [vmem:[%s3226_s3 + $0xa0] sm:$0xff]  ;;  %v53_v11 = vld [vmem:[%s3223_s0 + $0xa8] sm:$0xff] }
  0x3d   :  { %v1072_v8 = vmax.f32 %v944_v61, %v1008_v46  ;;  %v690_v9 = vmax.f32 %v562_v0, %v626_v53  ;;  %v308_v10 = vmax.f32 %v180_v2, %v244_v60  ;;  %v117_v12 = vld [vmem:[%s3224_s1 + $0xa8] sm:$0xff]  ;;  %v882_v15 = vld [vmem:[%s3230_s7 + $0x90] sm:$0xff]  ;;  %v500_v18 = vld [vmem:[%s3227_s4 + $0xa0] sm:$0xff] }
  0x3e   :  { %v245_v13 = vld [vmem:[%s3225_s2 + $0xa8] sm:$0xff]  ;;  %v945_v14 = vmax.f32 %v817_v3, %v881_v62  ;;  %v1010_v16 = vld [vmem:[%s3231_s8 + $0x90] sm:$0xff]  ;;  %v563_v17 = vmax.f32 %v435_v5, %v499_v1  ;;  %v181_v19 = vmax.f32 %v53_v11, %v117_v12  ;;  %v755_v21 = vld [vmem:[%s3229_s6 + $0x98] sm:$0xff] }
  0x3f   :  { %1137 = vst.msk [vmem:[%s3232_s9 + $0x80] sm:$0xff] %vm1120_vm0, %v1072_v8  ;;  %v818_v20 = vmax.f32 %v690_v9, %v754_v4  ;;  %v436_v22 = vmax.f32 %v308_v10, %v372_v7  ;;  %v628_v23 = vld [vmem:[%s3228_s5 + $0xa0] sm:$0xff]  ;;  %v373_v24 = vld [vmem:[%s3226_s3 + $0xa8] sm:$0xff]  ;;  %v54_v28 = vld [vmem:[%s3223_s0 + $0xb0] sm:$0xff] }
  0x40   :  { %v1073_v25 = vmax.f32 %v945_v14, %v1009_v63  ;;  %v691_v26 = vmax.f32 %v563_v17, %v627_v6  ;;  %v309_v27 = vmax.f32 %v181_v19, %v245_v13  ;;  %v118_v29 = vld [vmem:[%s3224_s1 + $0xb0] sm:$0xff]  ;;  %v883_v32 = vld [vmem:[%s3230_s7 + $0x98] sm:$0xff]  ;;  %v501_v35 = vld [vmem:[%s3227_s4 + $0xa8] sm:$0xff] }
  0x41   :  { %v246_v30 = vld [vmem:[%s3225_s2 + $0xb0] sm:$0xff]  ;;  %v946_v31 = vmax.f32 %v818_v20, %v882_v15  ;;  %v1011_v33 = vld [vmem:[%s3231_s8 + $0x98] sm:$0xff]  ;;  %v564_v34 = vmax.f32 %v436_v22, %v500_v18  ;;  %v182_v36 = vmax.f32 %v54_v28, %v118_v29  ;;  %v756_v38 = vld [vmem:[%s3229_s6 + $0xa0] sm:$0xff] }
  0x42   :  { %1138 = vst.msk [vmem:[%s3232_s9 + $0x88] sm:$0xff] %vm1120_vm0, %v1073_v25  ;;  %v819_v37 = vmax.f32 %v691_v26, %v755_v21  ;;  %v437_v39 = vmax.f32 %v309_v27, %v373_v24  ;;  %v629_v40 = vld [vmem:[%s3228_s5 + $0xa8] sm:$0xff]  ;;  %v374_v41 = vld [vmem:[%s3226_s3 + $0xb0] sm:$0xff]  ;;  %v55_v45 = vld [vmem:[%s3223_s0 + $0xb8] sm:$0xff] }
  0x43   :  { %v1074_v42 = vmax.f32 %v946_v31, %v1010_v16  ;;  %v692_v43 = vmax.f32 %v564_v34, %v628_v23  ;;  %v310_v44 = vmax.f32 %v182_v36, %v246_v30  ;;  %v119_v46 = vld [vmem:[%s3224_s1 + $0xb8] sm:$0xff]  ;;  %v884_v49 = vld [vmem:[%s3230_s7 + $0xa0] sm:$0xff]  ;;  %v502_v52 = vld [vmem:[%s3227_s4 + $0xb0] sm:$0xff] }
  0x44   :  { %v247_v47 = vld [vmem:[%s3225_s2 + $0xb8] sm:$0xff]  ;;  %v947_v48 = vmax.f32 %v819_v37, %v883_v32  ;;  %v1012_v50 = vld [vmem:[%s3231_s8 + $0xa0] sm:$0xff]  ;;  %v565_v51 = vmax.f32 %v437_v39, %v501_v35  ;;  %v183_v53 = vmax.f32 %v55_v45, %v119_v46  ;;  %v757_v55 = vld [vmem:[%s3229_s6 + $0xa8] sm:$0xff] }
  0x45   :  { %1139 = vst.msk [vmem:[%s3232_s9 + $0x90] sm:$0xff] %vm1120_vm0, %v1074_v42  ;;  %v820_v54 = vmax.f32 %v692_v43, %v756_v38  ;;  %v438_v56 = vmax.f32 %v310_v44, %v374_v41  ;;  %v630_v57 = vld [vmem:[%s3228_s5 + $0xb0] sm:$0xff]  ;;  %v375_v58 = vld [vmem:[%s3226_s3 + $0xb8] sm:$0xff]  ;;  %v56_v62 = vld [vmem:[%s3223_s0 + $0xc0] sm:$0xff] }
  0x46   :  { %v1075_v59 = vmax.f32 %v947_v48, %v1011_v33  ;;  %v693_v60 = vmax.f32 %v565_v51, %v629_v40  ;;  %v311_v61 = vmax.f32 %v183_v53, %v247_v47  ;;  %v120_v63 = vld [vmem:[%s3224_s1 + $0xc0] sm:$0xff]  ;;  %v885_v2 = vld [vmem:[%s3230_s7 + $0xa8] sm:$0xff]  ;;  %v503_v5 = vld [vmem:[%s3227_s4 + $0xb8] sm:$0xff] }
  0x47   :  { %v248_v0 = vld [vmem:[%s3225_s2 + $0xc0] sm:$0xff]  ;;  %v948_v1 = vmax.f32 %v820_v54, %v884_v49  ;;  %v1013_v3 = vld [vmem:[%s3231_s8 + $0xa8] sm:$0xff]  ;;  %v566_v4 = vmax.f32 %v438_v56, %v502_v52  ;;  %v184_v6 = vmax.f32 %v56_v62, %v120_v63  ;;  %v758_v8 = vld [vmem:[%s3229_s6 + $0xb0] sm:$0xff] }
  0x48   :  { %1140 = vst.msk [vmem:[%s3232_s9 + $0x98] sm:$0xff] %vm1120_vm0, %v1075_v59  ;;  %v821_v7 = vmax.f32 %v693_v60, %v757_v55  ;;  %v439_v9 = vmax.f32 %v311_v61, %v375_v58  ;;  %v631_v10 = vld [vmem:[%s3228_s5 + $0xb8] sm:$0xff]  ;;  %v376_v11 = vld [vmem:[%s3226_s3 + $0xc0] sm:$0xff]  ;;  %v57_v15 = vld [vmem:[%s3223_s0 + $0xc8] sm:$0xff] }
  0x49   :  { %v1076_v12 = vmax.f32 %v948_v1, %v1012_v50  ;;  %v694_v13 = vmax.f32 %v566_v4, %v630_v57  ;;  %v312_v14 = vmax.f32 %v184_v6, %v248_v0  ;;  %v121_v16 = vld [vmem:[%s3224_s1 + $0xc8] sm:$0xff]  ;;  %v886_v19 = vld [vmem:[%s3230_s7 + $0xb0] sm:$0xff]  ;;  %v504_v22 = vld [vmem:[%s3227_s4 + $0xc0] sm:$0xff] }
  0x4a   :  { %v249_v17 = vld [vmem:[%s3225_s2 + $0xc8] sm:$0xff]  ;;  %v949_v18 = vmax.f32 %v821_v7, %v885_v2  ;;  %v1014_v20 = vld [vmem:[%s3231_s8 + $0xb0] sm:$0xff]  ;;  %v567_v21 = vmax.f32 %v439_v9, %v503_v5  ;;  %v185_v23 = vmax.f32 %v57_v15, %v121_v16  ;;  %v759_v25 = vld [vmem:[%s3229_s6 + $0xb8] sm:$0xff] }
  0x4b   :  { %1141 = vst.msk [vmem:[%s3232_s9 + $0xa0] sm:$0xff] %vm1120_vm0, %v1076_v12  ;;  %v822_v24 = vmax.f32 %v694_v13, %v758_v8  ;;  %v440_v26 = vmax.f32 %v312_v14, %v376_v11  ;;  %v632_v27 = vld [vmem:[%s3228_s5 + $0xc0] sm:$0xff]  ;;  %v377_v28 = vld [vmem:[%s3226_s3 + $0xc8] sm:$0xff]  ;;  %v58_v32 = vld [vmem:[%s3223_s0 + $0xd0] sm:$0xff] }
  0x4c   :  { %v1077_v29 = vmax.f32 %v949_v18, %v1013_v3  ;;  %v695_v30 = vmax.f32 %v567_v21, %v631_v10  ;;  %v313_v31 = vmax.f32 %v185_v23, %v249_v17  ;;  %v122_v33 = vld [vmem:[%s3224_s1 + $0xd0] sm:$0xff]  ;;  %v887_v36 = vld [vmem:[%s3230_s7 + $0xb8] sm:$0xff]  ;;  %v505_v39 = vld [vmem:[%s3227_s4 + $0xc8] sm:$0xff] }
  0x4d   :  { %v250_v34 = vld [vmem:[%s3225_s2 + $0xd0] sm:$0xff]  ;;  %v950_v35 = vmax.f32 %v822_v24, %v886_v19  ;;  %v1015_v37 = vld [vmem:[%s3231_s8 + $0xb8] sm:$0xff]  ;;  %v568_v38 = vmax.f32 %v440_v26, %v504_v22  ;;  %v186_v40 = vmax.f32 %v58_v32, %v122_v33  ;;  %v760_v42 = vld [vmem:[%s3229_s6 + $0xc0] sm:$0xff] }
  0x4e   :  { %1142 = vst.msk [vmem:[%s3232_s9 + $0xa8] sm:$0xff] %vm1120_vm0, %v1077_v29  ;;  %v823_v41 = vmax.f32 %v695_v30, %v759_v25  ;;  %v441_v43 = vmax.f32 %v313_v31, %v377_v28  ;;  %v633_v44 = vld [vmem:[%s3228_s5 + $0xc8] sm:$0xff]  ;;  %v378_v45 = vld [vmem:[%s3226_s3 + $0xd0] sm:$0xff]  ;;  %v59_v49 = vld [vmem:[%s3223_s0 + $0xd8] sm:$0xff] }
  0x4f   :  { %v1078_v46 = vmax.f32 %v950_v35, %v1014_v20  ;;  %v696_v47 = vmax.f32 %v568_v38, %v632_v27  ;;  %v314_v48 = vmax.f32 %v186_v40, %v250_v34  ;;  %v123_v50 = vld [vmem:[%s3224_s1 + $0xd8] sm:$0xff]  ;;  %v888_v53 = vld [vmem:[%s3230_s7 + $0xc0] sm:$0xff]  ;;  %v506_v56 = vld [vmem:[%s3227_s4 + $0xd0] sm:$0xff] }
  0x50   :  { %v251_v51 = vld [vmem:[%s3225_s2 + $0xd8] sm:$0xff]  ;;  %v951_v52 = vmax.f32 %v823_v41, %v887_v36  ;;  %v1016_v54 = vld [vmem:[%s3231_s8 + $0xc0] sm:$0xff]  ;;  %v569_v55 = vmax.f32 %v441_v43, %v505_v39  ;;  %v187_v57 = vmax.f32 %v59_v49, %v123_v50  ;;  %v761_v59 = vld [vmem:[%s3229_s6 + $0xc8] sm:$0xff] }
  0x51   :  { %1143 = vst.msk [vmem:[%s3232_s9 + $0xb0] sm:$0xff] %vm1120_vm0, %v1078_v46  ;;  %v824_v58 = vmax.f32 %v696_v47, %v760_v42  ;;  %v442_v60 = vmax.f32 %v314_v48, %v378_v45  ;;  %v634_v61 = vld [vmem:[%s3228_s5 + $0xd0] sm:$0xff]  ;;  %v379_v62 = vld [vmem:[%s3226_s3 + $0xd8] sm:$0xff]  ;;  %v60_v2 = vld [vmem:[%s3223_s0 + $0xe0] sm:$0xff] }
  0x52   :  { %v1079_v63 = vmax.f32 %v951_v52, %v1015_v37  ;;  %v697_v0 = vmax.f32 %v569_v55, %v633_v44  ;;  %v315_v1 = vmax.f32 %v187_v57, %v251_v51  ;;  %v124_v3 = vld [vmem:[%s3224_s1 + $0xe0] sm:$0xff]  ;;  %v889_v6 = vld [vmem:[%s3230_s7 + $0xc8] sm:$0xff]  ;;  %v507_v9 = vld [vmem:[%s3227_s4 + $0xd8] sm:$0xff] }
  0x53   :  { %v252_v4 = vld [vmem:[%s3225_s2 + $0xe0] sm:$0xff]  ;;  %v952_v5 = vmax.f32 %v824_v58, %v888_v53  ;;  %v1017_v7 = vld [vmem:[%s3231_s8 + $0xc8] sm:$0xff]  ;;  %v570_v8 = vmax.f32 %v442_v60, %v506_v56  ;;  %v188_v10 = vmax.f32 %v60_v2, %v124_v3  ;;  %v762_v12 = vld [vmem:[%s3229_s6 + $0xd0] sm:$0xff] }
  0x54   :  { %1144 = vst.msk [vmem:[%s3232_s9 + $0xb8] sm:$0xff] %vm1120_vm0, %v1079_v63  ;;  %v825_v11 = vmax.f32 %v697_v0, %v761_v59  ;;  %v443_v13 = vmax.f32 %v315_v1, %v379_v62  ;;  %v635_v14 = vld [vmem:[%s3228_s5 + $0xd8] sm:$0xff]  ;;  %v380_v15 = vld [vmem:[%s3226_s3 + $0xe0] sm:$0xff]  ;;  %v61_v19 = vld [vmem:[%s3223_s0 + $0xe8] sm:$0xff] }
  0x55   :  { %v1080_v16 = vmax.f32 %v952_v5, %v1016_v54  ;;  %v698_v17 = vmax.f32 %v570_v8, %v634_v61  ;;  %v316_v18 = vmax.f32 %v188_v10, %v252_v4  ;;  %v125_v20 = vld [vmem:[%s3224_s1 + $0xe8] sm:$0xff]  ;;  %v890_v23 = vld [vmem:[%s3230_s7 + $0xd0] sm:$0xff]  ;;  %v508_v26 = vld [vmem:[%s3227_s4 + $0xe0] sm:$0xff] }
  0x56   :  { %v253_v21 = vld [vmem:[%s3225_s2 + $0xe8] sm:$0xff]  ;;  %v953_v22 = vmax.f32 %v825_v11, %v889_v6  ;;  %v1018_v24 = vld [vmem:[%s3231_s8 + $0xd0] sm:$0xff]  ;;  %v571_v25 = vmax.f32 %v443_v13, %v507_v9  ;;  %v189_v27 = vmax.f32 %v61_v19, %v125_v20  ;;  %v763_v29 = vld [vmem:[%s3229_s6 + $0xd8] sm:$0xff] }
  0x57   :  { %1145 = vst.msk [vmem:[%s3232_s9 + $0xc0] sm:$0xff] %vm1120_vm0, %v1080_v16  ;;  %v826_v28 = vmax.f32 %v698_v17, %v762_v12  ;;  %v444_v30 = vmax.f32 %v316_v18, %v380_v15  ;;  %v636_v31 = vld [vmem:[%s3228_s5 + $0xe0] sm:$0xff]  ;;  %v381_v32 = vld [vmem:[%s3226_s3 + $0xe8] sm:$0xff]  ;;  %v62_v36 = vld [vmem:[%s3223_s0 + $0xf0] sm:$0xff] }
  0x58   :  { %v1081_v33 = vmax.f32 %v953_v22, %v1017_v7  ;;  %v699_v34 = vmax.f32 %v571_v25, %v635_v14  ;;  %v317_v35 = vmax.f32 %v189_v27, %v253_v21  ;;  %v126_v37 = vld [vmem:[%s3224_s1 + $0xf0] sm:$0xff]  ;;  %v891_v40 = vld [vmem:[%s3230_s7 + $0xd8] sm:$0xff]  ;;  %v509_v43 = vld [vmem:[%s3227_s4 + $0xe8] sm:$0xff] }
  0x59   :  { %v254_v38 = vld [vmem:[%s3225_s2 + $0xf0] sm:$0xff]  ;;  %v954_v39 = vmax.f32 %v826_v28, %v890_v23  ;;  %v1019_v41 = vld [vmem:[%s3231_s8 + $0xd8] sm:$0xff]  ;;  %v572_v42 = vmax.f32 %v444_v30, %v508_v26  ;;  %v190_v44 = vmax.f32 %v62_v36, %v126_v37  ;;  %v764_v46 = vld [vmem:[%s3229_s6 + $0xe0] sm:$0xff] }
  0x5a   :  { %1146 = vst.msk [vmem:[%s3232_s9 + $0xc8] sm:$0xff] %vm1120_vm0, %v1081_v33  ;;  %v827_v45 = vmax.f32 %v699_v34, %v763_v29  ;;  %v445_v47 = vmax.f32 %v317_v35, %v381_v32  ;;  %v637_v48 = vld [vmem:[%s3228_s5 + $0xe8] sm:$0xff]  ;;  %v382_v49 = vld [vmem:[%s3226_s3 + $0xf0] sm:$0xff]  ;;  %v63_v53 = vld [vmem:[%s3223_s0 + $0xf8] sm:$0xff] }
  0x5b   :  { %v1082_v50 = vmax.f32 %v954_v39, %v1018_v24  ;;  %v700_v51 = vmax.f32 %v572_v42, %v636_v31  ;;  %v318_v52 = vmax.f32 %v190_v44, %v254_v38  ;;  %v127_v54 = vld [vmem:[%s3224_s1 + $0xf8] sm:$0xff]  ;;  %v892_v57 = vld [vmem:[%s3230_s7 + $0xe0] sm:$0xff]  ;;  %v510_v60 = vld [vmem:[%s3227_s4 + $0xf0] sm:$0xff] }
  0x5c   :  { %v255_v55 = vld [vmem:[%s3225_s2 + $0xf8] sm:$0xff]  ;;  %v955_v56 = vmax.f32 %v827_v45, %v891_v40  ;;  %v1020_v58 = vld [vmem:[%s3231_s8 + $0xe0] sm:$0xff]  ;;  %v573_v59 = vmax.f32 %v445_v47, %v509_v43  ;;  %v191_v61 = vmax.f32 %v63_v53, %v127_v54  ;;  %v765_v63 = vld [vmem:[%s3229_s6 + $0xe8] sm:$0xff] }
  0x5d   :  { %1147 = vst.msk [vmem:[%s3232_s9 + $0xd0] sm:$0xff] %vm1120_vm0, %v1082_v50  ;;  %v828_v62 = vmax.f32 %v700_v51, %v764_v46  ;;  %v446_v0 = vmax.f32 %v318_v52, %v382_v49  ;;  %v638_v1 = vld [vmem:[%s3228_s5 + $0xf0] sm:$0xff]  ;;  %v383_v2 = vld [vmem:[%s3226_s3 + $0xf8] sm:$0xff]  ;;  %v64_v6 = vld [vmem:[%s3223_s0 + $0x100] sm:$0xff] }
  0x5e   :  { %v1083_v3 = vmax.f32 %v955_v56, %v1019_v41  ;;  %v701_v4 = vmax.f32 %v573_v59, %v637_v48  ;;  %v319_v5 = vmax.f32 %v191_v61, %v255_v55  ;;  %v128_v7 = vld [vmem:[%s3224_s1 + $0x100] sm:$0xff]  ;;  %v893_v10 = vld [vmem:[%s3230_s7 + $0xe8] sm:$0xff]  ;;  %v511_v13 = vld [vmem:[%s3227_s4 + $0xf8] sm:$0xff] }
  0x5f   :  { %v256_v8 = vld [vmem:[%s3225_s2 + $0x100] sm:$0xff]  ;;  %v956_v9 = vmax.f32 %v828_v62, %v892_v57  ;;  %v1021_v11 = vld [vmem:[%s3231_s8 + $0xe8] sm:$0xff]  ;;  %v574_v12 = vmax.f32 %v446_v0, %v510_v60  ;;  %v192_v14 = vmax.f32 %v64_v6, %v128_v7  ;;  %v766_v16 = vld [vmem:[%s3229_s6 + $0xf0] sm:$0xff] }
  0x60   :  { %1148 = vst.msk [vmem:[%s3232_s9 + $0xd8] sm:$0xff] %vm1120_vm0, %v1083_v3  ;;  %v829_v15 = vmax.f32 %v701_v4, %v765_v63  ;;  %v447_v17 = vmax.f32 %v319_v5, %v383_v2  ;;  %v639_v18 = vld [vmem:[%s3228_s5 + $0xf8] sm:$0xff]  ;;  %v384_v19 = vld [vmem:[%s3226_s3 + $0x100] sm:$0xff]  ;;  %v65_v23 = vld [vmem:[%s3223_s0 + $0x108] sm:$0xff] }
  0x61   :  { %v1084_v20 = vmax.f32 %v956_v9, %v1020_v58  ;;  %v702_v21 = vmax.f32 %v574_v12, %v638_v1  ;;  %v320_v22 = vmax.f32 %v192_v14, %v256_v8  ;;  %v129_v24 = vld [vmem:[%s3224_s1 + $0x108] sm:$0xff]  ;;  %v894_v27 = vld [vmem:[%s3230_s7 + $0xf0] sm:$0xff]  ;;  %v512_v30 = vld [vmem:[%s3227_s4 + $0x100] sm:$0xff] }
  0x62   :  { %v257_v25 = vld [vmem:[%s3225_s2 + $0x108] sm:$0xff]  ;;  %v957_v26 = vmax.f32 %v829_v15, %v893_v10  ;;  %v1022_v28 = vld [vmem:[%s3231_s8 + $0xf0] sm:$0xff]  ;;  %v575_v29 = vmax.f32 %v447_v17, %v511_v13  ;;  %v193_v31 = vmax.f32 %v65_v23, %v129_v24  ;;  %v767_v33 = vld [vmem:[%s3229_s6 + $0xf8] sm:$0xff] }
  0x63   :  { %1149 = vst.msk [vmem:[%s3232_s9 + $0xe0] sm:$0xff] %vm1120_vm0, %v1084_v20  ;;  %v830_v32 = vmax.f32 %v702_v21, %v766_v16  ;;  %v448_v34 = vmax.f32 %v320_v22, %v384_v19  ;;  %v640_v35 = vld [vmem:[%s3228_s5 + $0x100] sm:$0xff]  ;;  %v385_v36 = vld [vmem:[%s3226_s3 + $0x108] sm:$0xff]  ;;  %v66_v40 = vld [vmem:[%s3223_s0 + $0x110] sm:$0xff] }
  0x64   :  { %v1085_v37 = vmax.f32 %v957_v26, %v1021_v11  ;;  %v703_v38 = vmax.f32 %v575_v29, %v639_v18  ;;  %v321_v39 = vmax.f32 %v193_v31, %v257_v25  ;;  %v130_v41 = vld [vmem:[%s3224_s1 + $0x110] sm:$0xff]  ;;  %v895_v44 = vld [vmem:[%s3230_s7 + $0xf8] sm:$0xff]  ;;  %v513_v47 = vld [vmem:[%s3227_s4 + $0x108] sm:$0xff] }
  0x65   :  { %v258_v42 = vld [vmem:[%s3225_s2 + $0x110] sm:$0xff]  ;;  %v958_v43 = vmax.f32 %v830_v32, %v894_v27  ;;  %v1023_v45 = vld [vmem:[%s3231_s8 + $0xf8] sm:$0xff]  ;;  %v576_v46 = vmax.f32 %v448_v34, %v512_v30  ;;  %v194_v48 = vmax.f32 %v66_v40, %v130_v41  ;;  %v768_v50 = vld [vmem:[%s3229_s6 + $0x100] sm:$0xff] }
  0x66   :  { %1150 = vst.msk [vmem:[%s3232_s9 + $0xe8] sm:$0xff] %vm1120_vm0, %v1085_v37  ;;  %v831_v49 = vmax.f32 %v703_v38, %v767_v33  ;;  %v449_v51 = vmax.f32 %v321_v39, %v385_v36  ;;  %v641_v52 = vld [vmem:[%s3228_s5 + $0x108] sm:$0xff]  ;;  %v386_v53 = vld [vmem:[%s3226_s3 + $0x110] sm:$0xff]  ;;  %v67_v57 = vld [vmem:[%s3223_s0 + $0x118] sm:$0xff] }
  0x67   :  { %v1086_v54 = vmax.f32 %v958_v43, %v1022_v28  ;;  %v704_v55 = vmax.f32 %v576_v46, %v640_v35  ;;  %v322_v56 = vmax.f32 %v194_v48, %v258_v42  ;;  %v131_v58 = vld [vmem:[%s3224_s1 + $0x118] sm:$0xff]  ;;  %v896_v61 = vld [vmem:[%s3230_s7 + $0x100] sm:$0xff]  ;;  %v514_v0 = vld [vmem:[%s3227_s4 + $0x110] sm:$0xff] }
  0x68   :  { %v259_v59 = vld [vmem:[%s3225_s2 + $0x118] sm:$0xff]  ;;  %v959_v60 = vmax.f32 %v831_v49, %v895_v44  ;;  %v1024_v62 = vld [vmem:[%s3231_s8 + $0x100] sm:$0xff]  ;;  %v577_v63 = vmax.f32 %v449_v51, %v513_v47  ;;  %v195_v1 = vmax.f32 %v67_v57, %v131_v58  ;;  %v769_v3 = vld [vmem:[%s3229_s6 + $0x108] sm:$0xff] }
  0x69   :  { %1151 = vst.msk [vmem:[%s3232_s9 + $0xf0] sm:$0xff] %vm1120_vm0, %v1086_v54  ;;  %v832_v2 = vmax.f32 %v704_v55, %v768_v50  ;;  %v450_v4 = vmax.f32 %v322_v56, %v386_v53  ;;  %v642_v5 = vld [vmem:[%s3228_s5 + $0x110] sm:$0xff]  ;;  %v387_v6 = vld [vmem:[%s3226_s3 + $0x118] sm:$0xff]  ;;  %v68_v10 = vld [vmem:[%s3223_s0 + $0x120] sm:$0xff] }
  0x6a   :  { %v1087_v7 = vmax.f32 %v959_v60, %v1023_v45  ;;  %v705_v8 = vmax.f32 %v577_v63, %v641_v52  ;;  %v323_v9 = vmax.f32 %v195_v1, %v259_v59  ;;  %v132_v11 = vld [vmem:[%s3224_s1 + $0x120] sm:$0xff]  ;;  %v897_v14 = vld [vmem:[%s3230_s7 + $0x108] sm:$0xff]  ;;  %v515_v17 = vld [vmem:[%s3227_s4 + $0x118] sm:$0xff] }
  0x6b   :  { %v260_v12 = vld [vmem:[%s3225_s2 + $0x120] sm:$0xff]  ;;  %v960_v13 = vmax.f32 %v832_v2, %v896_v61  ;;  %v1025_v15 = vld [vmem:[%s3231_s8 + $0x108] sm:$0xff]  ;;  %v578_v16 = vmax.f32 %v450_v4, %v514_v0  ;;  %v196_v18 = vmax.f32 %v68_v10, %v132_v11  ;;  %v770_v20 = vld [vmem:[%s3229_s6 + $0x110] sm:$0xff] }
  0x6c   :  { %1152 = vst.msk [vmem:[%s3232_s9 + $0xf8] sm:$0xff] %vm1120_vm0, %v1087_v7  ;;  %v833_v19 = vmax.f32 %v705_v8, %v769_v3  ;;  %v451_v21 = vmax.f32 %v323_v9, %v387_v6  ;;  %v643_v22 = vld [vmem:[%s3228_s5 + $0x118] sm:$0xff]  ;;  %v388_v23 = vld [vmem:[%s3226_s3 + $0x120] sm:$0xff]  ;;  %v69_v27 = vld [vmem:[%s3223_s0 + $0x128] sm:$0xff] }
  0x6d   :  { %v1088_v24 = vmax.f32 %v960_v13, %v1024_v62  ;;  %v706_v25 = vmax.f32 %v578_v16, %v642_v5  ;;  %v324_v26 = vmax.f32 %v196_v18, %v260_v12  ;;  %v133_v28 = vld [vmem:[%s3224_s1 + $0x128] sm:$0xff]  ;;  %v898_v31 = vld [vmem:[%s3230_s7 + $0x110] sm:$0xff]  ;;  %v516_v34 = vld [vmem:[%s3227_s4 + $0x120] sm:$0xff] }
  0x6e   :  { %v261_v29 = vld [vmem:[%s3225_s2 + $0x128] sm:$0xff]  ;;  %v961_v30 = vmax.f32 %v833_v19, %v897_v14  ;;  %v1026_v32 = vld [vmem:[%s3231_s8 + $0x110] sm:$0xff]  ;;  %v579_v33 = vmax.f32 %v451_v21, %v515_v17  ;;  %v197_v35 = vmax.f32 %v69_v27, %v133_v28  ;;  %v771_v37 = vld [vmem:[%s3229_s6 + $0x118] sm:$0xff] }
  0x6f   :  { %1153 = vst.msk [vmem:[%s3232_s9 + $0x100] sm:$0xff] %vm1120_vm0, %v1088_v24  ;;  %v834_v36 = vmax.f32 %v706_v25, %v770_v20  ;;  %v452_v38 = vmax.f32 %v324_v26, %v388_v23  ;;  %v644_v39 = vld [vmem:[%s3228_s5 + $0x120] sm:$0xff]  ;;  %v389_v40 = vld [vmem:[%s3226_s3 + $0x128] sm:$0xff]  ;;  %v70_v44 = vld [vmem:[%s3223_s0 + $0x130] sm:$0xff] }
  0x70   :  { %v1089_v41 = vmax.f32 %v961_v30, %v1025_v15  ;;  %v707_v42 = vmax.f32 %v579_v33, %v643_v22  ;;  %v325_v43 = vmax.f32 %v197_v35, %v261_v29  ;;  %v134_v45 = vld [vmem:[%s3224_s1 + $0x130] sm:$0xff]  ;;  %v899_v48 = vld [vmem:[%s3230_s7 + $0x118] sm:$0xff]  ;;  %v517_v51 = vld [vmem:[%s3227_s4 + $0x128] sm:$0xff] }
  0x71   :  { %v262_v46 = vld [vmem:[%s3225_s2 + $0x130] sm:$0xff]  ;;  %v962_v47 = vmax.f32 %v834_v36, %v898_v31  ;;  %v1027_v49 = vld [vmem:[%s3231_s8 + $0x118] sm:$0xff]  ;;  %v580_v50 = vmax.f32 %v452_v38, %v516_v34  ;;  %v198_v52 = vmax.f32 %v70_v44, %v134_v45  ;;  %v772_v54 = vld [vmem:[%s3229_s6 + $0x120] sm:$0xff] }
  0x72   :  { %1154 = vst.msk [vmem:[%s3232_s9 + $0x108] sm:$0xff] %vm1120_vm0, %v1089_v41  ;;  %v835_v53 = vmax.f32 %v707_v42, %v771_v37  ;;  %v453_v55 = vmax.f32 %v325_v43, %v389_v40  ;;  %v645_v56 = vld [vmem:[%s3228_s5 + $0x128] sm:$0xff]  ;;  %v390_v57 = vld [vmem:[%s3226_s3 + $0x130] sm:$0xff]  ;;  %v71_v61 = vld [vmem:[%s3223_s0 + $0x138] sm:$0xff] }
  0x73   :  { %v1090_v58 = vmax.f32 %v962_v47, %v1026_v32  ;;  %v708_v59 = vmax.f32 %v580_v50, %v644_v39  ;;  %v326_v60 = vmax.f32 %v198_v52, %v262_v46  ;;  %v135_v62 = vld [vmem:[%s3224_s1 + $0x138] sm:$0xff]  ;;  %v900_v1 = vld [vmem:[%s3230_s7 + $0x120] sm:$0xff]  ;;  %v518_v4 = vld [vmem:[%s3227_s4 + $0x130] sm:$0xff] }
  0x74   :  { %v263_v63 = vld [vmem:[%s3225_s2 + $0x138] sm:$0xff]  ;;  %v963_v0 = vmax.f32 %v835_v53, %v899_v48  ;;  %v1028_v2 = vld [vmem:[%s3231_s8 + $0x120] sm:$0xff]  ;;  %v581_v3 = vmax.f32 %v453_v55, %v517_v51  ;;  %v199_v5 = vmax.f32 %v71_v61, %v135_v62  ;;  %v773_v7 = vld [vmem:[%s3229_s6 + $0x128] sm:$0xff] }
  0x75   :  { %1155 = vst.msk [vmem:[%s3232_s9 + $0x110] sm:$0xff] %vm1120_vm0, %v1090_v58  ;;  %v836_v6 = vmax.f32 %v708_v59, %v772_v54  ;;  %v454_v8 = vmax.f32 %v326_v60, %v390_v57  ;;  %v646_v9 = vld [vmem:[%s3228_s5 + $0x130] sm:$0xff]  ;;  %v391_v10 = vld [vmem:[%s3226_s3 + $0x138] sm:$0xff]  ;;  %v72_v14 = vld [vmem:[%s3223_s0 + $0x140] sm:$0xff] }
  0x76   :  { %v1091_v11 = vmax.f32 %v963_v0, %v1027_v49  ;;  %v709_v12 = vmax.f32 %v581_v3, %v645_v56  ;;  %v327_v13 = vmax.f32 %v199_v5, %v263_v63  ;;  %v136_v15 = vld [vmem:[%s3224_s1 + $0x140] sm:$0xff]  ;;  %v901_v18 = vld [vmem:[%s3230_s7 + $0x128] sm:$0xff]  ;;  %v519_v21 = vld [vmem:[%s3227_s4 + $0x138] sm:$0xff] }
  0x77   :  { %v264_v16 = vld [vmem:[%s3225_s2 + $0x140] sm:$0xff]  ;;  %v964_v17 = vmax.f32 %v836_v6, %v900_v1  ;;  %v1029_v19 = vld [vmem:[%s3231_s8 + $0x128] sm:$0xff]  ;;  %v582_v20 = vmax.f32 %v454_v8, %v518_v4  ;;  %v200_v22 = vmax.f32 %v72_v14, %v136_v15  ;;  %v774_v24 = vld [vmem:[%s3229_s6 + $0x130] sm:$0xff] }
  0x78   :  { %1156 = vst.msk [vmem:[%s3232_s9 + $0x118] sm:$0xff] %vm1120_vm0, %v1091_v11  ;;  %v837_v23 = vmax.f32 %v709_v12, %v773_v7  ;;  %v455_v25 = vmax.f32 %v327_v13, %v391_v10  ;;  %v647_v26 = vld [vmem:[%s3228_s5 + $0x138] sm:$0xff]  ;;  %v392_v27 = vld [vmem:[%s3226_s3 + $0x140] sm:$0xff]  ;;  %v73_v31 = vld [vmem:[%s3223_s0 + $0x148] sm:$0xff] }
  0x79   :  { %v1092_v28 = vmax.f32 %v964_v17, %v1028_v2  ;;  %v710_v29 = vmax.f32 %v582_v20, %v646_v9  ;;  %v328_v30 = vmax.f32 %v200_v22, %v264_v16  ;;  %v137_v32 = vld [vmem:[%s3224_s1 + $0x148] sm:$0xff]  ;;  %v902_v35 = vld [vmem:[%s3230_s7 + $0x130] sm:$0xff]  ;;  %v520_v38 = vld [vmem:[%s3227_s4 + $0x140] sm:$0xff] }
  0x7a   :  { %v265_v33 = vld [vmem:[%s3225_s2 + $0x148] sm:$0xff]  ;;  %v965_v34 = vmax.f32 %v837_v23, %v901_v18  ;;  %v1030_v36 = vld [vmem:[%s3231_s8 + $0x130] sm:$0xff]  ;;  %v583_v37 = vmax.f32 %v455_v25, %v519_v21  ;;  %v201_v39 = vmax.f32 %v73_v31, %v137_v32  ;;  %v775_v41 = vld [vmem:[%s3229_s6 + $0x138] sm:$0xff] }
  0x7b   :  { %1157 = vst.msk [vmem:[%s3232_s9 + $0x120] sm:$0xff] %vm1120_vm0, %v1092_v28  ;;  %v838_v40 = vmax.f32 %v710_v29, %v774_v24  ;;  %v456_v42 = vmax.f32 %v328_v30, %v392_v27  ;;  %v648_v43 = vld [vmem:[%s3228_s5 + $0x140] sm:$0xff]  ;;  %v393_v44 = vld [vmem:[%s3226_s3 + $0x148] sm:$0xff]  ;;  %v74_v48 = vld [vmem:[%s3223_s0 + $0x150] sm:$0xff] }
  0x7c   :  { %v1093_v45 = vmax.f32 %v965_v34, %v1029_v19  ;;  %v711_v46 = vmax.f32 %v583_v37, %v647_v26  ;;  %v329_v47 = vmax.f32 %v201_v39, %v265_v33  ;;  %v138_v49 = vld [vmem:[%s3224_s1 + $0x150] sm:$0xff]  ;;  %v903_v52 = vld [vmem:[%s3230_s7 + $0x138] sm:$0xff]  ;;  %v521_v55 = vld [vmem:[%s3227_s4 + $0x148] sm:$0xff] }
  0x7d   :  { %v266_v50 = vld [vmem:[%s3225_s2 + $0x150] sm:$0xff]  ;;  %v966_v51 = vmax.f32 %v838_v40, %v902_v35  ;;  %v1031_v53 = vld [vmem:[%s3231_s8 + $0x138] sm:$0xff]  ;;  %v584_v54 = vmax.f32 %v456_v42, %v520_v38  ;;  %v202_v56 = vmax.f32 %v74_v48, %v138_v49  ;;  %v776_v58 = vld [vmem:[%s3229_s6 + $0x140] sm:$0xff] }
  0x7e   :  { %1158 = vst.msk [vmem:[%s3232_s9 + $0x128] sm:$0xff] %vm1120_vm0, %v1093_v45  ;;  %v839_v57 = vmax.f32 %v711_v46, %v775_v41  ;;  %v457_v59 = vmax.f32 %v329_v47, %v393_v44  ;;  %v649_v60 = vld [vmem:[%s3228_s5 + $0x148] sm:$0xff]  ;;  %v394_v61 = vld [vmem:[%s3226_s3 + $0x150] sm:$0xff]  ;;  %v75_v1 = vld [vmem:[%s3223_s0 + $0x158] sm:$0xff] }
  0x7f   :  { %v1094_v62 = vmax.f32 %v966_v51, %v1030_v36  ;;  %v712_v63 = vmax.f32 %v584_v54, %v648_v43  ;;  %v330_v0 = vmax.f32 %v202_v56, %v266_v50  ;;  %v139_v2 = vld [vmem:[%s3224_s1 + $0x158] sm:$0xff]  ;;  %v904_v5 = vld [vmem:[%s3230_s7 + $0x140] sm:$0xff]  ;;  %v522_v8 = vld [vmem:[%s3227_s4 + $0x150] sm:$0xff] }
  0x80   :  { %v267_v3 = vld [vmem:[%s3225_s2 + $0x158] sm:$0xff]  ;;  %v967_v4 = vmax.f32 %v839_v57, %v903_v52  ;;  %v1032_v6 = vld [vmem:[%s3231_s8 + $0x140] sm:$0xff]  ;;  %v585_v7 = vmax.f32 %v457_v59, %v521_v55  ;;  %v203_v9 = vmax.f32 %v75_v1, %v139_v2  ;;  %v777_v11 = vld [vmem:[%s3229_s6 + $0x148] sm:$0xff] }
  0x81   :  { %1159 = vst.msk [vmem:[%s3232_s9 + $0x130] sm:$0xff] %vm1120_vm0, %v1094_v62  ;;  %v840_v10 = vmax.f32 %v712_v63, %v776_v58  ;;  %v458_v12 = vmax.f32 %v330_v0, %v394_v61  ;;  %v650_v13 = vld [vmem:[%s3228_s5 + $0x150] sm:$0xff]  ;;  %v395_v14 = vld [vmem:[%s3226_s3 + $0x158] sm:$0xff]  ;;  %v76_v18 = vld [vmem:[%s3223_s0 + $0x160] sm:$0xff] }
  0x82   :  { %v1095_v15 = vmax.f32 %v967_v4, %v1031_v53  ;;  %v713_v16 = vmax.f32 %v585_v7, %v649_v60  ;;  %v331_v17 = vmax.f32 %v203_v9, %v267_v3  ;;  %v140_v19 = vld [vmem:[%s3224_s1 + $0x160] sm:$0xff]  ;;  %v905_v22 = vld [vmem:[%s3230_s7 + $0x148] sm:$0xff]  ;;  %v523_v25 = vld [vmem:[%s3227_s4 + $0x158] sm:$0xff] }
  0x83   :  { %v268_v20 = vld [vmem:[%s3225_s2 + $0x160] sm:$0xff]  ;;  %v968_v21 = vmax.f32 %v840_v10, %v904_v5  ;;  %v1033_v23 = vld [vmem:[%s3231_s8 + $0x148] sm:$0xff]  ;;  %v586_v24 = vmax.f32 %v458_v12, %v522_v8  ;;  %v204_v26 = vmax.f32 %v76_v18, %v140_v19  ;;  %v778_v28 = vld [vmem:[%s3229_s6 + $0x150] sm:$0xff] }
  0x84   :  { %1160 = vst.msk [vmem:[%s3232_s9 + $0x138] sm:$0xff] %vm1120_vm0, %v1095_v15  ;;  %v841_v27 = vmax.f32 %v713_v16, %v777_v11  ;;  %v459_v29 = vmax.f32 %v331_v17, %v395_v14  ;;  %v651_v30 = vld [vmem:[%s3228_s5 + $0x158] sm:$0xff]  ;;  %v396_v31 = vld [vmem:[%s3226_s3 + $0x160] sm:$0xff]  ;;  %v77_v35 = vld [vmem:[%s3223_s0 + $0x168] sm:$0xff] }
  0x85   :  { %v1096_v32 = vmax.f32 %v968_v21, %v1032_v6  ;;  %v714_v33 = vmax.f32 %v586_v24, %v650_v13  ;;  %v332_v34 = vmax.f32 %v204_v26, %v268_v20  ;;  %v141_v36 = vld [vmem:[%s3224_s1 + $0x168] sm:$0xff]  ;;  %v906_v39 = vld [vmem:[%s3230_s7 + $0x150] sm:$0xff]  ;;  %v524_v42 = vld [vmem:[%s3227_s4 + $0x160] sm:$0xff] }
  0x86   :  { %v269_v37 = vld [vmem:[%s3225_s2 + $0x168] sm:$0xff]  ;;  %v969_v38 = vmax.f32 %v841_v27, %v905_v22  ;;  %v1034_v40 = vld [vmem:[%s3231_s8 + $0x150] sm:$0xff]  ;;  %v587_v41 = vmax.f32 %v459_v29, %v523_v25  ;;  %v205_v43 = vmax.f32 %v77_v35, %v141_v36  ;;  %v779_v45 = vld [vmem:[%s3229_s6 + $0x158] sm:$0xff] }
  0x87   :  { %1161 = vst.msk [vmem:[%s3232_s9 + $0x140] sm:$0xff] %vm1120_vm0, %v1096_v32  ;;  %v842_v44 = vmax.f32 %v714_v33, %v778_v28  ;;  %v460_v46 = vmax.f32 %v332_v34, %v396_v31  ;;  %v652_v47 = vld [vmem:[%s3228_s5 + $0x160] sm:$0xff]  ;;  %v397_v48 = vld [vmem:[%s3226_s3 + $0x168] sm:$0xff]  ;;  %v78_v52 = vld [vmem:[%s3223_s0 + $0x170] sm:$0xff] }
  0x88   :  { %v1097_v49 = vmax.f32 %v969_v38, %v1033_v23  ;;  %v715_v50 = vmax.f32 %v587_v41, %v651_v30  ;;  %v333_v51 = vmax.f32 %v205_v43, %v269_v37  ;;  %v142_v53 = vld [vmem:[%s3224_s1 + $0x170] sm:$0xff]  ;;  %v907_v56 = vld [vmem:[%s3230_s7 + $0x158] sm:$0xff]  ;;  %v525_v59 = vld [vmem:[%s3227_s4 + $0x168] sm:$0xff] }
  0x89   :  { %v270_v54 = vld [vmem:[%s3225_s2 + $0x170] sm:$0xff]  ;;  %v970_v55 = vmax.f32 %v842_v44, %v906_v39  ;;  %v1035_v57 = vld [vmem:[%s3231_s8 + $0x158] sm:$0xff]  ;;  %v588_v58 = vmax.f32 %v460_v46, %v524_v42  ;;  %v206_v60 = vmax.f32 %v78_v52, %v142_v53  ;;  %v780_v62 = vld [vmem:[%s3229_s6 + $0x160] sm:$0xff] }
  0x8a   :  { %1162 = vst.msk [vmem:[%s3232_s9 + $0x148] sm:$0xff] %vm1120_vm0, %v1097_v49  ;;  %v843_v61 = vmax.f32 %v715_v50, %v779_v45  ;;  %v461_v63 = vmax.f32 %v333_v51, %v397_v48  ;;  %v653_v0 = vld [vmem:[%s3228_s5 + $0x168] sm:$0xff]  ;;  %v398_v1 = vld [vmem:[%s3226_s3 + $0x170] sm:$0xff]  ;;  %v79_v5 = vld [vmem:[%s3223_s0 + $0x178] sm:$0xff] }
  0x8b   :  { %v1098_v2 = vmax.f32 %v970_v55, %v1034_v40  ;;  %v716_v3 = vmax.f32 %v588_v58, %v652_v47  ;;  %v334_v4 = vmax.f32 %v206_v60, %v270_v54  ;;  %v143_v6 = vld [vmem:[%s3224_s1 + $0x178] sm:$0xff]  ;;  %v908_v9 = vld [vmem:[%s3230_s7 + $0x160] sm:$0xff]  ;;  %v526_v12 = vld [vmem:[%s3227_s4 + $0x170] sm:$0xff] }
  0x8c   :  { %v271_v7 = vld [vmem:[%s3225_s2 + $0x178] sm:$0xff]  ;;  %v971_v8 = vmax.f32 %v843_v61, %v907_v56  ;;  %v1036_v10 = vld [vmem:[%s3231_s8 + $0x160] sm:$0xff]  ;;  %v589_v11 = vmax.f32 %v461_v63, %v525_v59  ;;  %v207_v13 = vmax.f32 %v79_v5, %v143_v6  ;;  %v781_v15 = vld [vmem:[%s3229_s6 + $0x168] sm:$0xff] }
  0x8d   :  { %1163 = vst.msk [vmem:[%s3232_s9 + $0x150] sm:$0xff] %vm1120_vm0, %v1098_v2  ;;  %v844_v14 = vmax.f32 %v716_v3, %v780_v62  ;;  %v462_v16 = vmax.f32 %v334_v4, %v398_v1  ;;  %v654_v17 = vld [vmem:[%s3228_s5 + $0x170] sm:$0xff]  ;;  %v399_v18 = vld [vmem:[%s3226_s3 + $0x178] sm:$0xff]  ;;  %v80_v22 = vld [vmem:[%s3223_s0 + $0x180] sm:$0xff] }
  0x8e   :  { %v1099_v19 = vmax.f32 %v971_v8, %v1035_v57  ;;  %v717_v20 = vmax.f32 %v589_v11, %v653_v0  ;;  %v335_v21 = vmax.f32 %v207_v13, %v271_v7  ;;  %v144_v23 = vld [vmem:[%s3224_s1 + $0x180] sm:$0xff]  ;;  %v909_v26 = vld [vmem:[%s3230_s7 + $0x168] sm:$0xff]  ;;  %v527_v29 = vld [vmem:[%s3227_s4 + $0x178] sm:$0xff] }
  0x8f   :  { %v272_v24 = vld [vmem:[%s3225_s2 + $0x180] sm:$0xff]  ;;  %v972_v25 = vmax.f32 %v844_v14, %v908_v9  ;;  %v1037_v27 = vld [vmem:[%s3231_s8 + $0x168] sm:$0xff]  ;;  %v590_v28 = vmax.f32 %v462_v16, %v526_v12  ;;  %v208_v30 = vmax.f32 %v80_v22, %v144_v23  ;;  %v782_v32 = vld [vmem:[%s3229_s6 + $0x170] sm:$0xff] }
  0x90   :  { %1164 = vst.msk [vmem:[%s3232_s9 + $0x158] sm:$0xff] %vm1120_vm0, %v1099_v19  ;;  %v845_v31 = vmax.f32 %v717_v20, %v781_v15  ;;  %v463_v33 = vmax.f32 %v335_v21, %v399_v18  ;;  %v655_v34 = vld [vmem:[%s3228_s5 + $0x178] sm:$0xff]  ;;  %v400_v35 = vld [vmem:[%s3226_s3 + $0x180] sm:$0xff]  ;;  %v81_v39 = vld [vmem:[%s3223_s0 + $0x188] sm:$0xff] }
  0x91   :  { %v1100_v36 = vmax.f32 %v972_v25, %v1036_v10  ;;  %v718_v37 = vmax.f32 %v590_v28, %v654_v17  ;;  %v336_v38 = vmax.f32 %v208_v30, %v272_v24  ;;  %v145_v40 = vld [vmem:[%s3224_s1 + $0x188] sm:$0xff]  ;;  %v910_v43 = vld [vmem:[%s3230_s7 + $0x170] sm:$0xff]  ;;  %v528_v46 = vld [vmem:[%s3227_s4 + $0x180] sm:$0xff] }
  0x92   :  { %v273_v41 = vld [vmem:[%s3225_s2 + $0x188] sm:$0xff]  ;;  %v973_v42 = vmax.f32 %v845_v31, %v909_v26  ;;  %v1038_v44 = vld [vmem:[%s3231_s8 + $0x170] sm:$0xff]  ;;  %v591_v45 = vmax.f32 %v463_v33, %v527_v29  ;;  %v209_v47 = vmax.f32 %v81_v39, %v145_v40  ;;  %v783_v49 = vld [vmem:[%s3229_s6 + $0x178] sm:$0xff] }
  0x93   :  { %1165 = vst.msk [vmem:[%s3232_s9 + $0x160] sm:$0xff] %vm1120_vm0, %v1100_v36  ;;  %v846_v48 = vmax.f32 %v718_v37, %v782_v32  ;;  %v464_v50 = vmax.f32 %v336_v38, %v400_v35  ;;  %v656_v51 = vld [vmem:[%s3228_s5 + $0x180] sm:$0xff]  ;;  %v401_v52 = vld [vmem:[%s3226_s3 + $0x188] sm:$0xff]  ;;  %v82_v56 = vld [vmem:[%s3223_s0 + $0x190] sm:$0xff] }
  0x94   :  { %v1101_v53 = vmax.f32 %v973_v42, %v1037_v27  ;;  %v719_v54 = vmax.f32 %v591_v45, %v655_v34  ;;  %v337_v55 = vmax.f32 %v209_v47, %v273_v41  ;;  %v146_v57 = vld [vmem:[%s3224_s1 + $0x190] sm:$0xff]  ;;  %v911_v60 = vld [vmem:[%s3230_s7 + $0x178] sm:$0xff]  ;;  %v529_v63 = vld [vmem:[%s3227_s4 + $0x188] sm:$0xff] }
  0x95   :  { %v274_v58 = vld [vmem:[%s3225_s2 + $0x190] sm:$0xff]  ;;  %v974_v59 = vmax.f32 %v846_v48, %v910_v43  ;;  %v1039_v61 = vld [vmem:[%s3231_s8 + $0x178] sm:$0xff]  ;;  %v592_v62 = vmax.f32 %v464_v50, %v528_v46  ;;  %v210_v0 = vmax.f32 %v82_v56, %v146_v57  ;;  %v784_v2 = vld [vmem:[%s3229_s6 + $0x180] sm:$0xff] }
  0x96   :  { %1166 = vst.msk [vmem:[%s3232_s9 + $0x168] sm:$0xff] %vm1120_vm0, %v1101_v53  ;;  %v847_v1 = vmax.f32 %v719_v54, %v783_v49  ;;  %v465_v3 = vmax.f32 %v337_v55, %v401_v52  ;;  %v657_v4 = vld [vmem:[%s3228_s5 + $0x188] sm:$0xff]  ;;  %v402_v5 = vld [vmem:[%s3226_s3 + $0x190] sm:$0xff]  ;;  %v83_v9 = vld [vmem:[%s3223_s0 + $0x198] sm:$0xff] }
  0x97   :  { %v1102_v6 = vmax.f32 %v974_v59, %v1038_v44  ;;  %v720_v7 = vmax.f32 %v592_v62, %v656_v51  ;;  %v338_v8 = vmax.f32 %v210_v0, %v274_v58  ;;  %v147_v10 = vld [vmem:[%s3224_s1 + $0x198] sm:$0xff]  ;;  %v912_v13 = vld [vmem:[%s3230_s7 + $0x180] sm:$0xff]  ;;  %v530_v16 = vld [vmem:[%s3227_s4 + $0x190] sm:$0xff] }
  0x98   :  { %v275_v11 = vld [vmem:[%s3225_s2 + $0x198] sm:$0xff]  ;;  %v975_v12 = vmax.f32 %v847_v1, %v911_v60  ;;  %v1040_v14 = vld [vmem:[%s3231_s8 + $0x180] sm:$0xff]  ;;  %v593_v15 = vmax.f32 %v465_v3, %v529_v63  ;;  %v211_v17 = vmax.f32 %v83_v9, %v147_v10  ;;  %v785_v19 = vld [vmem:[%s3229_s6 + $0x188] sm:$0xff] }
  0x99   :  { %1167 = vst.msk [vmem:[%s3232_s9 + $0x170] sm:$0xff] %vm1120_vm0, %v1102_v6  ;;  %v848_v18 = vmax.f32 %v720_v7, %v784_v2  ;;  %v466_v20 = vmax.f32 %v338_v8, %v402_v5  ;;  %v658_v21 = vld [vmem:[%s3228_s5 + $0x190] sm:$0xff]  ;;  %v403_v22 = vld [vmem:[%s3226_s3 + $0x198] sm:$0xff]  ;;  %v84_v26 = vld [vmem:[%s3223_s0 + $0x1a0] sm:$0xff] }
  0x9a   :  { %v1103_v23 = vmax.f32 %v975_v12, %v1039_v61  ;;  %v721_v24 = vmax.f32 %v593_v15, %v657_v4  ;;  %v339_v25 = vmax.f32 %v211_v17, %v275_v11  ;;  %v148_v27 = vld [vmem:[%s3224_s1 + $0x1a0] sm:$0xff]  ;;  %v913_v30 = vld [vmem:[%s3230_s7 + $0x188] sm:$0xff]  ;;  %v531_v33 = vld [vmem:[%s3227_s4 + $0x198] sm:$0xff] }
  0x9b   :  { %v276_v28 = vld [vmem:[%s3225_s2 + $0x1a0] sm:$0xff]  ;;  %v976_v29 = vmax.f32 %v848_v18, %v912_v13  ;;  %v1041_v31 = vld [vmem:[%s3231_s8 + $0x188] sm:$0xff]  ;;  %v594_v32 = vmax.f32 %v466_v20, %v530_v16  ;;  %v212_v34 = vmax.f32 %v84_v26, %v148_v27  ;;  %v786_v36 = vld [vmem:[%s3229_s6 + $0x190] sm:$0xff] }
  0x9c   :  { %1168 = vst.msk [vmem:[%s3232_s9 + $0x178] sm:$0xff] %vm1120_vm0, %v1103_v23  ;;  %v849_v35 = vmax.f32 %v721_v24, %v785_v19  ;;  %v467_v37 = vmax.f32 %v339_v25, %v403_v22  ;;  %v659_v38 = vld [vmem:[%s3228_s5 + $0x198] sm:$0xff]  ;;  %v404_v39 = vld [vmem:[%s3226_s3 + $0x1a0] sm:$0xff]  ;;  %v85_v43 = vld [vmem:[%s3223_s0 + $0x1a8] sm:$0xff] }
  0x9d   :  { %v1104_v40 = vmax.f32 %v976_v29, %v1040_v14  ;;  %v722_v41 = vmax.f32 %v594_v32, %v658_v21  ;;  %v340_v42 = vmax.f32 %v212_v34, %v276_v28  ;;  %v149_v44 = vld [vmem:[%s3224_s1 + $0x1a8] sm:$0xff]  ;;  %v914_v47 = vld [vmem:[%s3230_s7 + $0x190] sm:$0xff]  ;;  %v532_v50 = vld [vmem:[%s3227_s4 + $0x1a0] sm:$0xff] }
  0x9e   :  { %v277_v45 = vld [vmem:[%s3225_s2 + $0x1a8] sm:$0xff]  ;;  %v977_v46 = vmax.f32 %v849_v35, %v913_v30  ;;  %v1042_v48 = vld [vmem:[%s3231_s8 + $0x190] sm:$0xff]  ;;  %v595_v49 = vmax.f32 %v467_v37, %v531_v33  ;;  %v213_v51 = vmax.f32 %v85_v43, %v149_v44  ;;  %v787_v53 = vld [vmem:[%s3229_s6 + $0x198] sm:$0xff] }
  0x9f   :  { %1169 = vst.msk [vmem:[%s3232_s9 + $0x180] sm:$0xff] %vm1120_vm0, %v1104_v40  ;;  %v850_v52 = vmax.f32 %v722_v41, %v786_v36  ;;  %v468_v54 = vmax.f32 %v340_v42, %v404_v39  ;;  %v660_v55 = vld [vmem:[%s3228_s5 + $0x1a0] sm:$0xff]  ;;  %v405_v56 = vld [vmem:[%s3226_s3 + $0x1a8] sm:$0xff]  ;;  %v86_v60 = vld [vmem:[%s3223_s0 + $0x1b0] sm:$0xff] }
  0xa0   :  { %v1105_v57 = vmax.f32 %v977_v46, %v1041_v31  ;;  %v723_v58 = vmax.f32 %v595_v49, %v659_v38  ;;  %v341_v59 = vmax.f32 %v213_v51, %v277_v45  ;;  %v150_v61 = vld [vmem:[%s3224_s1 + $0x1b0] sm:$0xff]  ;;  %v915_v0 = vld [vmem:[%s3230_s7 + $0x198] sm:$0xff]  ;;  %v533_v3 = vld [vmem:[%s3227_s4 + $0x1a8] sm:$0xff] }
  0xa1   :  { %v278_v62 = vld [vmem:[%s3225_s2 + $0x1b0] sm:$0xff]  ;;  %v978_v63 = vmax.f32 %v850_v52, %v914_v47  ;;  %v1043_v1 = vld [vmem:[%s3231_s8 + $0x198] sm:$0xff]  ;;  %v596_v2 = vmax.f32 %v468_v54, %v532_v50  ;;  %v214_v4 = vmax.f32 %v86_v60, %v150_v61  ;;  %v788_v6 = vld [vmem:[%s3229_s6 + $0x1a0] sm:$0xff] }
  0xa2   :  { %1170 = vst.msk [vmem:[%s3232_s9 + $0x188] sm:$0xff] %vm1120_vm0, %v1105_v57  ;;  %v851_v5 = vmax.f32 %v723_v58, %v787_v53  ;;  %v469_v7 = vmax.f32 %v341_v59, %v405_v56  ;;  %v661_v8 = vld [vmem:[%s3228_s5 + $0x1a8] sm:$0xff]  ;;  %v406_v9 = vld [vmem:[%s3226_s3 + $0x1b0] sm:$0xff]  ;;  %v87_v13 = vld [vmem:[%s3223_s0 + $0x1b8] sm:$0xff] }
  0xa3   :  { %v1106_v10 = vmax.f32 %v978_v63, %v1042_v48  ;;  %v724_v11 = vmax.f32 %v596_v2, %v660_v55  ;;  %v342_v12 = vmax.f32 %v214_v4, %v278_v62  ;;  %v151_v14 = vld [vmem:[%s3224_s1 + $0x1b8] sm:$0xff]  ;;  %v916_v17 = vld [vmem:[%s3230_s7 + $0x1a0] sm:$0xff]  ;;  %v534_v20 = vld [vmem:[%s3227_s4 + $0x1b0] sm:$0xff] }
  0xa4   :  { %v279_v15 = vld [vmem:[%s3225_s2 + $0x1b8] sm:$0xff]  ;;  %v979_v16 = vmax.f32 %v851_v5, %v915_v0  ;;  %v1044_v18 = vld [vmem:[%s3231_s8 + $0x1a0] sm:$0xff]  ;;  %v597_v19 = vmax.f32 %v469_v7, %v533_v3  ;;  %v215_v21 = vmax.f32 %v87_v13, %v151_v14  ;;  %v789_v23 = vld [vmem:[%s3229_s6 + $0x1a8] sm:$0xff] }
  0xa5   :  { %1171 = vst.msk [vmem:[%s3232_s9 + $0x190] sm:$0xff] %vm1120_vm0, %v1106_v10  ;;  %v852_v22 = vmax.f32 %v724_v11, %v788_v6  ;;  %v470_v24 = vmax.f32 %v342_v12, %v406_v9  ;;  %v662_v25 = vld [vmem:[%s3228_s5 + $0x1b0] sm:$0xff]  ;;  %v407_v26 = vld [vmem:[%s3226_s3 + $0x1b8] sm:$0xff]  ;;  %v88_v30 = vld [vmem:[%s3223_s0 + $0x1c0] sm:$0xff] }
  0xa6   :  { %v1107_v27 = vmax.f32 %v979_v16, %v1043_v1  ;;  %v725_v28 = vmax.f32 %v597_v19, %v661_v8  ;;  %v343_v29 = vmax.f32 %v215_v21, %v279_v15  ;;  %v152_v31 = vld [vmem:[%s3224_s1 + $0x1c0] sm:$0xff]  ;;  %v917_v34 = vld [vmem:[%s3230_s7 + $0x1a8] sm:$0xff]  ;;  %v535_v37 = vld [vmem:[%s3227_s4 + $0x1b8] sm:$0xff] }
  0xa7   :  { %v280_v32 = vld [vmem:[%s3225_s2 + $0x1c0] sm:$0xff]  ;;  %v980_v33 = vmax.f32 %v852_v22, %v916_v17  ;;  %v1045_v35 = vld [vmem:[%s3231_s8 + $0x1a8] sm:$0xff]  ;;  %v598_v36 = vmax.f32 %v470_v24, %v534_v20  ;;  %v216_v38 = vmax.f32 %v88_v30, %v152_v31  ;;  %v790_v40 = vld [vmem:[%s3229_s6 + $0x1b0] sm:$0xff] }
  0xa8   :  { %1172 = vst.msk [vmem:[%s3232_s9 + $0x198] sm:$0xff] %vm1120_vm0, %v1107_v27  ;;  %v853_v39 = vmax.f32 %v725_v28, %v789_v23  ;;  %v471_v41 = vmax.f32 %v343_v29, %v407_v26  ;;  %v663_v42 = vld [vmem:[%s3228_s5 + $0x1b8] sm:$0xff]  ;;  %v408_v43 = vld [vmem:[%s3226_s3 + $0x1c0] sm:$0xff]  ;;  %v89_v47 = vld [vmem:[%s3223_s0 + $0x1c8] sm:$0xff] }
  0xa9   :  { %v1108_v44 = vmax.f32 %v980_v33, %v1044_v18  ;;  %v726_v45 = vmax.f32 %v598_v36, %v662_v25  ;;  %v344_v46 = vmax.f32 %v216_v38, %v280_v32  ;;  %v153_v48 = vld [vmem:[%s3224_s1 + $0x1c8] sm:$0xff]  ;;  %v918_v51 = vld [vmem:[%s3230_s7 + $0x1b0] sm:$0xff]  ;;  %v536_v54 = vld [vmem:[%s3227_s4 + $0x1c0] sm:$0xff] }
  0xaa   :  { %v281_v49 = vld [vmem:[%s3225_s2 + $0x1c8] sm:$0xff]  ;;  %v981_v50 = vmax.f32 %v853_v39, %v917_v34  ;;  %v1046_v52 = vld [vmem:[%s3231_s8 + $0x1b0] sm:$0xff]  ;;  %v599_v53 = vmax.f32 %v471_v41, %v535_v37  ;;  %v217_v55 = vmax.f32 %v89_v47, %v153_v48  ;;  %v791_v57 = vld [vmem:[%s3229_s6 + $0x1b8] sm:$0xff] }
  0xab   :  { %1173 = vst.msk [vmem:[%s3232_s9 + $0x1a0] sm:$0xff] %vm1120_vm0, %v1108_v44  ;;  %v854_v56 = vmax.f32 %v726_v45, %v790_v40  ;;  %v472_v58 = vmax.f32 %v344_v46, %v408_v43  ;;  %v664_v59 = vld [vmem:[%s3228_s5 + $0x1c0] sm:$0xff]  ;;  %v409_v60 = vld [vmem:[%s3226_s3 + $0x1c8] sm:$0xff]  ;;  %v90_v0 = vld [vmem:[%s3223_s0 + $0x1d0] sm:$0xff] }
  0xac   :  { %v1109_v61 = vmax.f32 %v981_v50, %v1045_v35  ;;  %v727_v62 = vmax.f32 %v599_v53, %v663_v42  ;;  %v345_v63 = vmax.f32 %v217_v55, %v281_v49  ;;  %v154_v1 = vld [vmem:[%s3224_s1 + $0x1d0] sm:$0xff]  ;;  %v919_v4 = vld [vmem:[%s3230_s7 + $0x1b8] sm:$0xff]  ;;  %v537_v7 = vld [vmem:[%s3227_s4 + $0x1c8] sm:$0xff] }
  0xad   :  { %v282_v2 = vld [vmem:[%s3225_s2 + $0x1d0] sm:$0xff]  ;;  %v982_v3 = vmax.f32 %v854_v56, %v918_v51  ;;  %v1047_v5 = vld [vmem:[%s3231_s8 + $0x1b8] sm:$0xff]  ;;  %v600_v6 = vmax.f32 %v472_v58, %v536_v54  ;;  %v218_v8 = vmax.f32 %v90_v0, %v154_v1  ;;  %v792_v10 = vld [vmem:[%s3229_s6 + $0x1c0] sm:$0xff] }
  0xae   :  { %1174 = vst.msk [vmem:[%s3232_s9 + $0x1a8] sm:$0xff] %vm1120_vm0, %v1109_v61  ;;  %v855_v9 = vmax.f32 %v727_v62, %v791_v57  ;;  %v473_v11 = vmax.f32 %v345_v63, %v409_v60  ;;  %v665_v12 = vld [vmem:[%s3228_s5 + $0x1c8] sm:$0xff]  ;;  %v410_v13 = vld [vmem:[%s3226_s3 + $0x1d0] sm:$0xff]  ;;  %v91_v17 = vld [vmem:[%s3223_s0 + $0x1d8] sm:$0xff] }
  0xaf   :  { %v1110_v14 = vmax.f32 %v982_v3, %v1046_v52  ;;  %v728_v15 = vmax.f32 %v600_v6, %v664_v59  ;;  %v346_v16 = vmax.f32 %v218_v8, %v282_v2  ;;  %v155_v18 = vld [vmem:[%s3224_s1 + $0x1d8] sm:$0xff]  ;;  %v920_v21 = vld [vmem:[%s3230_s7 + $0x1c0] sm:$0xff]  ;;  %v538_v24 = vld [vmem:[%s3227_s4 + $0x1d0] sm:$0xff] }
  0xb0   :  { %v283_v19 = vld [vmem:[%s3225_s2 + $0x1d8] sm:$0xff]  ;;  %v983_v20 = vmax.f32 %v855_v9, %v919_v4  ;;  %v1048_v22 = vld [vmem:[%s3231_s8 + $0x1c0] sm:$0xff]  ;;  %v601_v23 = vmax.f32 %v473_v11, %v537_v7  ;;  %v219_v25 = vmax.f32 %v91_v17, %v155_v18  ;;  %v793_v27 = vld [vmem:[%s3229_s6 + $0x1c8] sm:$0xff] }
  0xb1   :  { %1175 = vst.msk [vmem:[%s3232_s9 + $0x1b0] sm:$0xff] %vm1120_vm0, %v1110_v14  ;;  %v856_v26 = vmax.f32 %v728_v15, %v792_v10  ;;  %v474_v28 = vmax.f32 %v346_v16, %v410_v13  ;;  %v666_v29 = vld [vmem:[%s3228_s5 + $0x1d0] sm:$0xff]  ;;  %v411_v30 = vld [vmem:[%s3226_s3 + $0x1d8] sm:$0xff]  ;;  %v92_v34 = vld [vmem:[%s3223_s0 + $0x1e0] sm:$0xff] }
  0xb2   :  { %v1111_v31 = vmax.f32 %v983_v20, %v1047_v5  ;;  %v729_v32 = vmax.f32 %v601_v23, %v665_v12  ;;  %v347_v33 = vmax.f32 %v219_v25, %v283_v19  ;;  %v156_v35 = vld [vmem:[%s3224_s1 + $0x1e0] sm:$0xff]  ;;  %v921_v38 = vld [vmem:[%s3230_s7 + $0x1c8] sm:$0xff]  ;;  %v539_v41 = vld [vmem:[%s3227_s4 + $0x1d8] sm:$0xff] }
  0xb3   :  { %v284_v36 = vld [vmem:[%s3225_s2 + $0x1e0] sm:$0xff]  ;;  %v984_v37 = vmax.f32 %v856_v26, %v920_v21  ;;  %v1049_v39 = vld [vmem:[%s3231_s8 + $0x1c8] sm:$0xff]  ;;  %v602_v40 = vmax.f32 %v474_v28, %v538_v24  ;;  %v220_v42 = vmax.f32 %v92_v34, %v156_v35  ;;  %v794_v44 = vld [vmem:[%s3229_s6 + $0x1d0] sm:$0xff] }
  0xb4   :  { %1176 = vst.msk [vmem:[%s3232_s9 + $0x1b8] sm:$0xff] %vm1120_vm0, %v1111_v31  ;;  %v857_v43 = vmax.f32 %v729_v32, %v793_v27  ;;  %v475_v45 = vmax.f32 %v347_v33, %v411_v30  ;;  %v667_v46 = vld [vmem:[%s3228_s5 + $0x1d8] sm:$0xff]  ;;  %v412_v47 = vld [vmem:[%s3226_s3 + $0x1e0] sm:$0xff]  ;;  %v93_v51 = vld [vmem:[%s3223_s0 + $0x1e8] sm:$0xff] }
  0xb5   :  { %v1112_v48 = vmax.f32 %v984_v37, %v1048_v22  ;;  %v730_v49 = vmax.f32 %v602_v40, %v666_v29  ;;  %v348_v50 = vmax.f32 %v220_v42, %v284_v36  ;;  %v157_v52 = vld [vmem:[%s3224_s1 + $0x1e8] sm:$0xff]  ;;  %v922_v55 = vld [vmem:[%s3230_s7 + $0x1d0] sm:$0xff]  ;;  %v540_v58 = vld [vmem:[%s3227_s4 + $0x1e0] sm:$0xff] }
  0xb6   :  { %v285_v53 = vld [vmem:[%s3225_s2 + $0x1e8] sm:$0xff]  ;;  %v985_v54 = vmax.f32 %v857_v43, %v921_v38  ;;  %v1050_v56 = vld [vmem:[%s3231_s8 + $0x1d0] sm:$0xff]  ;;  %v603_v57 = vmax.f32 %v475_v45, %v539_v41  ;;  %v221_v59 = vmax.f32 %v93_v51, %v157_v52  ;;  %v795_v61 = vld [vmem:[%s3229_s6 + $0x1d8] sm:$0xff] }
  0xb7   :  { %1177 = vst.msk [vmem:[%s3232_s9 + $0x1c0] sm:$0xff] %vm1120_vm0, %v1112_v48  ;;  %v858_v60 = vmax.f32 %v730_v49, %v794_v44  ;;  %v476_v62 = vmax.f32 %v348_v50, %v412_v47  ;;  %v668_v63 = vld [vmem:[%s3228_s5 + $0x1e0] sm:$0xff]  ;;  %v413_v0 = vld [vmem:[%s3226_s3 + $0x1e8] sm:$0xff]  ;;  %v94_v4 = vld [vmem:[%s3223_s0 + $0x1f0] sm:$0xff] }
  0xb8   :  { %v1113_v1 = vmax.f32 %v985_v54, %v1049_v39  ;;  %v731_v2 = vmax.f32 %v603_v57, %v667_v46  ;;  %v349_v3 = vmax.f32 %v221_v59, %v285_v53  ;;  %v158_v5 = vld [vmem:[%s3224_s1 + $0x1f0] sm:$0xff]  ;;  %v923_v8 = vld [vmem:[%s3230_s7 + $0x1d8] sm:$0xff]  ;;  %v541_v11 = vld [vmem:[%s3227_s4 + $0x1e8] sm:$0xff] }
  0xb9   :  { %v286_v6 = vld [vmem:[%s3225_s2 + $0x1f0] sm:$0xff]  ;;  %v986_v7 = vmax.f32 %v858_v60, %v922_v55  ;;  %v1051_v9 = vld [vmem:[%s3231_s8 + $0x1d8] sm:$0xff]  ;;  %v604_v10 = vmax.f32 %v476_v62, %v540_v58  ;;  %v222_v12 = vmax.f32 %v94_v4, %v158_v5  ;;  %v796_v14 = vld [vmem:[%s3229_s6 + $0x1e0] sm:$0xff] }
  0xba   :  { %1178 = vst.msk [vmem:[%s3232_s9 + $0x1c8] sm:$0xff] %vm1120_vm0, %v1113_v1  ;;  %v859_v13 = vmax.f32 %v731_v2, %v795_v61  ;;  %v477_v15 = vmax.f32 %v349_v3, %v413_v0  ;;  %v669_v16 = vld [vmem:[%s3228_s5 + $0x1e8] sm:$0xff]  ;;  %v414_v17 = vld [vmem:[%s3226_s3 + $0x1f0] sm:$0xff]  ;;  %v95_v21 = vld [vmem:[%s3223_s0 + $0x1f8] sm:$0xff] }
  0xbb   :  { %v1114_v18 = vmax.f32 %v986_v7, %v1050_v56  ;;  %v732_v19 = vmax.f32 %v604_v10, %v668_v63  ;;  %v350_v20 = vmax.f32 %v222_v12, %v286_v6  ;;  %v159_v22 = vld [vmem:[%s3224_s1 + $0x1f8] sm:$0xff]  ;;  %v924_v25 = vld [vmem:[%s3230_s7 + $0x1e0] sm:$0xff]  ;;  %v542_v27 = vld [vmem:[%s3227_s4 + $0x1f0] sm:$0xff] }
  0xbc   :  { %v287_v23 = vld [vmem:[%s3225_s2 + $0x1f8] sm:$0xff]  ;;  %v987_v24 = vmax.f32 %v859_v13, %v923_v8  ;;  %v605_v26 = vmax.f32 %v477_v15, %v541_v11  ;;  %v223_v28 = vmax.f32 %v95_v21, %v159_v22  ;;  %v797_v30 = vld [vmem:[%s3229_s6 + $0x1e8] sm:$0xff]  ;;  %v1052_v34 = vld [vmem:[%s3231_s8 + $0x1e0] sm:$0xff] }
  0xbd   :  { %1179 = vst.msk [vmem:[%s3232_s9 + $0x1d0] sm:$0xff] %vm1120_vm0, %v1114_v18  ;;  %v860_v29 = vmax.f32 %v732_v19, %v796_v14  ;;  %v478_v31 = vmax.f32 %v350_v20, %v414_v17  ;;  %v415_v32 = vld [vmem:[%s3226_s3 + $0x1f8] sm:$0xff]  ;;  %v670_v36 = vld [vmem:[%s3228_s5 + $0x1f0] sm:$0xff]  ;;  %v925_v39 = vld [vmem:[%s3230_s7 + $0x1e8] sm:$0xff] }
  0xbe   :  { %v1115_v33 = vmax.f32 %v987_v24, %v1051_v9  ;;  %v733_v35 = vmax.f32 %v605_v26, %v669_v16  ;;  %v351_v37 = vmax.f32 %v223_v28, %v287_v23  ;;  %v543_v41 = vld [vmem:[%s3227_s4 + $0x1f8] sm:$0xff]  ;;  %v798_v43 = vld [vmem:[%s3229_s6 + $0x1f0] sm:$0xff]  ;;  %v1053_v46 = vld [vmem:[%s3231_s8 + $0x1e8] sm:$0xff] }
  0xbf   :  { %v988_v38 = vmax.f32 %v860_v29, %v924_v25  ;;  %v606_v40 = vmax.f32 %v478_v31, %v542_v27  ;;  %v671_v48 = vld [vmem:[%s3228_s5 + $0x1f8] sm:$0xff]  ;;  %v926_v50 = vld [vmem:[%s3230_s7 + $0x1f0] sm:$0xff] }
  0xc0   :  { %1180 = vst.msk [vmem:[%s3232_s9 + $0x1d8] sm:$0xff] %vm1120_vm0, %v1115_v33  ;;  %v861_v42 = vmax.f32 %v733_v35, %v797_v30  ;;  %v479_v44 = vmax.f32 %v351_v37, %v415_v32  ;;  %v799_v53 = vld [vmem:[%s3229_s6 + $0x1f8] sm:$0xff]  ;;  %v1054_v55 = vld [vmem:[%s3231_s8 + $0x1f0] sm:$0xff] }
  0xc1   :  { %v1116_v45 = vmax.f32 %v988_v38, %v1052_v34  ;;  %v734_v47 = vmax.f32 %v606_v40, %v670_v36  ;;  %v927_v58 = vld [vmem:[%s3230_s7 + $0x1f8] sm:$0xff] }
  0xc2   :  { %v989_v49 = vmax.f32 %v861_v42, %v925_v39  ;;  %v607_v51 = vmax.f32 %v479_v44, %v543_v41  ;;  %v1055_v61 = vld [vmem:[%s3231_s8 + $0x1f8] sm:$0xff] }
  0xc3   :  { %1181 = vst.msk [vmem:[%s3232_s9 + $0x1e0] sm:$0xff] %vm1120_vm0, %v1116_v45  ;;  %v862_v52 = vmax.f32 %v734_v47, %v798_v43 }
  0xc4   :  { %v1117_v54 = vmax.f32 %v989_v49, %v1053_v46  ;;  %v735_v56 = vmax.f32 %v607_v51, %v671_v48 }
  0xc5   :  { %v990_v57 = vmax.f32 %v862_v52, %v926_v50 }
  0xc6   :  { %1182 = vst.msk [vmem:[%s3232_s9 + $0x1e8] sm:$0xff] %vm1120_vm0, %v1117_v54  ;;  %v863_v59 = vmax.f32 %v735_v56, %v799_v53 }
  0xc7   :  { %v1118_v60 = vmax.f32 %v990_v57, %v1054_v55 }
  0xc8   :  { %v991_v62 = vmax.f32 %v863_v59, %v927_v58 }
  0xc9   :  { %1183 = vst.msk [vmem:[%s3232_s9 + $0x1f0] sm:$0xff] %vm1120_vm0, %v1118_v60 }
  0xca   :  { %v1119_v63 = vmax.f32 %v991_v62, %v1055_v61 }
  0xcc   :  { %1184 = vst.msk [vmem:[%s3232_s9 + $0x1f8] sm:$0xff] %vm1120_vm0, %v1119_v63 }

// kernel: slow_only_forward.18
= control target key start
LH: loop header
LB: loop body
LE: loop exit
PB: predicated region body
PF: predicated region fallthrough
CT: control target
= control target key end

     0   :  { %vm360_vm0 = vcmask 1041408   ;;  %vm263_vm1 = vcmask 293888   ;;  %vm597_vm2 = vcmask 31744   ;;  %s1360_s1 = inlined_call_operand.vmem [shape: bf16[36,4], index: 1, kind: input, shape index: {}]   ;;  %s1361_s2 = inlined_call_operand.vmem [shape: f32[1,4], index: 2, kind: input, shape index: {}]   ;;  %s1362_s0 = inlined_call_operand.vmem [shape: bf16[512,36], index: 0, kind: input, shape index: {}]   ;;  %s1363_s3 = inlined_call_operand.vmem [shape: f32[512,4], index: 3, kind: output, shape index: {}]  }
   0x1   :  { %v83_v0 = vld [vmem:[%s1360_s1 + $0x10] sm:$0x3]  ;;  %v867_v4 = vld [vmem:[%s1360_s1 + $0x8] sm:$0xff]  ;;  %v866_v5 = vld [vmem:[%s1360_s1] sm:$0xff] }
   0x2   :  { %v257_v1 = vunpack.c.l.b16 %v83_v0  ;;  %v834_v6 = vld [vmem:[%s1362_s0] sm:$0xff]  ;;  %v835_v10 = vld [vmem:[%s1362_s0 + $0x8] sm:$0xff]  ;;  %v836_v14 = vld [vmem:[%s1362_s0 + $0x10] sm:$0xff] }
   0x3   :  { %v842_v7 = vld [vmem:[%s1362_s0 + $0x40] sm:$0xff]  ;;  %v843_v11 = vld [vmem:[%s1362_s0 + $0x48] sm:$0xff]  ;;  %v844_v15 = vld [vmem:[%s1362_s0 + $0x50] sm:$0xff] }
   0x4   :  { %v260_v2 = vpack.c.b16 %v257_v1, %v257_v1  ;;  %v850_v8 = vld [vmem:[%s1362_s0 + $0x80] sm:$0xff]  ;;  %v851_v12 = vld [vmem:[%s1362_s0 + $0x88] sm:$0xff]  ;;  %v852_v16 = vld [vmem:[%s1362_s0 + $0x90] sm:$0xff] }
   0x5   :  { %v858_v9 = vld [vmem:[%s1362_s0 + $0xc0] sm:$0xff]  ;;  %v859_v13 = vld [vmem:[%s1362_s0 + $0xc8] sm:$0xff]  ;;  %v860_v17 = vld [vmem:[%s1362_s0 + $0xd0] sm:$0xff] }
   0x6   :  { %v362_v3 = vsel %vm360_vm0, %v260_v2, 0  ;;  %v837_v18 = vld [vmem:[%s1362_s0 + $0x18] sm:$0xff]  ;;  %v838_v22 = vld [vmem:[%s1362_s0 + $0x20] sm:$0xff]  ;;  %v839_v26 = vld [vmem:[%s1362_s0 + $0x28] sm:$0xff] }
   0x7   :  { %369 = vmatpush.bf16.msra.mxu0 %v362_v3  ;;  %868 = vmatpush.bf16.msra.mxu1 %v362_v3  ;;  %v845_v19 = vld [vmem:[%s1362_s0 + $0x58] sm:$0xff]  ;;  %v846_v23 = vld [vmem:[%s1362_s0 + $0x60] sm:$0xff]  ;;  %v847_v27 = vld [vmem:[%s1362_s0 + $0x68] sm:$0xff] }
   0x8   :  { %869 = vmatpush.bf16.msra.mxu2 %v362_v3  ;;  %870 = vmatpush.bf16.msra.mxu3 %v362_v3  ;;  %v853_v20 = vld [vmem:[%s1362_s0 + $0x98] sm:$0xff]  ;;  %v854_v24 = vld [vmem:[%s1362_s0 + $0xa0] sm:$0xff]  ;;  %v855_v28 = vld [vmem:[%s1362_s0 + $0xa8] sm:$0xff] }
   0x9   :  { %v861_v21 = vld [vmem:[%s1362_s0 + $0xd8] sm:$0xff]  ;;  %v862_v25 = vld [vmem:[%s1362_s0 + $0xe0] sm:$0xff]  ;;  %v863_v29 = vld [vmem:[%s1362_s0 + $0xe8] sm:$0xff] }
   0xa   :  { %v840_v30 = vld [vmem:[%s1362_s0 + $0x30] sm:$0xff]  ;;  %v841_v34 = vld [vmem:[%s1362_s0 + $0x38] sm:$0xff]  ;;  %v1038_v38 = vld [vmem:[%s1361_s2] ss:$0 sm:$0xff] }
   0xb   :  { %370 = vmatpush.bf16.msra.mxu0 %v867_v4  ;;  %871 = vmatpush.bf16.msra.mxu1 %v867_v4  ;;  %v848_v31 = vld [vmem:[%s1362_s0 + $0x70] sm:$0xff]  ;;  %v849_v35 = vld [vmem:[%s1362_s0 + $0x78] sm:$0xff] }
   0xc   :  { %872 = vmatpush.bf16.msra.mxu2 %v867_v4  ;;  %873 = vmatpush.bf16.msra.mxu3 %v867_v4  ;;  %v856_v32 = vld [vmem:[%s1362_s0 + $0xb0] sm:$0xff]  ;;  %v857_v36 = vld [vmem:[%s1362_s0 + $0xb8] sm:$0xff] }
   0xd   :  { %v864_v33 = vld [vmem:[%s1362_s0 + $0xf0] sm:$0xff]  ;;  %v865_v37 = vld [vmem:[%s1362_s0 + $0xf8] sm:$0xff] }
   0xf   :  { %371 = vmatpush.bf16.msra.mxu0 %v866_v5  ;;  %874 = vmatpush.bf16.msra.mxu1 %v866_v5 }
  0x10   :  { %875 = vmatpush.bf16.msra.mxu2 %v866_v5  ;;  %876 = vmatpush.bf16.msra.mxu3 %v866_v5 }
  0x12   :  { %802 = vmatmul.msk.bf16.vlgmr.msra.gmra.mxu0 %vm263_vm1, %v834_v6  ;;  %810 = vmatmul.msk.bf16.vlgmr.msra.gmra.mxu1 %vm263_vm1, %v842_v7 }
  0x13   :  { %818 = vmatmul.msk.bf16.vlgmr.msra.gmra.mxu2 %vm263_vm1, %v850_v8  ;;  %826 = vmatmul.msk.bf16.vlgmr.msra.gmra.mxu3 %vm263_vm1, %v858_v9 }
  0x22   :  { %803 = vmatmul.msk.bf16.gmra.mxu0 %vm263_vm1, %v835_v10  ;;  %811 = vmatmul.msk.bf16.gmra.mxu1 %vm263_vm1, %v843_v11 }
  0x23   :  { %819 = vmatmul.msk.bf16.gmra.mxu2 %vm263_vm1, %v851_v12  ;;  %827 = vmatmul.msk.bf16.gmra.mxu3 %vm263_vm1, %v859_v13 }
  0x32   :  { %804 = vmatmul.msk.bf16.gmra.mxu0 %vm263_vm1, %v836_v14  ;;  %812 = vmatmul.msk.bf16.gmra.mxu1 %vm263_vm1, %v844_v15 }
  0x33   :  { %820 = vmatmul.msk.bf16.gmra.mxu2 %vm263_vm1, %v852_v16  ;;  %828 = vmatmul.msk.bf16.gmra.mxu3 %vm263_vm1, %v860_v17 }
  0x42   :  { %805 = vmatmul.msk.bf16.gmra.mxu0 %vm263_vm1, %v837_v18  ;;  %813 = vmatmul.msk.bf16.gmra.mxu1 %vm263_vm1, %v845_v19 }
  0x43   :  { %821 = vmatmul.msk.bf16.gmra.mxu2 %vm263_vm1, %v853_v20  ;;  %829 = vmatmul.msk.bf16.gmra.mxu3 %vm263_vm1, %v861_v21 }
  0x52   :  { %806 = vmatmul.msk.bf16.gmra.mxu0 %vm263_vm1, %v838_v22  ;;  %814 = vmatmul.msk.bf16.gmra.mxu1 %vm263_vm1, %v846_v23 }
  0x53   :  { %822 = vmatmul.msk.bf16.gmra.mxu2 %vm263_vm1, %v854_v24  ;;  %830 = vmatmul.msk.bf16.gmra.mxu3 %vm263_vm1, %v862_v25 }
  0x62   :  { %807 = vmatmul.msk.bf16.gmra.mxu0 %vm263_vm1, %v839_v26  ;;  %815 = vmatmul.msk.bf16.gmra.mxu1 %vm263_vm1, %v847_v27 }
  0x63   :  { %823 = vmatmul.msk.bf16.gmra.mxu2 %vm263_vm1, %v855_v28  ;;  %831 = vmatmul.msk.bf16.gmra.mxu3 %vm263_vm1, %v863_v29 }
  0x72   :  { %808 = vmatmul.msk.bf16.gmra.mxu0 %vm263_vm1, %v840_v30  ;;  %816 = vmatmul.msk.bf16.gmra.mxu1 %vm263_vm1, %v848_v31 }
  0x73   :  { %824 = vmatmul.msk.bf16.gmra.mxu2 %vm263_vm1, %v856_v32  ;;  %832 = vmatmul.msk.bf16.gmra.mxu3 %vm263_vm1, %v864_v33 }
  0x82   :  { %809 = vmatmul.msk.bf16.gmra.mxu0 %vm263_vm1, %v841_v34  ;;  %817 = vmatmul.msk.bf16.gmra.mxu1 %vm263_vm1, %v849_v35 }
  0x83   :  { %825 = vmatmul.msk.bf16.gmra.mxu2 %vm263_vm1, %v857_v36  ;;  %833 = vmatmul.msk.bf16.gmra.mxu3 %vm263_vm1, %v865_v37 }
  0x8f   :  { %v373_v39 = vpop.f32.mrf.mxu0  ;;  %v413_v40 = vpop.f32.mrf.mxu1 }
  0x90   :  { %v374_v41 = vadd.f32 %v1038_v38, %v373_v39  ;;  %v414_v42 = vadd.f32 %v1038_v38, %v413_v40 }
  0x92   :  { %v533_v43 = vmax.f32 %v374_v41, 0.0  ;;  %v549_v44 = vmax.f32 %v414_v42, 0.0 }
  0x94   :  { %598 = vst.msk [vmem:[%s1363_s3] sm:$0xff] %vm597_vm2, %v533_v43 }
  0x95   :  { %614 = vst.msk [vmem:[%s1363_s3 + $0x80] sm:$0xff] %vm597_vm2, %v549_v44 }
  0x96   :  { %v453_v45 = vpop.f32.mrf.mxu2  ;;  %v493_v46 = vpop.f32.mrf.mxu3 }
  0x97   :  { %v454_v47 = vadd.f32 %v1038_v38, %v453_v45  ;;  %v494_v48 = vadd.f32 %v1038_v38, %v493_v46  ;;  %v375_v49 = vpop.f32.mrf.mxu0  ;;  %v415_v50 = vpop.f32.mrf.mxu1 }
  0x98   :  { %v376_v51 = vadd.f32 %v1038_v38, %v375_v49  ;;  %v416_v52 = vadd.f32 %v1038_v38, %v415_v50 }
  0x99   :  { %v565_v53 = vmax.f32 %v454_v47, 0.0  ;;  %v581_v54 = vmax.f32 %v494_v48, 0.0 }
  0x9a   :  { %v534_v55 = vmax.f32 %v376_v51, 0.0  ;;  %v550_v56 = vmax.f32 %v416_v52, 0.0 }
  0x9b   :  { %630 = vst.msk [vmem:[%s1363_s3 + $0x100] sm:$0xff] %vm597_vm2, %v565_v53 }
  0x9c   :  { %646 = vst.msk [vmem:[%s1363_s3 + $0x180] sm:$0xff] %vm597_vm2, %v581_v54 }
  0x9d   :  { %599 = vst.msk [vmem:[%s1363_s3 + $0x8] sm:$0xff] %vm597_vm2, %v534_v55 }
  0x9e   :  { %615 = vst.msk [vmem:[%s1363_s3 + $0x88] sm:$0xff] %vm597_vm2, %v550_v56  ;;  %v455_v57 = vpop.f32.mrf.mxu2  ;;  %v495_v58 = vpop.f32.mrf.mxu3 }
  0x9f   :  { %v456_v59 = vadd.f32 %v1038_v38, %v455_v57  ;;  %v496_v60 = vadd.f32 %v1038_v38, %v495_v58  ;;  %v378_v61 = vpop.f32.mrf.mxu0  ;;  %v418_v62 = vpop.f32.mrf.mxu1 }
  0xa0   :  { %v379_v63 = vadd.f32 %v1038_v38, %v378_v61  ;;  %v419_v0 = vadd.f32 %v1038_v38, %v418_v62 }
  0xa1   :  { %v566_v1 = vmax.f32 %v456_v59, 0.0  ;;  %v582_v2 = vmax.f32 %v496_v60, 0.0 }
  0xa2   :  { %v535_v3 = vmax.f32 %v379_v63, 0.0  ;;  %v551_v4 = vmax.f32 %v419_v0, 0.0 }
  0xa3   :  { %631 = vst.msk [vmem:[%s1363_s3 + $0x108] sm:$0xff] %vm597_vm2, %v566_v1 }
  0xa4   :  { %647 = vst.msk [vmem:[%s1363_s3 + $0x188] sm:$0xff] %vm597_vm2, %v582_v2 }
  0xa5   :  { %600 = vst.msk [vmem:[%s1363_s3 + $0x10] sm:$0xff] %vm597_vm2, %v535_v3 }
  0xa6   :  { %616 = vst.msk [vmem:[%s1363_s3 + $0x90] sm:$0xff] %vm597_vm2, %v551_v4  ;;  %v458_v5 = vpop.f32.mrf.mxu2  ;;  %v498_v6 = vpop.f32.mrf.mxu3 }
  0xa7   :  { %v459_v7 = vadd.f32 %v1038_v38, %v458_v5  ;;  %v499_v8 = vadd.f32 %v1038_v38, %v498_v6  ;;  %v380_v9 = vpop.f32.mrf.mxu0  ;;  %v420_v10 = vpop.f32.mrf.mxu1 }
  0xa8   :  { %v381_v11 = vadd.f32 %v1038_v38, %v380_v9  ;;  %v421_v12 = vadd.f32 %v1038_v38, %v420_v10 }
  0xa9   :  { %v567_v13 = vmax.f32 %v459_v7, 0.0  ;;  %v583_v14 = vmax.f32 %v499_v8, 0.0 }
  0xaa   :  { %v536_v15 = vmax.f32 %v381_v11, 0.0  ;;  %v552_v16 = vmax.f32 %v421_v12, 0.0 }
  0xab   :  { %632 = vst.msk [vmem:[%s1363_s3 + $0x110] sm:$0xff] %vm597_vm2, %v567_v13 }
  0xac   :  { %648 = vst.msk [vmem:[%s1363_s3 + $0x190] sm:$0xff] %vm597_vm2, %v583_v14 }
  0xad   :  { %601 = vst.msk [vmem:[%s1363_s3 + $0x18] sm:$0xff] %vm597_vm2, %v536_v15 }
  0xae   :  { %617 = vst.msk [vmem:[%s1363_s3 + $0x98] sm:$0xff] %vm597_vm2, %v552_v16  ;;  %v460_v17 = vpop.f32.mrf.mxu2  ;;  %v500_v18 = vpop.f32.mrf.mxu3 }
  0xaf   :  { %v461_v19 = vadd.f32 %v1038_v38, %v460_v17  ;;  %v501_v20 = vadd.f32 %v1038_v38, %v500_v18  ;;  %v383_v21 = vpop.f32.mrf.mxu0  ;;  %v423_v22 = vpop.f32.mrf.mxu1 }
  0xb0   :  { %v384_v23 = vadd.f32 %v1038_v38, %v383_v21  ;;  %v424_v24 = vadd.f32 %v1038_v38, %v423_v22 }
  0xb1   :  { %v568_v25 = vmax.f32 %v461_v19, 0.0  ;;  %v584_v26 = vmax.f32 %v501_v20, 0.0 }
  0xb2   :  { %v537_v27 = vmax.f32 %v384_v23, 0.0  ;;  %v553_v28 = vmax.f32 %v424_v24, 0.0 }
  0xb3   :  { %633 = vst.msk [vmem:[%s1363_s3 + $0x118] sm:$0xff] %vm597_vm2, %v568_v25 }
  0xb4   :  { %649 = vst.msk [vmem:[%s1363_s3 + $0x198] sm:$0xff] %vm597_vm2, %v584_v26 }
  0xb5   :  { %602 = vst.msk [vmem:[%s1363_s3 + $0x20] sm:$0xff] %vm597_vm2, %v537_v27 }
  0xb6   :  { %618 = vst.msk [vmem:[%s1363_s3 + $0xa0] sm:$0xff] %vm597_vm2, %v553_v28  ;;  %v463_v29 = vpop.f32.mrf.mxu2  ;;  %v503_v30 = vpop.f32.mrf.mxu3 }
  0xb7   :  { %v464_v31 = vadd.f32 %v1038_v38, %v463_v29  ;;  %v504_v32 = vadd.f32 %v1038_v38, %v503_v30  ;;  %v385_v33 = vpop.f32.mrf.mxu0  ;;  %v425_v34 = vpop.f32.mrf.mxu1 }
  0xb8   :  { %v386_v35 = vadd.f32 %v1038_v38, %v385_v33  ;;  %v426_v36 = vadd.f32 %v1038_v38, %v425_v34 }
  0xb9   :  { %v569_v37 = vmax.f32 %v464_v31, 0.0  ;;  %v585_v39 = vmax.f32 %v504_v32, 0.0 }
  0xba   :  { %v538_v40 = vmax.f32 %v386_v35, 0.0  ;;  %v554_v41 = vmax.f32 %v426_v36, 0.0 }
  0xbb   :  { %634 = vst.msk [vmem:[%s1363_s3 + $0x120] sm:$0xff] %vm597_vm2, %v569_v37 }
  0xbc   :  { %650 = vst.msk [vmem:[%s1363_s3 + $0x1a0] sm:$0xff] %vm597_vm2, %v585_v39 }
  0xbd   :  { %603 = vst.msk [vmem:[%s1363_s3 + $0x28] sm:$0xff] %vm597_vm2, %v538_v40 }
  0xbe   :  { %619 = vst.msk [vmem:[%s1363_s3 + $0xa8] sm:$0xff] %vm597_vm2, %v554_v41  ;;  %v465_v42 = vpop.f32.mrf.mxu2  ;;  %v505_v43 = vpop.f32.mrf.mxu3 }
  0xbf   :  { %v466_v44 = vadd.f32 %v1038_v38, %v465_v42  ;;  %v506_v45 = vadd.f32 %v1038_v38, %v505_v43  ;;  %v388_v46 = vpop.f32.mrf.mxu0  ;;  %v428_v47 = vpop.f32.mrf.mxu1 }
  0xc0   :  { %v389_v48 = vadd.f32 %v1038_v38, %v388_v46  ;;  %v429_v49 = vadd.f32 %v1038_v38, %v428_v47 }
  0xc1   :  { %v570_v50 = vmax.f32 %v466_v44, 0.0  ;;  %v586_v51 = vmax.f32 %v506_v45, 0.0 }
  0xc2   :  { %v539_v52 = vmax.f32 %v389_v48, 0.0  ;;  %v555_v53 = vmax.f32 %v429_v49, 0.0 }
  0xc3   :  { %635 = vst.msk [vmem:[%s1363_s3 + $0x128] sm:$0xff] %vm597_vm2, %v570_v50 }
  0xc4   :  { %651 = vst.msk [vmem:[%s1363_s3 + $0x1a8] sm:$0xff] %vm597_vm2, %v586_v51 }
  0xc5   :  { %604 = vst.msk [vmem:[%s1363_s3 + $0x30] sm:$0xff] %vm597_vm2, %v539_v52 }
  0xc6   :  { %620 = vst.msk [vmem:[%s1363_s3 + $0xb0] sm:$0xff] %vm597_vm2, %v555_v53  ;;  %v468_v54 = vpop.f32.mrf.mxu2  ;;  %v508_v55 = vpop.f32.mrf.mxu3 }
  0xc7   :  { %v469_v56 = vadd.f32 %v1038_v38, %v468_v54  ;;  %v509_v57 = vadd.f32 %v1038_v38, %v508_v55  ;;  %v390_v58 = vpop.f32.mrf.mxu0  ;;  %v430_v59 = vpop.f32.mrf.mxu1 }
  0xc8   :  { %v391_v60 = vadd.f32 %v1038_v38, %v390_v58  ;;  %v431_v61 = vadd.f32 %v1038_v38, %v430_v59 }
  0xc9   :  { %v571_v62 = vmax.f32 %v469_v56, 0.0  ;;  %v587_v63 = vmax.f32 %v509_v57, 0.0 }
  0xca   :  { %v540_v0 = vmax.f32 %v391_v60, 0.0  ;;  %v556_v1 = vmax.f32 %v431_v61, 0.0 }
  0xcb   :  { %636 = vst.msk [vmem:[%s1363_s3 + $0x130] sm:$0xff] %vm597_vm2, %v571_v62 }
  0xcc   :  { %652 = vst.msk [vmem:[%s1363_s3 + $0x1b0] sm:$0xff] %vm597_vm2, %v587_v63 }
  0xcd   :  { %605 = vst.msk [vmem:[%s1363_s3 + $0x38] sm:$0xff] %vm597_vm2, %v540_v0 }
  0xce   :  { %621 = vst.msk [vmem:[%s1363_s3 + $0xb8] sm:$0xff] %vm597_vm2, %v556_v1  ;;  %v470_v2 = vpop.f32.mrf.mxu2  ;;  %v510_v3 = vpop.f32.mrf.mxu3 }
  0xcf   :  { %v471_v4 = vadd.f32 %v1038_v38, %v470_v2  ;;  %v511_v5 = vadd.f32 %v1038_v38, %v510_v3  ;;  %v393_v6 = vpop.f32.mrf.mxu0  ;;  %v433_v7 = vpop.f32.mrf.mxu1 }
  0xd0   :  { %v394_v8 = vadd.f32 %v1038_v38, %v393_v6  ;;  %v434_v9 = vadd.f32 %v1038_v38, %v433_v7 }
  0xd1   :  { %v572_v10 = vmax.f32 %v471_v4, 0.0  ;;  %v588_v11 = vmax.f32 %v511_v5, 0.0 }
  0xd2   :  { %v541_v12 = vmax.f32 %v394_v8, 0.0  ;;  %v557_v13 = vmax.f32 %v434_v9, 0.0 }
  0xd3   :  { %637 = vst.msk [vmem:[%s1363_s3 + $0x138] sm:$0xff] %vm597_vm2, %v572_v10 }
  0xd4   :  { %653 = vst.msk [vmem:[%s1363_s3 + $0x1b8] sm:$0xff] %vm597_vm2, %v588_v11 }
  0xd5   :  { %606 = vst.msk [vmem:[%s1363_s3 + $0x40] sm:$0xff] %vm597_vm2, %v541_v12 }
  0xd6   :  { %622 = vst.msk [vmem:[%s1363_s3 + $0xc0] sm:$0xff] %vm597_vm2, %v557_v13  ;;  %v473_v14 = vpop.f32.mrf.mxu2  ;;  %v513_v15 = vpop.f32.mrf.mxu3 }
  0xd7   :  { %v474_v16 = vadd.f32 %v1038_v38, %v473_v14  ;;  %v514_v17 = vadd.f32 %v1038_v38, %v513_v15  ;;  %v395_v18 = vpop.f32.mrf.mxu0  ;;  %v435_v19 = vpop.f32.mrf.mxu1 }
  0xd8   :  { %v396_v20 = vadd.f32 %v1038_v38, %v395_v18  ;;  %v436_v21 = vadd.f32 %v1038_v38, %v435_v19 }
  0xd9   :  { %v573_v22 = vmax.f32 %v474_v16, 0.0  ;;  %v589_v23 = vmax.f32 %v514_v17, 0.0 }
  0xda   :  { %v542_v24 = vmax.f32 %v396_v20, 0.0  ;;  %v558_v25 = vmax.f32 %v436_v21, 0.0 }
  0xdb   :  { %638 = vst.msk [vmem:[%s1363_s3 + $0x140] sm:$0xff] %vm597_vm2, %v573_v22 }
  0xdc   :  { %654 = vst.msk [vmem:[%s1363_s3 + $0x1c0] sm:$0xff] %vm597_vm2, %v589_v23 }
  0xdd   :  { %607 = vst.msk [vmem:[%s1363_s3 + $0x48] sm:$0xff] %vm597_vm2, %v542_v24 }
  0xde   :  { %623 = vst.msk [vmem:[%s1363_s3 + $0xc8] sm:$0xff] %vm597_vm2, %v558_v25  ;;  %v475_v26 = vpop.f32.mrf.mxu2  ;;  %v515_v27 = vpop.f32.mrf.mxu3 }
  0xdf   :  { %v476_v28 = vadd.f32 %v1038_v38, %v475_v26  ;;  %v516_v29 = vadd.f32 %v1038_v38, %v515_v27  ;;  %v398_v30 = vpop.f32.mrf.mxu0  ;;  %v438_v31 = vpop.f32.mrf.mxu1 }
  0xe0   :  { %v399_v32 = vadd.f32 %v1038_v38, %v398_v30  ;;  %v439_v33 = vadd.f32 %v1038_v38, %v438_v31 }
  0xe1   :  { %v574_v34 = vmax.f32 %v476_v28, 0.0  ;;  %v590_v35 = vmax.f32 %v516_v29, 0.0 }
  0xe2   :  { %v543_v36 = vmax.f32 %v399_v32, 0.0  ;;  %v559_v37 = vmax.f32 %v439_v33, 0.0 }
  0xe3   :  { %639 = vst.msk [vmem:[%s1363_s3 + $0x148] sm:$0xff] %vm597_vm2, %v574_v34 }
  0xe4   :  { %655 = vst.msk [vmem:[%s1363_s3 + $0x1c8] sm:$0xff] %vm597_vm2, %v590_v35 }
  0xe5   :  { %608 = vst.msk [vmem:[%s1363_s3 + $0x50] sm:$0xff] %vm597_vm2, %v543_v36 }
  0xe6   :  { %624 = vst.msk [vmem:[%s1363_s3 + $0xd0] sm:$0xff] %vm597_vm2, %v559_v37  ;;  %v478_v39 = vpop.f32.mrf.mxu2  ;;  %v518_v40 = vpop.f32.mrf.mxu3 }
  0xe7   :  { %v479_v41 = vadd.f32 %v1038_v38, %v478_v39  ;;  %v519_v42 = vadd.f32 %v1038_v38, %v518_v40  ;;  %v400_v43 = vpop.f32.mrf.mxu0  ;;  %v440_v44 = vpop.f32.mrf.mxu1 }
  0xe8   :  { %v401_v45 = vadd.f32 %v1038_v38, %v400_v43  ;;  %v441_v46 = vadd.f32 %v1038_v38, %v440_v44 }
  0xe9   :  { %v575_v47 = vmax.f32 %v479_v41, 0.0  ;;  %v591_v48 = vmax.f32 %v519_v42, 0.0 }
  0xea   :  { %v544_v49 = vmax.f32 %v401_v45, 0.0  ;;  %v560_v50 = vmax.f32 %v441_v46, 0.0 }
  0xeb   :  { %640 = vst.msk [vmem:[%s1363_s3 + $0x150] sm:$0xff] %vm597_vm2, %v575_v47 }
  0xec   :  { %656 = vst.msk [vmem:[%s1363_s3 + $0x1d0] sm:$0xff] %vm597_vm2, %v591_v48 }
  0xed   :  { %609 = vst.msk [vmem:[%s1363_s3 + $0x58] sm:$0xff] %vm597_vm2, %v544_v49 }
  0xee   :  { %625 = vst.msk [vmem:[%s1363_s3 + $0xd8] sm:$0xff] %vm597_vm2, %v560_v50  ;;  %v480_v51 = vpop.f32.mrf.mxu2  ;;  %v520_v52 = vpop.f32.mrf.mxu3 }
  0xef   :  { %v481_v53 = vadd.f32 %v1038_v38, %v480_v51  ;;  %v521_v54 = vadd.f32 %v1038_v38, %v520_v52  ;;  %v403_v55 = vpop.f32.mrf.mxu0  ;;  %v443_v56 = vpop.f32.mrf.mxu1 }
  0xf0   :  { %v404_v57 = vadd.f32 %v1038_v38, %v403_v55  ;;  %v444_v58 = vadd.f32 %v1038_v38, %v443_v56 }
  0xf1   :  { %v576_v59 = vmax.f32 %v481_v53, 0.0  ;;  %v592_v60 = vmax.f32 %v521_v54, 0.0 }
  0xf2   :  { %v545_v61 = vmax.f32 %v404_v57, 0.0  ;;  %v561_v62 = vmax.f32 %v444_v58, 0.0 }
  0xf3   :  { %641 = vst.msk [vmem:[%s1363_s3 + $0x158] sm:$0xff] %vm597_vm2, %v576_v59 }
  0xf4   :  { %657 = vst.msk [vmem:[%s1363_s3 + $0x1d8] sm:$0xff] %vm597_vm2, %v592_v60 }
  0xf5   :  { %610 = vst.msk [vmem:[%s1363_s3 + $0x60] sm:$0xff] %vm597_vm2, %v545_v61 }
  0xf6   :  { %626 = vst.msk [vmem:[%s1363_s3 + $0xe0] sm:$0xff] %vm597_vm2, %v561_v62  ;;  %v483_v63 = vpop.f32.mrf.mxu2  ;;  %v523_v0 = vpop.f32.mrf.mxu3 }
  0xf7   :  { %v484_v1 = vadd.f32 %v1038_v38, %v483_v63  ;;  %v524_v2 = vadd.f32 %v1038_v38, %v523_v0  ;;  %v405_v3 = vpop.f32.mrf.mxu0  ;;  %v445_v4 = vpop.f32.mrf.mxu1 }
  0xf8   :  { %v406_v5 = vadd.f32 %v1038_v38, %v405_v3  ;;  %v446_v6 = vadd.f32 %v1038_v38, %v445_v4 }
  0xf9   :  { %v577_v7 = vmax.f32 %v484_v1, 0.0  ;;  %v593_v8 = vmax.f32 %v524_v2, 0.0 }
  0xfa   :  { %v546_v9 = vmax.f32 %v406_v5, 0.0  ;;  %v562_v10 = vmax.f32 %v446_v6, 0.0 }
  0xfb   :  { %642 = vst.msk [vmem:[%s1363_s3 + $0x160] sm:$0xff] %vm597_vm2, %v577_v7 }
  0xfc   :  { %658 = vst.msk [vmem:[%s1363_s3 + $0x1e0] sm:$0xff] %vm597_vm2, %v593_v8 }
  0xfd   :  { %611 = vst.msk [vmem:[%s1363_s3 + $0x68] sm:$0xff] %vm597_vm2, %v546_v9 }
  0xfe   :  { %627 = vst.msk [vmem:[%s1363_s3 + $0xe8] sm:$0xff] %vm597_vm2, %v562_v10  ;;  %v485_v11 = vpop.f32.mrf.mxu2  ;;  %v525_v12 = vpop.f32.mrf.mxu3 }
  0xff   :  { %v486_v13 = vadd.f32 %v1038_v38, %v485_v11  ;;  %v526_v14 = vadd.f32 %v1038_v38, %v525_v12  ;;  %v408_v15 = vpop.f32.mrf.mxu0  ;;  %v448_v16 = vpop.f32.mrf.mxu1 }
 0x100   :  { %v409_v17 = vadd.f32 %v1038_v38, %v408_v15  ;;  %v449_v18 = vadd.f32 %v1038_v38, %v448_v16 }
 0x101   :  { %v578_v19 = vmax.f32 %v486_v13, 0.0  ;;  %v594_v20 = vmax.f32 %v526_v14, 0.0 }
 0x102   :  { %v547_v21 = vmax.f32 %v409_v17, 0.0  ;;  %v563_v22 = vmax.f32 %v449_v18, 0.0 }
 0x103   :  { %643 = vst.msk [vmem:[%s1363_s3 + $0x168] sm:$0xff] %vm597_vm2, %v578_v19 }
 0x104   :  { %659 = vst.msk [vmem:[%s1363_s3 + $0x1e8] sm:$0xff] %vm597_vm2, %v594_v20 }
 0x105   :  { %612 = vst.msk [vmem:[%s1363_s3 + $0x70] sm:$0xff] %vm597_vm2, %v547_v21 }
 0x106   :  { %628 = vst.msk [vmem:[%s1363_s3 + $0xf0] sm:$0xff] %vm597_vm2, %v563_v22  ;;  %v488_v23 = vpop.f32.mrf.mxu2  ;;  %v528_v24 = vpop.f32.mrf.mxu3 }
 0x107   :  { %v489_v25 = vadd.f32 %v1038_v38, %v488_v23  ;;  %v529_v26 = vadd.f32 %v1038_v38, %v528_v24  ;;  %v410_v27 = vpop.f32.mrf.mxu0  ;;  %v450_v28 = vpop.f32.mrf.mxu1 }
 0x108   :  { %v411_v29 = vadd.f32 %v1038_v38, %v410_v27  ;;  %v451_v30 = vadd.f32 %v1038_v38, %v450_v28 }
 0x109   :  { %v579_v31 = vmax.f32 %v489_v25, 0.0  ;;  %v595_v32 = vmax.f32 %v529_v26, 0.0 }
 0x10a   :  { %v548_v33 = vmax.f32 %v411_v29, 0.0  ;;  %v564_v34 = vmax.f32 %v451_v30, 0.0 }
 0x10b   :  { %644 = vst.msk [vmem:[%s1363_s3 + $0x170] sm:$0xff] %vm597_vm2, %v579_v31 }
 0x10c   :  { %660 = vst.msk [vmem:[%s1363_s3 + $0x1f0] sm:$0xff] %vm597_vm2, %v595_v32 }
 0x10d   :  { %613 = vst.msk [vmem:[%s1363_s3 + $0x78] sm:$0xff] %vm597_vm2, %v548_v33 }
 0x10e   :  { %629 = vst.msk [vmem:[%s1363_s3 + $0xf8] sm:$0xff] %vm597_vm2, %v564_v34  ;;  %v490_v35 = vpop.f32.mrf.mxu2  ;;  %v530_v36 = vpop.f32.mrf.mxu3 }
 0x10f   :  { %v491_v37 = vadd.f32 %v1038_v38, %v490_v35  ;;  %v531_v39 = vadd.f32 %v1038_v38, %v530_v36 }
 0x111   :  { %v580_v40 = vmax.f32 %v491_v37, 0.0  ;;  %v596_v41 = vmax.f32 %v531_v39, 0.0 }
 0x113   :  { %645 = vst.msk [vmem:[%s1363_s3 + $0x178] sm:$0xff] %vm597_vm2, %v580_v40 }
 0x114   :  { %661 = vst.msk [vmem:[%s1363_s3 + $0x1f8] sm:$0xff] %vm597_vm2, %v596_v41 }

// kernel: slow_only_forward.19
= control target key start
LH: loop header
LB: loop body
LE: loop exit
PB: predicated region body
PF: predicated region fallthrough
CT: control target
= control target key end

     0   :  { %vm408_vm0 = vcmask 1043456   ;;  %vm838_vm1 = vcmask 1041408   ;;  %vm311_vm2 = vcmask 64512   ;;  %vm741_vm3 = vcmask 31744   ;;  %s2216_s3 = inlined_call_operand.vmem [shape: bf16[8,16], index: 3, kind: input, shape index: {}]   ;;  %s2217_s1 = inlined_call_operand.vmem [shape: bf16[4,16], index: 1, kind: input, shape index: {}]   ;;  %s2218_s2 = inlined_call_operand.vmem [shape: bf16[512,8], index: 2, kind: input, shape index: {}]   ;;  %s2219_s0 = inlined_call_operand.vmem [shape: bf16[512,4], index: 0, kind: input, shape index: {}]   ;;  %s2220_s4 = inlined_call_operand.vmem [shape: f32[1,16], index: 4, kind: input, shape index: {}]   ;;  %s2221_s5 = inlined_call_operand.vmem [shape: f32[512,16], index: 5, kind: output, shape index: {}]  }
   0x1   :  { %v150_v0 = vld [vmem:[%s2216_s3] sm:$0xf]  ;;  %v1565_v8 = vld [vmem:[%s2218_s2 + $0x8] sm:$0xff]  ;;  %v1566_v12 = vld [vmem:[%s2218_s2 + $0x10] sm:$0xff]  ;;  %vm1143_vm4 = vcmask 130048  }
   0x2   :  { %v85_v1 = vld [vmem:[%s2217_s1] sm:$0x3]  ;;  %v410_v2 = vsel %vm408_vm0, %v150_v0, 0  ;;  %v1581_v9 = vld [vmem:[%s2218_s2 + $0x88] sm:$0xff]  ;;  %v1582_v13 = vld [vmem:[%s2218_s2 + $0x90] sm:$0xff] }
   0x3   :  { %v840_v3 = vsel %vm838_vm1, %v85_v1, 0  ;;  %v1564_v4 = vld [vmem:[%s2218_s2] sm:$0xff]  ;;  %419 = vmatpush.bf16.msra.mxu0 %v410_v2  ;;  %1596 = vmatpush.bf16.msra.mxu2 %v410_v2  ;;  %v1533_v10 = vld [vmem:[%s2219_s0 + $0x8] sm:$0xff]  ;;  %v1534_v14 = vld [vmem:[%s2219_s0 + $0x10] sm:$0xff] }
   0x4   :  { %v1580_v5 = vld [vmem:[%s2218_s2 + $0x80] sm:$0xff]  ;;  %849 = vmatpush.bf16.msra.mxu1 %v840_v3  ;;  %1597 = vmatpush.bf16.msra.mxu3 %v840_v3  ;;  %v1549_v11 = vld [vmem:[%s2219_s0 + $0x88] sm:$0xff]  ;;  %v1550_v15 = vld [vmem:[%s2219_s0 + $0x90] sm:$0xff] }
   0x5   :  { %v1532_v6 = vld [vmem:[%s2219_s0] sm:$0xff]  ;;  %v1567_v16 = vld [vmem:[%s2218_s2 + $0x18] sm:$0xff]  ;;  %v1569_v24 = vld [vmem:[%s2218_s2 + $0x28] sm:$0xff] }
   0x6   :  { %v1548_v7 = vld [vmem:[%s2219_s0 + $0x80] sm:$0xff]  ;;  %1340 = vmatmul.msk.bf16.vlgmr.msra.gmra.mxu0 %vm311_vm2, %v1564_v4  ;;  %1356 = vmatmul.msk.bf16.vlgmr.msra.gmra.mxu2 %vm311_vm2, %v1580_v5  ;;  %v1583_v17 = vld [vmem:[%s2218_s2 + $0x98] sm:$0xff]  ;;  %v1585_v25 = vld [vmem:[%s2218_s2 + $0xa8] sm:$0xff] }
   0x7   :  { %1500 = vmatmul.msk.bf16.vlgmr.msra.gmra.mxu1 %vm741_vm3, %v1532_v6  ;;  %1516 = vmatmul.msk.bf16.vlgmr.msra.gmra.mxu3 %vm741_vm3, %v1548_v7  ;;  %v1535_v18 = vld [vmem:[%s2219_s0 + $0x18] sm:$0xff]  ;;  %v1568_v20 = vld [vmem:[%s2218_s2 + $0x20] sm:$0xff]  ;;  %v1537_v26 = vld [vmem:[%s2219_s0 + $0x28] sm:$0xff] }
   0x8   :  { %v1551_v19 = vld [vmem:[%s2219_s0 + $0x98] sm:$0xff]  ;;  %v1584_v21 = vld [vmem:[%s2218_s2 + $0xa0] sm:$0xff]  ;;  %v1553_v27 = vld [vmem:[%s2219_s0 + $0xa8] sm:$0xff] }
   0x9   :  { %v1536_v22 = vld [vmem:[%s2219_s0 + $0x20] sm:$0xff]  ;;  %v1570_v28 = vld [vmem:[%s2218_s2 + $0x30] sm:$0xff]  ;;  %v1571_v32 = vld [vmem:[%s2218_s2 + $0x38] sm:$0xff] }
   0xa   :  { %v1552_v23 = vld [vmem:[%s2219_s0 + $0xa0] sm:$0xff]  ;;  %v1586_v29 = vld [vmem:[%s2218_s2 + $0xb0] sm:$0xff]  ;;  %v1587_v33 = vld [vmem:[%s2218_s2 + $0xb8] sm:$0xff] }
   0xb   :  { %v1538_v30 = vld [vmem:[%s2219_s0 + $0x30] sm:$0xff]  ;;  %v1539_v34 = vld [vmem:[%s2219_s0 + $0x38] sm:$0xff]  ;;  %v1572_v36 = vld [vmem:[%s2218_s2 + $0x40] sm:$0xff] }
   0xc   :  { %v1554_v31 = vld [vmem:[%s2219_s0 + $0xb0] sm:$0xff]  ;;  %v1555_v35 = vld [vmem:[%s2219_s0 + $0xb8] sm:$0xff]  ;;  %v1588_v37 = vld [vmem:[%s2218_s2 + $0xc0] sm:$0xff] }
   0xd   :  { %v1772_v39 = vld [vmem:[%s2220_s4] ss:$0 sm:$0xff]  ;;  %v1573_v58 = vld [vmem:[%s2218_s2 + $0x48] sm:$0xff] }
   0xe   :  { %v1540_v40 = vld [vmem:[%s2219_s0 + $0x40] sm:$0xff]  ;;  %v1589_v59 = vld [vmem:[%s2218_s2 + $0xc8] sm:$0xff] }
   0xf   :  { %v1556_v41 = vld [vmem:[%s2219_s0 + $0xc0] sm:$0xff]  ;;  %v1541_v62 = vld [vmem:[%s2219_s0 + $0x48] sm:$0xff] }
  0x10   :  { %v1557_v63 = vld [vmem:[%s2219_s0 + $0xc8] sm:$0xff] }
  0x16   :  { %1341 = vmatmul.msk.bf16.gmra.mxu0 %vm311_vm2, %v1565_v8  ;;  %1357 = vmatmul.msk.bf16.gmra.mxu2 %vm311_vm2, %v1581_v9 }
  0x17   :  { %1501 = vmatmul.msk.bf16.gmra.mxu1 %vm741_vm3, %v1533_v10  ;;  %1517 = vmatmul.msk.bf16.gmra.mxu3 %vm741_vm3, %v1549_v11 }
  0x26   :  { %1342 = vmatmul.msk.bf16.gmra.mxu0 %vm311_vm2, %v1566_v12  ;;  %1358 = vmatmul.msk.bf16.gmra.mxu2 %vm311_vm2, %v1582_v13 }
  0x27   :  { %1502 = vmatmul.msk.bf16.gmra.mxu1 %vm741_vm3, %v1534_v14  ;;  %1518 = vmatmul.msk.bf16.gmra.mxu3 %vm741_vm3, %v1550_v15 }
  0x36   :  { %1343 = vmatmul.msk.bf16.gmra.mxu0 %vm311_vm2, %v1567_v16  ;;  %1359 = vmatmul.msk.bf16.gmra.mxu2 %vm311_vm2, %v1583_v17 }
  0x37   :  { %1503 = vmatmul.msk.bf16.gmra.mxu1 %vm741_vm3, %v1535_v18  ;;  %1519 = vmatmul.msk.bf16.gmra.mxu3 %vm741_vm3, %v1551_v19  ;;  %v1574_v18 = vld [vmem:[%s2218_s2 + $0x50] sm:$0xff] }
  0x38   :  { %v1590_v19 = vld [vmem:[%s2218_s2 + $0xd0] sm:$0xff] }
  0x46   :  { %1344 = vmatmul.msk.bf16.gmra.mxu0 %vm311_vm2, %v1568_v20  ;;  %1360 = vmatmul.msk.bf16.gmra.mxu2 %vm311_vm2, %v1584_v21 }
  0x47   :  { %1504 = vmatmul.msk.bf16.gmra.mxu1 %vm741_vm3, %v1536_v22  ;;  %1520 = vmatmul.msk.bf16.gmra.mxu3 %vm741_vm3, %v1552_v23  ;;  %v1542_v22 = vld [vmem:[%s2219_s0 + $0x50] sm:$0xff] }
  0x48   :  { %v1558_v23 = vld [vmem:[%s2219_s0 + $0xd0] sm:$0xff] }
  0x56   :  { %1345 = vmatmul.msk.bf16.gmra.mxu0 %vm311_vm2, %v1569_v24  ;;  %1361 = vmatmul.msk.bf16.gmra.mxu2 %vm311_vm2, %v1585_v25 }
  0x57   :  { %1505 = vmatmul.msk.bf16.gmra.mxu1 %vm741_vm3, %v1537_v26  ;;  %1521 = vmatmul.msk.bf16.gmra.mxu3 %vm741_vm3, %v1553_v27 }
  0x66   :  { %1346 = vmatmul.msk.bf16.gmra.mxu0 %vm311_vm2, %v1570_v28  ;;  %1362 = vmatmul.msk.bf16.gmra.mxu2 %vm311_vm2, %v1586_v29 }
  0x67   :  { %1506 = vmatmul.msk.bf16.gmra.mxu1 %vm741_vm3, %v1538_v30  ;;  %1522 = vmatmul.msk.bf16.gmra.mxu3 %vm741_vm3, %v1554_v31 }
  0x76   :  { %1347 = vmatmul.msk.bf16.gmra.mxu0 %vm311_vm2, %v1571_v32  ;;  %1363 = vmatmul.msk.bf16.gmra.mxu2 %vm311_vm2, %v1587_v33 }
  0x77   :  { %1507 = vmatmul.msk.bf16.gmra.mxu1 %vm741_vm3, %v1539_v34  ;;  %1523 = vmatmul.msk.bf16.gmra.mxu3 %vm741_vm3, %v1555_v35 }
  0x83   :  { %v421_v38 = vpop.f32.mrf.mxu0 }
  0x84   :  { %v851_v42 = vpop.f32.mrf.mxu1 }
  0x85   :  { %v852_v43 = vadd.f32 %v851_v42, %v421_v38 }
  0x86   :  { %1348 = vmatmul.msk.bf16.gmra.mxu0 %vm311_vm2, %v1572_v36  ;;  %1364 = vmatmul.msk.bf16.gmra.mxu2 %vm311_vm2, %v1588_v37 }
  0x87   :  { %v1015_v44 = vadd.f32 %v1772_v39, %v852_v43  ;;  %1508 = vmatmul.msk.bf16.gmra.mxu1 %vm741_vm3, %v1540_v40  ;;  %1524 = vmatmul.msk.bf16.gmra.mxu3 %vm741_vm3, %v1556_v41  ;;  %v1575_v43 = vld [vmem:[%s2218_s2 + $0x58] sm:$0xff] }
  0x89   :  { %v1079_v45 = vmax.f32 %v1015_v44, 0.0  ;;  %v501_v46 = vpop.f32.mrf.mxu2  ;;  %v1591_v44 = vld [vmem:[%s2218_s2 + $0xd8] sm:$0xff] }
  0x8a   :  { %v931_v47 = vpop.f32.mrf.mxu3 }
  0x8b   :  { %1144 = vst.msk [vmem:[%s2221_s5] sm:$0xff] %vm1143_vm4, %v1079_v45  ;;  %v932_v48 = vadd.f32 %v931_v47, %v501_v46  ;;  %v423_v49 = vpop.f32.mrf.mxu0  ;;  %v1543_v47 = vld [vmem:[%s2219_s0 + $0x58] sm:$0xff] }
  0x8c   :  { %v853_v50 = vpop.f32.mrf.mxu1 }
  0x8d   :  { %v1047_v51 = vadd.f32 %v1772_v39, %v932_v48  ;;  %v854_v52 = vadd.f32 %v853_v50, %v423_v49  ;;  %v1559_v48 = vld [vmem:[%s2219_s0 + $0xd8] sm:$0xff] }
  0x8f   :  { %v1111_v53 = vmax.f32 %v1047_v51, 0.0  ;;  %v1016_v54 = vadd.f32 %v1772_v39, %v854_v52 }
  0x91   :  { %1176 = vst.msk [vmem:[%s2221_s5 + $0x100] sm:$0xff] %vm1143_vm4, %v1111_v53  ;;  %v1080_v55 = vmax.f32 %v1016_v54, 0.0  ;;  %v503_v56 = vpop.f32.mrf.mxu2 }
  0x92   :  { %v933_v57 = vpop.f32.mrf.mxu3 }
  0x93   :  { %1145 = vst.msk [vmem:[%s2221_s5 + $0x8] sm:$0xff] %vm1143_vm4, %v1080_v55  ;;  %v934_v60 = vadd.f32 %v933_v57, %v503_v56  ;;  %v426_v61 = vpop.f32.mrf.mxu0 }
  0x94   :  { %v856_v0 = vpop.f32.mrf.mxu1 }
  0x95   :  { %v1048_v1 = vadd.f32 %v1772_v39, %v934_v60  ;;  %v857_v2 = vadd.f32 %v856_v0, %v426_v61 }
  0x96   :  { %1349 = vmatmul.msk.bf16.gmra.mxu0 %vm311_vm2, %v1573_v58  ;;  %1365 = vmatmul.msk.bf16.gmra.mxu2 %vm311_vm2, %v1589_v59 }
  0x97   :  { %v1112_v3 = vmax.f32 %v1048_v1, 0.0  ;;  %v1017_v4 = vadd.f32 %v1772_v39, %v857_v2  ;;  %1509 = vmatmul.msk.bf16.gmra.mxu1 %vm741_vm3, %v1541_v62  ;;  %1525 = vmatmul.msk.bf16.gmra.mxu3 %vm741_vm3, %v1557_v63 }
  0x99   :  { %1177 = vst.msk [vmem:[%s2221_s5 + $0x108] sm:$0xff] %vm1143_vm4, %v1112_v3  ;;  %v1081_v5 = vmax.f32 %v1017_v4, 0.0  ;;  %v506_v6 = vpop.f32.mrf.mxu2  ;;  %v1576_v3 = vld [vmem:[%s2218_s2 + $0x60] sm:$0xff] }
  0x9a   :  { %v936_v7 = vpop.f32.mrf.mxu3  ;;  %v1592_v4 = vld [vmem:[%s2218_s2 + $0xe0] sm:$0xff] }
  0x9b   :  { %1146 = vst.msk [vmem:[%s2221_s5 + $0x10] sm:$0xff] %vm1143_vm4, %v1081_v5  ;;  %v937_v8 = vadd.f32 %v936_v7, %v506_v6  ;;  %v428_v9 = vpop.f32.mrf.mxu0  ;;  %v1544_v7 = vld [vmem:[%s2219_s0 + $0x60] sm:$0xff] }
  0x9c   :  { %v858_v10 = vpop.f32.mrf.mxu1 }
  0x9d   :  { %v1049_v11 = vadd.f32 %v1772_v39, %v937_v8  ;;  %v859_v12 = vadd.f32 %v858_v10, %v428_v9  ;;  %v1560_v8 = vld [vmem:[%s2219_s0 + $0xe0] sm:$0xff] }
  0x9f   :  { %v1113_v13 = vmax.f32 %v1049_v11, 0.0  ;;  %v1018_v14 = vadd.f32 %v1772_v39, %v859_v12 }
  0xa1   :  { %1178 = vst.msk [vmem:[%s2221_s5 + $0x110] sm:$0xff] %vm1143_vm4, %v1113_v13  ;;  %v1082_v15 = vmax.f32 %v1018_v14, 0.0  ;;  %v508_v16 = vpop.f32.mrf.mxu2 }
  0xa2   :  { %v938_v17 = vpop.f32.mrf.mxu3 }
  0xa3   :  { %1147 = vst.msk [vmem:[%s2221_s5 + $0x18] sm:$0xff] %vm1143_vm4, %v1082_v15  ;;  %v939_v20 = vadd.f32 %v938_v17, %v508_v16  ;;  %v431_v21 = vpop.f32.mrf.mxu0 }
  0xa4   :  { %v861_v24 = vpop.f32.mrf.mxu1 }
  0xa5   :  { %v1050_v25 = vadd.f32 %v1772_v39, %v939_v20  ;;  %v862_v26 = vadd.f32 %v861_v24, %v431_v21 }
  0xa6   :  { %1350 = vmatmul.msk.bf16.gmra.mxu0 %vm311_vm2, %v1574_v18  ;;  %1366 = vmatmul.msk.bf16.gmra.mxu2 %vm311_vm2, %v1590_v19 }
  0xa7   :  { %v1114_v27 = vmax.f32 %v1050_v25, 0.0  ;;  %v1019_v28 = vadd.f32 %v1772_v39, %v862_v26  ;;  %1510 = vmatmul.msk.bf16.gmra.mxu1 %vm741_vm3, %v1542_v22  ;;  %1526 = vmatmul.msk.bf16.gmra.mxu3 %vm741_vm3, %v1558_v23 }
  0xa9   :  { %1179 = vst.msk [vmem:[%s2221_s5 + $0x118] sm:$0xff] %vm1143_vm4, %v1114_v27  ;;  %v1083_v29 = vmax.f32 %v1019_v28, 0.0  ;;  %v511_v30 = vpop.f32.mrf.mxu2  ;;  %v1577_v27 = vld [vmem:[%s2218_s2 + $0x68] sm:$0xff] }
  0xaa   :  { %v941_v31 = vpop.f32.mrf.mxu3  ;;  %v1593_v28 = vld [vmem:[%s2218_s2 + $0xe8] sm:$0xff] }
  0xab   :  { %1148 = vst.msk [vmem:[%s2221_s5 + $0x20] sm:$0xff] %vm1143_vm4, %v1083_v29  ;;  %v942_v32 = vadd.f32 %v941_v31, %v511_v30  ;;  %v433_v33 = vpop.f32.mrf.mxu0  ;;  %v1545_v31 = vld [vmem:[%s2219_s0 + $0x68] sm:$0xff] }
  0xac   :  { %v863_v34 = vpop.f32.mrf.mxu1 }
  0xad   :  { %v1051_v35 = vadd.f32 %v1772_v39, %v942_v32  ;;  %v864_v36 = vadd.f32 %v863_v34, %v433_v33  ;;  %v1561_v32 = vld [vmem:[%s2219_s0 + $0xe8] sm:$0xff] }
  0xaf   :  { %v1115_v37 = vmax.f32 %v1051_v35, 0.0  ;;  %v1020_v38 = vadd.f32 %v1772_v39, %v864_v36 }
  0xb1   :  { %1180 = vst.msk [vmem:[%s2221_s5 + $0x120] sm:$0xff] %vm1143_vm4, %v1115_v37  ;;  %v1084_v40 = vmax.f32 %v1020_v38, 0.0  ;;  %v513_v41 = vpop.f32.mrf.mxu2 }
  0xb2   :  { %v943_v42 = vpop.f32.mrf.mxu3 }
  0xb3   :  { %1149 = vst.msk [vmem:[%s2221_s5 + $0x28] sm:$0xff] %vm1143_vm4, %v1084_v40  ;;  %v944_v45 = vadd.f32 %v943_v42, %v513_v41  ;;  %v436_v46 = vpop.f32.mrf.mxu0 }
  0xb4   :  { %v866_v49 = vpop.f32.mrf.mxu1 }
  0xb5   :  { %v1052_v50 = vadd.f32 %v1772_v39, %v944_v45  ;;  %v867_v51 = vadd.f32 %v866_v49, %v436_v46 }
  0xb6   :  { %1351 = vmatmul.msk.bf16.gmra.mxu0 %vm311_vm2, %v1575_v43  ;;  %1367 = vmatmul.msk.bf16.gmra.mxu2 %vm311_vm2, %v1591_v44 }
  0xb7   :  { %v1116_v52 = vmax.f32 %v1052_v50, 0.0  ;;  %v1021_v53 = vadd.f32 %v1772_v39, %v867_v51  ;;  %1511 = vmatmul.msk.bf16.gmra.mxu1 %vm741_vm3, %v1543_v47  ;;  %1527 = vmatmul.msk.bf16.gmra.mxu3 %vm741_vm3, %v1559_v48 }
  0xb9   :  { %1181 = vst.msk [vmem:[%s2221_s5 + $0x128] sm:$0xff] %vm1143_vm4, %v1116_v52  ;;  %v1085_v54 = vmax.f32 %v1021_v53, 0.0  ;;  %v516_v55 = vpop.f32.mrf.mxu2  ;;  %v1578_v52 = vld [vmem:[%s2218_s2 + $0x70] sm:$0xff] }
  0xba   :  { %v946_v56 = vpop.f32.mrf.mxu3  ;;  %v1594_v53 = vld [vmem:[%s2218_s2 + $0xf0] sm:$0xff] }
  0xbb   :  { %1150 = vst.msk [vmem:[%s2221_s5 + $0x30] sm:$0xff] %vm1143_vm4, %v1085_v54  ;;  %v947_v57 = vadd.f32 %v946_v56, %v516_v55  ;;  %v438_v58 = vpop.f32.mrf.mxu0  ;;  %v1546_v56 = vld [vmem:[%s2219_s0 + $0x70] sm:$0xff] }
  0xbc   :  { %v868_v59 = vpop.f32.mrf.mxu1 }
  0xbd   :  { %v1053_v60 = vadd.f32 %v1772_v39, %v947_v57  ;;  %v869_v61 = vadd.f32 %v868_v59, %v438_v58  ;;  %v1562_v57 = vld [vmem:[%s2219_s0 + $0xf0] sm:$0xff] }
  0xbf   :  { %v1117_v62 = vmax.f32 %v1053_v60, 0.0  ;;  %v1022_v63 = vadd.f32 %v1772_v39, %v869_v61 }
  0xc1   :  { %1182 = vst.msk [vmem:[%s2221_s5 + $0x130] sm:$0xff] %vm1143_vm4, %v1117_v62  ;;  %v1086_v0 = vmax.f32 %v1022_v63, 0.0  ;;  %v518_v1 = vpop.f32.mrf.mxu2 }
  0xc2   :  { %v948_v2 = vpop.f32.mrf.mxu3 }
  0xc3   :  { %1151 = vst.msk [vmem:[%s2221_s5 + $0x38] sm:$0xff] %vm1143_vm4, %v1086_v0  ;;  %v949_v5 = vadd.f32 %v948_v2, %v518_v1  ;;  %v441_v6 = vpop.f32.mrf.mxu0 }
  0xc4   :  { %v871_v9 = vpop.f32.mrf.mxu1 }
  0xc5   :  { %v1054_v10 = vadd.f32 %v1772_v39, %v949_v5  ;;  %v872_v11 = vadd.f32 %v871_v9, %v441_v6 }
  0xc6   :  { %1352 = vmatmul.msk.bf16.gmra.mxu0 %vm311_vm2, %v1576_v3  ;;  %1368 = vmatmul.msk.bf16.gmra.mxu2 %vm311_vm2, %v1592_v4 }
  0xc7   :  { %v1118_v12 = vmax.f32 %v1054_v10, 0.0  ;;  %v1023_v13 = vadd.f32 %v1772_v39, %v872_v11  ;;  %1512 = vmatmul.msk.bf16.gmra.mxu1 %vm741_vm3, %v1544_v7  ;;  %1528 = vmatmul.msk.bf16.gmra.mxu3 %vm741_vm3, %v1560_v8 }
  0xc9   :  { %1183 = vst.msk [vmem:[%s2221_s5 + $0x138] sm:$0xff] %vm1143_vm4, %v1118_v12  ;;  %v1087_v14 = vmax.f32 %v1023_v13, 0.0  ;;  %v521_v15 = vpop.f32.mrf.mxu2  ;;  %v1579_v12 = vld [vmem:[%s2218_s2 + $0x78] sm:$0xff] }
  0xca   :  { %v951_v16 = vpop.f32.mrf.mxu3  ;;  %v1595_v13 = vld [vmem:[%s2218_s2 + $0xf8] sm:$0xff] }
  0xcb   :  { %1152 = vst.msk [vmem:[%s2221_s5 + $0x40] sm:$0xff] %vm1143_vm4, %v1087_v14  ;;  %v952_v17 = vadd.f32 %v951_v16, %v521_v15  ;;  %v443_v18 = vpop.f32.mrf.mxu0  ;;  %v1547_v16 = vld [vmem:[%s2219_s0 + $0x78] sm:$0xff] }
  0xcc   :  { %v873_v19 = vpop.f32.mrf.mxu1 }
  0xcd   :  { %v1055_v20 = vadd.f32 %v1772_v39, %v952_v17  ;;  %v874_v21 = vadd.f32 %v873_v19, %v443_v18  ;;  %v1563_v17 = vld [vmem:[%s2219_s0 + $0xf8] sm:$0xff] }
  0xcf   :  { %v1119_v22 = vmax.f32 %v1055_v20, 0.0  ;;  %v1024_v23 = vadd.f32 %v1772_v39, %v874_v21 }
  0xd1   :  { %1184 = vst.msk [vmem:[%s2221_s5 + $0x140] sm:$0xff] %vm1143_vm4, %v1119_v22  ;;  %v1088_v24 = vmax.f32 %v1024_v23, 0.0  ;;  %v523_v25 = vpop.f32.mrf.mxu2 }
  0xd2   :  { %v953_v26 = vpop.f32.mrf.mxu3 }
  0xd3   :  { %1153 = vst.msk [vmem:[%s2221_s5 + $0x48] sm:$0xff] %vm1143_vm4, %v1088_v24  ;;  %v954_v29 = vadd.f32 %v953_v26, %v523_v25  ;;  %v446_v30 = vpop.f32.mrf.mxu0 }
  0xd4   :  { %v876_v33 = vpop.f32.mrf.mxu1 }
  0xd5   :  { %v1056_v34 = vadd.f32 %v1772_v39, %v954_v29  ;;  %v877_v35 = vadd.f32 %v876_v33, %v446_v30 }
  0xd6   :  { %1353 = vmatmul.msk.bf16.gmra.mxu0 %vm311_vm2, %v1577_v27  ;;  %1369 = vmatmul.msk.bf16.gmra.mxu2 %vm311_vm2, %v1593_v28 }
  0xd7   :  { %v1120_v36 = vmax.f32 %v1056_v34, 0.0  ;;  %v1025_v37 = vadd.f32 %v1772_v39, %v877_v35  ;;  %1513 = vmatmul.msk.bf16.gmra.mxu1 %vm741_vm3, %v1545_v31  ;;  %1529 = vmatmul.msk.bf16.gmra.mxu3 %vm741_vm3, %v1561_v32 }
  0xd9   :  { %1185 = vst.msk [vmem:[%s2221_s5 + $0x148] sm:$0xff] %vm1143_vm4, %v1120_v36  ;;  %v1089_v38 = vmax.f32 %v1025_v37, 0.0  ;;  %v526_v40 = vpop.f32.mrf.mxu2 }
  0xda   :  { %v956_v41 = vpop.f32.mrf.mxu3 }
  0xdb   :  { %1154 = vst.msk [vmem:[%s2221_s5 + $0x50] sm:$0xff] %vm1143_vm4, %v1089_v38  ;;  %v957_v42 = vadd.f32 %v956_v41, %v526_v40  ;;  %v448_v43 = vpop.f32.mrf.mxu0 }
  0xdc   :  { %v878_v44 = vpop.f32.mrf.mxu1 }
  0xdd   :  { %v1057_v45 = vadd.f32 %v1772_v39, %v957_v42  ;;  %v879_v46 = vadd.f32 %v878_v44, %v448_v43 }
  0xdf   :  { %v1121_v47 = vmax.f32 %v1057_v45, 0.0  ;;  %v1026_v48 = vadd.f32 %v1772_v39, %v879_v46 }
  0xe1   :  { %1186 = vst.msk [vmem:[%s2221_s5 + $0x150] sm:$0xff] %vm1143_vm4, %v1121_v47  ;;  %v1090_v49 = vmax.f32 %v1026_v48, 0.0  ;;  %v528_v50 = vpop.f32.mrf.mxu2 }
  0xe2   :  { %v958_v51 = vpop.f32.mrf.mxu3 }
  0xe3   :  { %1155 = vst.msk [vmem:[%s2221_s5 + $0x58] sm:$0xff] %vm1143_vm4, %v1090_v49  ;;  %v959_v54 = vadd.f32 %v958_v51, %v528_v50  ;;  %v451_v55 = vpop.f32.mrf.mxu0 }
  0xe4   :  { %v881_v58 = vpop.f32.mrf.mxu1 }
  0xe5   :  { %v1058_v59 = vadd.f32 %v1772_v39, %v959_v54  ;;  %v882_v60 = vadd.f32 %v881_v58, %v451_v55 }
  0xe6   :  { %1354 = vmatmul.msk.bf16.gmra.mxu0 %vm311_vm2, %v1578_v52  ;;  %1370 = vmatmul.msk.bf16.gmra.mxu2 %vm311_vm2, %v1594_v53 }
  0xe7   :  { %v1122_v61 = vmax.f32 %v1058_v59, 0.0  ;;  %v1027_v62 = vadd.f32 %v1772_v39, %v882_v60  ;;  %1514 = vmatmul.msk.bf16.gmra.mxu1 %vm741_vm3, %v1546_v56  ;;  %1530 = vmatmul.msk.bf16.gmra.mxu3 %vm741_vm3, %v1562_v57 }
  0xe9   :  { %1187 = vst.msk [vmem:[%s2221_s5 + $0x158] sm:$0xff] %vm1143_vm4, %v1122_v61  ;;  %v1091_v63 = vmax.f32 %v1027_v62, 0.0  ;;  %v531_v0 = vpop.f32.mrf.mxu2 }
  0xea   :  { %v961_v1 = vpop.f32.mrf.mxu3 }
  0xeb   :  { %1156 = vst.msk [vmem:[%s2221_s5 + $0x60] sm:$0xff] %vm1143_vm4, %v1091_v63  ;;  %v962_v2 = vadd.f32 %v961_v1, %v531_v0  ;;  %v453_v3 = vpop.f32.mrf.mxu0 }
  0xec   :  { %v883_v4 = vpop.f32.mrf.mxu1 }
  0xed   :  { %v1059_v5 = vadd.f32 %v1772_v39, %v962_v2  ;;  %v884_v6 = vadd.f32 %v883_v4, %v453_v3 }
  0xef   :  { %v1123_v7 = vmax.f32 %v1059_v5, 0.0  ;;  %v1028_v8 = vadd.f32 %v1772_v39, %v884_v6 }
  0xf1   :  { %1188 = vst.msk [vmem:[%s2221_s5 + $0x160] sm:$0xff] %vm1143_vm4, %v1123_v7  ;;  %v1092_v9 = vmax.f32 %v1028_v8, 0.0  ;;  %v533_v10 = vpop.f32.mrf.mxu2 }
  0xf2   :  { %v963_v11 = vpop.f32.mrf.mxu3 }
  0xf3   :  { %1157 = vst.msk [vmem:[%s2221_s5 + $0x68] sm:$0xff] %vm1143_vm4, %v1092_v9  ;;  %v964_v14 = vadd.f32 %v963_v11, %v533_v10  ;;  %v456_v15 = vpop.f32.mrf.mxu0 }
  0xf4   :  { %v886_v18 = vpop.f32.mrf.mxu1 }
  0xf5   :  { %v1060_v19 = vadd.f32 %v1772_v39, %v964_v14  ;;  %v887_v20 = vadd.f32 %v886_v18, %v456_v15 }
  0xf6   :  { %1355 = vmatmul.msk.bf16.gmra.mxu0 %vm311_vm2, %v1579_v12  ;;  %1371 = vmatmul.msk.bf16.gmra.mxu2 %vm311_vm2, %v1595_v13 }
  0xf7   :  { %v1124_v21 = vmax.f32 %v1060_v19, 0.0  ;;  %v1029_v22 = vadd.f32 %v1772_v39, %v887_v20  ;;  %1515 = vmatmul.msk.bf16.gmra.mxu1 %vm741_vm3, %v1547_v16  ;;  %1531 = vmatmul.msk.bf16.gmra.mxu3 %vm741_vm3, %v1563_v17 }
  0xf9   :  { %1189 = vst.msk [vmem:[%s2221_s5 + $0x168] sm:$0xff] %vm1143_vm4, %v1124_v21  ;;  %v1093_v23 = vmax.f32 %v1029_v22, 0.0  ;;  %v536_v24 = vpop.f32.mrf.mxu2 }
  0xfa   :  { %v966_v25 = vpop.f32.mrf.mxu3 }
  0xfb   :  { %1158 = vst.msk [vmem:[%s2221_s5 + $0x70] sm:$0xff] %vm1143_vm4, %v1093_v23  ;;  %v967_v26 = vadd.f32 %v966_v25, %v536_v24  ;;  %v458_v27 = vpop.f32.mrf.mxu0 }
  0xfc   :  { %v888_v28 = vpop.f32.mrf.mxu1 }
  0xfd   :  { %v1061_v29 = vadd.f32 %v1772_v39, %v967_v26  ;;  %v889_v30 = vadd.f32 %v888_v28, %v458_v27 }
  0xff   :  { %v1125_v31 = vmax.f32 %v1061_v29, 0.0  ;;  %v1030_v32 = vadd.f32 %v1772_v39, %v889_v30 }
 0x101   :  { %1190 = vst.msk [vmem:[%s2221_s5 + $0x170] sm:$0xff] %vm1143_vm4, %v1125_v31  ;;  %v1094_v33 = vmax.f32 %v1030_v32, 0.0  ;;  %v538_v34 = vpop.f32.mrf.mxu2 }
 0x102   :  { %v968_v35 = vpop.f32.mrf.mxu3 }
 0x103   :  { %1159 = vst.msk [vmem:[%s2221_s5 + $0x78] sm:$0xff] %vm1143_vm4, %v1094_v33  ;;  %v969_v36 = vadd.f32 %v968_v35, %v538_v34  ;;  %v461_v37 = vpop.f32.mrf.mxu0 }
 0x104   :  { %v891_v38 = vpop.f32.mrf.mxu1 }
 0x105   :  { %v1062_v40 = vadd.f32 %v1772_v39, %v969_v36  ;;  %v892_v41 = vadd.f32 %v891_v38, %v461_v37 }
 0x107   :  { %v1126_v42 = vmax.f32 %v1062_v40, 0.0  ;;  %v1031_v43 = vadd.f32 %v1772_v39, %v892_v41 }
 0x109   :  { %1191 = vst.msk [vmem:[%s2221_s5 + $0x178] sm:$0xff] %vm1143_vm4, %v1126_v42  ;;  %v1095_v44 = vmax.f32 %v1031_v43, 0.0  ;;  %v541_v45 = vpop.f32.mrf.mxu2 }
 0x10a   :  { %v971_v46 = vpop.f32.mrf.mxu3 }
 0x10b   :  { %1160 = vst.msk [vmem:[%s2221_s5 + $0x80] sm:$0xff] %vm1143_vm4, %v1095_v44  ;;  %v972_v47 = vadd.f32 %v971_v46, %v541_v45  ;;  %v463_v48 = vpop.f32.mrf.mxu0 }
 0x10c   :  { %v893_v49 = vpop.f32.mrf.mxu1 }
 0x10d   :  { %v1063_v50 = vadd.f32 %v1772_v39, %v972_v47  ;;  %v894_v51 = vadd.f32 %v893_v49, %v463_v48 }
 0x10f   :  { %v1127_v52 = vmax.f32 %v1063_v50, 0.0  ;;  %v1032_v53 = vadd.f32 %v1772_v39, %v894_v51 }
 0x111   :  { %1192 = vst.msk [vmem:[%s2221_s5 + $0x180] sm:$0xff] %vm1143_vm4, %v1127_v52  ;;  %v1096_v54 = vmax.f32 %v1032_v53, 0.0  ;;  %v543_v55 = vpop.f32.mrf.mxu2 }
 0x112   :  { %v973_v56 = vpop.f32.mrf.mxu3 }
 0x113   :  { %1161 = vst.msk [vmem:[%s2221_s5 + $0x88] sm:$0xff] %vm1143_vm4, %v1096_v54  ;;  %v974_v57 = vadd.f32 %v973_v56, %v543_v55  ;;  %v466_v58 = vpop.f32.mrf.mxu0 }
 0x114   :  { %v896_v59 = vpop.f32.mrf.mxu1 }
 0x115   :  { %v1064_v60 = vadd.f32 %v1772_v39, %v974_v57  ;;  %v897_v61 = vadd.f32 %v896_v59, %v466_v58 }
 0x117   :  { %v1128_v62 = vmax.f32 %v1064_v60, 0.0  ;;  %v1033_v63 = vadd.f32 %v1772_v39, %v897_v61 }
 0x119   :  { %1193 = vst.msk [vmem:[%s2221_s5 + $0x188] sm:$0xff] %vm1143_vm4, %v1128_v62  ;;  %v1097_v0 = vmax.f32 %v1033_v63, 0.0  ;;  %v546_v1 = vpop.f32.mrf.mxu2 }
 0x11a   :  { %v976_v2 = vpop.f32.mrf.mxu3 }
 0x11b   :  { %1162 = vst.msk [vmem:[%s2221_s5 + $0x90] sm:$0xff] %vm1143_vm4, %v1097_v0  ;;  %v977_v3 = vadd.f32 %v976_v2, %v546_v1  ;;  %v468_v4 = vpop.f32.mrf.mxu0 }
 0x11c   :  { %v898_v5 = vpop.f32.mrf.mxu1 }
 0x11d   :  { %v1065_v6 = vadd.f32 %v1772_v39, %v977_v3  ;;  %v899_v7 = vadd.f32 %v898_v5, %v468_v4 }
 0x11f   :  { %v1129_v8 = vmax.f32 %v1065_v6, 0.0  ;;  %v1034_v9 = vadd.f32 %v1772_v39, %v899_v7 }
 0x121   :  { %1194 = vst.msk [vmem:[%s2221_s5 + $0x190] sm:$0xff] %vm1143_vm4, %v1129_v8  ;;  %v1098_v10 = vmax.f32 %v1034_v9, 0.0  ;;  %v548_v11 = vpop.f32.mrf.mxu2 }
 0x122   :  { %v978_v12 = vpop.f32.mrf.mxu3 }
 0x123   :  { %1163 = vst.msk [vmem:[%s2221_s5 + $0x98] sm:$0xff] %vm1143_vm4, %v1098_v10  ;;  %v979_v13 = vadd.f32 %v978_v12, %v548_v11  ;;  %v471_v14 = vpop.f32.mrf.mxu0 }
 0x124   :  { %v901_v15 = vpop.f32.mrf.mxu1 }
 0x125   :  { %v1066_v16 = vadd.f32 %v1772_v39, %v979_v13  ;;  %v902_v17 = vadd.f32 %v901_v15, %v471_v14 }
 0x127   :  { %v1130_v18 = vmax.f32 %v1066_v16, 0.0  ;;  %v1035_v19 = vadd.f32 %v1772_v39, %v902_v17 }
 0x129   :  { %1195 = vst.msk [vmem:[%s2221_s5 + $0x198] sm:$0xff] %vm1143_vm4, %v1130_v18  ;;  %v1099_v20 = vmax.f32 %v1035_v19, 0.0  ;;  %v551_v21 = vpop.f32.mrf.mxu2 }
 0x12a   :  { %v981_v22 = vpop.f32.mrf.mxu3 }
 0x12b   :  { %1164 = vst.msk [vmem:[%s2221_s5 + $0xa0] sm:$0xff] %vm1143_vm4, %v1099_v20  ;;  %v982_v23 = vadd.f32 %v981_v22, %v551_v21  ;;  %v473_v24 = vpop.f32.mrf.mxu0 }
 0x12c   :  { %v903_v25 = vpop.f32.mrf.mxu1 }
 0x12d   :  { %v1067_v26 = vadd.f32 %v1772_v39, %v982_v23  ;;  %v904_v27 = vadd.f32 %v903_v25, %v473_v24 }
 0x12f   :  { %v1131_v28 = vmax.f32 %v1067_v26, 0.0  ;;  %v1036_v29 = vadd.f32 %v1772_v39, %v904_v27 }
 0x131   :  { %1196 = vst.msk [vmem:[%s2221_s5 + $0x1a0] sm:$0xff] %vm1143_vm4, %v1131_v28  ;;  %v1100_v30 = vmax.f32 %v1036_v29, 0.0  ;;  %v553_v31 = vpop.f32.mrf.mxu2 }
 0x132   :  { %v983_v32 = vpop.f32.mrf.mxu3 }
 0x133   :  { %1165 = vst.msk [vmem:[%s2221_s5 + $0xa8] sm:$0xff] %vm1143_vm4, %v1100_v30  ;;  %v984_v33 = vadd.f32 %v983_v32, %v553_v31  ;;  %v476_v34 = vpop.f32.mrf.mxu0 }
 0x134   :  { %v906_v35 = vpop.f32.mrf.mxu1 }
 0x135   :  { %v1068_v36 = vadd.f32 %v1772_v39, %v984_v33  ;;  %v907_v37 = vadd.f32 %v906_v35, %v476_v34 }
 0x137   :  { %v1132_v38 = vmax.f32 %v1068_v36, 0.0  ;;  %v1037_v40 = vadd.f32 %v1772_v39, %v907_v37 }
 0x139   :  { %1197 = vst.msk [vmem:[%s2221_s5 + $0x1a8] sm:$0xff] %vm1143_vm4, %v1132_v38  ;;  %v1101_v41 = vmax.f32 %v1037_v40, 0.0  ;;  %v556_v42 = vpop.f32.mrf.mxu2 }
 0x13a   :  { %v986_v43 = vpop.f32.mrf.mxu3 }
 0x13b   :  { %1166 = vst.msk [vmem:[%s2221_s5 + $0xb0] sm:$0xff] %vm1143_vm4, %v1101_v41  ;;  %v987_v44 = vadd.f32 %v986_v43, %v556_v42  ;;  %v478_v45 = vpop.f32.mrf.mxu0 }
 0x13c   :  { %v908_v46 = vpop.f32.mrf.mxu1 }
 0x13d   :  { %v1069_v47 = vadd.f32 %v1772_v39, %v987_v44  ;;  %v909_v48 = vadd.f32 %v908_v46, %v478_v45 }
 0x13f   :  { %v1133_v49 = vmax.f32 %v1069_v47, 0.0  ;;  %v1038_v50 = vadd.f32 %v1772_v39, %v909_v48 }
 0x141   :  { %1198 = vst.msk [vmem:[%s2221_s5 + $0x1b0] sm:$0xff] %vm1143_vm4, %v1133_v49  ;;  %v1102_v51 = vmax.f32 %v1038_v50, 0.0  ;;  %v558_v52 = vpop.f32.mrf.mxu2 }
 0x142   :  { %v988_v53 = vpop.f32.mrf.mxu3 }
 0x143   :  { %1167 = vst.msk [vmem:[%s2221_s5 + $0xb8] sm:$0xff] %vm1143_vm4, %v1102_v51  ;;  %v989_v54 = vadd.f32 %v988_v53, %v558_v52  ;;  %v481_v55 = vpop.f32.mrf.mxu0 }
 0x144   :  { %v911_v56 = vpop.f32.mrf.mxu1 }
 0x145   :  { %v1070_v57 = vadd.f32 %v1772_v39, %v989_v54  ;;  %v912_v58 = vadd.f32 %v911_v56, %v481_v55 }
 0x147   :  { %v1134_v59 = vmax.f32 %v1070_v57, 0.0  ;;  %v1039_v60 = vadd.f32 %v1772_v39, %v912_v58 }
 0x149   :  { %1199 = vst.msk [vmem:[%s2221_s5 + $0x1b8] sm:$0xff] %vm1143_vm4, %v1134_v59  ;;  %v1103_v61 = vmax.f32 %v1039_v60, 0.0  ;;  %v561_v62 = vpop.f32.mrf.mxu2 }
 0x14a   :  { %v991_v63 = vpop.f32.mrf.mxu3 }
 0x14b   :  { %1168 = vst.msk [vmem:[%s2221_s5 + $0xc0] sm:$0xff] %vm1143_vm4, %v1103_v61  ;;  %v992_v0 = vadd.f32 %v991_v63, %v561_v62  ;;  %v483_v1 = vpop.f32.mrf.mxu0 }
 0x14c   :  { %v913_v2 = vpop.f32.mrf.mxu1 }
 0x14d   :  { %v1071_v3 = vadd.f32 %v1772_v39, %v992_v0  ;;  %v914_v4 = vadd.f32 %v913_v2, %v483_v1 }
 0x14f   :  { %v1135_v5 = vmax.f32 %v1071_v3, 0.0  ;;  %v1040_v6 = vadd.f32 %v1772_v39, %v914_v4 }
 0x151   :  { %1200 = vst.msk [vmem:[%s2221_s5 + $0x1c0] sm:$0xff] %vm1143_vm4, %v1135_v5  ;;  %v1104_v7 = vmax.f32 %v1040_v6, 0.0  ;;  %v563_v8 = vpop.f32.mrf.mxu2 }
 0x152   :  { %v993_v9 = vpop.f32.mrf.mxu3 }
 0x153   :  { %1169 = vst.msk [vmem:[%s2221_s5 + $0xc8] sm:$0xff] %vm1143_vm4, %v1104_v7  ;;  %v994_v10 = vadd.f32 %v993_v9, %v563_v8  ;;  %v486_v11 = vpop.f32.mrf.mxu0 }
 0x154   :  { %v916_v12 = vpop.f32.mrf.mxu1 }
 0x155   :  { %v1072_v13 = vadd.f32 %v1772_v39, %v994_v10  ;;  %v917_v14 = vadd.f32 %v916_v12, %v486_v11 }
 0x157   :  { %v1136_v15 = vmax.f32 %v1072_v13, 0.0  ;;  %v1041_v16 = vadd.f32 %v1772_v39, %v917_v14 }
 0x159   :  { %1201 = vst.msk [vmem:[%s2221_s5 + $0x1c8] sm:$0xff] %vm1143_vm4, %v1136_v15  ;;  %v1105_v17 = vmax.f32 %v1041_v16, 0.0  ;;  %v566_v18 = vpop.f32.mrf.mxu2 }
 0x15a   :  { %v996_v19 = vpop.f32.mrf.mxu3 }
 0x15b   :  { %1170 = vst.msk [vmem:[%s2221_s5 + $0xd0] sm:$0xff] %vm1143_vm4, %v1105_v17  ;;  %v997_v20 = vadd.f32 %v996_v19, %v566_v18  ;;  %v488_v21 = vpop.f32.mrf.mxu0 }
 0x15c   :  { %v918_v22 = vpop.f32.mrf.mxu1 }
 0x15d   :  { %v1073_v23 = vadd.f32 %v1772_v39, %v997_v20  ;;  %v919_v24 = vadd.f32 %v918_v22, %v488_v21 }
 0x15f   :  { %v1137_v25 = vmax.f32 %v1073_v23, 0.0  ;;  %v1042_v26 = vadd.f32 %v1772_v39, %v919_v24 }
 0x161   :  { %1202 = vst.msk [vmem:[%s2221_s5 + $0x1d0] sm:$0xff] %vm1143_vm4, %v1137_v25  ;;  %v1106_v27 = vmax.f32 %v1042_v26, 0.0  ;;  %v568_v28 = vpop.f32.mrf.mxu2 }
 0x162   :  { %v998_v29 = vpop.f32.mrf.mxu3 }
 0x163   :  { %1171 = vst.msk [vmem:[%s2221_s5 + $0xd8] sm:$0xff] %vm1143_vm4, %v1106_v27  ;;  %v999_v30 = vadd.f32 %v998_v29, %v568_v28  ;;  %v491_v31 = vpop.f32.mrf.mxu0 }
 0x164   :  { %v921_v32 = vpop.f32.mrf.mxu1 }
 0x165   :  { %v1074_v33 = vadd.f32 %v1772_v39, %v999_v30  ;;  %v922_v34 = vadd.f32 %v921_v32, %v491_v31 }
 0x167   :  { %v1138_v35 = vmax.f32 %v1074_v33, 0.0  ;;  %v1043_v36 = vadd.f32 %v1772_v39, %v922_v34 }
 0x169   :  { %1203 = vst.msk [vmem:[%s2221_s5 + $0x1d8] sm:$0xff] %vm1143_vm4, %v1138_v35  ;;  %v1107_v37 = vmax.f32 %v1043_v36, 0.0  ;;  %v571_v38 = vpop.f32.mrf.mxu2 }
 0x16a   :  { %v1001_v40 = vpop.f32.mrf.mxu3 }
 0x16b   :  { %1172 = vst.msk [vmem:[%s2221_s5 + $0xe0] sm:$0xff] %vm1143_vm4, %v1107_v37  ;;  %v1002_v41 = vadd.f32 %v1001_v40, %v571_v38  ;;  %v493_v42 = vpop.f32.mrf.mxu0 }
 0x16c   :  { %v923_v43 = vpop.f32.mrf.mxu1 }
 0x16d   :  { %v1075_v44 = vadd.f32 %v1772_v39, %v1002_v41  ;;  %v924_v45 = vadd.f32 %v923_v43, %v493_v42 }
 0x16f   :  { %v1139_v46 = vmax.f32 %v1075_v44, 0.0  ;;  %v1044_v47 = vadd.f32 %v1772_v39, %v924_v45 }
 0x171   :  { %1204 = vst.msk [vmem:[%s2221_s5 + $0x1e0] sm:$0xff] %vm1143_vm4, %v1139_v46  ;;  %v1108_v48 = vmax.f32 %v1044_v47, 0.0  ;;  %v573_v49 = vpop.f32.mrf.mxu2 }
 0x172   :  { %v1003_v50 = vpop.f32.mrf.mxu3 }
 0x173   :  { %1173 = vst.msk [vmem:[%s2221_s5 + $0xe8] sm:$0xff] %vm1143_vm4, %v1108_v48  ;;  %v1004_v51 = vadd.f32 %v1003_v50, %v573_v49  ;;  %v496_v52 = vpop.f32.mrf.mxu0 }
 0x174   :  { %v926_v53 = vpop.f32.mrf.mxu1 }
 0x175   :  { %v1076_v54 = vadd.f32 %v1772_v39, %v1004_v51  ;;  %v927_v55 = vadd.f32 %v926_v53, %v496_v52 }
 0x177   :  { %v1140_v56 = vmax.f32 %v1076_v54, 0.0  ;;  %v1045_v57 = vadd.f32 %v1772_v39, %v927_v55 }
 0x179   :  { %1205 = vst.msk [vmem:[%s2221_s5 + $0x1e8] sm:$0xff] %vm1143_vm4, %v1140_v56  ;;  %v1109_v58 = vmax.f32 %v1045_v57, 0.0  ;;  %v576_v59 = vpop.f32.mrf.mxu2 }
 0x17a   :  { %v1006_v60 = vpop.f32.mrf.mxu3 }
 0x17b   :  { %1174 = vst.msk [vmem:[%s2221_s5 + $0xf0] sm:$0xff] %vm1143_vm4, %v1109_v58  ;;  %v1007_v61 = vadd.f32 %v1006_v60, %v576_v59  ;;  %v498_v62 = vpop.f32.mrf.mxu0 }
 0x17c   :  { %v928_v63 = vpop.f32.mrf.mxu1 }
 0x17d   :  { %v1077_v0 = vadd.f32 %v1772_v39, %v1007_v61  ;;  %v929_v1 = vadd.f32 %v928_v63, %v498_v62 }
 0x17f   :  { %v1141_v2 = vmax.f32 %v1077_v0, 0.0  ;;  %v1046_v3 = vadd.f32 %v1772_v39, %v929_v1 }
 0x181   :  { %1206 = vst.msk [vmem:[%s2221_s5 + $0x1f0] sm:$0xff] %vm1143_vm4, %v1141_v2  ;;  %v1110_v4 = vmax.f32 %v1046_v3, 0.0  ;;  %v578_v5 = vpop.f32.mrf.mxu2 }
 0x182   :  { %v1008_v6 = vpop.f32.mrf.mxu3 }
 0x183   :  { %1175 = vst.msk [vmem:[%s2221_s5 + $0xf8] sm:$0xff] %vm1143_vm4, %v1110_v4  ;;  %v1009_v7 = vadd.f32 %v1008_v6, %v578_v5 }
 0x185   :  { %v1078_v8 = vadd.f32 %v1772_v39, %v1009_v7 }
 0x187   :  { %v1142_v9 = vmax.f32 %v1078_v8, 0.0 }
 0x189   :  { %1207 = vst.msk [vmem:[%s2221_s5 + $0x1f8] sm:$0xff] %vm1143_vm4, %v1142_v9 }

// kernel: slow_only_forward.20
= control target key start
LH: loop header
LB: loop body
LE: loop exit
PB: predicated region body
PF: predicated region fallthrough
CT: control target
= control target key end

     0   :  { %vm251_vm0 = vcmask 130048   ;;  %vm581_vm1 = vcmask 64512   ;;  %s1327_s1 = inlined_call_operand.vmem [shape: bf16[16,8], index: 1, kind: input, shape index: {}]   ;;  %s1328_s0 = inlined_call_operand.vmem [shape: bf16[512,16], index: 0, kind: input, shape index: {}]   ;;  %s1329_s2 = inlined_call_operand.vmem [shape: f32[1,8], index: 2, kind: input, shape index: {}]   ;;  %s1330_s3 = inlined_call_operand.vmem [shape: f32[512,8], index: 3, kind: output, shape index: {}]  }
   0x1   :  { %v846_v0 = vld [vmem:[%s1327_s1] sm:$0xff]  ;;  %v815_v5 = vld [vmem:[%s1328_s0 + $0x8] sm:$0xff]  ;;  %v816_v9 = vld [vmem:[%s1328_s0 + $0x10] sm:$0xff] }
   0x2   :  { %v814_v1 = vld [vmem:[%s1328_s0] sm:$0xff]  ;;  %355 = vmatpush.bf16.msra.mxu0 %v846_v0  ;;  %847 = vmatpush.bf16.msra.mxu1 %v846_v0  ;;  %v823_v6 = vld [vmem:[%s1328_s0 + $0x48] sm:$0xff]  ;;  %v824_v10 = vld [vmem:[%s1328_s0 + $0x50] sm:$0xff] }
   0x3   :  { %v822_v2 = vld [vmem:[%s1328_s0 + $0x40] sm:$0xff]  ;;  %848 = vmatpush.bf16.msra.mxu2 %v846_v0  ;;  %849 = vmatpush.bf16.msra.mxu3 %v846_v0  ;;  %v831_v7 = vld [vmem:[%s1328_s0 + $0x88] sm:$0xff]  ;;  %v832_v11 = vld [vmem:[%s1328_s0 + $0x90] sm:$0xff] }
   0x4   :  { %v830_v3 = vld [vmem:[%s1328_s0 + $0x80] sm:$0xff]  ;;  %v839_v8 = vld [vmem:[%s1328_s0 + $0xc8] sm:$0xff]  ;;  %v840_v12 = vld [vmem:[%s1328_s0 + $0xd0] sm:$0xff] }
   0x5   :  { %v838_v4 = vld [vmem:[%s1328_s0 + $0xc0] sm:$0xff]  ;;  %782 = vmatmul.msk.bf16.vlgmr.msra.gmra.mxu0 %vm251_vm0, %v814_v1  ;;  %790 = vmatmul.msk.bf16.vlgmr.msra.gmra.mxu1 %vm251_vm0, %v822_v2  ;;  %v817_v13 = vld [vmem:[%s1328_s0 + $0x18] sm:$0xff]  ;;  %v819_v21 = vld [vmem:[%s1328_s0 + $0x28] sm:$0xff] }
   0x6   :  { %798 = vmatmul.msk.bf16.vlgmr.msra.gmra.mxu2 %vm251_vm0, %v830_v3  ;;  %806 = vmatmul.msk.bf16.vlgmr.msra.gmra.mxu3 %vm251_vm0, %v838_v4  ;;  %v825_v14 = vld [vmem:[%s1328_s0 + $0x58] sm:$0xff]  ;;  %v818_v17 = vld [vmem:[%s1328_s0 + $0x20] sm:$0xff]  ;;  %v827_v22 = vld [vmem:[%s1328_s0 + $0x68] sm:$0xff] }
   0x7   :  { %v833_v15 = vld [vmem:[%s1328_s0 + $0x98] sm:$0xff]  ;;  %v826_v18 = vld [vmem:[%s1328_s0 + $0x60] sm:$0xff]  ;;  %v835_v23 = vld [vmem:[%s1328_s0 + $0xa8] sm:$0xff] }
   0x8   :  { %v841_v16 = vld [vmem:[%s1328_s0 + $0xd8] sm:$0xff]  ;;  %v834_v19 = vld [vmem:[%s1328_s0 + $0xa0] sm:$0xff]  ;;  %v843_v24 = vld [vmem:[%s1328_s0 + $0xe8] sm:$0xff] }
   0x9   :  { %v842_v20 = vld [vmem:[%s1328_s0 + $0xe0] sm:$0xff]  ;;  %v820_v25 = vld [vmem:[%s1328_s0 + $0x30] sm:$0xff]  ;;  %v821_v29 = vld [vmem:[%s1328_s0 + $0x38] sm:$0xff] }
   0xa   :  { %v828_v26 = vld [vmem:[%s1328_s0 + $0x70] sm:$0xff]  ;;  %v829_v30 = vld [vmem:[%s1328_s0 + $0x78] sm:$0xff]  ;;  %v1005_v33 = vld [vmem:[%s1329_s2] ss:$0 sm:$0xff] }
   0xb   :  { %v836_v27 = vld [vmem:[%s1328_s0 + $0xb0] sm:$0xff]  ;;  %v837_v31 = vld [vmem:[%s1328_s0 + $0xb8] sm:$0xff] }
   0xc   :  { %v844_v28 = vld [vmem:[%s1328_s0 + $0xf0] sm:$0xff]  ;;  %v845_v32 = vld [vmem:[%s1328_s0 + $0xf8] sm:$0xff] }
  0x15   :  { %783 = vmatmul.msk.bf16.gmra.mxu0 %vm251_vm0, %v815_v5  ;;  %791 = vmatmul.msk.bf16.gmra.mxu1 %vm251_vm0, %v823_v6 }
  0x16   :  { %799 = vmatmul.msk.bf16.gmra.mxu2 %vm251_vm0, %v831_v7  ;;  %807 = vmatmul.msk.bf16.gmra.mxu3 %vm251_vm0, %v839_v8 }
  0x25   :  { %784 = vmatmul.msk.bf16.gmra.mxu0 %vm251_vm0, %v816_v9  ;;  %792 = vmatmul.msk.bf16.gmra.mxu1 %vm251_vm0, %v824_v10 }
  0x26   :  { %800 = vmatmul.msk.bf16.gmra.mxu2 %vm251_vm0, %v832_v11  ;;  %808 = vmatmul.msk.bf16.gmra.mxu3 %vm251_vm0, %v840_v12 }
  0x35   :  { %785 = vmatmul.msk.bf16.gmra.mxu0 %vm251_vm0, %v817_v13  ;;  %793 = vmatmul.msk.bf16.gmra.mxu1 %vm251_vm0, %v825_v14 }
  0x36   :  { %801 = vmatmul.msk.bf16.gmra.mxu2 %vm251_vm0, %v833_v15  ;;  %809 = vmatmul.msk.bf16.gmra.mxu3 %vm251_vm0, %v841_v16 }
  0x45   :  { %786 = vmatmul.msk.bf16.gmra.mxu0 %vm251_vm0, %v818_v17  ;;  %794 = vmatmul.msk.bf16.gmra.mxu1 %vm251_vm0, %v826_v18 }
  0x46   :  { %802 = vmatmul.msk.bf16.gmra.mxu2 %vm251_vm0, %v834_v19  ;;  %810 = vmatmul.msk.bf16.gmra.mxu3 %vm251_vm0, %v842_v20 }
  0x55   :  { %787 = vmatmul.msk.bf16.gmra.mxu0 %vm251_vm0, %v819_v21  ;;  %795 = vmatmul.msk.bf16.gmra.mxu1 %vm251_vm0, %v827_v22 }
  0x56   :  { %803 = vmatmul.msk.bf16.gmra.mxu2 %vm251_vm0, %v835_v23  ;;  %811 = vmatmul.msk.bf16.gmra.mxu3 %vm251_vm0, %v843_v24 }
  0x65   :  { %788 = vmatmul.msk.bf16.gmra.mxu0 %vm251_vm0, %v820_v25  ;;  %796 = vmatmul.msk.bf16.gmra.mxu1 %vm251_vm0, %v828_v26 }
  0x66   :  { %804 = vmatmul.msk.bf16.gmra.mxu2 %vm251_vm0, %v836_v27  ;;  %812 = vmatmul.msk.bf16.gmra.mxu3 %vm251_vm0, %v844_v28 }
  0x75   :  { %789 = vmatmul.msk.bf16.gmra.mxu0 %vm251_vm0, %v821_v29  ;;  %797 = vmatmul.msk.bf16.gmra.mxu1 %vm251_vm0, %v829_v30 }
  0x76   :  { %805 = vmatmul.msk.bf16.gmra.mxu2 %vm251_vm0, %v837_v31  ;;  %813 = vmatmul.msk.bf16.gmra.mxu3 %vm251_vm0, %v845_v32 }
  0x82   :  { %v357_v34 = vpop.f32.mrf.mxu0  ;;  %v397_v35 = vpop.f32.mrf.mxu1 }
  0x83   :  { %v358_v36 = vadd.f32 %v1005_v33, %v357_v34  ;;  %v398_v37 = vadd.f32 %v1005_v33, %v397_v35 }
  0x85   :  { %v517_v38 = vmax.f32 %v358_v36, 0.0  ;;  %v533_v39 = vmax.f32 %v398_v37, 0.0 }
  0x87   :  { %582 = vst.msk [vmem:[%s1330_s3] sm:$0xff] %vm581_vm1, %v517_v38 }
  0x88   :  { %598 = vst.msk [vmem:[%s1330_s3 + $0x80] sm:$0xff] %vm581_vm1, %v533_v39 }
  0x89   :  { %v437_v40 = vpop.f32.mrf.mxu2  ;;  %v477_v41 = vpop.f32.mrf.mxu3 }
  0x8a   :  { %v438_v42 = vadd.f32 %v1005_v33, %v437_v40  ;;  %v478_v43 = vadd.f32 %v1005_v33, %v477_v41  ;;  %v359_v44 = vpop.f32.mrf.mxu0  ;;  %v399_v45 = vpop.f32.mrf.mxu1 }
  0x8b   :  { %v360_v46 = vadd.f32 %v1005_v33, %v359_v44  ;;  %v400_v47 = vadd.f32 %v1005_v33, %v399_v45 }
  0x8c   :  { %v549_v48 = vmax.f32 %v438_v42, 0.0  ;;  %v565_v49 = vmax.f32 %v478_v43, 0.0 }
  0x8d   :  { %v518_v50 = vmax.f32 %v360_v46, 0.0  ;;  %v534_v51 = vmax.f32 %v400_v47, 0.0 }
  0x8e   :  { %614 = vst.msk [vmem:[%s1330_s3 + $0x100] sm:$0xff] %vm581_vm1, %v549_v48 }
  0x8f   :  { %630 = vst.msk [vmem:[%s1330_s3 + $0x180] sm:$0xff] %vm581_vm1, %v565_v49 }
  0x90   :  { %583 = vst.msk [vmem:[%s1330_s3 + $0x8] sm:$0xff] %vm581_vm1, %v518_v50 }
  0x91   :  { %599 = vst.msk [vmem:[%s1330_s3 + $0x88] sm:$0xff] %vm581_vm1, %v534_v51  ;;  %v439_v52 = vpop.f32.mrf.mxu2  ;;  %v479_v53 = vpop.f32.mrf.mxu3 }
  0x92   :  { %v440_v54 = vadd.f32 %v1005_v33, %v439_v52  ;;  %v480_v55 = vadd.f32 %v1005_v33, %v479_v53  ;;  %v362_v56 = vpop.f32.mrf.mxu0  ;;  %v402_v57 = vpop.f32.mrf.mxu1 }
  0x93   :  { %v363_v58 = vadd.f32 %v1005_v33, %v362_v56  ;;  %v403_v59 = vadd.f32 %v1005_v33, %v402_v57 }
  0x94   :  { %v550_v60 = vmax.f32 %v440_v54, 0.0  ;;  %v566_v61 = vmax.f32 %v480_v55, 0.0 }
  0x95   :  { %v519_v62 = vmax.f32 %v363_v58, 0.0  ;;  %v535_v63 = vmax.f32 %v403_v59, 0.0 }
  0x96   :  { %615 = vst.msk [vmem:[%s1330_s3 + $0x108] sm:$0xff] %vm581_vm1, %v550_v60 }
  0x97   :  { %631 = vst.msk [vmem:[%s1330_s3 + $0x188] sm:$0xff] %vm581_vm1, %v566_v61 }
  0x98   :  { %584 = vst.msk [vmem:[%s1330_s3 + $0x10] sm:$0xff] %vm581_vm1, %v519_v62 }
  0x99   :  { %600 = vst.msk [vmem:[%s1330_s3 + $0x90] sm:$0xff] %vm581_vm1, %v535_v63  ;;  %v442_v0 = vpop.f32.mrf.mxu2  ;;  %v482_v1 = vpop.f32.mrf.mxu3 }
  0x9a   :  { %v443_v2 = vadd.f32 %v1005_v33, %v442_v0  ;;  %v483_v3 = vadd.f32 %v1005_v33, %v482_v1  ;;  %v364_v4 = vpop.f32.mrf.mxu0  ;;  %v404_v5 = vpop.f32.mrf.mxu1 }
  0x9b   :  { %v365_v6 = vadd.f32 %v1005_v33, %v364_v4  ;;  %v405_v7 = vadd.f32 %v1005_v33, %v404_v5 }
  0x9c   :  { %v551_v8 = vmax.f32 %v443_v2, 0.0  ;;  %v567_v9 = vmax.f32 %v483_v3, 0.0 }
  0x9d   :  { %v520_v10 = vmax.f32 %v365_v6, 0.0  ;;  %v536_v11 = vmax.f32 %v405_v7, 0.0 }
  0x9e   :  { %616 = vst.msk [vmem:[%s1330_s3 + $0x110] sm:$0xff] %vm581_vm1, %v551_v8 }
  0x9f   :  { %632 = vst.msk [vmem:[%s1330_s3 + $0x190] sm:$0xff] %vm581_vm1, %v567_v9 }
  0xa0   :  { %585 = vst.msk [vmem:[%s1330_s3 + $0x18] sm:$0xff] %vm581_vm1, %v520_v10 }
  0xa1   :  { %601 = vst.msk [vmem:[%s1330_s3 + $0x98] sm:$0xff] %vm581_vm1, %v536_v11  ;;  %v444_v12 = vpop.f32.mrf.mxu2  ;;  %v484_v13 = vpop.f32.mrf.mxu3 }
  0xa2   :  { %v445_v14 = vadd.f32 %v1005_v33, %v444_v12  ;;  %v485_v15 = vadd.f32 %v1005_v33, %v484_v13  ;;  %v367_v16 = vpop.f32.mrf.mxu0  ;;  %v407_v17 = vpop.f32.mrf.mxu1 }
  0xa3   :  { %v368_v18 = vadd.f32 %v1005_v33, %v367_v16  ;;  %v408_v19 = vadd.f32 %v1005_v33, %v407_v17 }
  0xa4   :  { %v552_v20 = vmax.f32 %v445_v14, 0.0  ;;  %v568_v21 = vmax.f32 %v485_v15, 0.0 }
  0xa5   :  { %v521_v22 = vmax.f32 %v368_v18, 0.0  ;;  %v537_v23 = vmax.f32 %v408_v19, 0.0 }
  0xa6   :  { %617 = vst.msk [vmem:[%s1330_s3 + $0x118] sm:$0xff] %vm581_vm1, %v552_v20 }
  0xa7   :  { %633 = vst.msk [vmem:[%s1330_s3 + $0x198] sm:$0xff] %vm581_vm1, %v568_v21 }
  0xa8   :  { %586 = vst.msk [vmem:[%s1330_s3 + $0x20] sm:$0xff] %vm581_vm1, %v521_v22 }
  0xa9   :  { %602 = vst.msk [vmem:[%s1330_s3 + $0xa0] sm:$0xff] %vm581_vm1, %v537_v23  ;;  %v447_v24 = vpop.f32.mrf.mxu2  ;;  %v487_v25 = vpop.f32.mrf.mxu3 }
  0xaa   :  { %v448_v26 = vadd.f32 %v1005_v33, %v447_v24  ;;  %v488_v27 = vadd.f32 %v1005_v33, %v487_v25  ;;  %v369_v28 = vpop.f32.mrf.mxu0  ;;  %v409_v29 = vpop.f32.mrf.mxu1 }
  0xab   :  { %v370_v30 = vadd.f32 %v1005_v33, %v369_v28  ;;  %v410_v31 = vadd.f32 %v1005_v33, %v409_v29 }
  0xac   :  { %v553_v32 = vmax.f32 %v448_v26, 0.0  ;;  %v569_v34 = vmax.f32 %v488_v27, 0.0 }
  0xad   :  { %v522_v35 = vmax.f32 %v370_v30, 0.0  ;;  %v538_v36 = vmax.f32 %v410_v31, 0.0 }
  0xae   :  { %618 = vst.msk [vmem:[%s1330_s3 + $0x120] sm:$0xff] %vm581_vm1, %v553_v32 }
  0xaf   :  { %634 = vst.msk [vmem:[%s1330_s3 + $0x1a0] sm:$0xff] %vm581_vm1, %v569_v34 }
  0xb0   :  { %587 = vst.msk [vmem:[%s1330_s3 + $0x28] sm:$0xff] %vm581_vm1, %v522_v35 }
  0xb1   :  { %603 = vst.msk [vmem:[%s1330_s3 + $0xa8] sm:$0xff] %vm581_vm1, %v538_v36  ;;  %v449_v37 = vpop.f32.mrf.mxu2  ;;  %v489_v38 = vpop.f32.mrf.mxu3 }
  0xb2   :  { %v450_v39 = vadd.f32 %v1005_v33, %v449_v37  ;;  %v490_v40 = vadd.f32 %v1005_v33, %v489_v38  ;;  %v372_v41 = vpop.f32.mrf.mxu0  ;;  %v412_v42 = vpop.f32.mrf.mxu1 }
  0xb3   :  { %v373_v43 = vadd.f32 %v1005_v33, %v372_v41  ;;  %v413_v44 = vadd.f32 %v1005_v33, %v412_v42 }
  0xb4   :  { %v554_v45 = vmax.f32 %v450_v39, 0.0  ;;  %v570_v46 = vmax.f32 %v490_v40, 0.0 }
  0xb5   :  { %v523_v47 = vmax.f32 %v373_v43, 0.0  ;;  %v539_v48 = vmax.f32 %v413_v44, 0.0 }
  0xb6   :  { %619 = vst.msk [vmem:[%s1330_s3 + $0x128] sm:$0xff] %vm581_vm1, %v554_v45 }
  0xb7   :  { %635 = vst.msk [vmem:[%s1330_s3 + $0x1a8] sm:$0xff] %vm581_vm1, %v570_v46 }
  0xb8   :  { %588 = vst.msk [vmem:[%s1330_s3 + $0x30] sm:$0xff] %vm581_vm1, %v523_v47 }
  0xb9   :  { %604 = vst.msk [vmem:[%s1330_s3 + $0xb0] sm:$0xff] %vm581_vm1, %v539_v48  ;;  %v452_v49 = vpop.f32.mrf.mxu2  ;;  %v492_v50 = vpop.f32.mrf.mxu3 }
  0xba   :  { %v453_v51 = vadd.f32 %v1005_v33, %v452_v49  ;;  %v493_v52 = vadd.f32 %v1005_v33, %v492_v50  ;;  %v374_v53 = vpop.f32.mrf.mxu0  ;;  %v414_v54 = vpop.f32.mrf.mxu1 }
  0xbb   :  { %v375_v55 = vadd.f32 %v1005_v33, %v374_v53  ;;  %v415_v56 = vadd.f32 %v1005_v33, %v414_v54 }
  0xbc   :  { %v555_v57 = vmax.f32 %v453_v51, 0.0  ;;  %v571_v58 = vmax.f32 %v493_v52, 0.0 }
  0xbd   :  { %v524_v59 = vmax.f32 %v375_v55, 0.0  ;;  %v540_v60 = vmax.f32 %v415_v56, 0.0 }
  0xbe   :  { %620 = vst.msk [vmem:[%s1330_s3 + $0x130] sm:$0xff] %vm581_vm1, %v555_v57 }
  0xbf   :  { %636 = vst.msk [vmem:[%s1330_s3 + $0x1b0] sm:$0xff] %vm581_vm1, %v571_v58 }
  0xc0   :  { %589 = vst.msk [vmem:[%s1330_s3 + $0x38] sm:$0xff] %vm581_vm1, %v524_v59 }
  0xc1   :  { %605 = vst.msk [vmem:[%s1330_s3 + $0xb8] sm:$0xff] %vm581_vm1, %v540_v60  ;;  %v454_v61 = vpop.f32.mrf.mxu2  ;;  %v494_v62 = vpop.f32.mrf.mxu3 }
  0xc2   :  { %v455_v63 = vadd.f32 %v1005_v33, %v454_v61  ;;  %v495_v0 = vadd.f32 %v1005_v33, %v494_v62  ;;  %v377_v1 = vpop.f32.mrf.mxu0  ;;  %v417_v2 = vpop.f32.mrf.mxu1 }
  0xc3   :  { %v378_v3 = vadd.f32 %v1005_v33, %v377_v1  ;;  %v418_v4 = vadd.f32 %v1005_v33, %v417_v2 }
  0xc4   :  { %v556_v5 = vmax.f32 %v455_v63, 0.0  ;;  %v572_v6 = vmax.f32 %v495_v0, 0.0 }
  0xc5   :  { %v525_v7 = vmax.f32 %v378_v3, 0.0  ;;  %v541_v8 = vmax.f32 %v418_v4, 0.0 }
  0xc6   :  { %621 = vst.msk [vmem:[%s1330_s3 + $0x138] sm:$0xff] %vm581_vm1, %v556_v5 }
  0xc7   :  { %637 = vst.msk [vmem:[%s1330_s3 + $0x1b8] sm:$0xff] %vm581_vm1, %v572_v6 }
  0xc8   :  { %590 = vst.msk [vmem:[%s1330_s3 + $0x40] sm:$0xff] %vm581_vm1, %v525_v7 }
  0xc9   :  { %606 = vst.msk [vmem:[%s1330_s3 + $0xc0] sm:$0xff] %vm581_vm1, %v541_v8  ;;  %v457_v9 = vpop.f32.mrf.mxu2  ;;  %v497_v10 = vpop.f32.mrf.mxu3 }
  0xca   :  { %v458_v11 = vadd.f32 %v1005_v33, %v457_v9  ;;  %v498_v12 = vadd.f32 %v1005_v33, %v497_v10  ;;  %v379_v13 = vpop.f32.mrf.mxu0  ;;  %v419_v14 = vpop.f32.mrf.mxu1 }
  0xcb   :  { %v380_v15 = vadd.f32 %v1005_v33, %v379_v13  ;;  %v420_v16 = vadd.f32 %v1005_v33, %v419_v14 }
  0xcc   :  { %v557_v17 = vmax.f32 %v458_v11, 0.0  ;;  %v573_v18 = vmax.f32 %v498_v12, 0.0 }
  0xcd   :  { %v526_v19 = vmax.f32 %v380_v15, 0.0  ;;  %v542_v20 = vmax.f32 %v420_v16, 0.0 }
  0xce   :  { %622 = vst.msk [vmem:[%s1330_s3 + $0x140] sm:$0xff] %vm581_vm1, %v557_v17 }
  0xcf   :  { %638 = vst.msk [vmem:[%s1330_s3 + $0x1c0] sm:$0xff] %vm581_vm1, %v573_v18 }
  0xd0   :  { %591 = vst.msk [vmem:[%s1330_s3 + $0x48] sm:$0xff] %vm581_vm1, %v526_v19 }
  0xd1   :  { %607 = vst.msk [vmem:[%s1330_s3 + $0xc8] sm:$0xff] %vm581_vm1, %v542_v20  ;;  %v459_v21 = vpop.f32.mrf.mxu2  ;;  %v499_v22 = vpop.f32.mrf.mxu3 }
  0xd2   :  { %v460_v23 = vadd.f32 %v1005_v33, %v459_v21  ;;  %v500_v24 = vadd.f32 %v1005_v33, %v499_v22  ;;  %v382_v25 = vpop.f32.mrf.mxu0  ;;  %v422_v26 = vpop.f32.mrf.mxu1 }
  0xd3   :  { %v383_v27 = vadd.f32 %v1005_v33, %v382_v25  ;;  %v423_v28 = vadd.f32 %v1005_v33, %v422_v26 }
  0xd4   :  { %v558_v29 = vmax.f32 %v460_v23, 0.0  ;;  %v574_v30 = vmax.f32 %v500_v24, 0.0 }
  0xd5   :  { %v527_v31 = vmax.f32 %v383_v27, 0.0  ;;  %v543_v32 = vmax.f32 %v423_v28, 0.0 }
  0xd6   :  { %623 = vst.msk [vmem:[%s1330_s3 + $0x148] sm:$0xff] %vm581_vm1, %v558_v29 }
  0xd7   :  { %639 = vst.msk [vmem:[%s1330_s3 + $0x1c8] sm:$0xff] %vm581_vm1, %v574_v30 }
  0xd8   :  { %592 = vst.msk [vmem:[%s1330_s3 + $0x50] sm:$0xff] %vm581_vm1, %v527_v31 }
  0xd9   :  { %608 = vst.msk [vmem:[%s1330_s3 + $0xd0] sm:$0xff] %vm581_vm1, %v543_v32  ;;  %v462_v34 = vpop.f32.mrf.mxu2  ;;  %v502_v35 = vpop.f32.mrf.mxu3 }
  0xda   :  { %v463_v36 = vadd.f32 %v1005_v33, %v462_v34  ;;  %v503_v37 = vadd.f32 %v1005_v33, %v502_v35  ;;  %v384_v38 = vpop.f32.mrf.mxu0  ;;  %v424_v39 = vpop.f32.mrf.mxu1 }
  0xdb   :  { %v385_v40 = vadd.f32 %v1005_v33, %v384_v38  ;;  %v425_v41 = vadd.f32 %v1005_v33, %v424_v39 }
  0xdc   :  { %v559_v42 = vmax.f32 %v463_v36, 0.0  ;;  %v575_v43 = vmax.f32 %v503_v37, 0.0 }
  0xdd   :  { %v528_v44 = vmax.f32 %v385_v40, 0.0  ;;  %v544_v45 = vmax.f32 %v425_v41, 0.0 }
  0xde   :  { %624 = vst.msk [vmem:[%s1330_s3 + $0x150] sm:$0xff] %vm581_vm1, %v559_v42 }
  0xdf   :  { %640 = vst.msk [vmem:[%s1330_s3 + $0x1d0] sm:$0xff] %vm581_vm1, %v575_v43 }
  0xe0   :  { %593 = vst.msk [vmem:[%s1330_s3 + $0x58] sm:$0xff] %vm581_vm1, %v528_v44 }
  0xe1   :  { %609 = vst.msk [vmem:[%s1330_s3 + $0xd8] sm:$0xff] %vm581_vm1, %v544_v45  ;;  %v464_v46 = vpop.f32.mrf.mxu2  ;;  %v504_v47 = vpop.f32.mrf.mxu3 }
  0xe2   :  { %v465_v48 = vadd.f32 %v1005_v33, %v464_v46  ;;  %v505_v49 = vadd.f32 %v1005_v33, %v504_v47  ;;  %v387_v50 = vpop.f32.mrf.mxu0  ;;  %v427_v51 = vpop.f32.mrf.mxu1 }
  0xe3   :  { %v388_v52 = vadd.f32 %v1005_v33, %v387_v50  ;;  %v428_v53 = vadd.f32 %v1005_v33, %v427_v51 }
  0xe4   :  { %v560_v54 = vmax.f32 %v465_v48, 0.0  ;;  %v576_v55 = vmax.f32 %v505_v49, 0.0 }
  0xe5   :  { %v529_v56 = vmax.f32 %v388_v52, 0.0  ;;  %v545_v57 = vmax.f32 %v428_v53, 0.0 }
  0xe6   :  { %625 = vst.msk [vmem:[%s1330_s3 + $0x158] sm:$0xff] %vm581_vm1, %v560_v54 }
  0xe7   :  { %641 = vst.msk [vmem:[%s1330_s3 + $0x1d8] sm:$0xff] %vm581_vm1, %v576_v55 }
  0xe8   :  { %594 = vst.msk [vmem:[%s1330_s3 + $0x60] sm:$0xff] %vm581_vm1, %v529_v56 }
  0xe9   :  { %610 = vst.msk [vmem:[%s1330_s3 + $0xe0] sm:$0xff] %vm581_vm1, %v545_v57  ;;  %v467_v58 = vpop.f32.mrf.mxu2  ;;  %v507_v59 = vpop.f32.mrf.mxu3 }
  0xea   :  { %v468_v60 = vadd.f32 %v1005_v33, %v467_v58  ;;  %v508_v61 = vadd.f32 %v1005_v33, %v507_v59  ;;  %v389_v62 = vpop.f32.mrf.mxu0  ;;  %v429_v63 = vpop.f32.mrf.mxu1 }
  0xeb   :  { %v390_v0 = vadd.f32 %v1005_v33, %v389_v62  ;;  %v430_v1 = vadd.f32 %v1005_v33, %v429_v63 }
  0xec   :  { %v561_v2 = vmax.f32 %v468_v60, 0.0  ;;  %v577_v3 = vmax.f32 %v508_v61, 0.0 }
  0xed   :  { %v530_v4 = vmax.f32 %v390_v0, 0.0  ;;  %v546_v5 = vmax.f32 %v430_v1, 0.0 }
  0xee   :  { %626 = vst.msk [vmem:[%s1330_s3 + $0x160] sm:$0xff] %vm581_vm1, %v561_v2 }
  0xef   :  { %642 = vst.msk [vmem:[%s1330_s3 + $0x1e0] sm:$0xff] %vm581_vm1, %v577_v3 }
  0xf0   :  { %595 = vst.msk [vmem:[%s1330_s3 + $0x68] sm:$0xff] %vm581_vm1, %v530_v4 }
  0xf1   :  { %611 = vst.msk [vmem:[%s1330_s3 + $0xe8] sm:$0xff] %vm581_vm1, %v546_v5  ;;  %v469_v6 = vpop.f32.mrf.mxu2  ;;  %v509_v7 = vpop.f32.mrf.mxu3 }
  0xf2   :  { %v470_v8 = vadd.f32 %v1005_v33, %v469_v6  ;;  %v510_v9 = vadd.f32 %v1005_v33, %v509_v7  ;;  %v392_v10 = vpop.f32.mrf.mxu0  ;;  %v432_v11 = vpop.f32.mrf.mxu1 }
  0xf3   :  { %v393_v12 = vadd.f32 %v1005_v33, %v392_v10  ;;  %v433_v13 = vadd.f32 %v1005_v33, %v432_v11 }
  0xf4   :  { %v562_v14 = vmax.f32 %v470_v8, 0.0  ;;  %v578_v15 = vmax.f32 %v510_v9, 0.0 }
  0xf5   :  { %v531_v16 = vmax.f32 %v393_v12, 0.0  ;;  %v547_v17 = vmax.f32 %v433_v13, 0.0 }
  0xf6   :  { %627 = vst.msk [vmem:[%s1330_s3 + $0x168] sm:$0xff] %vm581_vm1, %v562_v14 }
  0xf7   :  { %643 = vst.msk [vmem:[%s1330_s3 + $0x1e8] sm:$0xff] %vm581_vm1, %v578_v15 }
  0xf8   :  { %596 = vst.msk [vmem:[%s1330_s3 + $0x70] sm:$0xff] %vm581_vm1, %v531_v16 }
  0xf9   :  { %612 = vst.msk [vmem:[%s1330_s3 + $0xf0] sm:$0xff] %vm581_vm1, %v547_v17  ;;  %v472_v18 = vpop.f32.mrf.mxu2  ;;  %v512_v19 = vpop.f32.mrf.mxu3 }
  0xfa   :  { %v473_v20 = vadd.f32 %v1005_v33, %v472_v18  ;;  %v513_v21 = vadd.f32 %v1005_v33, %v512_v19  ;;  %v394_v22 = vpop.f32.mrf.mxu0  ;;  %v434_v23 = vpop.f32.mrf.mxu1 }
  0xfb   :  { %v395_v24 = vadd.f32 %v1005_v33, %v394_v22  ;;  %v435_v25 = vadd.f32 %v1005_v33, %v434_v23 }
  0xfc   :  { %v563_v26 = vmax.f32 %v473_v20, 0.0  ;;  %v579_v27 = vmax.f32 %v513_v21, 0.0 }
  0xfd   :  { %v532_v28 = vmax.f32 %v395_v24, 0.0  ;;  %v548_v29 = vmax.f32 %v435_v25, 0.0 }
  0xfe   :  { %628 = vst.msk [vmem:[%s1330_s3 + $0x170] sm:$0xff] %vm581_vm1, %v563_v26 }
  0xff   :  { %644 = vst.msk [vmem:[%s1330_s3 + $0x1f0] sm:$0xff] %vm581_vm1, %v579_v27 }
 0x100   :  { %597 = vst.msk [vmem:[%s1330_s3 + $0x78] sm:$0xff] %vm581_vm1, %v532_v28 }
 0x101   :  { %613 = vst.msk [vmem:[%s1330_s3 + $0xf8] sm:$0xff] %vm581_vm1, %v548_v29  ;;  %v474_v30 = vpop.f32.mrf.mxu2  ;;  %v514_v31 = vpop.f32.mrf.mxu3 }
 0x102   :  { %v475_v32 = vadd.f32 %v1005_v33, %v474_v30  ;;  %v515_v34 = vadd.f32 %v1005_v33, %v514_v31 }
 0x104   :  { %v564_v35 = vmax.f32 %v475_v32, 0.0  ;;  %v580_v36 = vmax.f32 %v515_v34, 0.0 }
 0x106   :  { %629 = vst.msk [vmem:[%s1330_s3 + $0x178] sm:$0xff] %vm581_vm1, %v564_v35 }
 0x107   :  { %645 = vst.msk [vmem:[%s1330_s3 + $0x1f8] sm:$0xff] %vm581_vm1, %v580_v36 }

// kernel: slow_only_forward.21
= control target key start
LH: loop header
LB: loop body
LE: loop exit
PB: predicated region body
PF: predicated region fallthrough
CT: control target
= control target key end

     0   :  { %vm136_vm0 = vcmask 1043456   ;;  %vm111_vm1 = vcmask 588800   ;;  %vm205_vm2 = vcmask 64512   ;;  %s444_s1 = inlined_call_operand.vmem [shape: bf16[72,8], index: 1, kind: input, shape index: {}]   ;;  %s445_s2 = inlined_call_operand.vmem [shape: f32[1,8], index: 2, kind: input, shape index: {}]   ;;  %s446_s0 = inlined_call_operand.vmem [shape: bf16[128,72], index: 0, kind: input, shape index: {}]   ;;  %s447_s3 = inlined_call_operand.vmem [shape: f32[128,8], index: 3, kind: output, shape index: {}]  }
   0x1   :  { %v39_v0 = vld [vmem:[%s444_s1 + $0x20] sm:$0xf]  ;;  %v293_v4 = vld [vmem:[%s444_s1 + $0x18] sm:$0xff]  ;;  %v292_v5 = vld [vmem:[%s444_s1 + $0x10] sm:$0xff] }
   0x2   :  { %v101_v1 = vunpack.c.l.b16 %v39_v0  ;;  %v291_v6 = vld [vmem:[%s444_s1 + $0x8] sm:$0xff]  ;;  %v290_v7 = vld [vmem:[%s444_s1] sm:$0xff]  ;;  %v284_v9 = vld [vmem:[%s446_s0 + $0x10] sm:$0xff] }
   0x3   :  { %v282_v8 = vld [vmem:[%s446_s0] sm:$0xff]  ;;  %v288_v11 = vld [vmem:[%s446_s0 + $0x30] sm:$0xff]  ;;  %v283_v12 = vld [vmem:[%s446_s0 + $0x8] sm:$0xff] }
   0x4   :  { %v106_v2 = vpack.c.b16 %v101_v1, %v101_v1  ;;  %v286_v10 = vld [vmem:[%s446_s0 + $0x20] sm:$0xff]  ;;  %v285_v13 = vld [vmem:[%s446_s0 + $0x18] sm:$0xff]  ;;  %v287_v14 = vld [vmem:[%s446_s0 + $0x28] sm:$0xff] }
   0x5   :  { %v289_v15 = vld [vmem:[%s446_s0 + $0x38] sm:$0xff]  ;;  %v309_v16 = vld [vmem:[%s445_s2] ss:$0 sm:$0xff] }
   0x6   :  { %v138_v3 = vsel %vm136_vm0, %v106_v2, 0 }
   0x7   :  { %143 = vmatpush.bf16.msra.mxu0 %v138_v3  ;;  %294 = vmatpush.bf16.msra.mxu1 %v138_v3 }
   0x8   :  { %295 = vmatpush.bf16.msra.mxu2 %v138_v3  ;;  %296 = vmatpush.bf16.msra.mxu3 %v138_v3 }
   0xb   :  { %144 = vmatpush.bf16.msra.mxu0 %v293_v4  ;;  %297 = vmatpush.bf16.msra.mxu1 %v293_v4 }
   0xc   :  { %298 = vmatpush.bf16.msra.mxu2 %v293_v4  ;;  %299 = vmatpush.bf16.msra.mxu3 %v293_v4 }
   0xf   :  { %145 = vmatpush.bf16.msra.mxu0 %v292_v5  ;;  %300 = vmatpush.bf16.msra.mxu1 %v292_v5 }
  0x10   :  { %301 = vmatpush.bf16.msra.mxu2 %v292_v5  ;;  %302 = vmatpush.bf16.msra.mxu3 %v292_v5 }
  0x13   :  { %146 = vmatpush.bf16.msra.mxu0 %v291_v6  ;;  %303 = vmatpush.bf16.msra.mxu1 %v291_v6 }
  0x14   :  { %304 = vmatpush.bf16.msra.mxu2 %v291_v6  ;;  %305 = vmatpush.bf16.msra.mxu3 %v291_v6 }
  0x17   :  { %147 = vmatpush.bf16.msra.mxu0 %v290_v7  ;;  %306 = vmatpush.bf16.msra.mxu1 %v290_v7 }
  0x18   :  { %307 = vmatpush.bf16.msra.mxu2 %v290_v7  ;;  %308 = vmatpush.bf16.msra.mxu3 %v290_v7 }
  0x1a   :  { %274 = vmatmul.msk.bf16.vlgmr.msra.gmra.mxu0 %vm111_vm1, %v282_v8  ;;  %276 = vmatmul.msk.bf16.vlgmr.msra.gmra.mxu1 %vm111_vm1, %v284_v9 }
  0x1b   :  { %278 = vmatmul.msk.bf16.vlgmr.msra.gmra.mxu2 %vm111_vm1, %v286_v10  ;;  %280 = vmatmul.msk.bf16.vlgmr.msra.gmra.mxu3 %vm111_vm1, %v288_v11 }
  0x2a   :  { %275 = vmatmul.msk.bf16.gmra.mxu0 %vm111_vm1, %v283_v12  ;;  %277 = vmatmul.msk.bf16.gmra.mxu1 %vm111_vm1, %v285_v13 }
  0x2b   :  { %279 = vmatmul.msk.bf16.gmra.mxu2 %vm111_vm1, %v287_v14  ;;  %281 = vmatmul.msk.bf16.gmra.mxu3 %vm111_vm1, %v289_v15 }
  0x97   :  { %v149_v17 = vpop.f32.mrf.mxu0  ;;  %v159_v18 = vpop.f32.mrf.mxu1 }
  0x98   :  { %v150_v19 = vadd.f32 %v309_v16, %v149_v17  ;;  %v160_v20 = vadd.f32 %v309_v16, %v159_v18 }
  0x9a   :  { %v189_v21 = vmax.f32 %v150_v19, 0.0  ;;  %v193_v22 = vmax.f32 %v160_v20, 0.0 }
  0x9c   :  { %206 = vst.msk [vmem:[%s447_s3] sm:$0xff] %vm205_vm2, %v189_v21 }
  0x9d   :  { %210 = vst.msk [vmem:[%s447_s3 + $0x20] sm:$0xff] %vm205_vm2, %v193_v22 }
  0x9e   :  { %v169_v23 = vpop.f32.mrf.mxu2  ;;  %v179_v24 = vpop.f32.mrf.mxu3 }
  0x9f   :  { %v170_v25 = vadd.f32 %v309_v16, %v169_v23  ;;  %v180_v26 = vadd.f32 %v309_v16, %v179_v24  ;;  %v151_v27 = vpop.f32.mrf.mxu0  ;;  %v161_v28 = vpop.f32.mrf.mxu1 }
  0xa0   :  { %v152_v29 = vadd.f32 %v309_v16, %v151_v27  ;;  %v162_v30 = vadd.f32 %v309_v16, %v161_v28 }
  0xa1   :  { %v197_v31 = vmax.f32 %v170_v25, 0.0  ;;  %v201_v32 = vmax.f32 %v180_v26, 0.0 }
  0xa2   :  { %v190_v33 = vmax.f32 %v152_v29, 0.0  ;;  %v194_v34 = vmax.f32 %v162_v30, 0.0 }
  0xa3   :  { %214 = vst.msk [vmem:[%s447_s3 + $0x40] sm:$0xff] %vm205_vm2, %v197_v31 }
  0xa4   :  { %218 = vst.msk [vmem:[%s447_s3 + $0x60] sm:$0xff] %vm205_vm2, %v201_v32 }
  0xa5   :  { %207 = vst.msk [vmem:[%s447_s3 + $0x8] sm:$0xff] %vm205_vm2, %v190_v33 }
  0xa6   :  { %211 = vst.msk [vmem:[%s447_s3 + $0x28] sm:$0xff] %vm205_vm2, %v194_v34  ;;  %v171_v35 = vpop.f32.mrf.mxu2  ;;  %v181_v36 = vpop.f32.mrf.mxu3 }
  0xa7   :  { %v172_v37 = vadd.f32 %v309_v16, %v171_v35  ;;  %v182_v38 = vadd.f32 %v309_v16, %v181_v36  ;;  %v154_v39 = vpop.f32.mrf.mxu0  ;;  %v164_v40 = vpop.f32.mrf.mxu1 }
  0xa8   :  { %v155_v41 = vadd.f32 %v309_v16, %v154_v39  ;;  %v165_v42 = vadd.f32 %v309_v16, %v164_v40 }
  0xa9   :  { %v198_v43 = vmax.f32 %v172_v37, 0.0  ;;  %v202_v44 = vmax.f32 %v182_v38, 0.0 }
  0xaa   :  { %v191_v45 = vmax.f32 %v155_v41, 0.0  ;;  %v195_v46 = vmax.f32 %v165_v42, 0.0 }
  0xab   :  { %215 = vst.msk [vmem:[%s447_s3 + $0x48] sm:$0xff] %vm205_vm2, %v198_v43 }
  0xac   :  { %219 = vst.msk [vmem:[%s447_s3 + $0x68] sm:$0xff] %vm205_vm2, %v202_v44 }
  0xad   :  { %208 = vst.msk [vmem:[%s447_s3 + $0x10] sm:$0xff] %vm205_vm2, %v191_v45 }
  0xae   :  { %212 = vst.msk [vmem:[%s447_s3 + $0x30] sm:$0xff] %vm205_vm2, %v195_v46  ;;  %v174_v47 = vpop.f32.mrf.mxu2  ;;  %v184_v48 = vpop.f32.mrf.mxu3 }
  0xaf   :  { %v175_v49 = vadd.f32 %v309_v16, %v174_v47  ;;  %v185_v50 = vadd.f32 %v309_v16, %v184_v48  ;;  %v156_v51 = vpop.f32.mrf.mxu0  ;;  %v166_v52 = vpop.f32.mrf.mxu1 }
  0xb0   :  { %v157_v53 = vadd.f32 %v309_v16, %v156_v51  ;;  %v167_v54 = vadd.f32 %v309_v16, %v166_v52 }
  0xb1   :  { %v199_v55 = vmax.f32 %v175_v49, 0.0  ;;  %v203_v56 = vmax.f32 %v185_v50, 0.0 }
  0xb2   :  { %v192_v57 = vmax.f32 %v157_v53, 0.0  ;;  %v196_v58 = vmax.f32 %v167_v54, 0.0 }
  0xb3   :  { %216 = vst.msk [vmem:[%s447_s3 + $0x50] sm:$0xff] %vm205_vm2, %v199_v55 }
  0xb4   :  { %220 = vst.msk [vmem:[%s447_s3 + $0x70] sm:$0xff] %vm205_vm2, %v203_v56 }
  0xb5   :  { %209 = vst.msk [vmem:[%s447_s3 + $0x18] sm:$0xff] %vm205_vm2, %v192_v57 }
  0xb6   :  { %213 = vst.msk [vmem:[%s447_s3 + $0x38] sm:$0xff] %vm205_vm2, %v196_v58  ;;  %v176_v59 = vpop.f32.mrf.mxu2  ;;  %v186_v60 = vpop.f32.mrf.mxu3 }
  0xb7   :  { %v177_v61 = vadd.f32 %v309_v16, %v176_v59  ;;  %v187_v62 = vadd.f32 %v309_v16, %v186_v60 }
  0xb9   :  { %v200_v63 = vmax.f32 %v177_v61, 0.0  ;;  %v204_v0 = vmax.f32 %v187_v62, 0.0 }
  0xbb   :  { %217 = vst.msk [vmem:[%s447_s3 + $0x58] sm:$0xff] %vm205_vm2, %v200_v63 }
  0xbc   :  { %221 = vst.msk [vmem:[%s447_s3 + $0x78] sm:$0xff] %vm205_vm2, %v204_v0 }

// kernel: slow_only_forward.22
= control target key start
LH: loop header
LB: loop body
LE: loop exit
PB: predicated region body
PF: predicated region fallthrough
CT: control target
= control target key end

     0   :  { %vm241_vm0 = vcmask 1043456   ;;  %vm216_vm1 = vcmask 64512   ;;  %vm102_vm2 = vcmask 130048   ;;  %vm330_vm3 = vcmask 261120   ;;  %s640_s1 = inlined_call_operand.vmem [shape: bf16[8,32], index: 1, kind: input, shape index: {}]   ;;  %s641_s3 = inlined_call_operand.vmem [shape: bf16[16,32], index: 3, kind: input, shape index: {}]   ;;  %s642_s0 = inlined_call_operand.vmem [shape: bf16[128,8], index: 0, kind: input, shape index: {}]   ;;  %s643_s2 = inlined_call_operand.vmem [shape: bf16[128,16], index: 2, kind: input, shape index: {}]   ;;  %s644_s4 = inlined_call_operand.vmem [shape: f32[1,32], index: 4, kind: input, shape index: {}]   ;;  %s645_s5 = inlined_call_operand.vmem [shape: f32[128,32], index: 5, kind: output, shape index: {}]  }
   0x1   :  { %v37_v0 = vld [vmem:[%s640_s1] sm:$0xf]  ;;  %v436_v7 = vld [vmem:[%s642_s0 + $0x8] sm:$0xff]  ;;  %v437_v11 = vld [vmem:[%s642_s0 + $0x10] sm:$0xff] }
   0x2   :  { %v451_v1 = vld [vmem:[%s641_s3] sm:$0xff]  ;;  %v243_v2 = vsel %vm241_vm0, %v37_v0, 0  ;;  %v440_v8 = vld [vmem:[%s642_s0 + $0x28] sm:$0xff]  ;;  %v441_v12 = vld [vmem:[%s642_s0 + $0x30] sm:$0xff] }
   0x3   :  { %v435_v3 = vld [vmem:[%s642_s0] sm:$0xff]  ;;  %252 = vmatpush.bf16.msra.mxu1 %v243_v2  ;;  %453 = vmatpush.bf16.msra.mxu3 %v243_v2  ;;  %v444_v9 = vld [vmem:[%s643_s2 + $0x8] sm:$0xff]  ;;  %v445_v13 = vld [vmem:[%s643_s2 + $0x10] sm:$0xff] }
   0x4   :  { %v439_v4 = vld [vmem:[%s642_s0 + $0x20] sm:$0xff]  ;;  %134 = vmatpush.bf16.msra.mxu0 %v451_v1  ;;  %452 = vmatpush.bf16.msra.mxu2 %v451_v1  ;;  %v448_v10 = vld [vmem:[%s643_s2 + $0x28] sm:$0xff]  ;;  %v449_v14 = vld [vmem:[%s643_s2 + $0x30] sm:$0xff] }
   0x5   :  { %v443_v5 = vld [vmem:[%s643_s2] sm:$0xff]  ;;  %v438_v15 = vld [vmem:[%s642_s0 + $0x18] sm:$0xff] }
   0x6   :  { %v447_v6 = vld [vmem:[%s643_s2 + $0x20] sm:$0xff]  ;;  %427 = vmatmul.msk.bf16.vlgmr.msra.gmra.mxu1 %vm216_vm1, %v435_v3  ;;  %431 = vmatmul.msk.bf16.vlgmr.msra.gmra.mxu3 %vm216_vm1, %v439_v4  ;;  %v442_v16 = vld [vmem:[%s642_s0 + $0x38] sm:$0xff] }
   0x7   :  { %387 = vmatmul.msk.bf16.vlgmr.msra.gmra.mxu0 %vm102_vm2, %v443_v5  ;;  %391 = vmatmul.msk.bf16.vlgmr.msra.gmra.mxu2 %vm102_vm2, %v447_v6  ;;  %v446_v17 = vld [vmem:[%s643_s2 + $0x18] sm:$0xff]  ;;  %v558_v20 = vld [vmem:[%s644_s4] ss:$0 sm:$0xff] }
   0x8   :  { %v450_v18 = vld [vmem:[%s643_s2 + $0x38] sm:$0xff] }
  0x16   :  { %428 = vmatmul.msk.bf16.gmra.mxu1 %vm216_vm1, %v436_v7  ;;  %432 = vmatmul.msk.bf16.gmra.mxu3 %vm216_vm1, %v440_v8 }
  0x17   :  { %388 = vmatmul.msk.bf16.gmra.mxu0 %vm102_vm2, %v444_v9  ;;  %392 = vmatmul.msk.bf16.gmra.mxu2 %vm102_vm2, %v448_v10 }
  0x26   :  { %429 = vmatmul.msk.bf16.gmra.mxu1 %vm216_vm1, %v437_v11  ;;  %433 = vmatmul.msk.bf16.gmra.mxu3 %vm216_vm1, %v441_v12 }
  0x27   :  { %389 = vmatmul.msk.bf16.gmra.mxu0 %vm102_vm2, %v445_v13  ;;  %393 = vmatmul.msk.bf16.gmra.mxu2 %vm102_vm2, %v449_v14 }
  0x36   :  { %430 = vmatmul.msk.bf16.gmra.mxu1 %vm216_vm1, %v438_v15  ;;  %434 = vmatmul.msk.bf16.gmra.mxu3 %vm216_vm1, %v442_v16 }
  0x37   :  { %390 = vmatmul.msk.bf16.gmra.mxu0 %vm102_vm2, %v446_v17  ;;  %394 = vmatmul.msk.bf16.gmra.mxu2 %vm102_vm2, %v450_v18 }
  0x83   :  { %v254_v19 = vpop.f32.mrf.mxu1 }
  0x84   :  { %v136_v21 = vpop.f32.mrf.mxu0 }
  0x85   :  { %v255_v22 = vadd.f32 %v254_v19, %v136_v21 }
  0x87   :  { %v298_v23 = vadd.f32 %v558_v20, %v255_v22 }
  0x89   :  { %v314_v24 = vmax.f32 %v298_v23, 0.0  ;;  %v274_v25 = vpop.f32.mrf.mxu3 }
  0x8a   :  { %v156_v26 = vpop.f32.mrf.mxu2 }
  0x8b   :  { %331 = vst.msk [vmem:[%s645_s5] sm:$0xff] %vm330_vm3, %v314_v24  ;;  %v275_v27 = vadd.f32 %v274_v25, %v156_v26  ;;  %v256_v28 = vpop.f32.mrf.mxu1 }
  0x8c   :  { %v138_v29 = vpop.f32.mrf.mxu0 }
  0x8d   :  { %v306_v30 = vadd.f32 %v558_v20, %v275_v27  ;;  %v257_v31 = vadd.f32 %v256_v28, %v138_v29 }
  0x8f   :  { %v322_v32 = vmax.f32 %v306_v30, 0.0  ;;  %v299_v33 = vadd.f32 %v558_v20, %v257_v31 }
  0x91   :  { %339 = vst.msk [vmem:[%s645_s5 + $0x40] sm:$0xff] %vm330_vm3, %v322_v32  ;;  %v315_v34 = vmax.f32 %v299_v33, 0.0  ;;  %v276_v35 = vpop.f32.mrf.mxu3 }
  0x92   :  { %v158_v36 = vpop.f32.mrf.mxu2 }
  0x93   :  { %332 = vst.msk [vmem:[%s645_s5 + $0x8] sm:$0xff] %vm330_vm3, %v315_v34  ;;  %v277_v37 = vadd.f32 %v276_v35, %v158_v36  ;;  %v259_v38 = vpop.f32.mrf.mxu1 }
  0x94   :  { %v141_v39 = vpop.f32.mrf.mxu0 }
  0x95   :  { %v307_v40 = vadd.f32 %v558_v20, %v277_v37  ;;  %v260_v41 = vadd.f32 %v259_v38, %v141_v39 }
  0x97   :  { %v323_v42 = vmax.f32 %v307_v40, 0.0  ;;  %v300_v43 = vadd.f32 %v558_v20, %v260_v41 }
  0x99   :  { %340 = vst.msk [vmem:[%s645_s5 + $0x48] sm:$0xff] %vm330_vm3, %v323_v42  ;;  %v316_v44 = vmax.f32 %v300_v43, 0.0  ;;  %v279_v45 = vpop.f32.mrf.mxu3 }
  0x9a   :  { %v161_v46 = vpop.f32.mrf.mxu2 }
  0x9b   :  { %333 = vst.msk [vmem:[%s645_s5 + $0x10] sm:$0xff] %vm330_vm3, %v316_v44  ;;  %v280_v47 = vadd.f32 %v279_v45, %v161_v46  ;;  %v261_v48 = vpop.f32.mrf.mxu1 }
  0x9c   :  { %v143_v49 = vpop.f32.mrf.mxu0 }
  0x9d   :  { %v308_v50 = vadd.f32 %v558_v20, %v280_v47  ;;  %v262_v51 = vadd.f32 %v261_v48, %v143_v49 }
  0x9f   :  { %v324_v52 = vmax.f32 %v308_v50, 0.0  ;;  %v301_v53 = vadd.f32 %v558_v20, %v262_v51 }
  0xa1   :  { %341 = vst.msk [vmem:[%s645_s5 + $0x50] sm:$0xff] %vm330_vm3, %v324_v52  ;;  %v317_v54 = vmax.f32 %v301_v53, 0.0  ;;  %v281_v55 = vpop.f32.mrf.mxu3 }
  0xa2   :  { %v163_v56 = vpop.f32.mrf.mxu2 }
  0xa3   :  { %334 = vst.msk [vmem:[%s645_s5 + $0x18] sm:$0xff] %vm330_vm3, %v317_v54  ;;  %v282_v57 = vadd.f32 %v281_v55, %v163_v56  ;;  %v264_v58 = vpop.f32.mrf.mxu1 }
  0xa4   :  { %v146_v59 = vpop.f32.mrf.mxu0 }
  0xa5   :  { %v309_v60 = vadd.f32 %v558_v20, %v282_v57  ;;  %v265_v61 = vadd.f32 %v264_v58, %v146_v59 }
  0xa7   :  { %v325_v62 = vmax.f32 %v309_v60, 0.0  ;;  %v302_v63 = vadd.f32 %v558_v20, %v265_v61 }
  0xa9   :  { %342 = vst.msk [vmem:[%s645_s5 + $0x58] sm:$0xff] %vm330_vm3, %v325_v62  ;;  %v318_v0 = vmax.f32 %v302_v63, 0.0  ;;  %v284_v1 = vpop.f32.mrf.mxu3 }
  0xaa   :  { %v166_v2 = vpop.f32.mrf.mxu2 }
  0xab   :  { %335 = vst.msk [vmem:[%s645_s5 + $0x20] sm:$0xff] %vm330_vm3, %v318_v0  ;;  %v285_v3 = vadd.f32 %v284_v1, %v166_v2  ;;  %v266_v4 = vpop.f32.mrf.mxu1 }
  0xac   :  { %v148_v5 = vpop.f32.mrf.mxu0 }
  0xad   :  { %v310_v6 = vadd.f32 %v558_v20, %v285_v3  ;;  %v267_v7 = vadd.f32 %v266_v4, %v148_v5 }
  0xaf   :  { %v326_v8 = vmax.f32 %v310_v6, 0.0  ;;  %v303_v9 = vadd.f32 %v558_v20, %v267_v7 }
  0xb1   :  { %343 = vst.msk [vmem:[%s645_s5 + $0x60] sm:$0xff] %vm330_vm3, %v326_v8  ;;  %v319_v10 = vmax.f32 %v303_v9, 0.0  ;;  %v286_v11 = vpop.f32.mrf.mxu3 }
  0xb2   :  { %v168_v12 = vpop.f32.mrf.mxu2 }
  0xb3   :  { %336 = vst.msk [vmem:[%s645_s5 + $0x28] sm:$0xff] %vm330_vm3, %v319_v10  ;;  %v287_v13 = vadd.f32 %v286_v11, %v168_v12  ;;  %v269_v14 = vpop.f32.mrf.mxu1 }
  0xb4   :  { %v151_v15 = vpop.f32.mrf.mxu0 }
  0xb5   :  { %v311_v16 = vadd.f32 %v558_v20, %v287_v13  ;;  %v270_v17 = vadd.f32 %v269_v14, %v151_v15 }
  0xb7   :  { %v327_v18 = vmax.f32 %v311_v16, 0.0  ;;  %v304_v19 = vadd.f32 %v558_v20, %v270_v17 }
  0xb9   :  { %344 = vst.msk [vmem:[%s645_s5 + $0x68] sm:$0xff] %vm330_vm3, %v327_v18  ;;  %v320_v21 = vmax.f32 %v304_v19, 0.0  ;;  %v289_v22 = vpop.f32.mrf.mxu3 }
  0xba   :  { %v171_v23 = vpop.f32.mrf.mxu2 }
  0xbb   :  { %337 = vst.msk [vmem:[%s645_s5 + $0x30] sm:$0xff] %vm330_vm3, %v320_v21  ;;  %v290_v24 = vadd.f32 %v289_v22, %v171_v23  ;;  %v271_v25 = vpop.f32.mrf.mxu1 }
  0xbc   :  { %v153_v26 = vpop.f32.mrf.mxu0 }
  0xbd   :  { %v312_v27 = vadd.f32 %v558_v20, %v290_v24  ;;  %v272_v28 = vadd.f32 %v271_v25, %v153_v26 }
  0xbf   :  { %v328_v29 = vmax.f32 %v312_v27, 0.0  ;;  %v305_v30 = vadd.f32 %v558_v20, %v272_v28 }
  0xc1   :  { %345 = vst.msk [vmem:[%s645_s5 + $0x70] sm:$0xff] %vm330_vm3, %v328_v29  ;;  %v321_v31 = vmax.f32 %v305_v30, 0.0  ;;  %v291_v32 = vpop.f32.mrf.mxu3 }
  0xc2   :  { %v173_v33 = vpop.f32.mrf.mxu2 }
  0xc3   :  { %338 = vst.msk [vmem:[%s645_s5 + $0x38] sm:$0xff] %vm330_vm3, %v321_v31  ;;  %v292_v34 = vadd.f32 %v291_v32, %v173_v33 }
  0xc5   :  { %v313_v35 = vadd.f32 %v558_v20, %v292_v34 }
  0xc7   :  { %v329_v36 = vmax.f32 %v313_v35, 0.0 }
  0xc9   :  { %346 = vst.msk [vmem:[%s645_s5 + $0x78] sm:$0xff] %vm330_vm3, %v329_v36 }

// kernel: slow_only_forward.23
= control target key start
LH: loop header
LB: loop body
LE: loop exit
PB: predicated region body
PF: predicated region fallthrough
CT: control target
= control target key end

     0   :  { %vm123_vm0 = vcmask 785408   ;;  %vm213_vm1 = vcmask 130048   ;;  %s468_s1 = inlined_call_operand.vmem [shape: bf16[96,16], index: 1, kind: input, shape index: {}]   ;;  %s469_s2 = inlined_call_operand.vmem [shape: f32[1,16], index: 2, kind: input, shape index: {}]   ;;  %s470_s0 = inlined_call_operand.vmem [shape: bf16[128,96], index: 0, kind: input, shape index: {}]   ;;  %s471_s3 = inlined_call_operand.vmem [shape: f32[128,16], index: 3, kind: output, shape index: {}]  }
   0x1   :  { %v311_v0 = vld [vmem:[%s468_s1 + $0x28] sm:$0xff]  ;;  %v310_v1 = vld [vmem:[%s468_s1 + $0x20] sm:$0xff]  ;;  %v309_v2 = vld [vmem:[%s468_s1 + $0x18] sm:$0xff] }
   0x2   :  { %150 = vmatpush.bf16.msra.mxu0 %v311_v0  ;;  %312 = vmatpush.bf16.msra.mxu1 %v311_v0  ;;  %v308_v3 = vld [vmem:[%s468_s1 + $0x10] sm:$0xff]  ;;  %v307_v4 = vld [vmem:[%s468_s1 + $0x8] sm:$0xff]  ;;  %v306_v5 = vld [vmem:[%s468_s1] sm:$0xff] }
   0x3   :  { %313 = vmatpush.bf16.msra.mxu2 %v311_v0  ;;  %314 = vmatpush.bf16.msra.mxu3 %v311_v0  ;;  %v298_v6 = vld [vmem:[%s470_s0] sm:$0xff]  ;;  %v300_v7 = vld [vmem:[%s470_s0 + $0x10] sm:$0xff]  ;;  %v299_v10 = vld [vmem:[%s470_s0 + $0x8] sm:$0xff] }
   0x4   :  { %v302_v8 = vld [vmem:[%s470_s0 + $0x20] sm:$0xff]  ;;  %v304_v9 = vld [vmem:[%s470_s0 + $0x30] sm:$0xff]  ;;  %v301_v11 = vld [vmem:[%s470_s0 + $0x18] sm:$0xff] }
   0x5   :  { %v303_v12 = vld [vmem:[%s470_s0 + $0x28] sm:$0xff]  ;;  %v305_v13 = vld [vmem:[%s470_s0 + $0x38] sm:$0xff]  ;;  %v330_v14 = vld [vmem:[%s469_s2] ss:$0 sm:$0xff] }
   0x6   :  { %151 = vmatpush.bf16.msra.mxu0 %v310_v1  ;;  %315 = vmatpush.bf16.msra.mxu1 %v310_v1 }
   0x7   :  { %316 = vmatpush.bf16.msra.mxu2 %v310_v1  ;;  %317 = vmatpush.bf16.msra.mxu3 %v310_v1 }
   0xa   :  { %152 = vmatpush.bf16.msra.mxu0 %v309_v2  ;;  %318 = vmatpush.bf16.msra.mxu1 %v309_v2 }
   0xb   :  { %319 = vmatpush.bf16.msra.mxu2 %v309_v2  ;;  %320 = vmatpush.bf16.msra.mxu3 %v309_v2 }
   0xe   :  { %153 = vmatpush.bf16.msra.mxu0 %v308_v3  ;;  %321 = vmatpush.bf16.msra.mxu1 %v308_v3 }
   0xf   :  { %322 = vmatpush.bf16.msra.mxu2 %v308_v3  ;;  %323 = vmatpush.bf16.msra.mxu3 %v308_v3 }
  0x12   :  { %154 = vmatpush.bf16.msra.mxu0 %v307_v4  ;;  %324 = vmatpush.bf16.msra.mxu1 %v307_v4 }
  0x13   :  { %325 = vmatpush.bf16.msra.mxu2 %v307_v4  ;;  %326 = vmatpush.bf16.msra.mxu3 %v307_v4 }
  0x16   :  { %155 = vmatpush.bf16.msra.mxu0 %v306_v5  ;;  %327 = vmatpush.bf16.msra.mxu1 %v306_v5 }
  0x17   :  { %328 = vmatpush.bf16.msra.mxu2 %v306_v5  ;;  %329 = vmatpush.bf16.msra.mxu3 %v306_v5 }
  0x19   :  { %290 = vmatmul.msk.bf16.vlgmr.msra.gmra.mxu0 %vm123_vm0, %v298_v6  ;;  %292 = vmatmul.msk.bf16.vlgmr.msra.gmra.mxu1 %vm123_vm0, %v300_v7 }
  0x1a   :  { %294 = vmatmul.msk.bf16.vlgmr.msra.gmra.mxu2 %vm123_vm0, %v302_v8  ;;  %296 = vmatmul.msk.bf16.vlgmr.msra.gmra.mxu3 %vm123_vm0, %v304_v9 }
  0x29   :  { %291 = vmatmul.msk.bf16.gmra.mxu0 %vm123_vm0, %v299_v10  ;;  %293 = vmatmul.msk.bf16.gmra.mxu1 %vm123_vm0, %v301_v11 }
  0x2a   :  { %295 = vmatmul.msk.bf16.gmra.mxu2 %vm123_vm0, %v303_v12  ;;  %297 = vmatmul.msk.bf16.gmra.mxu3 %vm123_vm0, %v305_v13 }
  0x96   :  { %v157_v15 = vpop.f32.mrf.mxu0  ;;  %v167_v16 = vpop.f32.mrf.mxu1 }
  0x97   :  { %v158_v17 = vadd.f32 %v330_v14, %v157_v15  ;;  %v168_v18 = vadd.f32 %v330_v14, %v167_v16 }
  0x99   :  { %v197_v19 = vmax.f32 %v158_v17, 0.0  ;;  %v201_v20 = vmax.f32 %v168_v18, 0.0 }
  0x9b   :  { %214 = vst.msk [vmem:[%s471_s3] sm:$0xff] %vm213_vm1, %v197_v19 }
  0x9c   :  { %218 = vst.msk [vmem:[%s471_s3 + $0x20] sm:$0xff] %vm213_vm1, %v201_v20 }
  0x9d   :  { %v177_v21 = vpop.f32.mrf.mxu2  ;;  %v187_v22 = vpop.f32.mrf.mxu3 }
  0x9e   :  { %v178_v23 = vadd.f32 %v330_v14, %v177_v21  ;;  %v188_v24 = vadd.f32 %v330_v14, %v187_v22  ;;  %v159_v25 = vpop.f32.mrf.mxu0  ;;  %v169_v26 = vpop.f32.mrf.mxu1 }
  0x9f   :  { %v160_v27 = vadd.f32 %v330_v14, %v159_v25  ;;  %v170_v28 = vadd.f32 %v330_v14, %v169_v26 }
  0xa0   :  { %v205_v29 = vmax.f32 %v178_v23, 0.0  ;;  %v209_v30 = vmax.f32 %v188_v24, 0.0 }
  0xa1   :  { %v198_v31 = vmax.f32 %v160_v27, 0.0  ;;  %v202_v32 = vmax.f32 %v170_v28, 0.0 }
  0xa2   :  { %222 = vst.msk [vmem:[%s471_s3 + $0x40] sm:$0xff] %vm213_vm1, %v205_v29 }
  0xa3   :  { %226 = vst.msk [vmem:[%s471_s3 + $0x60] sm:$0xff] %vm213_vm1, %v209_v30 }
  0xa4   :  { %215 = vst.msk [vmem:[%s471_s3 + $0x8] sm:$0xff] %vm213_vm1, %v198_v31 }
  0xa5   :  { %219 = vst.msk [vmem:[%s471_s3 + $0x28] sm:$0xff] %vm213_vm1, %v202_v32  ;;  %v179_v33 = vpop.f32.mrf.mxu2  ;;  %v189_v34 = vpop.f32.mrf.mxu3 }
  0xa6   :  { %v180_v35 = vadd.f32 %v330_v14, %v179_v33  ;;  %v190_v36 = vadd.f32 %v330_v14, %v189_v34  ;;  %v162_v37 = vpop.f32.mrf.mxu0  ;;  %v172_v38 = vpop.f32.mrf.mxu1 }
  0xa7   :  { %v163_v39 = vadd.f32 %v330_v14, %v162_v37  ;;  %v173_v40 = vadd.f32 %v330_v14, %v172_v38 }
  0xa8   :  { %v206_v41 = vmax.f32 %v180_v35, 0.0  ;;  %v210_v42 = vmax.f32 %v190_v36, 0.0 }
  0xa9   :  { %v199_v43 = vmax.f32 %v163_v39, 0.0  ;;  %v203_v44 = vmax.f32 %v173_v40, 0.0 }
  0xaa   :  { %223 = vst.msk [vmem:[%s471_s3 + $0x48] sm:$0xff] %vm213_vm1, %v206_v41 }
  0xab   :  { %227 = vst.msk [vmem:[%s471_s3 + $0x68] sm:$0xff] %vm213_vm1, %v210_v42 }
  0xac   :  { %216 = vst.msk [vmem:[%s471_s3 + $0x10] sm:$0xff] %vm213_vm1, %v199_v43 }
  0xad   :  { %220 = vst.msk [vmem:[%s471_s3 + $0x30] sm:$0xff] %vm213_vm1, %v203_v44  ;;  %v182_v45 = vpop.f32.mrf.mxu2  ;;  %v192_v46 = vpop.f32.mrf.mxu3 }
  0xae   :  { %v183_v47 = vadd.f32 %v330_v14, %v182_v45  ;;  %v193_v48 = vadd.f32 %v330_v14, %v192_v46  ;;  %v164_v49 = vpop.f32.mrf.mxu0  ;;  %v174_v50 = vpop.f32.mrf.mxu1 }
  0xaf   :  { %v165_v51 = vadd.f32 %v330_v14, %v164_v49  ;;  %v175_v52 = vadd.f32 %v330_v14, %v174_v50 }
  0xb0   :  { %v207_v53 = vmax.f32 %v183_v47, 0.0  ;;  %v211_v54 = vmax.f32 %v193_v48, 0.0 }
  0xb1   :  { %v200_v55 = vmax.f32 %v165_v51, 0.0  ;;  %v204_v56 = vmax.f32 %v175_v52, 0.0 }
  0xb2   :  { %224 = vst.msk [vmem:[%s471_s3 + $0x50] sm:$0xff] %vm213_vm1, %v207_v53 }
  0xb3   :  { %228 = vst.msk [vmem:[%s471_s3 + $0x70] sm:$0xff] %vm213_vm1, %v211_v54 }
  0xb4   :  { %217 = vst.msk [vmem:[%s471_s3 + $0x18] sm:$0xff] %vm213_vm1, %v200_v55 }
  0xb5   :  { %221 = vst.msk [vmem:[%s471_s3 + $0x38] sm:$0xff] %vm213_vm1, %v204_v56  ;;  %v184_v57 = vpop.f32.mrf.mxu2  ;;  %v194_v58 = vpop.f32.mrf.mxu3 }
  0xb6   :  { %v185_v59 = vadd.f32 %v330_v14, %v184_v57  ;;  %v195_v60 = vadd.f32 %v330_v14, %v194_v58 }
  0xb8   :  { %v208_v61 = vmax.f32 %v185_v59, 0.0  ;;  %v212_v62 = vmax.f32 %v195_v60, 0.0 }
  0xba   :  { %225 = vst.msk [vmem:[%s471_s3 + $0x58] sm:$0xff] %vm213_vm1, %v208_v61 }
  0xbb   :  { %229 = vst.msk [vmem:[%s471_s3 + $0x78] sm:$0xff] %vm213_vm1, %v212_v62 }

// kernel: slow_only_forward.24
= control target key start
LH: loop header
LB: loop body
LE: loop exit
PB: predicated region body
PF: predicated region fallthrough
CT: control target
= control target key end

     0   :  { %vm113_vm0 = vcmask 130048   ;;  %s338_s1 = inlined_call_operand.vmem [shape: bf16[144,16], index: 1, kind: input, shape index: {}]   ;;  %s339_s0 = inlined_call_operand.vmem [shape: bf16[32,144], index: 0, kind: input, shape index: {}]   ;;  %s340_s2 = inlined_call_operand.vmem [shape: f32[1,16], index: 2, kind: input, shape index: {}]   ;;  %s341_s3 = inlined_call_operand.vmem [shape: f32[32,16], index: 3, kind: output, shape index: {}]  }
   0x1   :  { %v235_v0 = vld [vmem:[%s338_s1 + $0x38] sm:$0xff]  ;;  %v236_v1 = vld [vmem:[%s338_s1 + $0x40] sm:$0xff]  ;;  %v234_v3 = vld [vmem:[%s338_s1 + $0x30] sm:$0xff] }
   0x2   :  { %v224_v2 = vld [vmem:[%s339_s0 + $0x4] sm:$0xf]  ;;  %120 = vmatpush.bf16.msra.mxu0 %v235_v0  ;;  %237 = vmatpush.bf16.msra.mxu2 %v235_v0  ;;  %v174_v4 = vld [vmem:[%s339_s0 + $0x8] sm:$0xf0]  ;;  %v231_v8 = vld [vmem:[%s338_s1 + $0x18] sm:$0xff] }
   0x3   :  { %146 = vmatpush.bf16.msra.mxu1 %v236_v1  ;;  %v177_v5 = vor.u32 %v224_v2, %v174_v4  ;;  %v233_v6 = vld [vmem:[%s338_s1 + $0x28] sm:$0xff]  ;;  %v232_v7 = vld [vmem:[%s338_s1 + $0x20] sm:$0xff]  ;;  %v226_v9 = vld [vmem:[%s339_s0 + $0x14] sm:$0xf] }
   0x4   :  { %v182_v10 = vld [vmem:[%s339_s0 + $0x18] sm:$0xf0]  ;;  %v230_v11 = vld [vmem:[%s338_s1 + $0x10] sm:$0xff]  ;;  %v229_v13 = vld [vmem:[%s338_s1 + $0x8] sm:$0xff] }
   0x5   :  { %v185_v12 = vor.u32 %v226_v9, %v182_v10  ;;  %v228_v14 = vld [vmem:[%s338_s1] sm:$0xff]  ;;  %v225_v16 = vld [vmem:[%s339_s0 + $0x4] sm:$0xf0]  ;;  %v180_v17 = vld [vmem:[%s339_s0 + $0x10] sm:$0xf] }
   0x6   :  { %121 = vmatpush.bf16.msra.mxu0 %v234_v3  ;;  %238 = vmatpush.bf16.msra.mxu2 %v234_v3  ;;  %v172_v15 = vld [vmem:[%s339_s0] sm:$0xf]  ;;  %v227_v18 = vld [vmem:[%s339_s0 + $0x14] sm:$0xf0] }
   0x7   :  { %222 = vmatmul.msk.bf16.vlgmr.msra.gmra.mxu1 %vm113_vm0, %v177_v5  ;;  %v173_v19 = vor.u32 %v225_v16, %v172_v15  ;;  %v181_v20 = vor.u32 %v227_v18, %v180_v17  ;;  %v245_v23 = vld [vmem:[%s340_s2] ss:$0 sm:$0xff] }
   0xa   :  { %122 = vmatpush.bf16.msra.mxu0 %v233_v6  ;;  %239 = vmatpush.bf16.msra.mxu2 %v233_v6 }
   0xe   :  { %123 = vmatpush.bf16.msra.mxu0 %v232_v7  ;;  %240 = vmatpush.bf16.msra.mxu2 %v232_v7 }
  0x12   :  { %124 = vmatpush.bf16.msra.mxu0 %v231_v8  ;;  %241 = vmatpush.bf16.msra.mxu2 %v231_v8 }
  0x16   :  { %125 = vmatpush.bf16.msra.mxu0 %v230_v11  ;;  %242 = vmatpush.bf16.msra.mxu2 %v230_v11 }
  0x17   :  { %223 = vmatmul.msk.bf16.gmra.mxu1 %vm113_vm0, %v185_v12 }
  0x1a   :  { %126 = vmatpush.bf16.msra.mxu0 %v229_v13  ;;  %243 = vmatpush.bf16.msra.mxu2 %v229_v13 }
  0x1e   :  { %127 = vmatpush.bf16.msra.mxu0 %v228_v14  ;;  %244 = vmatpush.bf16.msra.mxu2 %v228_v14 }
  0x21   :  { %128 = vmatmul.bf16.vlgmr.msra.gmra.mxu0 %v173_v19  ;;  %133 = vmatmul.bf16.vlgmr.msra.gmra.mxu2 %v181_v20 }
  0x84   :  { %v148_v21 = vpop.f32.mrf.mxu1 }
  0x8c   :  { %v150_v22 = vpop.f32.mrf.mxu1 }
  0x94   :  { %v153_v28 = vpop.f32.mrf.mxu1 }
  0x9c   :  { %v155_v39 = vpop.f32.mrf.mxu1 }
  0x9e   :  { %v129_v24 = vpop.f32.mrf.mxu0 }
  0x9f   :  { %v130_v25 = vadd.f32 %v245_v23, %v129_v24 }
  0xa1   :  { %v149_v26 = vadd.f32 %v148_v21, %v130_v25 }
  0xa3   :  { %v158_v27 = vmax.f32 %v149_v26, 0.0 }
  0xa4   :  { %v134_v29 = vpop.f32.mrf.mxu2 }
  0xa5   :  { %162 = vst.msk [vmem:[%s341_s3] sm:$0xff] %vm113_vm0, %v158_v27  ;;  %v135_v30 = vadd.f32 %v245_v23, %v134_v29 }
  0xa6   :  { %v131_v31 = vpop.f32.mrf.mxu0 }
  0xa7   :  { %v154_v32 = vadd.f32 %v153_v28, %v135_v30  ;;  %v132_v33 = vadd.f32 %v245_v23, %v131_v31 }
  0xa9   :  { %v160_v34 = vmax.f32 %v154_v32, 0.0  ;;  %v151_v35 = vadd.f32 %v150_v22, %v132_v33 }
  0xab   :  { %164 = vst.msk [vmem:[%s341_s3 + $0x10] sm:$0xff] %vm113_vm0, %v160_v34  ;;  %v159_v36 = vmax.f32 %v151_v35, 0.0 }
  0xac   :  { %v136_v37 = vpop.f32.mrf.mxu2 }
  0xad   :  { %163 = vst.msk [vmem:[%s341_s3 + $0x8] sm:$0xff] %vm113_vm0, %v159_v36  ;;  %v137_v38 = vadd.f32 %v245_v23, %v136_v37 }
  0xaf   :  { %v156_v40 = vadd.f32 %v155_v39, %v137_v38 }
  0xb1   :  { %v161_v41 = vmax.f32 %v156_v40, 0.0 }
  0xb3   :  { %165 = vst.msk [vmem:[%s341_s3 + $0x18] sm:$0xff] %vm113_vm0, %v161_v41 }

// kernel: slow_only_forward.25
= control target key start
LH: loop header
LB: loop body
LE: loop exit
PB: predicated region body
PF: predicated region fallthrough
CT: control target
= control target key end

     0   :  { %vm99_vm0 = vcmask 130048   ;;  %vm57_vm1 = vcmask 261120   ;;  %vm137_vm2 = vcmask 523264   ;;  %s259_s3 = inlined_call_operand.vmem [shape: bf16[32,64], index: 3, kind: input, shape index: {}]   ;;  %s260_s1 = inlined_call_operand.vmem [shape: bf16[16,64], index: 1, kind: input, shape index: {}]   ;;  %s261_s0 = inlined_call_operand.vmem [shape: bf16[32,16], index: 0, kind: input, shape index: {}]   ;;  %s262_s2 = inlined_call_operand.vmem [shape: bf16[32,32], index: 2, kind: input, shape index: {}]   ;;  %s263_s4 = inlined_call_operand.vmem [shape: f32[1,64], index: 4, kind: input, shape index: {}]   ;;  %s264_s5 = inlined_call_operand.vmem [shape: f32[32,64], index: 5, kind: output, shape index: {}]  }
   0x1   :  { %v184_v0 = vld [vmem:[%s259_s3 + $0x8] sm:$0xff]  ;;  %v180_v1 = vld [vmem:[%s260_s1] sm:$0xff] }
   0x2   :  { %70 = vmatpush.bf16.msra.mxu0 %v184_v0  ;;  %185 = vmatpush.bf16.msra.mxu2 %v184_v0  ;;  %v179_v2 = vld [vmem:[%s261_s0 + $0x8] sm:$0xff]  ;;  %v183_v3 = vld [vmem:[%s259_s3] sm:$0xff] }
   0x3   :  { %187 = vmatpush.bf16.msra.mxu3 %v180_v1  ;;  %113 = vmatpush.bf16.msra.mxu1 %v180_v1  ;;  %v178_v4 = vld [vmem:[%s261_s0] sm:$0xff]  ;;  %v182_v6 = vld [vmem:[%s262_s2 + $0x8] sm:$0xff] }
   0x4   :  { %v181_v5 = vld [vmem:[%s262_s2] sm:$0xff] }
   0x5   :  { %v188_v8 = vld [vmem:[%s263_s4] ss:$0 sm:$0xff] }
   0x6   :  { %177 = vmatmul.msk.bf16.vlgmr.msra.gmra.mxu3 %vm99_vm0, %v179_v2  ;;  %71 = vmatpush.bf16.msra.mxu0 %v183_v3 }
   0x7   :  { %186 = vmatpush.bf16.msra.mxu2 %v183_v3  ;;  %176 = vmatmul.msk.bf16.vlgmr.msra.gmra.mxu1 %vm99_vm0, %v178_v4 }
   0x9   :  { %162 = vmatmul.msk.bf16.vlgmr.msra.gmra.mxu0 %vm57_vm1, %v181_v5 }
   0xa   :  { %163 = vmatmul.msk.bf16.vlgmr.msra.gmra.mxu2 %vm57_vm1, %v182_v6 }
  0x84   :  { %v115_v7 = vpop.f32.mrf.mxu1 }
  0x86   :  { %v73_v9 = vpop.f32.mrf.mxu0 }
  0x87   :  { %v116_v10 = vadd.f32 %v115_v7, %v73_v9 }
  0x89   :  { %v129_v11 = vadd.f32 %v188_v8, %v116_v10  ;;  %v120_v13 = vpop.f32.mrf.mxu3 }
  0x8b   :  { %v133_v12 = vmax.f32 %v129_v11, 0.0 }
  0x8c   :  { %v117_v16 = vpop.f32.mrf.mxu1 }
  0x8d   :  { %138 = vst.msk [vmem:[%s264_s5] sm:$0xff] %vm137_vm2, %v133_v12  ;;  %v78_v14 = vpop.f32.mrf.mxu2 }
  0x8e   :  { %v121_v15 = vadd.f32 %v120_v13, %v78_v14  ;;  %v75_v17 = vpop.f32.mrf.mxu0 }
  0x8f   :  { %v118_v18 = vadd.f32 %v117_v16, %v75_v17 }
  0x90   :  { %v131_v19 = vadd.f32 %v188_v8, %v121_v15 }
  0x91   :  { %v130_v20 = vadd.f32 %v188_v8, %v118_v18  ;;  %v122_v23 = vpop.f32.mrf.mxu3 }
  0x92   :  { %v135_v21 = vmax.f32 %v131_v19, 0.0 }
  0x93   :  { %v134_v22 = vmax.f32 %v130_v20, 0.0 }
  0x94   :  { %140 = vst.msk [vmem:[%s264_s5 + $0x10] sm:$0xff] %vm137_vm2, %v135_v21 }
  0x95   :  { %139 = vst.msk [vmem:[%s264_s5 + $0x8] sm:$0xff] %vm137_vm2, %v134_v22  ;;  %v80_v24 = vpop.f32.mrf.mxu2 }
  0x96   :  { %v123_v25 = vadd.f32 %v122_v23, %v80_v24 }
  0x98   :  { %v132_v26 = vadd.f32 %v188_v8, %v123_v25 }
  0x9a   :  { %v136_v27 = vmax.f32 %v132_v26, 0.0 }
  0x9c   :  { %141 = vst.msk [vmem:[%s264_s5 + $0x18] sm:$0xff] %vm137_vm2, %v136_v27 }

// kernel: slow_only_forward.26
= control target key start
LH: loop header
LB: loop body
LE: loop exit
PB: predicated region body
PF: predicated region fallthrough
CT: control target
= control target key end

     0   :  { %vm137_vm0 = vcmask 523264   ;;  %vm186_vm1 = vcmask 261120   ;;  %s387_s1 = inlined_call_operand.vmem [shape: bf16[192,32], index: 1, kind: input, shape index: {}]   ;;  %s388_s0 = inlined_call_operand.vmem [shape: bf16[32,192], index: 0, kind: input, shape index: {}]   ;;  %s389_s2 = inlined_call_operand.vmem [shape: f32[1,32], index: 2, kind: input, shape index: {}]   ;;  %s390_s3 = inlined_call_operand.vmem [shape: f32[32,32], index: 3, kind: output, shape index: {}]  }
   0x1   :  { %v272_v0 = vld [vmem:[%s387_s1 + $0x38] sm:$0xff]  ;;  %v271_v2 = vld [vmem:[%s387_s1 + $0x30] sm:$0xff]  ;;  %v270_v4 = vld [vmem:[%s387_s1 + $0x28] sm:$0xff] }
   0x2   :  { %v276_v1 = vld [vmem:[%s387_s1 + $0x58] sm:$0xff]  ;;  %144 = vmatpush.bf16.msra.mxu0 %v272_v0  ;;  %277 = vmatpush.bf16.msra.mxu2 %v272_v0  ;;  %v275_v3 = vld [vmem:[%s387_s1 + $0x50] sm:$0xff]  ;;  %v274_v5 = vld [vmem:[%s387_s1 + $0x48] sm:$0xff] }
   0x3   :  { %167 = vmatpush.bf16.msra.mxu1 %v276_v1  ;;  %v269_v6 = vld [vmem:[%s387_s1 + $0x20] sm:$0xff]  ;;  %v199_v9 = vld [vmem:[%s388_s0 + $0x8] sm:$0xf0]  ;;  %v268_v11 = vld [vmem:[%s387_s1 + $0x18] sm:$0xff] }
   0x4   :  { %v273_v7 = vld [vmem:[%s387_s1 + $0x40] sm:$0xff]  ;;  %v267_v12 = vld [vmem:[%s387_s1 + $0x10] sm:$0xff]  ;;  %v266_v13 = vld [vmem:[%s387_s1 + $0x8] sm:$0xff] }
   0x5   :  { %v261_v8 = vld [vmem:[%s388_s0 + $0x4] sm:$0xf]  ;;  %v197_v15 = vld [vmem:[%s388_s0] sm:$0xf]  ;;  %v262_v16 = vld [vmem:[%s388_s0 + $0x4] sm:$0xf0] }
   0x6   :  { %145 = vmatpush.bf16.msra.mxu0 %v271_v2  ;;  %278 = vmatpush.bf16.msra.mxu2 %v271_v2  ;;  %v202_v10 = vor.u32 %v261_v8, %v199_v9  ;;  %v265_v14 = vld [vmem:[%s387_s1] sm:$0xff]  ;;  %v205_v17 = vld [vmem:[%s388_s0 + $0x10] sm:$0xf]  ;;  %v264_v18 = vld [vmem:[%s388_s0 + $0x14] sm:$0xf0]  ;;  %v198_v21 = vor.u32 %v262_v16, %v197_v15 }
   0x7   :  { %168 = vmatpush.bf16.msra.mxu1 %v275_v3  ;;  %v263_v19 = vld [vmem:[%s388_s0 + $0x14] sm:$0xf]  ;;  %v207_v20 = vld [vmem:[%s388_s0 + $0x18] sm:$0xf0]  ;;  %v206_v22 = vor.u32 %v264_v18, %v205_v17  ;;  %v285_v26 = vld [vmem:[%s389_s2] ss:$0 sm:$0xff] }
   0x8   :  { %v210_v23 = vor.u32 %v263_v19, %v207_v20 }
   0xa   :  { %146 = vmatpush.bf16.msra.mxu0 %v270_v4  ;;  %279 = vmatpush.bf16.msra.mxu2 %v270_v4 }
   0xb   :  { %169 = vmatpush.bf16.msra.mxu1 %v274_v5 }
   0xe   :  { %147 = vmatpush.bf16.msra.mxu0 %v269_v6  ;;  %280 = vmatpush.bf16.msra.mxu2 %v269_v6 }
   0xf   :  { %170 = vmatpush.bf16.msra.mxu1 %v273_v7 }
  0x12   :  { %259 = vmatmul.msk.bf16.vlgmr.msra.gmra.mxu1 %vm137_vm0, %v202_v10  ;;  %148 = vmatpush.bf16.msra.mxu0 %v268_v11 }
  0x13   :  { %281 = vmatpush.bf16.msra.mxu2 %v268_v11 }
  0x16   :  { %149 = vmatpush.bf16.msra.mxu0 %v267_v12 }
  0x17   :  { %282 = vmatpush.bf16.msra.mxu2 %v267_v12 }
  0x1a   :  { %150 = vmatpush.bf16.msra.mxu0 %v266_v13 }
  0x1b   :  { %283 = vmatpush.bf16.msra.mxu2 %v266_v13 }
  0x1e   :  { %151 = vmatpush.bf16.msra.mxu0 %v265_v14 }
  0x1f   :  { %284 = vmatpush.bf16.msra.mxu2 %v265_v14 }
  0x21   :  { %152 = vmatmul.bf16.vlgmr.msra.gmra.mxu0 %v198_v21 }
  0x22   :  { %157 = vmatmul.bf16.vlgmr.msra.gmra.mxu2 %v206_v22  ;;  %260 = vmatmul.msk.bf16.gmra.mxu1 %vm137_vm0, %v210_v23 }
  0x8f   :  { %v172_v24 = vpop.f32.mrf.mxu1 }
  0x97   :  { %v174_v25 = vpop.f32.mrf.mxu1 }
  0x9e   :  { %v153_v27 = vpop.f32.mrf.mxu0 }
  0x9f   :  { %v154_v28 = vadd.f32 %v285_v26, %v153_v27  ;;  %v177_v31 = vpop.f32.mrf.mxu1 }
  0xa1   :  { %v173_v29 = vadd.f32 %v172_v24, %v154_v28 }
  0xa3   :  { %v182_v30 = vmax.f32 %v173_v29, 0.0 }
  0xa5   :  { %187 = vst.msk [vmem:[%s390_s3] sm:$0xff] %vm186_vm1, %v182_v30  ;;  %v158_v32 = vpop.f32.mrf.mxu2 }
  0xa6   :  { %v159_v33 = vadd.f32 %v285_v26, %v158_v32  ;;  %v155_v34 = vpop.f32.mrf.mxu0 }
  0xa7   :  { %v156_v35 = vadd.f32 %v285_v26, %v155_v34  ;;  %v179_v42 = vpop.f32.mrf.mxu1 }
  0xa8   :  { %v178_v36 = vadd.f32 %v177_v31, %v159_v33 }
  0xa9   :  { %v175_v37 = vadd.f32 %v174_v25, %v156_v35 }
  0xaa   :  { %v184_v38 = vmax.f32 %v178_v36, 0.0 }
  0xab   :  { %v183_v39 = vmax.f32 %v175_v37, 0.0 }
  0xac   :  { %189 = vst.msk [vmem:[%s390_s3 + $0x10] sm:$0xff] %vm186_vm1, %v184_v38 }
  0xad   :  { %188 = vst.msk [vmem:[%s390_s3 + $0x8] sm:$0xff] %vm186_vm1, %v183_v39  ;;  %v160_v40 = vpop.f32.mrf.mxu2 }
  0xae   :  { %v161_v41 = vadd.f32 %v285_v26, %v160_v40 }
  0xb0   :  { %v180_v43 = vadd.f32 %v179_v42, %v161_v41 }
  0xb2   :  { %v185_v44 = vmax.f32 %v180_v43, 0.0 }
  0xb4   :  { %190 = vst.msk [vmem:[%s390_s3 + $0x18] sm:$0xff] %vm186_vm1, %v185_v44 }

// kernel: slow_only_forward.27
= control target key start
LH: loop header
LB: loop body
LE: loop exit
PB: predicated region body
PF: predicated region fallthrough
CT: control target
= control target key end

     0   :  { %vm175_vm0 = vcmask 261120   ;;  %s404_s1 = inlined_call_operand.vmem [shape: bf16[288,32], index: 1, kind: input, shape index: {}]   ;;  %s405_s0 = inlined_call_operand.vmem [shape: bf16[8,288], index: 0, kind: input, shape index: {}]   ;;  %s406_s2 = inlined_call_operand.vmem [shape: f32[1,32], index: 2, kind: input, shape index: {}]   ;;  %s407_s3 = inlined_call_operand.vmem [shape: f32[8,32], index: 3, kind: output, shape index: {}]  }
   0x1   :  { %v304_v0 = vld [vmem:[%s404_s1 + $0x38] sm:$0xff]  ;;  %v303_v2 = vld [vmem:[%s404_s1 + $0x30] sm:$0xff]  ;;  %v314_v4 = vld [vmem:[%s404_s1 + $0x88] sm:$0xff] }
   0x2   :  { %v312_v1 = vld [vmem:[%s404_s1 + $0x78] sm:$0xff]  ;;  %179 = vmatpush.bf16.msra.mxu0 %v304_v0  ;;  %v311_v3 = vld [vmem:[%s404_s1 + $0x70] sm:$0xff]  ;;  %211 = vmatpush.bf16.msra.mxu2 %v314_v4  ;;  %v313_v5 = vld [vmem:[%s404_s1 + $0x80] sm:$0xff] }
   0x3   :  { %192 = vmatpush.bf16.msra.mxu1 %v312_v1  ;;  %v16_v6 = vld [vmem:[%s405_s0 + $0x8] sm:$0xf]  ;;  %v301_v11 = vld [vmem:[%s404_s1 + $0x20] sm:$0xff]  ;;  %v300_v13 = vld [vmem:[%s404_s1 + $0x18] sm:$0xff] }
   0x4   :  { %v61_v7 = vunpack.c.l.b16 %v16_v6  ;;  %v302_v8 = vld [vmem:[%s404_s1 + $0x28] sm:$0xff]  ;;  %v309_v12 = vld [vmem:[%s404_s1 + $0x60] sm:$0xff]  ;;  %v308_v14 = vld [vmem:[%s404_s1 + $0x58] sm:$0xff] }
   0x5   :  { %v310_v9 = vld [vmem:[%s404_s1 + $0x68] sm:$0xff]  ;;  %v299_v15 = vld [vmem:[%s404_s1 + $0x10] sm:$0xff]  ;;  %v15_v19 = vld [vmem:[%s405_s0] sm:$0xff] }
   0x6   :  { %180 = vmatpush.bf16.msra.mxu0 %v303_v2  ;;  %v64_v10 = vpack.c.b16 %v61_v7, %v61_v7  ;;  %212 = vmatpush.bf16.msra.mxu2 %v313_v5  ;;  %v307_v16 = vld [vmem:[%s404_s1 + $0x50] sm:$0xff]  ;;  %v298_v17 = vld [vmem:[%s404_s1 + $0x8] sm:$0xff]  ;;  %v59_v20 = vunpack.c.l.b16 %v15_v19  ;;  %v60_v21 = vunpack.c.h.b16 %v15_v19  ;;  %v297_v22 = vld [vmem:[%s404_s1] sm:$0xff] }
   0x7   :  { %193 = vmatpush.bf16.msra.mxu1 %v311_v3  ;;  %v306_v18 = vld [vmem:[%s404_s1 + $0x48] sm:$0xff]  ;;  %v305_v23 = vld [vmem:[%s404_s1 + $0x40] sm:$0xff] }
   0x8   :  { %v62_v24 = vpack.c.b16 %v59_v20, %v59_v20  ;;  %v63_v25 = vpack.c.b16 %v60_v21, %v60_v21  ;;  %v315_v28 = vld [vmem:[%s406_s2] ss:$0 sm:$0xff] }
   0x9   :  { %296 = vmatmul.msk.bf16.vlgmr.msra.gmra.mxu2 %vm175_vm0, %v64_v10 }
   0xa   :  { %181 = vmatpush.bf16.msra.mxu0 %v302_v8 }
   0xb   :  { %194 = vmatpush.bf16.msra.mxu1 %v310_v9 }
   0xe   :  { %182 = vmatpush.bf16.msra.mxu0 %v301_v11 }
   0xf   :  { %195 = vmatpush.bf16.msra.mxu1 %v309_v12 }
  0x12   :  { %183 = vmatpush.bf16.msra.mxu0 %v300_v13 }
  0x13   :  { %196 = vmatpush.bf16.msra.mxu1 %v308_v14 }
  0x16   :  { %184 = vmatpush.bf16.msra.mxu0 %v299_v15 }
  0x17   :  { %197 = vmatpush.bf16.msra.mxu1 %v307_v16 }
  0x1a   :  { %185 = vmatpush.bf16.msra.mxu0 %v298_v17 }
  0x1b   :  { %198 = vmatpush.bf16.msra.mxu1 %v306_v18 }
  0x1e   :  { %186 = vmatpush.bf16.msra.mxu0 %v297_v22 }
  0x1f   :  { %199 = vmatpush.bf16.msra.mxu1 %v305_v23 }
  0x21   :  { %187 = vmatmul.bf16.vlgmr.msra.gmra.mxu0 %v62_v24 }
  0x22   :  { %200 = vmatmul.bf16.vlgmr.msra.gmra.mxu1 %v63_v25 }
  0x8c   :  { %v214_v26 = vpop.f32.mrf.mxu2 }
  0x94   :  { %v216_v27 = vpop.f32.mrf.mxu2 }
  0x9e   :  { %v188_v29 = vpop.f32.mrf.mxu0 }
  0x9f   :  { %v201_v30 = vpop.f32.mrf.mxu1  ;;  %v189_v31 = vadd.f32 %v315_v28, %v188_v29 }
  0xa1   :  { %v202_v32 = vadd.f32 %v201_v30, %v189_v31 }
  0xa3   :  { %v215_v33 = vadd.f32 %v214_v26, %v202_v32 }
  0xa5   :  { %v218_v34 = vmax.f32 %v215_v33, 0.0 }
  0xa6   :  { %v190_v35 = vpop.f32.mrf.mxu0 }
  0xa7   :  { %v203_v36 = vpop.f32.mrf.mxu1  ;;  %219 = vst.msk [vmem:[%s407_s3] sm:$0xff] %vm175_vm0, %v218_v34 }

// kernel: slow_only_forward.29
= control target key start
LH: loop header
LB: loop body
LE: loop exit
PB: predicated region body
PF: predicated region fallthrough
CT: control target
= control target key end

     0   :  { %v163_v2 = vmov 4.0   ;;  %vm17_vm0 = vcmask 1043456   ;;  %s248_s0 = inlined_call_operand.vmem [shape: f32[2,4,128], index: 0, kind: input, shape index: {}]   ;;  %s249_s1 = inlined_call_operand.vmem [shape: f32[128,10], index: 1, kind: input, shape index: {}]   ;;  %s250_s2 = inlined_call_operand.vmem [shape: f32[1,10], index: 2, kind: input, shape index: {}]   ;;  %s251_s3 = inlined_call_operand.hbm [shape: f32[2,10], index: 3, kind: output, shape index: {}]  }
   0x1   :  { %v56_v0 = vld [vmem:[%s249_s1 + $0x78] sm:$0xff]  ;;  %v55_v1 = vld [vmem:[%s249_s1 + $0x70] sm:$0xff]  ;;  %131 = vrcp.f32 %v163_v2  ;;  %v54_v3 = vld [vmem:[%s249_s1 + $0x68] sm:$0xff] }
   0x2   :  { %66 = vmatpush.msra.mxu0 %v56_v0  ;;  %v53_v4 = vld [vmem:[%s249_s1 + $0x60] sm:$0xff]  ;;  %v52_v7 = vld [vmem:[%s249_s1 + $0x58] sm:$0xff] }
   0x3   :  { %v15_v5 = vld [vmem:[%s248_s0] sm:$0xf]  ;;  %v16_v6 = vld [vmem:[%s248_s0 + $0x4] sm:$0xf] }
   0x4   :  { %67 = vmatpush.msra.mxu0 %v55_v1  ;;  %v18_v8 = vsel %vm17_vm0, %v15_v5, 0.0  ;;  %v25_v9 = vsel %vm17_vm0, %v16_v6, 0.0 }
   0x5   :  { %v19_v11 = vrot.slane %v18_v8, 4  ;;  %v26_v12 = vrot.slane %v25_v9, 4 }
   0x6   :  { %68 = vmatpush.msra.mxu0 %v54_v3 }
   0x7   :  { %v132_v10 = vpop.eup %131 }
   0x8   :  { %69 = vmatpush.msra.mxu0 %v53_v4 }
   0x9   :  { %8 = vsyncpa [#allocation3], 0  ;;  %v51_v13 = vld [vmem:[%s249_s1 + $0x50] sm:$0xff]  ;;  %v33_v14 = vmul.f32 4.0, %v132_v10  ;;  %v20_v15 = vadd.f32 %v19_v11, %v18_v8  ;;  %v27_v16 = vadd.f32 %v26_v12, %v25_v9  ;;  %v50_v17 = vld [vmem:[%s249_s1 + $0x48] sm:$0xff]  ;;  %vm37_vm1 = vweird.f32 %v132_v10  ;;  %s119_s24 = sshll.u32 %s251_s3, 4  ;;  %s120_s24 = int_to_ptr.hbm [resolvable:$true] %s119_s24 }
   0xa   :  { %70 = vmatpush.msra.mxu0 %v52_v7  ;;  %v49_v21 = vld [vmem:[%s249_s1 + $0x40] sm:$0xff]  ;;  %v48_v24 = vld [vmem:[%s249_s1 + $0x38] sm:$0xff]  ;;  %v47_v26 = vld [vmem:[%s249_s1 + $0x30] sm:$0xff]  ;;  %vm63_vm2 = vcmask 1041409   ;;  %vm86_vm3 = vcmask 74752  }
   0xb   :  { %v34_v18 = vsub.f32 1.0, %v33_v14  ;;  %v21_v19 = vrot.slane %v20_v15, 2  ;;  %v28_v20 = vrot.slane %v27_v16, 2  ;;  %v46_v29 = vld [vmem:[%s249_s1 + $0x28] sm:$0xff]  ;;  %v45_v31 = vld [vmem:[%s249_s1 + $0x20] sm:$0xff]  ;;  %v44_v34 = vld [vmem:[%s249_s1 + $0x18] sm:$0xff] }
   0xc   :  { %71 = vmatpush.msra.mxu0 %v51_v13  ;;  %v43_v36 = vld [vmem:[%s249_s1 + $0x10] sm:$0xff]  ;;  %v42_v39 = vld [vmem:[%s249_s1 + $0x8] sm:$0xff]  ;;  %v41_v40 = vld [vmem:[%s249_s1] sm:$0xff]  ;;  %s164_s1 = smov [#allocation2]  }
   0xd   :  { %v22_v22 = vadd.f32 %v21_v19, %v20_v15  ;;  %v29_v23 = vadd.f32 %v28_v20, %v27_v16  ;;  %v35_v25 = vmul.f32 %v132_v10, %v34_v18  ;;  %v130_v42 = vld [vmem:[%s250_s2] ss:$0 sm:$0xff]  ;;  %s117_s2 = sshll.u32 %s164_s1, 4  ;;  %s118_s2 = int_to_ptr.vmem [resolvable:$true] %s117_s2 }
   0xe   :  { %72 = vmatpush.msra.mxu0 %v50_v17 }
   0xf   :  { %v23_v27 = vrot.slane %v22_v22, 1  ;;  %v30_v28 = vrot.slane %v29_v23, 1  ;;  %v36_v30 = vadd.f32 %v132_v10, %v35_v25 }
  0x10   :  { %73 = vmatpush.msra.mxu0 %v49_v21 }
  0x11   :  { %v24_v32 = vadd.f32 %v23_v27, %v22_v22  ;;  %v31_v33 = vadd.f32 %v30_v28, %v29_v23  ;;  %v38_v35 = vsel %vm37_vm1, %v132_v10, %v36_v30 }
  0x12   :  { %74 = vmatpush.msra.mxu0 %v48_v24 }
  0x13   :  { %v39_v37 = vmul.f32 %v38_v35, %v24_v32  ;;  %v40_v38 = vmul.f32 %v38_v35, %v31_v33 }
  0x14   :  { %75 = vmatpush.msra.mxu0 %v47_v26 }
  0x15   :  { %v64_v41 = vsel %vm63_vm2, %v40_v38, %v39_v37 }
  0x16   :  { %76 = vmatpush.msra.mxu0 %v46_v29 }
  0x18   :  { %77 = vmatpush.msra.mxu0 %v45_v31 }
  0x1a   :  { %78 = vmatpush.msra.mxu0 %v44_v34 }
  0x1c   :  { %79 = vmatpush.msra.mxu0 %v43_v36 }
  0x1e   :  { %80 = vmatpush.msra.mxu0 %v42_v39 }
  0x20   :  { %81 = vmatpush.msra.mxu0 %v41_v40 }
  0x21   :  { %82 = vmatmul.f32.vlgmr.msra.gmra.mxu0 %v64_v41 }
  0x9e   :  { %v83_v43 = vpop.f32.mrf.mxu0 }
  0x9f   :  { %v84_v44 = vadd.f32 %v130_v42, %v83_v43 }
  0xa1   :  { %v87_v45 = vsel %vm86_vm3, %v84_v44, -inf }
  0xa2   :  { %88 = vmax.xlane.f32.xlu0 %v87_v45 }
 0x115   :  { %v89_v46 = vpop.xlane.xlu0 %88 }
 0x116   :  { %v90_v47 = vsub.f32 %v84_v44, %v89_v46 }
 0x118   :  { %v91_v48 = vmul.f32 1.442695, %v90_v47 }
 0x11a   :  { %133 = vpow2.f32 %v91_v48 }
 0x120   :  { %v134_v49 = vpop.eup %133 }
 0x121   :  { %v93_v50 = vsel %vm86_vm3, %v134_v49, 0.0 }
 0x122   :  { %94 = vadd.xlane.f32.xlu0 %v93_v50 }
 0x195   :  { %v95_v51 = vpop.xlane.xlu0 %94 }
 0x196   :  { %135 = vrcp.f32 %v95_v51  ;;  %v107_v55 = vand.u32 2147483648, %v95_v51  ;;  %v105_v57 = vand.u32 2147483647, %v95_v51  ;;  %vm101_vm5 = vweird.f32 %v95_v51 }
 0x198   :  { %v108_v59 = vor.u32 1.1754944e-38, %v107_v55  ;;  %vm106_vm7 = vcmp.eq.f32.partialorder %v105_v57, 8.507059e+37 }
 0x19c   :  { %v136_v52 = vpop.eup %135 }
 0x19d   :  { %v97_v53 = vmul.f32 %v136_v52, %v95_v51  ;;  %vm102_vm4 = vweird.f32 %v136_v52 }
 0x19e   :  { %vm103_vm6 = vmor %vm101_vm5, %vm102_vm4 }
 0x19f   :  { %v98_v54 = vsub.f32 1.0, %v97_v53 }
 0x1a1   :  { %v99_v56 = vmul.f32 %v136_v52, %v98_v54 }
 0x1a3   :  { %v100_v58 = vadd.f32 %v136_v52, %v99_v56 }
 0x1a5   :  { %v104_v60 = vsel %vm103_vm6, %v136_v52, %v100_v58 }
 0x1a6   :  { %v109_v61 = vsel %vm106_vm7, %v108_v59, %v104_v60 }
 0x1a7   :  { %v110_v62 = vmul.f32 %v134_v49, %v109_v61 }
 0x1a9   :  { %111 = vst.msk [vmem:[#allocation2] sm:$0x3] %vm86_vm3, %v110_v62 }
 0x1aa   :  { %122 = dma.vmem_to_hbm [thread:$0]  %s118_s2, 32, %s120_s24, [#allocation3]  }
 0x1ab   :  { %161 = dma.done.wait [#allocation3], 32  }
 0x1ac   :  { %162 = vsyncadd [#allocation3], 4294967264 }
 0x1ad   :  { %127 = vsyncpa [#allocation3], 1 }

// kernel: slow_only_forward.28
= control target key start
LH: loop header
LB: loop body
LE: loop exit
PB: predicated region body
PF: predicated region fallthrough
CT: control target
= control target key end

     0   :  { %vm88_vm0 = vcmask 261120   ;;  %vm59_vm1 = vcmask 523264   ;;  %s209_s3 = inlined_call_operand.vmem [shape: bf16[64,128], index: 3, kind: input, shape index: {}]   ;;  %s210_s1 = inlined_call_operand.vmem [shape: bf16[32,128], index: 1, kind: input, shape index: {}]   ;;  %s211_s0 = inlined_call_operand.vmem [shape: bf16[8,32], index: 0, kind: input, shape index: {}]   ;;  %s212_s4 = inlined_call_operand.vmem [shape: f32[1,128], index: 4, kind: input, shape index: {}]   ;;  %s213_s2 = inlined_call_operand.vmem [shape: bf16[8,64], index: 2, kind: input, shape index: {}]   ;;  %s214_s5 = inlined_call_operand.vmem [shape: f32[8,128], index: 5, kind: output, shape index: {}]  }
   0x1   :  { %v147_v0 = vld [vmem:[%s209_s3 + $0x18] sm:$0xff]  ;;  %v143_v1 = vld [vmem:[%s210_s1 + $0x8] sm:$0xff]  ;;  %v146_v2 = vld [vmem:[%s209_s3 + $0x10] sm:$0xff] }
   0x2   :  { %67 = vmatpush.bf16.msra.mxu0 %v147_v0  ;;  %98 = vmatpush.bf16.msra.mxu1 %v143_v1  ;;  %v142_v3 = vld [vmem:[%s210_s1] sm:$0xff]  ;;  %v145_v5 = vld [vmem:[%s209_s3 + $0x8] sm:$0xff] }
   0x3   :  { %v21_v4 = vld [vmem:[%s211_s0] sm:$0xf] }
   0x4   :  { %v144_v6 = vld [vmem:[%s209_s3] sm:$0xff] }
   0x5   :  { %v26_v7 = vld [vmem:[%s213_s2] sm:$0xf] }
   0x6   :  { %68 = vmatpush.bf16.msra.mxu0 %v146_v2  ;;  %99 = vmatpush.bf16.msra.mxu1 %v142_v3  ;;  %v148_v9 = vld [vmem:[%s212_s4] ss:$0 sm:$0xff] }
   0x9   :  { %141 = vmatmul.msk.bf16.vlgmr.msra.gmra.mxu1 %vm88_vm0, %v21_v4 }
   0xa   :  { %69 = vmatpush.bf16.msra.mxu0 %v145_v5 }
   0xe   :  { %70 = vmatpush.bf16.msra.mxu0 %v144_v6 }
  0x11   :  { %132 = vmatmul.msk.bf16.vlgmr.msra.gmra.mxu0 %vm59_vm1, %v26_v7 }
  0x86   :  { %v101_v8 = vpop.f32.mrf.mxu1 }
  0x8e   :  { %v72_v10 = vpop.f32.mrf.mxu0  ;;  %v103_v11 = vpop.f32.mrf.mxu1 }
  0x8f   :  { %v102_v12 = vadd.f32 %v101_v8, %v72_v10 }
  0x91   :  { %v109_v13 = vadd.f32 %v148_v9, %v102_v12 }
  0x93   :  { %v110_v14 = vmax.f32 %v109_v13, 0.0 }
  0x95   :  { %111 = vst [vmem:[%s214_s5] sm:$0xff] %v110_v14 }
  0x96   :  { %v74_v15 = vpop.f32.mrf.mxu0 }

</bundles_post_ra>
